<compile_context>
chip_gen: v7x
topology: tpu7x:2x2x1
jax: 0.10.0
libtpu: 0.0.40
codegen_flags: <defaults>
</compile_context>

<pallas_src>
import numpy as np
import jax
import jax.numpy as jnp
from jax import lax
from jax.experimental import pallas as pl
from jax.experimental.pallas import tpu as pltpu

HP = lax.Precision.HIGHEST
BN_EPS = 1e-5
CELU_ALPHA = 0.06


# ---------------------------------------------------------------------------
# Model configuration (mirrors the CNN.__init__ shape bookkeeping)
# ---------------------------------------------------------------------------
class Config:
    def __init__(self, num_features, hidden_size, n_categories, emb_dim=10,
                 channel_1=32, channel_2=128, channel_3=128, kernel1=5):
        assert channel_2 == channel_3, "conv2(x) * x requires channel_2 == channel_3"
        self.num_features = num_features
        self.hidden = hidden_size
        self.n_categories = list(n_categories)
        self.emb_dim = emb_dim
        self.cat_dim = emb_dim * len(n_categories)
        self.d_in = num_features + self.cat_dim
        self.C1, self.C2, self.C3 = channel_1, channel_2, channel_3
        self.K1 = kernel1
        self.L1 = hidden_size // channel_1            # cha_1_reshape
        self.L2 = hidden_size // channel_1 // 2       # cha_po_1 (AdaptiveAvgPool target)
        assert self.L1 * channel_1 == hidden_size and self.L1 == 2 * self.L2
        assert self.L2 % 2 == 0
        self.L3 = (self.L2 + 2 - 4) // 2 + 1          # MaxPool1d(kernel=4, stride=2, pad=1)
        self.cha_po_2 = (hidden_size // channel_1 // 4) * channel_3
        assert self.cha_po_2 == self.L3 * self.C3


# ---------------------------------------------------------------------------
# Parameter init (PyTorch-style defaults; BN running stats randomized so the
# eval-mode BN is actually exercised)
# ---------------------------------------------------------------------------
def init_params(key, cfg):
    ks = jax.random.split(key, 32)
    it = iter(ks)
    p = {}
    p["embs"] = [jax.random.normal(next(it), (n, cfg.emb_dim), jnp.float32)
                 for n in cfg.n_categories]

    def bn(k, n):
        k1, k2, k3, k4 = jax.random.split(k, 4)
        return dict(gamma=jax.random.uniform(k1, (n,), jnp.float32, 0.8, 1.2),
                    beta=0.1 * jax.random.normal(k2, (n,), jnp.float32),
                    mean=0.1 * jax.random.normal(k3, (n,), jnp.float32),
                    var=jax.random.uniform(k4, (n,), jnp.float32, 0.5, 1.5))

    def linear(k, fan_in, fan_out):
        kw, kb = jax.random.split(k)
        bound = 1.0 / np.sqrt(fan_in)
        w = jax.random.uniform(kw, (fan_in, fan_out), jnp.float32, -bound, bound)
        b = jax.random.uniform(kb, (fan_out,), jnp.float32, -bound, bound)
        return w, b

    def conv(k, cin, cout, ksz, bias=True):
        kw, kb = jax.random.split(k)
        bound = 1.0 / np.sqrt(cin * ksz)
        w = jax.random.uniform(kw, (cout, cin, ksz), jnp.float32, -bound, bound)
        b = jax.random.uniform(kb, (cout,), jnp.float32, -bound, bound) if bias else None
        return w, b

    p["bn0"] = bn(next(it), cfg.d_in)
    p["exp_w"], p["exp_b"] = linear(next(it), cfg.d_in, cfg.hidden)
    p["bn1"] = bn(next(it), cfg.C1)
    p["c1_w"], _ = conv(next(it), cfg.C1, cfg.C2, cfg.K1, bias=False)
    p["bn2"] = bn(next(it), cfg.C2)
    p["c2_w"], p["c2_b"] = conv(next(it), cfg.C2, cfg.C2, 3)
    p["bn3"] = bn(next(it), cfg.C2)
    p["c3_w"], p["c3_b"] = conv(next(it), cfg.C2, cfg.C2, 3)
    p["bn4"] = bn(next(it), cfg.C2)
    p["c4_w"], p["c4_b"] = conv(next(it), cfg.C2, cfg.C3, 5)
    p["bn5"] = bn(next(it), cfg.cha_po_2)
    p["d_w"], p["d_b"] = linear(next(it), cfg.cha_po_2, 1)
    return p


# ---------------------------------------------------------------------------
# Plain-JAX reference (faithful, un-fused translation of CNN.forward, eval mode)
# ---------------------------------------------------------------------------
def _bn2d(x, bn):
    return (x - bn["mean"]) / jnp.sqrt(bn["var"] + BN_EPS) * bn["gamma"] + bn["beta"]


def _bn3d(x, bn):
    s = bn["gamma"] / jnp.sqrt(bn["var"] + BN_EPS)
    t = bn["beta"] - bn["mean"] * s
    return x * s[None, :, None] + t[None, :, None]


def _celu(x, alpha=CELU_ALPHA):
    return jnp.maximum(x, 0.0) + alpha * (jnp.exp(jnp.minimum(x, 0.0) / alpha) - 1.0)


def _conv1d(x, w, b, pad):
    # x: (B, Cin, L); w: (Cout, Cin, K)  -- PyTorch cross-correlation, stride 1, 'same' pad.
    K = w.shape[2]
    L = x.shape[2]
    xp = jnp.pad(x, ((0, 0), (0, 0), (pad, pad)))
    out = None
    for t in range(K):
        c = jnp.einsum("bcl,oc->bol", xp[:, :, t:t + L], w[:, :, t], precision=HP)
        out = c if out is None else out + c
    if b is not None:
        out = out + b[None, :, None]
    return out


def _maxpool_k4s2p1(x):
    B, C, L = x.shape
    neg = jnp.full((B, C, 1), -jnp.inf, x.dtype)
    xp = jnp.concatenate([neg, x, neg], axis=2)
    Lo = (L + 2 - 4) // 2 + 1
    return jnp.stack([jnp.max(xp[:, :, 2 * j:2 * j + 4], axis=2) for j in range(Lo)], axis=2)


def cnn_forward_ref(x_num, x_cat, p, cfg):
    embs = [p["embs"][i][x_cat[:, i]] for i in range(len(p["embs"]))]
    x = jnp.concatenate([x_num] + embs, axis=1)
    x = _bn2d(x, p["bn0"])
    x = _celu(jnp.dot(x, p["exp_w"], precision=HP) + p["exp_b"])
    B = x.shape[0]
    x = x.reshape(B, cfg.C1, cfg.L1)
    x = _bn3d(x, p["bn1"])
    x = jnp.maximum(_conv1d(x, p["c1_w"], None, cfg.K1 // 2), 0.0)
    x = x.reshape(B, cfg.C2, cfg.L2, 2).mean(axis=3)            # AdaptiveAvgPool1d(L1 -> L2)
    x = _bn3d(x, p["bn2"])
    x = jnp.maximum(_conv1d(x, p["c2_w"], p["c2_b"], 1), 0.0)
    z = x
    y = jnp.maximum(_conv1d(_bn3d(z, p["bn3"]), p["c3_w"], p["c3_b"], 1), 0.0)
    y = jnp.maximum(_conv1d(_bn3d(y, p["bn4"]), p["c4_w"], p["c4_b"], 2), 0.0)
    x = y * z
    x = _maxpool_k4s2p1(x)
    x = x.reshape(B, -1)
    x = _bn2d(x, p["bn5"])
    x = jnp.dot(x, p["d_w"], precision=HP) + p["d_b"]
    return jnp.squeeze(x)


# ---------------------------------------------------------------------------
# Fused weight preparation: fold BN / Conv1d into dense position-major matrices
# so the kernel is a chain of lane-dense bf16 matmuls.
# ---------------------------------------------------------------------------
def _bn_affine(bn):
    s = np.asarray(bn["gamma"], np.float64) / np.sqrt(np.asarray(bn["var"], np.float64) + BN_EPS)
    t = np.asarray(bn["beta"], np.float64) - np.asarray(bn["mean"], np.float64) * s
    return s, t


def _conv_as_matrix(w, L):
    # w: (Cout, Cin, K), stride 1, pad K//2.  Position-major flattening on both sides:
    # flat index = position * C + channel.
    w = np.asarray(w, np.float64)
    Cout, Cin, K = w.shape
    pad = K // 2
    M = np.zeros((L * Cin, L * Cout), np.float64)
    for lo in range(L):
        for t in range(K):
            li = lo + t - pad
            if 0 <= li < L:
                M[li * Cin:(li + 1) * Cin, lo * Cout:(lo + 1) * Cout] = w[:, :, t].T
    return M


def prepare_fused_weights(p, cfg, d_in_pad):
    C1, C2, C3 = cfg.C1, cfg.C2, cfg.C3
    L1, L2, L3 = cfg.L1, cfg.L2, cfg.L3

    # Stage A: BN(d_in) + Linear(d_in, hidden), permuted from torch's channel-major reshape
    # (c*L1+l) to position-major (l*C1+c).  CELU applied in-kernel.
    s0, t0 = _bn_affine(p["bn0"])
    W = np.asarray(p["exp_w"], np.float64)
    b = np.asarray(p["exp_b"], np.float64)
    perm1 = np.array([c * L1 + l for l in range(L1) for c in range(C1)])
    Wpm, bpm = W[:, perm1], b[perm1]
    W1 = s0[:, None] * Wpm
    b1 = t0 @ Wpm + bpm
    W1p = np.zeros((d_in_pad, C1 * L1), np.float64)
    W1p[:cfg.d_in, :] = W1                                   # zero rows for padded lanes

    # Stage B: BN(C1) + Conv1d(C1->C2, K1, 'same', no bias).
    s1, t1 = _bn_affine(p["bn1"])
    M1 = _conv_as_matrix(p["c1_w"], L1)
    WB = np.tile(s1, L1)[:, None] * M1
    bB = np.tile(t1, L1) @ M1

    # Stage C: BN(C2) + Conv1d(C2->C2, 3, 'same', bias) over the POOLED sequence.  The
    # AdaptiveAvgPool(L1->L2) is done in-kernel on the VPU as a pairwise position SUM; the
    # 0.5 (and BN2 scale) are folded here, so the matmul K is L2*C2 (512) not L1*C2 (1024).
    s2, t2 = _bn_affine(p["bn2"])
    M2 = _conv_as_matrix(p["c2_w"], L2)
    WC = 0.5 * (np.tile(s2, L2)[:, None] * M2)
    bC = np.tile(t2, L2) @ M2 + np.tile(np.asarray(p["c2_b"], np.float64), L2)

    # Stage D: conv2 block = (BN + Conv3 + ReLU), (BN + Conv5 + ReLU).
    s3, t3 = _bn_affine(p["bn3"])
    M3 = _conv_as_matrix(p["c3_w"], L2)
    WD1 = np.tile(s3, L2)[:, None] * M3
    bD1 = np.tile(t3, L2) @ M3 + np.tile(np.asarray(p["c3_b"], np.float64), L2)
    s4, t4 = _bn_affine(p["bn4"])
    M4 = _conv_as_matrix(p["c4_w"], L2)
    WD2 = np.tile(s4, L2)[:, None] * M4
    bD2 = np.tile(t4, L2) @ M4 + np.tile(np.asarray(p["c4_b"], np.float64), L2)

    # Stage E head: BN(cha_po_2) + Linear(cha_po_2, 1), permuted from torch's channel-major
    # flatten (c*L3+j) to position-major (j*C3+c), padded to 128 output lanes so the head is
    # a single lane-dense MXU dot (column 0 carries the result).  Bias becomes one float.
    s5, t5 = _bn_affine(p["bn5"])
    v = np.asarray(p["d_w"], np.float64).reshape(-1)
    perm_e = np.array([c * L3 + j for j in range(L3) for c in range(C3)])
    s5p, t5p, vp = s5[perm_e], t5[perm_e], v[perm_e]
    WE = np.zeros((C3 * L3, 128), np.float64)
    WE[:, 0] = s5p * vp
    bE = float(t5p @ vp + float(np.asarray(p["d_b"]).reshape(())))

    # bf16 matmul operands (MXU-native on v5e/v6e/v7x); biases stay f32 (added on the VPU to
    # the f32 accumulators).
    bf16 = lambda a: jnp.asarray(np.asarray(a, np.float32)).astype(jnp.bfloat16)
    f32 = lambda a: jnp.asarray(np.asarray(a, np.float32))
    return dict(
        w1=bf16(W1p), b1=f32(b1.reshape(1, -1)),
        wB=bf16(WB), bB=f32(bB.reshape(1, -1)),
        wC=bf16(WC), bC=f32(bC.reshape(1, -1)),
        wD1=bf16(WD1), bD1=f32(bD1.reshape(1, -1)),
        wD2=bf16(WD2), bD2=f32(bD2.reshape(1, -1)),
        wE=bf16(WE),
        bE=bE,                                             # python float, folded in-kernel
    )


# ---------------------------------------------------------------------------
# Pallas kernel: whole CNN forward for one batch tile of TM rows.
# ---------------------------------------------------------------------------
def make_cnn_pallas(cfg, fused, tm=256, d_in_pad=128):
    C2, C3, L2, L3 = cfg.C2, cfg.C3, cfg.L2, cfg.L3
    H1 = cfg.C1 * cfg.L1          # 256
    HB = cfg.C2 * cfg.L1          # 1024
    HC = cfg.C2 * cfg.L2          # 512
    HD = cfg.C3 * cfg.L2          # 512
    HE = cfg.C3 * cfg.L3          # 256
    alpha = CELU_ALPHA
    inv_alpha = 1.0 / CELU_ALPHA
    bE = float(fused["bE"])
    bf16 = jnp.bfloat16

    def kernel(x_ref, w1_ref, b1_ref, wB_ref, bB_ref, wC_ref, bC_ref,
               wD1_ref, bD1_ref, wD2_ref, bD2_ref, wE_ref, o_ref):
        # Every dot below: bf16 operands, f32 accumulation (preferred_element_type).
        # Stage A: (BN0 + Linear) folded, then CELU(0.06).
        x = x_ref[...].astype(bf16)                                        # (tm, 128)
        h = jnp.dot(x, w1_ref[...], preferred_element_type=jnp.float32) + b1_ref[...]
        h = jnp.maximum(h, 0.0) + alpha * (
            jnp.exp(jnp.minimum(h, 0.0) * inv_alpha) - 1.0)
        # Stage B: BN1 + Conv1d(C1->C2, K1, 'same') densified + ReLU.
        h = jnp.maximum(jnp.dot(h.astype(bf16), wB_ref[...],
                                preferred_element_type=jnp.float32) + bB_ref[...], 0.0)
        # Stage C: AdaptiveAvgPool(L1->L2) as a pairwise position SUM on the VPU (the 0.5
        # and BN2 scale live in wC); slices are 128-lane aligned, so this rides the VALU slot
        # and halves the K of the biggest matmul.  Then Conv1d(3) densified + ReLU.
        hp = jnp.concatenate(
            [h[:, (2 * j) * C2:(2 * j + 1) * C2] + h[:, (2 * j + 1) * C2:(2 * j + 2) * C2]
             for j in range(L2)], axis=1)                                  # (tm, L2*C2)
        z = jnp.maximum(jnp.dot(hp.astype(bf16), wC_ref[...],
                                preferred_element_type=jnp.float32) + bC_ref[...], 0.0)
        # Stage D: conv2 block (BN3+Conv3+ReLU, BN4+Conv5+ReLU), then gated multiply.
        d = jnp.maximum(jnp.dot(z.astype(bf16), wD1_ref[...],
                                preferred_element_type=jnp.float32) + bD1_ref[...], 0.0)
        d = jnp.maximum(jnp.dot(d.astype(bf16), wD2_ref[...],
                                preferred_element_type=jnp.float32) + bD2_ref[...], 0.0)
        u = d * z                                                          # (tm, L2*C3) pos-major
        # MaxPool1d(kernel=4, stride=2, pad=1) along positions on the VPU; out-of-range taps
        # skipped == -inf padding semantics.
        pooled_parts = []
        for j in range(L3):
            window = None
            for t in range(4):
                pos = 2 * j - 1 + t
                if 0 <= pos < L2:
                    sl = u[:, pos * C3:(pos + 1) * C3]
                    window = sl if window is None else jnp.maximum(window, sl)
            pooled_parts.append(window)
        pooled = jnp.concatenate(pooled_parts, axis=1)                     # (tm, L3*C3)
        # Head: (BN5 + Linear) folded into wE (HE, 128) -> one lane-dense MXU dot; column 0
        # carries the prediction.  Scalar bias folded in as a compile-time constant; the
        # (tm, 128) store is full / unmasked (no cross-lane reduce tail).
        head = jnp.dot(pooled.astype(bf16), wE_ref[...],
                       preferred_element_type=jnp.float32)
        o_ref[...] = head + bE

    const = lambda i: (0, 0)
    # Weights/biases use constant index_maps: DMA'd once, VMEM-resident across grid steps
    # (no re-fetch when the block index is unchanged).  Total resident weight footprint is
    # ~2.3 MB bf16 (~4.6 MB with the default double-buffer reservation), far inside the
    # 32 MiB scoped-VMEM budget on v5e/v6e/v7x, so explicit single-buffering isn't needed.
    in_specs = [
        pl.BlockSpec((tm, d_in_pad), lambda i: (i, 0)),                    # activations (streamed)
        pl.BlockSpec((d_in_pad, H1), const), pl.BlockSpec((1, H1), const),
        pl.BlockSpec((H1, HB), const), pl.BlockSpec((1, HB), const),
        pl.BlockSpec((HC, HC), const), pl.BlockSpec((1, HC), const),
        pl.BlockSpec((HC, HC), const), pl.BlockSpec((1, HC), const),
        pl.BlockSpec((HC, HD), const), pl.BlockSpec((1, HD), const),
        pl.BlockSpec((HE, 128), const),
    ]
    weight_names = ("w1", "b1", "wB", "bB", "wC", "bC", "wD1", "bD1", "wD2", "bD2", "wE")
    weights = [fused[k] for k in weight_names]
    weight_bytes = int(sum(int(np.prod(w.shape)) * w.dtype.itemsize for w in weights))
    macs_per_row = (d_in_pad * H1 + H1 * HB + HC * HC + HC * HC + HC * HD + HE * 128)

    def forward(x_num, x_cat, embs):
        B = x_num.shape[0]
        # Embedding gather + concat: tiny glue, left to XLA.
        # TODO(synk): gather the categorical embeddings in-kernel via scalar prefetch to
        # avoid materialising x_all in HBM.
        e = [embs[i][x_cat[:, i]] for i in range(len(embs))]
        x_all = jnp.concatenate([x_num] + e, axis=1).astype(jnp.float32)
        # Zero-pad features to 128 lanes and the batch to a multiple of tm.
        G = pl.cdiv(B, tm)
        Bpad = G * tm
        x_pad = jnp.pad(x_all, ((0, Bpad - B), (0, d_in_pad - cfg.d_in)))
        cost = pl.CostEstimate(
            flops=2 * Bpad * macs_per_row,
            transcendentals=Bpad * H1,                     # CELU exp
            bytes_accessed=weight_bytes + Bpad * d_in_pad * 4 + Bpad * 128 * 4)
        out = pl.pallas_call(
            kernel,
            out_shape=jax.ShapeDtypeStruct((Bpad, 128), jnp.float32),
            grid=(G,),
            in_specs=in_specs,
            out_specs=pl.BlockSpec((tm, 128), lambda i: (i, 0)),
            compiler_params=pltpu.CompilerParams(
                dimension_semantics=("parallel",),         # shards batch tiles across v7x's 2 TCs
                vmem_limit_bytes=32 * 1024 * 1024),
            cost_estimate=cost,
        )(x_pad, *weights)
        # Column 0 of each row holds the prediction; drop batch padding.
        return out[:B, 0]

    return forward


# ---------------------------------------------------------------------------
# Demo / correctness check
# ---------------------------------------------------------------------------
if __name__ == "__main__":
    # Small but TPU-aligned constructor arguments of the original CNN module:
    #   num_features=16, hidden_size=256, channel_1=32, channel_2=channel_3=128,
    #   emb_dim=10, n_categories=[7,5,11], kernel1=5  ->  seq lens 8 -> 4 -> 2, cha_po_2=256.
    cfg = Config(num_features=16, hidden_size=256, n_categories=[7, 5, 11],
                 emb_dim=10, channel_1=32, channel_2=128, channel_3=128, kernel1=5)
    # TM=256 amortizes per-grid-step overhead and fills the MXU M dim; B chosen so the
    # grid G = B/TM = 2 (even, >= 2) to keep both v7x TensorCores busy.
    B, TM, D_IN_PAD = 512, 256, 128

    key = jax.random.PRNGKey(0)
    k_par, k_num, k_cat = jax.random.split(key, 3)
    params = init_params(k_par, cfg)

    x_num = jax.random.normal(k_num, (B, cfg.num_features), dtype=jnp.float32)
    cat_keys = jax.random.split(k_cat, len(cfg.n_categories))
    x_cat = jnp.stack(
        [jax.random.randint(cat_keys[i], (B,), 0, n) for i, n in enumerate(cfg.n_categories)],
        axis=1,
    ).astype(jnp.int32)

    fused = prepare_fused_weights(params, cfg, D_IN_PAD)
    forward = jax.jit(make_cnn_pallas(cfg, fused, tm=TM, d_in_pad=D_IN_PAD))

    out = forward(x_num, x_cat, params["embs"])
    jax.block_until_ready(out)

    ref = cnn_forward_ref(x_num, x_cat, params, cfg)
    assert out.shape == (B,)
    max_err = float(jnp.max(jnp.abs(out - ref)))
    # bf16 matmul operands with f32 accumulation: tolerance loosened accordingly.
    assert jnp.allclose(out, ref, atol=2e-2, rtol=2e-2), f"max_abs_err={max_err}"

    print("KERNEL_OK")
</pallas_src>

<mosaic_0001>
module attributes {stable_mosaic.version = 11 : i64} {
  func.func @kernel(%arg0: i32, %arg1: memref<256x128xf32, #tpu.memory_space<vmem>>, %arg2: memref<128x256xbf16, #tpu.memory_space<vmem>>, %arg3: memref<1x256xf32, #tpu.memory_space<vmem>>, %arg4: memref<256x1024xbf16, #tpu.memory_space<vmem>>, %arg5: memref<1x1024xf32, #tpu.memory_space<vmem>>, %arg6: memref<512x512xbf16, #tpu.memory_space<vmem>>, %arg7: memref<1x512xf32, #tpu.memory_space<vmem>>, %arg8: memref<512x512xbf16, #tpu.memory_space<vmem>>, %arg9: memref<1x512xf32, #tpu.memory_space<vmem>>, %arg10: memref<512x512xbf16, #tpu.memory_space<vmem>>, %arg11: memref<1x512xf32, #tpu.memory_space<vmem>>, %arg12: memref<256x128xbf16, #tpu.memory_space<vmem>>, %arg13: memref<256x128xf32, #tpu.memory_space<vmem>>) attributes {dimension_semantics = [#tpu.dimension_semantics<parallel>], iteration_bounds = array<i64: 2>, scalar_prefetch = 0 : i64, scratch_operands = 0 : i64, tpu.core_type = #tpu.core_type<tc>, window_params = [{transform_indices = @transform_0, window_bounds = array<i64: 256, 128>}, {pipeline_mode = #tpu.pipeline_mode<synchronous>, transform_indices = @transform_1, window_bounds = array<i64: 128, 256>}, {pipeline_mode = #tpu.pipeline_mode<synchronous>, transform_indices = @transform_2, window_bounds = array<i64: 1, 256>}, {pipeline_mode = #tpu.pipeline_mode<synchronous>, transform_indices = @transform_3, window_bounds = array<i64: 256, 1024>}, {pipeline_mode = #tpu.pipeline_mode<synchronous>, transform_indices = @transform_4, window_bounds = array<i64: 1, 1024>}, {pipeline_mode = #tpu.pipeline_mode<synchronous>, transform_indices = @transform_5, window_bounds = array<i64: 512, 512>}, {pipeline_mode = #tpu.pipeline_mode<synchronous>, transform_indices = @transform_6, window_bounds = array<i64: 1, 512>}, {pipeline_mode = #tpu.pipeline_mode<synchronous>, transform_indices = @transform_7, window_bounds = array<i64: 512, 512>}, {pipeline_mode = #tpu.pipeline_mode<synchronous>, transform_indices = @transform_8, window_bounds = array<i64: 1, 512>}, {pipeline_mode = #tpu.pipeline_mode<synchronous>, transform_indices = @transform_9, window_bounds = array<i64: 512, 512>}, {pipeline_mode = #tpu.pipeline_mode<synchronous>, transform_indices = @transform_10, window_bounds = array<i64: 1, 512>}, {pipeline_mode = #tpu.pipeline_mode<synchronous>, transform_indices = @transform_11, window_bounds = array<i64: 256, 128>}, {transform_indices = @transform_12, window_bounds = array<i64: 256, 128>}]} {
    %c0 = arith.constant 0 : index
    %c0_0 = arith.constant 0 : index
    %0 = vector.load %arg1[%c0, %c0_0] : memref<256x128xf32, #tpu.memory_space<vmem>>, vector<256x128xf32>
    %1 = arith.truncf %0 : vector<256x128xf32> to vector<256x128xbf16>
    %c0_1 = arith.constant 0 : index
    %c0_2 = arith.constant 0 : index
    %2 = vector.load %arg2[%c0_1, %c0_2] : memref<128x256xbf16, #tpu.memory_space<vmem>>, vector<128x256xbf16>
    %cst = arith.constant dense<0.000000e+00> : vector<256x256xf32>
    %3 = tpu.matmul %1, %2, %cst {dimension_numbers = #tpu.dot_dimension_numbers<[1], [0], [0], [1], [0, 0, 1, 1], [], []>} : vector<256x128xbf16>, vector<128x256xbf16>, vector<256x256xf32> -> vector<256x256xf32>
    %c0_3 = arith.constant 0 : index
    %c0_4 = arith.constant 0 : index
    %4 = vector.load %arg3[%c0_3, %c0_4] : memref<1x256xf32, #tpu.memory_space<vmem>>, vector<1x256xf32>
    %5 = vector.broadcast %4 : vector<1x256xf32> to vector<256x256xf32>
    %6 = arith.addf %3, %5 : vector<256x256xf32>
    %cst_5 = arith.constant 0.000000e+00 : f32
    %7 = vector.broadcast %cst_5 : f32 to vector<256x256xf32>
    %8 = arith.maximumf %6, %7 : vector<256x256xf32>
    %cst_6 = arith.constant 0.000000e+00 : f32
    %9 = vector.broadcast %cst_6 : f32 to vector<256x256xf32>
    %10 = arith.minimumf %6, %9 : vector<256x256xf32>
    %cst_7 = arith.constant 16.666666 : f32
    %11 = vector.broadcast %cst_7 : f32 to vector<256x256xf32>
    %12 = arith.mulf %10, %11 : vector<256x256xf32>
    %13 = math.exp %12 : vector<256x256xf32>
    %cst_8 = arith.constant 1.000000e+00 : f32
    %14 = vector.broadcast %cst_8 : f32 to vector<256x256xf32>
    %15 = arith.subf %13, %14 : vector<256x256xf32>
    %cst_9 = arith.constant 6.000000e-02 : f32
    %16 = vector.broadcast %cst_9 : f32 to vector<256x256xf32>
    %17 = arith.mulf %16, %15 : vector<256x256xf32>
    %18 = arith.addf %8, %17 : vector<256x256xf32>
    %19 = arith.truncf %18 : vector<256x256xf32> to vector<256x256xbf16>
    %c0_10 = arith.constant 0 : index
    %c0_11 = arith.constant 0 : index
    %20 = vector.load %arg4[%c0_10, %c0_11] : memref<256x1024xbf16, #tpu.memory_space<vmem>>, vector<256x1024xbf16>
    %cst_12 = arith.constant dense<0.000000e+00> : vector<256x1024xf32>
    %21 = tpu.matmul %19, %20, %cst_12 {dimension_numbers = #tpu.dot_dimension_numbers<[1], [0], [0], [1], [0, 0, 1, 1], [], []>} : vector<256x256xbf16>, vector<256x1024xbf16>, vector<256x1024xf32> -> vector<256x1024xf32>
    %c0_13 = arith.constant 0 : index
    %c0_14 = arith.constant 0 : index
    %22 = vector.load %arg5[%c0_13, %c0_14] : memref<1x1024xf32, #tpu.memory_space<vmem>>, vector<1x1024xf32>
    %23 = vector.broadcast %22 : vector<1x1024xf32> to vector<256x1024xf32>
    %24 = arith.addf %21, %23 : vector<256x1024xf32>
    %cst_15 = arith.constant 0.000000e+00 : f32
    %25 = vector.broadcast %cst_15 : f32 to vector<256x1024xf32>
    %26 = arith.maximumf %24, %25 : vector<256x1024xf32>
    %27 = vector.extract_strided_slice %26 {offsets = [0, 0], sizes = [256, 128], strides = [1, 1]} : vector<256x1024xf32> to vector<256x128xf32>
    %28 = vector.extract_strided_slice %26 {offsets = [0, 128], sizes = [256, 128], strides = [1, 1]} : vector<256x1024xf32> to vector<256x128xf32>
    %29 = arith.addf %27, %28 : vector<256x128xf32>
    %30 = vector.extract_strided_slice %26 {offsets = [0, 256], sizes = [256, 128], strides = [1, 1]} : vector<256x1024xf32> to vector<256x128xf32>
    %31 = vector.extract_strided_slice %26 {offsets = [0, 384], sizes = [256, 128], strides = [1, 1]} : vector<256x1024xf32> to vector<256x128xf32>
    %32 = arith.addf %30, %31 : vector<256x128xf32>
    %33 = vector.extract_strided_slice %26 {offsets = [0, 512], sizes = [256, 128], strides = [1, 1]} : vector<256x1024xf32> to vector<256x128xf32>
    %34 = vector.extract_strided_slice %26 {offsets = [0, 640], sizes = [256, 128], strides = [1, 1]} : vector<256x1024xf32> to vector<256x128xf32>
    %35 = arith.addf %33, %34 : vector<256x128xf32>
    %36 = vector.extract_strided_slice %26 {offsets = [0, 768], sizes = [256, 128], strides = [1, 1]} : vector<256x1024xf32> to vector<256x128xf32>
    %37 = vector.extract_strided_slice %26 {offsets = [0, 896], sizes = [256, 128], strides = [1, 1]} : vector<256x1024xf32> to vector<256x128xf32>
    %38 = arith.addf %36, %37 : vector<256x128xf32>
    %39 = tpu.concatenate %29, %32, %35, %38 in 1 : vector<256x128xf32>, vector<256x128xf32>, vector<256x128xf32>, vector<256x128xf32> -> vector<256x512xf32>
    %40 = arith.truncf %39 : vector<256x512xf32> to vector<256x512xbf16>
    %c0_16 = arith.constant 0 : index
    %c0_17 = arith.constant 0 : index
    %41 = vector.load %arg6[%c0_16, %c0_17] : memref<512x512xbf16, #tpu.memory_space<vmem>>, vector<512x512xbf16>
    %cst_18 = arith.constant dense<0.000000e+00> : vector<256x512xf32>
    %42 = tpu.matmul %40, %41, %cst_18 {dimension_numbers = #tpu.dot_dimension_numbers<[1], [0], [0], [1], [0, 0, 1, 1], [], []>} : vector<256x512xbf16>, vector<512x512xbf16>, vector<256x512xf32> -> vector<256x512xf32>
    %c0_19 = arith.constant 0 : index
    %c0_20 = arith.constant 0 : index
    %43 = vector.load %arg7[%c0_19, %c0_20] : memref<1x512xf32, #tpu.memory_space<vmem>>, vector<1x512xf32>
    %44 = vector.broadcast %43 : vector<1x512xf32> to vector<256x512xf32>
    %45 = arith.addf %42, %44 : vector<256x512xf32>
    %cst_21 = arith.constant 0.000000e+00 : f32
    %46 = vector.broadcast %cst_21 : f32 to vector<256x512xf32>
    %47 = arith.maximumf %45, %46 : vector<256x512xf32>
    %48 = arith.truncf %47 : vector<256x512xf32> to vector<256x512xbf16>
    %c0_22 = arith.constant 0 : index
    %c0_23 = arith.constant 0 : index
    %49 = vector.load %arg8[%c0_22, %c0_23] : memref<512x512xbf16, #tpu.memory_space<vmem>>, vector<512x512xbf16>
    %cst_24 = arith.constant dense<0.000000e+00> : vector<256x512xf32>
    %50 = tpu.matmul %48, %49, %cst_24 {dimension_numbers = #tpu.dot_dimension_numbers<[1], [0], [0], [1], [0, 0, 1, 1], [], []>} : vector<256x512xbf16>, vector<512x512xbf16>, vector<256x512xf32> -> vector<256x512xf32>
    %c0_25 = arith.constant 0 : index
    %c0_26 = arith.constant 0 : index
    %51 = vector.load %arg9[%c0_25, %c0_26] : memref<1x512xf32, #tpu.memory_space<vmem>>, vector<1x512xf32>
    %52 = vector.broadcast %51 : vector<1x512xf32> to vector<256x512xf32>
    %53 = arith.addf %50, %52 : vector<256x512xf32>
    %cst_27 = arith.constant 0.000000e+00 : f32
    %54 = vector.broadcast %cst_27 : f32 to vector<256x512xf32>
    %55 = arith.maximumf %53, %54 : vector<256x512xf32>
    %56 = arith.truncf %55 : vector<256x512xf32> to vector<256x512xbf16>
    %c0_28 = arith.constant 0 : index
    %c0_29 = arith.constant 0 : index
    %57 = vector.load %arg10[%c0_28, %c0_29] : memref<512x512xbf16, #tpu.memory_space<vmem>>, vector<512x512xbf16>
    %cst_30 = arith.constant dense<0.000000e+00> : vector<256x512xf32>
    %58 = tpu.matmul %56, %57, %cst_30 {dimension_numbers = #tpu.dot_dimension_numbers<[1], [0], [0], [1], [0, 0, 1, 1], [], []>} : vector<256x512xbf16>, vector<512x512xbf16>, vector<256x512xf32> -> vector<256x512xf32>
    %c0_31 = arith.constant 0 : index
    %c0_32 = arith.constant 0 : index
    %59 = vector.load %arg11[%c0_31, %c0_32] : memref<1x512xf32, #tpu.memory_space<vmem>>, vector<1x512xf32>
    %60 = vector.broadcast %59 : vector<1x512xf32> to vector<256x512xf32>
    %61 = arith.addf %58, %60 : vector<256x512xf32>
    %cst_33 = arith.constant 0.000000e+00 : f32
    %62 = vector.broadcast %cst_33 : f32 to vector<256x512xf32>
    %63 = arith.maximumf %61, %62 : vector<256x512xf32>
    %64 = arith.mulf %63, %47 : vector<256x512xf32>
    %65 = vector.extract_strided_slice %64 {offsets = [0, 0], sizes = [256, 128], strides = [1, 1]} : vector<256x512xf32> to vector<256x128xf32>
    %66 = vector.extract_strided_slice %64 {offsets = [0, 128], sizes = [256, 128], strides = [1, 1]} : vector<256x512xf32> to vector<256x128xf32>
    %67 = arith.maximumf %65, %66 : vector<256x128xf32>
    %68 = vector.extract_strided_slice %64 {offsets = [0, 256], sizes = [256, 128], strides = [1, 1]} : vector<256x512xf32> to vector<256x128xf32>
    %69 = arith.maximumf %67, %68 : vector<256x128xf32>
    %70 = vector.extract_strided_slice %64 {offsets = [0, 128], sizes = [256, 128], strides = [1, 1]} : vector<256x512xf32> to vector<256x128xf32>
    %71 = vector.extract_strided_slice %64 {offsets = [0, 256], sizes = [256, 128], strides = [1, 1]} : vector<256x512xf32> to vector<256x128xf32>
    %72 = arith.maximumf %70, %71 : vector<256x128xf32>
    %73 = vector.extract_strided_slice %64 {offsets = [0, 384], sizes = [256, 128], strides = [1, 1]} : vector<256x512xf32> to vector<256x128xf32>
    %74 = arith.maximumf %72, %73 : vector<256x128xf32>
    %75 = tpu.concatenate %69, %74 in 1 : vector<256x128xf32>, vector<256x128xf32> -> vector<256x256xf32>
    %76 = arith.truncf %75 : vector<256x256xf32> to vector<256x256xbf16>
    %c0_34 = arith.constant 0 : index
    %c0_35 = arith.constant 0 : index
    %77 = vector.load %arg12[%c0_34, %c0_35] : memref<256x128xbf16, #tpu.memory_space<vmem>>, vector<256x128xbf16>
    %cst_36 = arith.constant dense<0.000000e+00> : vector<256x128xf32>
    %78 = tpu.matmul %76, %77, %cst_36 {dimension_numbers = #tpu.dot_dimension_numbers<[1], [0], [0], [1], [0, 0, 1, 1], [], []>} : vector<256x256xbf16>, vector<256x128xbf16>, vector<256x128xf32> -> vector<256x128xf32>
    %cst_37 = arith.constant -0.00794188119 : f32
    %79 = vector.broadcast %cst_37 : f32 to vector<256x128xf32>
    %80 = arith.addf %78, %79 : vector<256x128xf32>
    %c0_38 = arith.constant 0 : index
    %c0_39 = arith.constant 0 : index
    %81 = vector.load %arg13[%c0_38, %c0_39] : memref<256x128xf32, #tpu.memory_space<vmem>>, vector<256x128xf32>
    tpu.vector_store %arg13[%c0_38, %c0_39], %80 {strides = array<i32>} : memref<256x128xf32, #tpu.memory_space<vmem>>, vector<256x128xf32>,
    return
  }
  func.func @transform_0(%arg0: i32) -> (i32, i32) {
    %c0_i32 = arith.constant 0 : i32
    %c0_i32_0 = arith.constant 0 : i32
    return %arg0, %c0_i32 : i32, i32
  }
  func.func @transform_1(%arg0: i32) -> (i32, i32) {
    %c0_i32 = arith.constant 0 : i32
    %c0_i32_0 = arith.constant 0 : i32
    %c0_i32_1 = arith.constant 0 : i32
    return %c0_i32, %c0_i32_0 : i32, i32
  }
  func.func @transform_2(%arg0: i32) -> (i32, i32) {
    %c0_i32 = arith.constant 0 : i32
    %c0_i32_0 = arith.constant 0 : i32
    %c0_i32_1 = arith.constant 0 : i32
    return %c0_i32, %c0_i32_0 : i32, i32
  }
  func.func @transform_3(%arg0: i32) -> (i32, i32) {
    %c0_i32 = arith.constant 0 : i32
    %c0_i32_0 = arith.constant 0 : i32
    %c0_i32_1 = arith.constant 0 : i32
    return %c0_i32, %c0_i32_0 : i32, i32
  }
  func.func @transform_4(%arg0: i32) -> (i32, i32) {
    %c0_i32 = arith.constant 0 : i32
    %c0_i32_0 = arith.constant 0 : i32
    %c0_i32_1 = arith.constant 0 : i32
    return %c0_i32, %c0_i32_0 : i32, i32
  }
  func.func @transform_5(%arg0: i32) -> (i32, i32) {
    %c0_i32 = arith.constant 0 : i32
    %c0_i32_0 = arith.constant 0 : i32
    %c0_i32_1 = arith.constant 0 : i32
    return %c0_i32, %c0_i32_0 : i32, i32
  }
  func.func @transform_6(%arg0: i32) -> (i32, i32) {
    %c0_i32 = arith.constant 0 : i32
    %c0_i32_0 = arith.constant 0 : i32
    %c0_i32_1 = arith.constant 0 : i32
    return %c0_i32, %c0_i32_0 : i32, i32
  }
  func.func @transform_7(%arg0: i32) -> (i32, i32) {
    %c0_i32 = arith.constant 0 : i32
    %c0_i32_0 = arith.constant 0 : i32
    %c0_i32_1 = arith.constant 0 : i32
    return %c0_i32, %c0_i32_0 : i32, i32
  }
  func.func @transform_8(%arg0: i32) -> (i32, i32) {
    %c0_i32 = arith.constant 0 : i32
    %c0_i32_0 = arith.constant 0 : i32
    %c0_i32_1 = arith.constant 0 : i32
    return %c0_i32, %c0_i32_0 : i32, i32
  }
  func.func @transform_9(%arg0: i32) -> (i32, i32) {
    %c0_i32 = arith.constant 0 : i32
    %c0_i32_0 = arith.constant 0 : i32
    %c0_i32_1 = arith.constant 0 : i32
    return %c0_i32, %c0_i32_0 : i32, i32
  }
  func.func @transform_10(%arg0: i32) -> (i32, i32) {
    %c0_i32 = arith.constant 0 : i32
    %c0_i32_0 = arith.constant 0 : i32
    %c0_i32_1 = arith.constant 0 : i32
    return %c0_i32, %c0_i32_0 : i32, i32
  }
  func.func @transform_11(%arg0: i32) -> (i32, i32) {
    %c0_i32 = arith.constant 0 : i32
    %c0_i32_0 = arith.constant 0 : i32
    %c0_i32_1 = arith.constant 0 : i32
    return %c0_i32, %c0_i32_0 : i32, i32
  }
  func.func @transform_12(%arg0: i32) -> (i32, i32) {
    %c0_i32 = arith.constant 0 : i32
    %c0_i32_0 = arith.constant 0 : i32
    return %arg0, %c0_i32 : i32, i32
  }
}

</mosaic_0001>

<bundles_post_ra>
// kernel: forward.1
= control target key start
LH: loop header
LB: loop body
LE: loop exit
PB: predicated region body
PF: predicated region fallthrough
CT: control target
= control target key end

     0   :  { %s11549_s21 = smov 0   ;;  %s16564_s0 = inlined_call_operand.vmem [shape: f32[512,128], index: 0, kind: input, shape index: {}]   ;;  %s16565_s1 = inlined_call_operand.vmem [shape: bf16[128,256], index: 1, kind: input, shape index: {}]   ;;  %s16566_s2 = inlined_call_operand.vmem [shape: f32[1,256], index: 2, kind: input, shape index: {}]   ;;  %s16567_s3 = inlined_call_operand.vmem [shape: bf16[256,1024], index: 3, kind: input, shape index: {}]   ;;  %s16568_s4 = inlined_call_operand.vmem [shape: f32[1,1024], index: 4, kind: input, shape index: {}]   ;;  %s16569_s5 = inlined_call_operand.vmem [shape: bf16[512,512], index: 5, kind: input, shape index: {}]   ;;  %s16570_s6 = inlined_call_operand.vmem [shape: f32[1,512], index: 6, kind: input, shape index: {}]   ;;  %s16571_s7 = inlined_call_operand.vmem [shape: bf16[512,512], index: 7, kind: input, shape index: {}]   ;;  %s16572_s8 = inlined_call_operand.vmem [shape: f32[1,512], index: 8, kind: input, shape index: {}]   ;;  %s16573_s9 = inlined_call_operand.vmem [shape: bf16[512,512], index: 9, kind: input, shape index: {}]   ;;  %s16574_s10 = inlined_call_operand.vmem [shape: f32[1,512], index: 10, kind: input, shape index: {}]   ;;  %s16575_s11 = inlined_call_operand.vmem [shape: bf16[256,128], index: 11, kind: input, shape index: {}]   ;;  %s16576_s12 = inlined_call_operand.vmem [shape: f32[512,128], index: 12, kind: output, shape index: {}]  }
   0x1 LB: > { %s9204_s22 = sadd.s32 4294967295, %s11481_s21   ;;  %p9208_p0 = scmp.ge.s32.totalorder %s11481_s21, 1  ;;  %s11481_s21 = sphi %s11549_s21, %s22_s21  }
   0x2   : > { %p363_p1 = scmp.lt.s32.totalorder %s11481_s21, 3 }
   0x4   : > { %p364_p2 = pnand %p9208_p0, %p363_p1 }
   0x6   : > { %367 = sbr.rel (%p364_p2) target bundleno = 2018 (0x7e2), region = 68 }
   0xd   : > { %v10728_v0 = vld [vmem:[%s16565_s1 + $0x4] ss:$8 sps:$4 sm:$0xff]   ;;  %v10730_v1 = vld [vmem:[%s16565_s1] ss:$8 sps:$4 sm:$0xff]   ;;  %v11483_v2 = vmov 0   ;;  %s9209_s19 = sshll.u32 %s9204_s22, 5 }
   0xe   : > { %606 = vmatprep.mubr.bf16.mxu0 %v11483_v2  ;;  %574 = vmatprep.subr.bf16.mxu0 %v10728_v0  ;;  %v10731_v3 = vld [vmem:[%s16565_s1 + $0x14] ss:$8 sps:$4 sm:$0xff]   ;;  %v10733_v4 = vld [vmem:[%s16565_s1 + $0x10] ss:$8 sps:$4 sm:$0xff]   ;;  %v10734_v5 = vld [vmem:[%s16565_s1 + $0x24] ss:$8 sps:$4 sm:$0xff]  }
   0xf   : > { %575 = vmatpush1.bf16.msra.mxu0 %v10730_v1  ;;  %v10736_v6 = vld [vmem:[%s16565_s1 + $0x20] ss:$8 sps:$4 sm:$0xff]   ;;  %v10737_v7 = vld [vmem:[%s16565_s1 + $0x34] ss:$8 sps:$4 sm:$0xff]   ;;  %v10739_v8 = vld [vmem:[%s16565_s1 + $0x30] ss:$8 sps:$4 sm:$0xff]  }
  0x10   : > { %576 = vmatprep.subr.bf16.mxu0 %v10731_v3  ;;  %v10740_v9 = vld [vmem:[%s16565_s1 + $0x44] ss:$8 sps:$4 sm:$0xff]   ;;  %p406_p3 = scmp.lt.s32.totalorder %s9209_s19, 63  ;;  %v10742_v10 = vld [vmem:[%s16565_s1 + $0x40] ss:$8 sps:$4 sm:$0xff]  }
  0x11   : > { %v10743_v11 = vld [vmem:[%s16565_s1 + $0x54] ss:$8 sps:$4 sm:$0xff]   ;;  %v10745_v12 = vld [vmem:[%s16565_s1 + $0x50] ss:$8 sps:$4 sm:$0xff]   ;;  %v10746_v13 = vld [vmem:[%s16565_s1 + $0x64] ss:$8 sps:$4 sm:$0xff]  }
  0x12   : > { %s17469_s19 = smov (!%p406_p3, %s9209_s19), 63  ;;  %v10748_v14 = vld [vmem:[%s16565_s1 + $0x60] ss:$8 sps:$4 sm:$0xff]   ;;  %v10749_v15 = vld [vmem:[%s16565_s1 + $0x74] ss:$8 sps:$4 sm:$0xff]  }
  0x13   : > { %577 = vmatpush1.bf16.msra.mxu0 %v10733_v4  ;;  %s9210_s17 = sshll.u32 %s17469_s19, 3  ;;  %v1312_v16 = vld [vmem:[%s16567_s3 + $0x8] sm:$0xff]  ;;  %v10751_v18 = vld [vmem:[%s16565_s1 + $0x70] ss:$8 sps:$4 sm:$0xff]   ;;  %v1311_v22 = vld [vmem:[%s16567_s3] sm:$0xff] }
  0x14   : > { %578 = vmatprep.subr.bf16.mxu0 %v10734_v5  ;;  %s11611_s25 = scalar_lea.vmem %s16564_s0, %s9210_s17  ;;  %v1316_v17 = vld [vmem:[%s16567_s3 + $0x28] sm:$0xff]  ;;  %v1315_v25 = vld [vmem:[%s16567_s3 + $0x20] sm:$0xff]  ;;  %s16527_s30 = scalar_lea.vmem %s16576_s12, %s9210_s17 }
  0x15   : > { %v418_v19 = vld [vmem:[%s11611_s25] sm:$0xff]  ;;  %v419_v20 = vld [vmem:[%s11611_s25 + $0x8] sm:$0xff]  ;;  %v9296_v21 = vcombine.high %v1312_v16, %v1316_v17  ;;  %v9294_v27 = vcombine.high %v1311_v22, %v1315_v25  ;;  %v9293_v28 = vcombine.low %v1311_v22, %v1315_v25  ;;  %v9295_v31 = vcombine.low %v1312_v16, %v1316_v17  ;;  %v420_v39 = vld [vmem:[%s11611_s25 + $0x10] sm:$0xff] }
  0x16   : > { %v1320_v23 = vld [vmem:[%s16567_s3 + $0x48] sm:$0xff]  ;;  %v450_v26 = vpack.c.bf16 %v419_v20, %v418_v19  ;;  %v1319_v29 = vld [vmem:[%s16567_s3 + $0x40] sm:$0xff]  ;;  %v421_v41 = vld [vmem:[%s11611_s25 + $0x18] sm:$0xff] }
  0x17   : > { %579 = vmatpush1.bf16.msra.mxu0 %v10736_v6  ;;  %v1324_v24 = vld [vmem:[%s16567_s3 + $0x68] sm:$0xff]  ;;  %v1323_v30 = vld [vmem:[%s16567_s3 + $0x60] sm:$0xff]  ;;  %2121 = vmatprep.subr.bf16.mxu1 %v9294_v27  ;;  %v451_v50 = vpack.c.bf16 %v421_v41, %v420_v39  ;;  %v429_v41 = vld [vmem:[%s11611_s25 + $0x58] sm:$0xff] }
  0x18   : > { %580 = vmatprep.subr.bf16.mxu0 %v10737_v7  ;;  %v9302_v32 = vcombine.high %v1319_v29, %v1323_v30  ;;  %v1327_v33 = vld [vmem:[%s16567_s3 + $0x80] sm:$0xff]  ;;  %v9304_v35 = vcombine.high %v1320_v23, %v1324_v24  ;;  %v1328_v36 = vld [vmem:[%s16567_s3 + $0x88] sm:$0xff]  ;;  %2122 = vmatpush1.bf16.msra.mxu1 %v9293_v28  ;;  %v9301_v38 = vcombine.low %v1319_v29, %v1323_v30 }
  0x19   : > { %v1331_v34 = vld [vmem:[%s16567_s3 + $0xa0] sm:$0xff]  ;;  %v1332_v37 = vld [vmem:[%s16567_s3 + $0xa8] sm:$0xff]  ;;  %v9303_v42 = vcombine.low %v1320_v23, %v1324_v24 }
  0x1a   : > { %2123 = vmatprep.subr.bf16.mxu1 %v9302_v32  ;;  %v9310_v40 = vcombine.high %v1327_v33, %v1331_v34  ;;  %v1335_v43 = vld [vmem:[%s16567_s3 + $0xc0] sm:$0xff]  ;;  %v9312_v45 = vcombine.high %v1328_v36, %v1332_v37  ;;  %v1336_v46 = vld [vmem:[%s16567_s3 + $0xc8] sm:$0xff]  ;;  %v9309_v48 = vcombine.low %v1327_v33, %v1331_v34  ;;  %v9311_v53 = vcombine.low %v1328_v36, %v1332_v37 }
  0x1b   : > { %581 = vmatpush1.bf16.msra.mxu0 %v10739_v8  ;;  %v1339_v44 = vld [vmem:[%s16567_s3 + $0xe0] sm:$0xff]  ;;  %v1340_v47 = vld [vmem:[%s16567_s3 + $0xe8] sm:$0xff] }
  0x1c   : > { %582 = vmatprep.subr.bf16.mxu0 %v10740_v9  ;;  %2124 = vmatpush1.bf16.msra.mxu1 %v9301_v38  ;;  %v1343_v49 = vld [vmem:[%s16567_s3 + $0x100] sm:$0xff]  ;;  %v9318_v51 = vcombine.high %v1335_v43, %v1339_v44  ;;  %v1344_v54 = vld [vmem:[%s16567_s3 + $0x108] sm:$0xff]  ;;  %v9320_v56 = vcombine.high %v1336_v46, %v1340_v47  ;;  %v9317_v59 = vcombine.low %v1335_v43, %v1339_v44 }
  0x1d   : > { %2125 = vmatprep.subr.bf16.mxu1 %v9310_v40  ;;  %v1347_v52 = vld [vmem:[%s16567_s3 + $0x120] sm:$0xff]  ;;  %v1348_v55 = vld [vmem:[%s16567_s3 + $0x128] sm:$0xff]  ;;  %v9319_v63 = vcombine.low %v1336_v46, %v1340_v47  ;;  %v428_v40 = vld [vmem:[%s11611_s25 + $0x50] sm:$0xff] }
  0x1e   : > { %v422_v57 = vld [vmem:[%s11611_s25 + $0x20] sm:$0xff]  ;;  %v423_v58 = vld [vmem:[%s11611_s25 + $0x28] sm:$0xff]  ;;  %v9326_v62 = vcombine.high %v1343_v49, %v1347_v52  ;;  %v9328_v3 = vcombine.high %v1344_v54, %v1348_v55  ;;  %v9325_v4 = vcombine.low %v1343_v49, %v1347_v52  ;;  %v9327_v9 = vcombine.low %v1344_v54, %v1348_v55  ;;  %v432_v46 = vld [vmem:[%s11611_s25 + $0x70] sm:$0xff] }
  0x1f   : > { %583 = vmatpush1.bf16.msra.mxu0 %v10742_v10  ;;  %v1351_v60 = vld [vmem:[%s16567_s3 + $0x140] sm:$0xff]  ;;  %v1352_v0 = vld [vmem:[%s16567_s3 + $0x148] sm:$0xff]  ;;  %v452_v7 = vpack.c.bf16 %v423_v58, %v422_v57  ;;  %v433_v47 = vld [vmem:[%s11611_s25 + $0x78] sm:$0xff] }
  0x20   : > { %584 = vmatprep.subr.bf16.mxu0 %v10743_v11  ;;  %2126 = vmatpush1.bf16.msra.mxu1 %v9309_v48  ;;  %v1355_v61 = vld [vmem:[%s16567_s3 + $0x160] sm:$0xff]  ;;  %v1356_v1 = vld [vmem:[%s16567_s3 + $0x168] sm:$0xff]  ;;  %v457_v48 = vpack.c.bf16 %v433_v47, %v432_v46  ;;  %v436_v52 = vld [vmem:[%s11611_s25 + $0x90] sm:$0xff] }
  0x21   : > { %2127 = vmatprep.subr.bf16.mxu1 %v9318_v51  ;;  %v1359_v5 = vld [vmem:[%s16567_s3 + $0x180] sm:$0xff]  ;;  %v9334_v8 = vcombine.high %v1351_v60, %v1355_v61  ;;  %v1360_v10 = vld [vmem:[%s16567_s3 + $0x188] sm:$0xff]  ;;  %v9335_v19 = vcombine.low %v1352_v0, %v1356_v1  ;;  %v440_v58 = vld [vmem:[%s11611_s25 + $0xb0] sm:$0xff] }
  0x22   : > { %v1363_v6 = vld [vmem:[%s16567_s3 + $0x1a0] sm:$0xff]  ;;  %v1364_v11 = vld [vmem:[%s16567_s3 + $0x1a8] sm:$0xff] }
  0x23   : > { %585 = vmatpush1.bf16.msra.mxu0 %v10745_v12  ;;  %v9336_v12 = vcombine.high %v1352_v0, %v1356_v1  ;;  %v1367_v16 = vld [vmem:[%s16567_s3 + $0x1c0] sm:$0xff]  ;;  %v1368_v20 = vld [vmem:[%s16567_s3 + $0x1c8] sm:$0xff]  ;;  %v9344_v22 = vcombine.high %v1360_v10, %v1364_v11  ;;  %v9341_v23 = vcombine.low %v1359_v5, %v1363_v6  ;;  %v9343_v28 = vcombine.low %v1360_v10, %v1364_v11 }
  0x24   : > { %586 = vmatprep.subr.bf16.mxu0 %v10746_v13  ;;  %2128 = vmatpush1.bf16.msra.mxu1 %v9317_v59  ;;  %v424_v13 = vld [vmem:[%s11611_s25 + $0x30] sm:$0xff]  ;;  %v1371_v17 = vld [vmem:[%s16567_s3 + $0x1e0] sm:$0xff]  ;;  %v1376_v29 = vld [vmem:[%s16567_s3 + $0x208] sm:$0xff] }
  0x25   : > { %2129 = vmatprep.subr.bf16.mxu1 %v9326_v62  ;;  %v11726_v24 = vld [vmem:[%s16567_s3 + $0x200] sm:$0xff]  ;;  %v9350_v27 = vcombine.high %v1367_v16, %v1371_v17  ;;  %v1380_v30 = vld [vmem:[%s16567_s3 + $0x228] sm:$0xff]  ;;  %v9349_v34 = vcombine.low %v1367_v16, %v1371_v17  ;;  %v441_v59 = vld [vmem:[%s11611_s25 + $0xb8] sm:$0xff] }
  0x26   : > { %v11731_v25 = vld [vmem:[%s16567_s3 + $0x220] sm:$0xff]  ;;  %v427_v33 = vld [vmem:[%s11611_s25 + $0x48] sm:$0xff]  ;;  %v9360_v37 = vcombine.high %v1376_v29, %v1380_v30  ;;  %v9359_v39 = vcombine.low %v1376_v29, %v1380_v30 }
  0x27   : > { %587 = vmatpush1.bf16.msra.mxu0 %v10748_v14  ;;  %v425_v14 = vld [vmem:[%s11611_s25 + $0x38] sm:$0xff]  ;;  %v426_v32 = vld [vmem:[%s11611_s25 + $0x40] sm:$0xff]  ;;  %v431_v44 = vld [vmem:[%s11611_s25 + $0x68] sm:$0xff] }
  0x28   : > { %588 = vmatprep.subr.bf16.mxu0 %v10749_v15  ;;  %2130 = vmatpush1.bf16.msra.mxu1 %v9325_v4  ;;  %v9333_v15 = vcombine.low %v1351_v60, %v1355_v61  ;;  %v454_v38 = vpack.c.bf16 %v427_v33, %v426_v32  ;;  %v430_v43 = vld [vmem:[%s11611_s25 + $0x60] sm:$0xff]  ;;  %v9357_v60 = vcombine.low %v11726_v24, %v11731_v25  ;;  %v1384_v0 = vld [vmem:[%s16567_s3 + $0x248] sm:$0xff] }
  0x29   : > { %2131 = vmatprep.subr.bf16.mxu1 %v9334_v8  ;;  %v434_v49 = vld [vmem:[%s11611_s25 + $0x80] sm:$0xff]  ;;  %v461_v61 = vpack.c.bf16 %v441_v59, %v440_v58  ;;  %v443_v8 = vld [vmem:[%s11611_s25 + $0xc8] sm:$0xff] }
  0x2a   : > { %v438_v55 = vld [vmem:[%s11611_s25 + $0xa0] sm:$0xff]  ;;  %v1392_v11 = vld [vmem:[%s16567_s3 + $0x288] sm:$0xff] }
  0x2b   : > { %589 = vmatpush1.bf16.msra.mxu0 %v10751_v18  ;;  %v9342_v18 = vcombine.high %v1359_v5, %v1363_v6  ;;  %v1383_v62 = vld [vmem:[%s16567_s3 + $0x240] sm:$0xff]  ;;  %v1408_v30 = vld [vmem:[%s16567_s3 + $0x308] sm:$0xff] }
  0x2c   : > { %2314 = vmatprep.subr.bf16.mxu0 %v9296_v21  ;;  %v1372_v21 = vld [vmem:[%s16567_s3 + $0x1e8] sm:$0xff]  ;;  %2132 = vmatpush1.bf16.msra.mxu1 %v9333_v15  ;;  %v1395_v10 = vld [vmem:[%s16567_s3 + $0x2a0] sm:$0xff] }
  0x2d   : > { %2133 = vmatprep.subr.bf16.mxu1 %v9342_v18  ;;  %v9351_v36 = vcombine.low %v1368_v20, %v1372_v21  ;;  %v1399_v18 = vld [vmem:[%s16567_s3 + $0x2c0] sm:$0xff]  ;;  %v1412_v32 = vld [vmem:[%s16567_s3 + $0x328] sm:$0xff] }
  0x2e   : > { %607 = vmatmul.mubr.bf16.vlgmr.msra.gmra.mrb[0].mxu0 %v450_v26  ;;  %v453_v26 = vpack.c.bf16 %v425_v14, %v424_v13  ;;  %v1396_v13 = vld [vmem:[%s16567_s3 + $0x2a8] sm:$0xff]  ;;  %v1411_v29 = vld [vmem:[%s16567_s3 + $0x320] sm:$0xff] }
  0x2f   : > { %616 = vmatprep.mubr.bf16.mxu0 %v11483_v2  ;;  %2315 = vmatpush1.bf16.msra.mxu0 %v9295_v31  ;;  %v9352_v31 = vcombine.high %v1368_v20, %v1372_v21  ;;  %v9375_v15 = vcombine.low %v1392_v11, %v1396_v13  ;;  %v9376_v16 = vcombine.high %v1392_v11, %v1396_v13  ;;  %v1400_v20 = vld [vmem:[%s16567_s3 + $0x2c8] sm:$0xff]  ;;  %v1423_v47 = vld [vmem:[%s16567_s3 + $0x380] sm:$0xff]  ;;  %v484_v11 = vlaneseq }
  0x30   : > { %2316 = vmatprep.subr.bf16.mxu0 %v9304_v35  ;;  %2134 = vmatpush1.bf16.msra.mxu1 %v9341_v23  ;;  %v9358_v35 = vcombine.high %v11726_v24, %v11731_v25  ;;  %v447_v46 = vld [vmem:[%s11611_s25 + $0xe8] sm:$0xff] }
  0x31   : > { %2135 = vmatprep.subr.bf16.mxu1 %v9350_v27  ;;  %v445_v27 = vld [vmem:[%s11611_s25 + $0xd8] sm:$0xff]  ;;  %v1432_v58 = vld [vmem:[%s16567_s3 + $0x3c8] sm:$0xff] }
  0x33   : > { %2317 = vmatpush1.bf16.msra.mxu0 %v9303_v42  ;;  %v455_v42 = vpack.c.bf16 %v429_v41, %v428_v40  ;;  %v1420_v41 = vld [vmem:[%s16567_s3 + $0x368] sm:$0xff] }
  0x34   : > { %2318 = vmatprep.subr.bf16.mxu0 %v9312_v45  ;;  %2136 = vmatpush1.bf16.msra.mxu1 %v9349_v34  ;;  %v456_v45 = vpack.c.bf16 %v431_v44, %v430_v43  ;;  %v9391_v34 = vcombine.low %v1408_v30, %v1412_v32 }
  0x35   : > { %2137 = vmatprep.subr.bf16.mxu1 %v9358_v35  ;;  %v9392_v35 = vcombine.high %v1408_v30, %v1412_v32  ;;  %v11968_v30 = vld [vmem:[%s16567_s3 + $0x78] sm:$0xff] }
  0x36   : > { %617 = vmatmul.mubr.bf16.gmra.mrb[4].mxu0 %v451_v50  ;;  %v435_v50 = vld [vmem:[%s11611_s25 + $0x88] sm:$0xff] }
  0x37   : > { %626 = vmatprep.mubr.bf16.mxu0 %v11483_v2  ;;  %2319 = vmatpush1.bf16.msra.mxu0 %v9311_v53  ;;  %v458_v51 = vpack.c.bf16 %v435_v50, %v434_v49  ;;  %v437_v53 = vld [vmem:[%s11611_s25 + $0x98] sm:$0xff]  ;;  %v1424_v49 = vld [vmem:[%s16567_s3 + $0x388] sm:$0xff] }
  0x38   : > { %2320 = vmatprep.subr.bf16.mxu0 %v9320_v56  ;;  %v459_v54 = vpack.c.bf16 %v437_v53, %v436_v52  ;;  %v439_v56 = vld [vmem:[%s11611_s25 + $0xa8] sm:$0xff]  ;;  %2138 = vmatpush1.bf16.msra.mxu1 %v9357_v60 }
  0x39   : > { %v460_v57 = vpack.c.bf16 %v439_v56, %v438_v55  ;;  %v1431_v56 = vld [vmem:[%s16567_s3 + $0x3c0] sm:$0xff]  ;;  %v1436_v60 = vld [vmem:[%s16567_s3 + $0x3e8] sm:$0xff] }
  0x3b   : > { %2321 = vmatpush1.bf16.msra.mxu0 %v9319_v63  ;;  %v1387_v63 = vld [vmem:[%s16567_s3 + $0x260] sm:$0xff] }
  0x3c   : > { %2322 = vmatprep.subr.bf16.mxu0 %v9328_v3  ;;  %v9366_v1 = vcombine.high %v1383_v62, %v1387_v63  ;;  %v1388_v3 = vld [vmem:[%s16567_s3 + $0x268] sm:$0xff]  ;;  %v9365_v4 = vcombine.low %v1383_v62, %v1387_v63  ;;  %v9415_v62 = vcombine.low %v1432_v58, %v1436_v60  ;;  %v9416_v63 = vcombine.high %v1432_v58, %v1436_v60  ;;  %v12042_v58 = vld [vmem:[%s16567_s3 + $0xf8] sm:$0xff] }
  0x3d   : > { %v9367_v5 = vcombine.low %v1384_v0, %v1388_v3  ;;  %v9368_v6 = vcombine.high %v1384_v0, %v1388_v3  ;;  %v448_v0 = vld [vmem:[%s11611_s25 + $0xf0] sm:$0xff] }
  0x3e   : > { %627 = vmatmul.mubr.bf16.gmra.mrb[8].mxu0 %v452_v7  ;;  %v442_v7 = vld [vmem:[%s11611_s25 + $0xc0] sm:$0xff]  ;;  %2139 = vmatprep.subr.bf16.mxu1 %v9366_v1  ;;  %v449_v1 = vld [vmem:[%s11611_s25 + $0xf8] sm:$0xff] }
  0x3f   : > { %636 = vmatprep.mubr.bf16.mxu0 %v11483_v2  ;;  %2323 = vmatpush1.bf16.msra.mxu0 %v9327_v9  ;;  %v1391_v9 = vld [vmem:[%s16567_s3 + $0x280] sm:$0xff]  ;;  %v462_v17 = vpack.c.bf16 %v443_v8, %v442_v7  ;;  %v465_v3 = vpack.c.bf16 %v449_v1, %v448_v0  ;;  %v11880_v7 = vld [vmem:[%s16567_s3 + $0x18] sm:$0xff]  ;;  %v12060_v0 = vld [vmem:[%s16567_s3 + $0x230] sm:$0xff] }
  0x40   : > { %2324 = vmatprep.subr.bf16.mxu0 %v9336_v12  ;;  %2140 = vmatpush1.bf16.msra.mxu1 %v9365_v4  ;;  %v9374_v12 = vcombine.high %v1391_v9, %v1395_v10  ;;  %v9373_v14 = vcombine.low %v1391_v9, %v1395_v10  ;;  %v11866_v4 = vld [vmem:[%s16567_s3 + $0x10] sm:$0xff]  ;;  %v11885_v8 = vld [vmem:[%s16567_s3 + $0x38] sm:$0xff]  ;;  %16902 = vst [vmem:[#allocation10_spill] sm:$0xff] %v12060_v0 }
  0x41   : > { %v9300_v10 = vcombine.high %v11880_v7, %v11885_v8 }
  0x42   : > { %2141 = vmatprep.subr.bf16.mxu1 %v9374_v12  ;;  %v11891_v12 = vshrl.u32 %v484_v11, 7  ;;  %v12070_v11 = vld [vmem:[%s16567_s3 + $0x118] sm:$0xff] }
  0x43   : > { %2325 = vmatpush1.bf16.msra.mxu0 %v9335_v19  ;;  %v1403_v19 = vld [vmem:[%s16567_s3 + $0x2e0] sm:$0xff] }
  0x44   : > { %2326 = vmatprep.subr.bf16.mxu0 %v9344_v22  ;;  %2142 = vmatpush1.bf16.msra.mxu1 %v9373_v14  ;;  %v9382_v21 = vcombine.high %v1399_v18, %v1403_v19  ;;  %v1404_v22 = vld [vmem:[%s16567_s3 + $0x2e8] sm:$0xff]  ;;  %v9381_v23 = vcombine.low %v1399_v18, %v1403_v19  ;;  %16894 = vst [vmem:[#allocation2_spill] sm:$0xff] %v11891_v12  ;;  %v11894_v13 = vsub.s32 0, %v11891_v12  ;;  %v482_v14 = vld [vmem:[%s16566_s2] sm:$0x3]  ;;  %v11915_v18 = vld [vmem:[%s16567_s3 + $0x90] sm:$0xff] }
  0x45   : > { %v9383_v24 = vcombine.low %v1400_v20, %v1404_v22  ;;  %v9384_v25 = vcombine.high %v1400_v20, %v1404_v22  ;;  %v11923_v20 = vld [vmem:[%s16567_s3 + $0xb0] sm:$0xff] }
  0x46   : > { %637 = vmatmul.mubr.bf16.gmra.mrb[12].mxu0 %v453_v26  ;;  %v444_v26 = vld [vmem:[%s11611_s25 + $0xd0] sm:$0xff]  ;;  %2143 = vmatprep.subr.bf16.mxu1 %v9382_v21  ;;  %16895 = vst [vmem:[#allocation3_spill] sm:$0xff] %v11894_v13  ;;  %v11918_v19 = vrot.slane %v482_v14, %v11894_v13 }
  0x47   : > { %646 = vmatprep.mubr.bf16.mxu0 %v11483_v2  ;;  %2327 = vmatpush1.bf16.msra.mxu0 %v9343_v28  ;;  %v1407_v28 = vld [vmem:[%s16567_s3 + $0x300] sm:$0xff]  ;;  %v11928_v21 = vld [vmem:[%s16567_s3 + $0xd0] sm:$0xff] }
  0x48   : > { %2328 = vmatprep.subr.bf16.mxu0 %v9352_v31  ;;  %2144 = vmatpush1.bf16.msra.mxu1 %v9381_v23  ;;  %v9390_v31 = vcombine.high %v1407_v28, %v1411_v29  ;;  %v9389_v33 = vcombine.low %v1407_v28, %v1411_v29  ;;  %v11933_v22 = vld [vmem:[%s16567_s3 + $0xf0] sm:$0xff]  ;;  %v11963_v29 = vld [vmem:[%s16567_s3 + $0x58] sm:$0xff] }
  0x49   : > { %v11958_v28 = vld [vmem:[%s16567_s3 + $0x170] sm:$0xff] }
  0x4a   : > { %2145 = vmatprep.subr.bf16.mxu1 %v9390_v31 }
  0x4b   : > { %2329 = vmatpush1.bf16.msra.mxu0 %v9351_v36  ;;  %v463_v36 = vpack.c.bf16 %v445_v27, %v444_v26  ;;  %v11951_v26 = vld [vmem:[%s16567_s3 + $0x150] sm:$0xff] }
  0x4c   : > { %2330 = vmatprep.subr.bf16.mxu0 %v9360_v37  ;;  %2146 = vmatpush1.bf16.msra.mxu1 %v9389_v33  ;;  %v1415_v37 = vld [vmem:[%s16567_s3 + $0x340] sm:$0xff] }
  0x4e   : > { %647 = vmatmul.mubr.bf16.gmra.mrb[16].mxu0 %v454_v38  ;;  %v1419_v38 = vld [vmem:[%s16567_s3 + $0x360] sm:$0xff] }
  0x4f   : > { %656 = vmatprep.mubr.bf16.mxu0 %v11483_v2  ;;  %2331 = vmatpush1.bf16.msra.mxu0 %v9359_v39  ;;  %v1416_v39 = vld [vmem:[%s16567_s3 + $0x348] sm:$0xff]  ;;  %v9398_v40 = vcombine.high %v1415_v37, %v1419_v38 }
  0x50   : > { %2332 = vmatprep.subr.bf16.mxu0 %v9368_v6  ;;  %v9399_v43 = vcombine.low %v1416_v39, %v1420_v41  ;;  %v9400_v44 = vcombine.high %v1416_v39, %v1420_v41  ;;  %v12167_v6 = vld [vmem:[%s16567_s3 + $0x2d0] sm:$0xff] }
  0x51   : > { %2147 = vmatprep.subr.bf16.mxu1 %v9398_v40  ;;  %16911 = vst [vmem:[#allocation19_spill] sm:$0xff] %v12167_v6 }
  0x53   : > { %2333 = vmatpush1.bf16.msra.mxu0 %v9367_v5  ;;  %v11871_v5 = vld [vmem:[%s16567_s3 + $0x30] sm:$0xff] }
  0x54   : > { %2334 = vmatprep.subr.bf16.mxu0 %v9376_v16  ;;  %v11905_v16 = vld [vmem:[%s16567_s3 + $0x50] sm:$0xff] }
  0x56   : > { %657 = vmatmul.mubr.bf16.gmra.mrb[20].mxu0 %v455_v42  ;;  %v9397_v42 = vcombine.low %v1415_v37, %v1419_v38  ;;  %v11986_v37 = vld [vmem:[%s16567_s3 + $0x1b0] sm:$0xff] }
  0x57   : > { %666 = vmatprep.mubr.bf16.mxu0 %v11483_v2  ;;  %2335 = vmatpush1.bf16.msra.mxu0 %v9375_v15  ;;  %v11900_v15 = vsub.s32 1, %v11891_v12  ;;  %16898 = vst [vmem:[#allocation6_spill] sm:$0xff] %v11986_v37 }
  0x58   : > { %2336 = vmatprep.subr.bf16.mxu0 %v9384_v25  ;;  %2148 = vmatpush1.bf16.msra.mxu1 %v9397_v42  ;;  %v11946_v25 = vld [vmem:[%s16567_s3 + $0x130] sm:$0xff] }
  0x59   : > { %16896 = vst [vmem:[#allocation4_spill] sm:$0xff] %v11900_v15  ;;  %v11936_v23 = vrot.slane %v482_v14, %v11900_v15  ;;  %v12075_v14 = vld [vmem:[%s16567_s3 + $0x138] sm:$0xff] }
  0x5b   : > { %2337 = vmatpush1.bf16.msra.mxu0 %v9383_v24  ;;  %v11941_v24 = vld [vmem:[%s16567_s3 + $0x110] sm:$0xff] }
  0x5c   : > { %2338 = vmatprep.subr.bf16.mxu0 %v9392_v35 }
  0x5e   : > { %667 = vmatmul.mubr.bf16.gmra.mrb[24].mxu0 %v456_v45  ;;  %v446_v45 = vld [vmem:[%s11611_s25 + $0xe0] sm:$0xff] }
  0x5f   : > { %676 = vmatprep.mubr.bf16.mxu0 %v11483_v2  ;;  %2339 = vmatpush1.bf16.msra.mxu0 %v9391_v34  ;;  %v464_v55 = vpack.c.bf16 %v447_v46, %v446_v45 }
  0x60   : > { %2340 = vmatprep.subr.bf16.mxu0 %v9400_v44  ;;  %v12005_v44 = vld [vmem:[%s16567_s3 + $0xb8] sm:$0xff] }
  0x63   : > { %2341 = vmatpush1.bf16.msra.mxu0 %v9399_v43  ;;  %v12000_v43 = vld [vmem:[%s16567_s3 + $0x98] sm:$0xff] }
  0x66   : > { %677 = vmatmul.mubr.bf16.gmra.mrb[28].mxu0 %v457_v48  ;;  %v1427_v48 = vld [vmem:[%s16567_s3 + $0x3a0] sm:$0xff] }
  0x67   : > { %686 = vmatprep.mubr.bf16.mxu0 %v11483_v2  ;;  %v9406_v50 = vcombine.high %v1423_v47, %v1427_v48  ;;  %v9405_v52 = vcombine.low %v1423_v47, %v1427_v48  ;;  %v12101_v47 = vld [vmem:[%s16567_s3 + $0x158] sm:$0xff] }
  0x68   : > { %16905 = vst [vmem:[#allocation13_spill] sm:$0xff] %v12101_v47 }
  0x69   : > { %2149 = vmatprep.subr.bf16.mxu1 %v9406_v50  ;;  %v12019_v50 = vld [vmem:[%s16567_s3 + $0x1d0] sm:$0xff] }
  0x6a   : > { %2150 = vmatpush1.bf16.msra.mxu1 %v9405_v52  ;;  %16899 = vst [vmem:[#allocation7_spill] sm:$0xff] %v12019_v50 }
  0x6e   : > { %687 = vmatmul.mubr.bf16.gmra.mrb[32].mxu0 %v458_v51  ;;  %v1428_v51 = vld [vmem:[%s16567_s3 + $0x3a8] sm:$0xff] }
  0x6f   : > { %696 = vmatprep.mubr.bf16.mxu0 %v11483_v2  ;;  %v9407_v53 = vcombine.low %v1424_v49, %v1428_v51 }
  0x76   : > { %697 = vmatmul.mubr.bf16.gmra.mrb[36].mxu0 %v459_v54  ;;  %v9408_v54 = vcombine.high %v1424_v49, %v1428_v51  ;;  %v12024_v51 = vld [vmem:[%s16567_s3 + $0x1f0] sm:$0xff] }
  0x77   : > { %706 = vmatprep.mubr.bf16.mxu0 %v11483_v2  ;;  %16900 = vst [vmem:[#allocation8_spill] sm:$0xff] %v12024_v51 }
  0x78   : > { %2342 = vmatprep.subr.bf16.mxu0 %v9408_v54 }
  0x79   : > { %2343 = vmatpush1.bf16.msra.mxu0 %v9407_v53 }
  0x7a   : > { %2344 = vmatprep.subr.bf16.mxu0 %v9416_v63  ;;  %v12055_v63 = vld [vmem:[%s16567_s3 + $0x210] sm:$0xff] }
  0x7b   : > { %16901 = vst [vmem:[#allocation9_spill] sm:$0xff] %v12055_v63 }
  0x7d   : > { %2345 = vmatpush1.bf16.msra.mxu0 %v9415_v62 }
  0x7e   : > { %707 = vmatmul.mubr.bf16.gmra.mrb[40].mxu0 %v460_v57  ;;  %v1435_v57 = vld [vmem:[%s16567_s3 + $0x3e0] sm:$0xff]  ;;  %2700 = vmatprep.subr.bf16.mxu0 %v9300_v10  ;;  %v12090_v10 = vld [vmem:[%s16567_s3 + $0x270] sm:$0xff] }
  0x7f   : > { %716 = vmatprep.mubr.bf16.mxu0 %v11483_v2  ;;  %v9414_v59 = vcombine.high %v1431_v56, %v1435_v57  ;;  %16904 = vst [vmem:[#allocation12_spill] sm:$0xff] %v12090_v10 }
  0x81   : > { %2151 = vmatprep.subr.bf16.mxu1 %v9414_v59 }
  0x86   : > { %717 = vmatmul.mubr.bf16.gmra.mrb[44].mxu0 %v461_v61  ;;  %v9413_v61 = vcombine.low %v1431_v56, %v1435_v57  ;;  %v12037_v57 = vld [vmem:[%s16567_s3 + $0xd8] sm:$0xff] }
  0x87   : > { %726 = vmatprep.mubr.bf16.mxu0 %v11483_v2 }
  0x88   : > { %2152 = vmatpush1.bf16.msra.mxu1 %v9413_v61 }
  0x8e   : > { %727 = vmatmul.mubr.bf16.gmra.mrb[48].mxu0 %v462_v17  ;;  %v11910_v17 = vld [vmem:[%s16567_s3 + $0x70] sm:$0xff] }
  0x8f   : > { %736 = vmatprep.mubr.bf16.mxu0 %v11483_v2 }
  0x96   : > { %737 = vmatmul.mubr.bf16.gmra.mrb[52].mxu0 %v463_v36  ;;  %v11981_v36 = vld [vmem:[%s16567_s3 + $0x190] sm:$0xff] }
  0x97   : > { %746 = vmatprep.mubr.bf16.mxu0 %v11483_v2  ;;  %16897 = vst [vmem:[#allocation5_spill] sm:$0xff] %v11981_v36 }
  0x9e   : > { %747 = vmatmul.mubr.bf16.gmra.mrb[56].mxu0 %v464_v55 }
  0x9f   : > { %756 = vmatprep.mubr.bf16.mxu0 %v11483_v2  ;;  %v9298_v2 = vcombine.high %v11866_v4, %v11871_v5 }
  0xa1   : > { %2507 = vmatprep.subr.bf16.mxu1 %v9298_v2 }
  0xa6   : > { %757 = vmatmul.mubr.bf16.gmra.mrb[60].mxu0 %v465_v3 }
 0x101   : > { %v608_v31 = vpop.f32.mrb[0].mxu0 }
 0x102   : > { %v11989_v38 = vadd.f32 %v608_v31, %v11918_v19  ;;  %v610_v39 = vpop.f32.mrb[1].mxu0 }
 0x103   : > { %v12008_v45 = vadd.f32 %v610_v39, %v11936_v23  ;;  %v612_v46 = vpop.f32.mrb[2].mxu0 }
 0x104   : > { %v831_v52 = vmin.f32 %v11989_v38, 0.0  ;;  %v12028_v53 = vadd.f32 %v612_v46, %v11918_v19  ;;  %v614_v54 = vpop.f32.mrb[3].mxu0  ;;  %v12110_v46 = vld [vmem:[%s16567_s3 + $0x178] sm:$0xff] }
 0x105   : > { %v832_v59 = vmin.f32 %v12008_v45, 0.0  ;;  %v12046_v60 = vadd.f32 %v614_v54, %v11936_v23  ;;  %v12085_v54 = vld [vmem:[%s16567_s3 + $0x250] sm:$0xff]  ;;  %16906 = vst [vmem:[#allocation14_spill] sm:$0xff] %v12110_v46 }
 0x106   : > { %v895_v1 = vmul.f32 16.666666, %v831_v52  ;;  %v833_v3 = vmin.f32 %v12028_v53, 0.0  ;;  %16903 = vst [vmem:[#allocation11_spill] sm:$0xff] %v12085_v54 }
 0x107   : > { %v896_v31 = vmul.f32 16.666666, %v832_v59  ;;  %v834_v39 = vmin.f32 %v12046_v60, 0.0 }
 0x108   : > { %v897_v56 = vmul.f32 16.666666, %v833_v3  ;;  %v959_v61 = vmul.f32 1.442695, %v895_v1 }
 0x109   : > { %v961_v48 = vmul.f32 1.442695, %v896_v31  ;;  %v898_v41 = vmul.f32 16.666666, %v834_v39  ;;  %v618_v42 = vpop.f32.mrb[4].mxu0  ;;  %v12156_v31 = vld [vmem:[%s16567_s3 + $0x1b8] sm:$0xff] }
 0x10a   : > { %v12113_v35 = vadd.f32 %v618_v42, %v11918_v19  ;;  %v620_v59 = vpop.f32.mrb[5].mxu0  ;;  %v963_v3 = vmul.f32 1.442695, %v897_v56  ;;  %16910 = vst [vmem:[#allocation18_spill] sm:$0xff] %v12156_v31 }
 0x10b   : > { %11344 = vpow2.f32 %v961_v48  ;;  %v965_v40 = vmul.f32 1.442695, %v898_v41  ;;  %v12120_v52 = vadd.f32 %v620_v59, %v11936_v23  ;;  %v622_v62 = vpop.f32.mrb[6].mxu0  ;;  %v12143_v59 = vld [vmem:[%s16567_s3 + $0x2b0] sm:$0xff] }
 0x10c   : > { %v835_v33 = vmin.f32 %v12113_v35, 0.0  ;;  %v12124_v1 = vadd.f32 %v622_v62, %v11918_v19  ;;  %v624_v42 = vpop.f32.mrb[7].mxu0  ;;  %v12138_v62 = vld [vmem:[%s16567_s3 + $0x290] sm:$0xff]  ;;  %16908 = vst [vmem:[#allocation16_spill] sm:$0xff] %v12143_v59 }
 0x10d   : > { %11346 = vpow2.f32 %v965_v40  ;;  %v836_v41 = vmin.f32 %v12120_v52, 0.0  ;;  %v12133_v56 = vadd.f32 %v624_v42, %v11936_v23  ;;  %16907 = vst [vmem:[#allocation15_spill] sm:$0xff] %v12138_v62  ;;  %v12151_v42 = vld [vmem:[%s16567_s3 + $0x198] sm:$0xff] }
 0x10e   : > { %11348 = vpow2.f32 %v959_v61  ;;  %v837_v2 = vmin.f32 %v12124_v1, 0.0  ;;  %16909 = vst [vmem:[#allocation17_spill] sm:$0xff] %v12151_v42  ;;  %v899_v34 = vmul.f32 16.666666, %v835_v33  ;;  %v12172_v33 = vld [vmem:[%s16567_s3 + $0x2f0] sm:$0xff] }
 0x10f   : > { %11350 = vpow2.f32 %v963_v3  ;;  %v900_v49 = vmul.f32 16.666666, %v836_v41  ;;  %v838_v61 = vmin.f32 %v12133_v56, 0.0  ;;  %16912 = vst [vmem:[#allocation20_spill] sm:$0xff] %v12172_v33  ;;  %v12187_v3 = vld [vmem:[%s16567_s3 + $0x1d8] sm:$0xff] }
 0x110   : > { %v901_v55 = vmul.f32 16.666666, %v837_v2  ;;  %16913 = vst [vmem:[#allocation21_spill] sm:$0xff] %v12187_v3 }
 0x111   : > { %v902_v41 = vmul.f32 16.666666, %v838_v61  ;;  %v628_v40 = vpop.f32.mrb[8].mxu0  ;;  %v969_v9 = vmul.f32 1.442695, %v900_v49  ;;  %v12192_v61 = vld [vmem:[%s16567_s3 + $0x1f8] sm:$0xff] }
 0x112   : > { %v12180_v27 = vadd.f32 %v628_v40, %v11918_v19  ;;  %v630_v39 = vpop.f32.mrb[9].mxu0  ;;  %16914 = vst [vmem:[#allocation22_spill] sm:$0xff] %v12192_v61  ;;  %v967_v49 = vmul.f32 1.442695, %v899_v34  ;;  %v971_v2 = vmul.f32 1.442695, %v901_v55 }
 0x113   : > { %v12196_v40 = vadd.f32 %v630_v39, %v11936_v23  ;;  %v632_v48 = vpop.f32.mrb[10].mxu0  ;;  %v973_v10 = vmul.f32 1.442695, %v902_v41  ;;  %11352 = vpow2.f32 %v969_v9 }
 0x114   : > { %v839_v13 = vmin.f32 %v12180_v27, 0.0  ;;  %v12202_v12 = vadd.f32 %v632_v48, %v11918_v19  ;;  %v634_v59 = vpop.f32.mrb[11].mxu0  ;;  %11354 = vpow2.f32 %v967_v49 }
 0x115   : > { %v11345_v34 = vpop.eup %11344  ;;  %v840_v32 = vmin.f32 %v12196_v40, 0.0  ;;  %v12208_v39 = vadd.f32 %v634_v59, %v11936_v23  ;;  %11356 = vpow2.f32 %v971_v2 }
 0x116   : > { %v903_v55 = vmul.f32 16.666666, %v839_v13  ;;  %v841_v54 = vmin.f32 %v12202_v12, 0.0  ;;  %v9230_v33 = vadd.f32 -1.0, %v11345_v34  ;;  %11358 = vpow2.f32 %v973_v10 }
 0x117   : > { %v11347_v0 = vpop.eup %11346  ;;  %v904_v62 = vmul.f32 16.666666, %v840_v32  ;;  %v842_v41 = vmin.f32 %v12208_v39, 0.0 }
 0x118   : > { %v11349_v6 = vpop.eup %11348  ;;  %v905_v63 = vmul.f32 16.666666, %v841_v54  ;;  %v9232_v51 = vadd.f32 -1.0, %v11347_v0  ;;  %v975_v9 = vmul.f32 1.442695, %v903_v55 }
 0x119   : > { %v11351_v15 = vpop.eup %11350  ;;  %v906_v50 = vmul.f32 16.666666, %v842_v41  ;;  %v638_v31 = vpop.f32.mrb[12].mxu0  ;;  %v977_v48 = vmul.f32 1.442695, %v904_v62  ;;  %v9229_v55 = vadd.f32 -1.0, %v11349_v6 }
 0x11a   : > { %v12221_v34 = vadd.f32 %v638_v31, %v11918_v19  ;;  %v640_v2 = vpop.f32.mrb[13].mxu0  ;;  %v1152_v54 = vmul.f32 0.06, %v9230_v33  ;;  %v1154_v10 = vmul.f32 0.06, %v9232_v51  ;;  %v9231_v13 = vadd.f32 -1.0, %v11351_v15 }
 0x11b   : > { %v12224_v59 = vadd.f32 %v640_v2, %v11936_v23  ;;  %v642_v0 = vpop.f32.mrb[14].mxu0  ;;  %v979_v61 = vmul.f32 1.442695, %v905_v63  ;;  %11360 = vpow2.f32 %v975_v9  ;;  %v981_v32 = vmul.f32 1.442695, %v906_v50 }
 0x11c   : > { %16915 = vst [vmem:[#allocation23_spill] sm:$0xff] %v12221_v34  ;;  %v843_v41 = vmin.f32 %v12221_v34, 0.0  ;;  %v12228_v62 = vadd.f32 %v642_v0, %v11918_v19  ;;  %v644_v49 = vpop.f32.mrb[15].mxu0  ;;  %11362 = vpow2.f32 %v977_v48  ;;  %v16916_v0 = vmax.f32 %v12008_v45, 0.0 }
 0x11d   : > { %v844_v31 = vmin.f32 %v12224_v59, 0.0  ;;  %v12232_v3 = vadd.f32 %v644_v49, %v11936_v23  ;;  %v16917_v15 = vmax.f32 %v12046_v60, 0.0  ;;  %v11353_v9 = vpop.eup %11352  ;;  %11364 = vpow2.f32 %v979_v61 }
 0x11e   : > { %v907_v51 = vmul.f32 16.666666, %v843_v41  ;;  %v845_v6 = vmin.f32 %v12228_v62, 0.0  ;;  %v1216_v42 = vadd.f32 %v1152_v54, %v16916_v0  ;;  %v1151_v36 = vmul.f32 0.06, %v9229_v55  ;;  %v11355_v48 = vpop.eup %11354 }
 0x11f   : > { %v908_v63 = vmul.f32 16.666666, %v844_v31  ;;  %v846_v2 = vmin.f32 %v12232_v3, 0.0  ;;  %v1218_v50 = vadd.f32 %v1154_v10, %v16917_v15  ;;  %11366 = vpow2.f32 %v981_v32  ;;  %v11357_v46 = vpop.eup %11356 }
 0x120   : > { %v983_v37 = vmul.f32 1.442695, %v907_v51  ;;  %v909_v49 = vmul.f32 16.666666, %v845_v6  ;;  %v1153_v54 = vmul.f32 0.06, %v9231_v13  ;;  %v11359_v10 = vpop.eup %11358 }
 0x121   : > { %v985_v33 = vmul.f32 1.442695, %v908_v63  ;;  %v910_v41 = vmul.f32 16.666666, %v846_v2  ;;  %v12241_v34 = vpack.c.bf16 %v1218_v50, %v1216_v42  ;;  %v648_v31 = vpop.f32.mrb[16].mxu0  ;;  %v9234_v6 = vadd.f32 -1.0, %v11353_v9 }
 0x122   : > { %v12246_v60 = vadd.f32 %v648_v31, %v11918_v19  ;;  %v650_v61 = vpop.f32.mrb[17].mxu0  ;;  %v987_v51 = vmul.f32 1.442695, %v909_v49  ;;  %11368 = vpow2.f32 %v983_v37  ;;  %v16918_v2 = vmax.f32 %v11989_v38, 0.0  ;;  %v12262_v49 = vld [vmem:[%s16567_s3 + $0x310] sm:$0xff] }
 0x123   : > { %2153 = vmatprep.mubr.bf16.mxu1 %v12241_v34  ;;  %2346 = vmatprep.mubr.bf16.mxu0 %v12241_v34  ;;  %v12252_v42 = vadd.f32 %v650_v61, %v11936_v23  ;;  %v652_v32 = vpop.f32.mrb[18].mxu0  ;;  %v16919_v0 = vmax.f32 %v12028_v53, 0.0  ;;  %v12267_v31 = vld [vmem:[%s16567_s3 + $0x330] sm:$0xff]  ;;  %11370 = vpow2.f32 %v985_v33  ;;  %v989_v37 = vmul.f32 1.442695, %v910_v41 }
 0x124   : > { %v847_v63 = vmin.f32 %v12246_v60, 0.0  ;;  %v1215_v13 = vadd.f32 %v1151_v36, %v16918_v2  ;;  %v654_v50 = vpop.f32.mrb[19].mxu0  ;;  %v12271_v36 = vadd.f32 %v652_v32, %v11918_v19  ;;  %v9236_v61 = vadd.f32 -1.0, %v11359_v10 }
 0x125   : > { %v1217_v15 = vadd.f32 %v1153_v54, %v16919_v0  ;;  %v848_v9 = vmin.f32 %v12252_v42, 0.0  ;;  %v12276_v54 = vadd.f32 %v654_v50, %v11936_v23  ;;  %v12278_v2 = vpop.eup %11360  ;;  %11372 = vpow2.f32 %v987_v51 }
 0x126   : > { %v911_v38 = vmul.f32 16.666666, %v847_v63  ;;  %v849_v0 = vmin.f32 %v12271_v36, 0.0  ;;  %v1156_v45 = vmul.f32 0.06, %v9234_v6  ;;  %v11363_v41 = vpop.eup %11362  ;;  %11374 = vpow2.f32 %v989_v37 }
 0x127   : > { %v12273_v53 = vpack.c.bf16 %v1217_v15, %v1215_v13  ;;  %v912_v63 = vmul.f32 16.666666, %v848_v9  ;;  %v850_v13 = vmin.f32 %v12276_v54, 0.0  ;;  %v1158_v10 = vmul.f32 0.06, %v9236_v61  ;;  %v12293_v55 = vpop.eup %11364 }
 0x128   : > { %v991_v15 = vmul.f32 1.442695, %v911_v38  ;;  %v16921_v51 = vcombine.low %v11866_v4, %v11871_v5  ;;  %v913_v6 = vmul.f32 16.666666, %v849_v0  ;;  %v9233_v33 = vadd.f32 -1.0, %v11355_v48 }
 0x129   : > { %16920 = vst [vmem:[#allocation24_spill] sm:$0xff] %v12273_v53  ;;  %2154 = vmatmul.mubr.bf16.vlgmr.msra.gmra.mrb[0].mxu1 %v12273_v53  ;;  %2347 = vmatmul.mubr.bf16.vlgmr.msra.gmra.mrb[64].mxu0 %v12273_v53  ;;  %v658_v50 = vpop.f32.mrb[20].mxu0  ;;  %v16922_v32 = vcombine.low %v11880_v7, %v11885_v8  ;;  %v914_v47 = vmul.f32 16.666666, %v850_v13  ;;  %v16923_v9 = vmax.f32 %v12120_v52, 0.0  ;;  %v16924_v37 = vmax.f32 %v12133_v56, 0.0  ;;  %v11367_v8 = vpop.eup %11366 }
 0x12a   : > { %2508 = vmatpush1.bf16.msra.mxu1 %v16921_v51  ;;  %v16925_v4 = vcombine.high %v11905_v16, %v11910_v17  ;;  %v12303_v5 = vadd.f32 %v658_v50, %v11918_v19  ;;  %v660_v48 = vpop.f32.mrb[21].mxu0  ;;  %v16926_v7 = vcombine.high %v11963_v29, %v11968_v30  ;;  %v784_v61 = vmax.f32 %v12252_v42, 0.0 }
 0x12b   : > { %2701 = vmatpush1.bf16.msra.mxu0 %v16922_v32  ;;  %v1220_v53 = vadd.f32 %v1156_v45, %v16923_v9  ;;  %v1222_v38 = vadd.f32 %v1158_v10, %v16924_v37  ;;  %v785_v52 = vmax.f32 %v12271_v36, 0.0  ;;  %v9235_v45 = vadd.f32 -1.0, %v11357_v46  ;;  %v662_v0 = vpop.f32.mrb[22].mxu0 }
 0x12c   : > { %2509 = vmatprep.subr.bf16.mxu1 %v16925_v4  ;;  %2702 = vmatprep.subr.bf16.mxu0 %v16926_v7  ;;  %v1155_v56 = vmul.f32 0.06, %v9233_v33  ;;  %v993_v32 = vmul.f32 1.442695, %v912_v63  ;;  %v786_v13 = vmax.f32 %v12276_v54, 0.0  ;;  %v851_v51 = vmin.f32 %v12303_v5, 0.0  ;;  %v12323_v33 = vpop.eup %11368 }
 0x12d   : > { %v12311_v10 = vpack.c.bf16 %v1222_v38, %v1220_v53  ;;  %v664_v50 = vpop.f32.mrb[23].mxu0  ;;  %11376 = vpow2.f32 %v991_v15  ;;  %v995_v9 = vmul.f32 1.442695, %v913_v6  ;;  %v1157_v37 = vmul.f32 0.06, %v9235_v45  ;;  %v16974_v54 = vld [vmem:[#allocation9_spill] sm:$0xff] }
 0x12e   : > { %v16927_v4 = vcombine.low %v11905_v16, %v11910_v17  ;;  %v12318_v7 = vadd.f32 %v660_v48, %v11936_v23  ;;  %v16928_v46 = vcombine.low %v11963_v29, %v11968_v30  ;;  %v997_v53 = vmul.f32 1.442695, %v914_v47  ;;  %v12333_v17 = vpop.eup %11370 }
 0x12f   : > { %2163 = vmatprep.mubr.bf16.mxu1 %v12311_v10  ;;  %2356 = vmatprep.mubr.bf16.mxu0 %v12311_v10  ;;  %v915_v63 = vmul.f32 16.666666, %v851_v51  ;;  %v12328_v15 = vadd.f32 %v662_v0, %v11918_v19  ;;  %v12331_v16 = vadd.f32 %v664_v50, %v11936_v23  ;;  %v16929_v6 = vmax.f32 %v12113_v35, 0.0 }
 0x130   : > { %2510 = vmatpush1.bf16.msra.mxu1 %v16927_v4  ;;  %2703 = vmatpush1.bf16.msra.mxu0 %v16928_v46  ;;  %v16930_v30 = vmax.f32 %v12124_v1, 0.0  ;;  %v852_v47 = vmin.f32 %v12318_v7, 0.0  ;;  %v9238_v48 = vadd.f32 -1.0, %v11363_v41  ;;  %v16931_v45 = vcombine.high %v11915_v18, %v11923_v20 }
 0x131   : > { %v1219_v29 = vadd.f32 %v1155_v56, %v16929_v6  ;;  %v16932_v0 = vcombine.high %v12000_v43, %v12005_v44  ;;  %11378 = vpow2.f32 %v993_v32  ;;  %v787_v51 = vmax.f32 %v12303_v5, 0.0  ;;  %v12348_v56 = vpop.eup %11372  ;;  %v668_v46 = vpop.f32.mrb[24].mxu0 }
 0x132   : > { %v1221_v38 = vadd.f32 %v1157_v37, %v16930_v30  ;;  %2511 = vmatprep.subr.bf16.mxu1 %v16931_v45  ;;  %v999_v50 = vmul.f32 1.442695, %v915_v63  ;;  %v853_v35 = vmin.f32 %v12328_v15, 0.0  ;;  %v916_v37 = vmul.f32 16.666666, %v852_v47 }
 0x133   : > { %2704 = vmatprep.subr.bf16.mxu0 %v16932_v0  ;;  %v854_v41 = vmin.f32 %v12331_v16, 0.0  ;;  %v9240_v4 = vadd.f32 -1.0, %v11367_v8  ;;  %v16933_v6 = vcombine.low %v11915_v18, %v11923_v20  ;;  %v16934_v32 = vcombine.low %v12000_v43, %v12005_v44  ;;  %v11375_v18 = vpop.eup %11374 }
 0x134   : > { %v12350_v1 = vpack.c.bf16 %v1221_v38, %v1219_v29  ;;  %11380 = vpow2.f32 %v995_v9  ;;  %v917_v63 = vmul.f32 16.666666, %v853_v35  ;;  %v1160_v30 = vmul.f32 0.06, %v9238_v48  ;;  %v670_v29 = vpop.f32.mrb[25].mxu0 }
 0x135   : > { %2512 = vmatpush1.bf16.msra.mxu1 %v16933_v6  ;;  %2705 = vmatpush1.bf16.msra.mxu0 %v16934_v32  ;;  %v12360_v45 = vadd.f32 %v668_v46, %v11918_v19  ;;  %v16935_v38 = vcombine.high %v11928_v21, %v11933_v22  ;;  %v16936_v8 = vcombine.high %v12037_v57, %v12042_v58  ;;  %11382 = vpow2.f32 %v997_v53  ;;  %v672_v35 = vpop.f32.mrb[26].mxu0 }
 0x136   : > { %2164 = vmatmul.mubr.bf16.gmra.mrb[4].mxu1 %v12350_v1  ;;  %2357 = vmatmul.mubr.bf16.gmra.mrb[68].mxu0 %v12350_v1  ;;  %v918_v20 = vmul.f32 16.666666, %v854_v41  ;;  %v1162_v43 = vmul.f32 0.06, %v9240_v4  ;;  %v12371_v44 = vadd.f32 %v670_v29, %v11936_v23  ;;  %v788_v9 = vmax.f32 %v12318_v7, 0.0  ;;  %v674_v29 = vpop.f32.mrb[27].mxu0 }
 0x137   : > { %2513 = vmatprep.subr.bf16.mxu1 %v16935_v38  ;;  %2706 = vmatprep.subr.bf16.mxu0 %v16936_v8  ;;  %v790_v48 = vmax.f32 %v12331_v16, 0.0  ;;  %v855_v0 = vmin.f32 %v12360_v45, 0.0  ;;  %v1001_v46 = vmul.f32 1.442695, %v916_v37  ;;  %v16937_v53 = vmax.f32 %v12196_v40, 0.0 }
 0x138   : > { %v16938_v32 = vmax.f32 %v12208_v39, 0.0  ;;  %v9237_v4 = vadd.f32 -1.0, %v12278_v2  ;;  %v16939_v38 = vcombine.low %v11928_v21, %v11933_v22  ;;  %v16940_v8 = vcombine.low %v12037_v57, %v12042_v58 }
 0x139   : > { %v1224_v6 = vadd.f32 %v1160_v30, %v16937_v53  ;;  %11384 = vpow2.f32 %v999_v50  ;;  %v1003_v47 = vmul.f32 1.442695, %v917_v63  ;;  %v919_v37 = vmul.f32 16.666666, %v855_v0  ;;  %v12395_v30 = vpop.eup %11376 }
 0x13a   : > { %v1226_v41 = vadd.f32 %v1162_v43, %v16938_v32  ;;  %2514 = vmatpush1.bf16.msra.mxu1 %v16939_v38  ;;  %2707 = vmatpush1.bf16.msra.mxu0 %v16940_v8  ;;  %v9239_v40 = vadd.f32 -1.0, %v12293_v55  ;;  %v16941_v39 = vcombine.high %v11941_v24, %v11946_v25  ;;  %v16942_v2 = vcombine.high %v12070_v11, %v12075_v14 }
 0x13b   : > { %v1005_v21 = vmul.f32 1.442695, %v918_v20  ;;  %v1159_v57 = vmul.f32 0.06, %v9237_v4  ;;  %v856_v58 = vmin.f32 %v12371_v44, 0.0  ;;  %v12401_v55 = vadd.f32 %v672_v35, %v11918_v19  ;;  %v11379_v32 = vpop.eup %11378 }
 0x13c   : > { %2515 = vmatprep.subr.bf16.mxu1 %v16941_v39  ;;  %2708 = vmatprep.subr.bf16.mxu0 %v16942_v2  ;;  %v12397_v22 = vpack.c.bf16 %v1226_v41, %v1224_v6  ;;  %v1007_v50 = vmul.f32 1.442695, %v919_v37  ;;  %v1161_v63 = vmul.f32 0.06, %v9239_v40  ;;  %v12404_v43 = vadd.f32 %v674_v29, %v11936_v23  ;;  %v678_v6 = vpop.f32.mrb[28].mxu0  ;;  %v16948_v37 = vld [vmem:[#allocation13_spill] sm:$0xff] }
 0x13d   : > { %11386 = vpow2.f32 %v1001_v46  ;;  %v920_v0 = vmul.f32 16.666666, %v856_v58  ;;  %v9242_v20 = vadd.f32 -1.0, %v12333_v17  ;;  %v9244_v53 = vadd.f32 -1.0, %v11375_v18  ;;  %v680_v46 = vpop.f32.mrb[29].mxu0  ;;  %v16949_v40 = vld [vmem:[#allocation14_spill] sm:$0xff] }
 0x13e   : > { %2173 = vmatprep.mubr.bf16.mxu1 %v12397_v22  ;;  %2366 = vmatprep.mubr.bf16.mxu0 %v12397_v22  ;;  %11388 = vpow2.f32 %v1003_v47  ;;  %v16943_v41 = vmax.f32 %v12180_v27, 0.0  ;;  %v16944_v35 = vmax.f32 %v12202_v12, 0.0  ;;  %v857_v29 = vmin.f32 %v12401_v55, 0.0 }
 0x13f   : > { %v16945_v8 = vcombine.low %v11941_v24, %v11946_v25  ;;  %v16946_v17 = vcombine.low %v12070_v11, %v12075_v14  ;;  %11390 = vpow2.f32 %v1005_v21  ;;  %v858_v27 = vmin.f32 %v12404_v43, 0.0  ;;  %v12428_v24 = vpop.eup %11380  ;;  %v682_v21 = vpop.f32.mrb[30].mxu0 }
 0x140   : > { %v1223_v4 = vadd.f32 %v1159_v57, %v16943_v41  ;;  %v1225_v38 = vadd.f32 %v1161_v63, %v16944_v35  ;;  %v1164_v47 = vmul.f32 0.06, %v9242_v20  ;;  %v16947_v12 = vcombine.high %v11951_v26, %v11958_v28  ;;  %v11383_v57 = vpop.eup %11382  ;;  %v684_v41 = vpop.f32.mrb[31].mxu0 }
 0x141   : > { %2516 = vmatpush1.bf16.msra.mxu1 %v16945_v8  ;;  %2709 = vmatpush1.bf16.msra.mxu0 %v16946_v17  ;;  %v16950_v39 = vcombine.high %v16948_v37, %v16949_v40  ;;  %v921_v11 = vmul.f32 16.666666, %v857_v29  ;;  %v1166_v14 = vmul.f32 0.06, %v9244_v53  ;;  %v12433_v2 = vadd.f32 %v678_v6, %v11918_v19 }
 0x142   : > { %2517 = vmatprep.subr.bf16.mxu1 %v16947_v12  ;;  %v12430_v25 = vpack.c.bf16 %v1225_v38, %v1223_v4  ;;  %11392 = vpow2.f32 %v1007_v50  ;;  %v1009_v63 = vmul.f32 1.442695, %v920_v0  ;;  %v9241_v20 = vadd.f32 -1.0, %v12323_v33 }
 0x143   : > { %2710 = vmatprep.subr.bf16.mxu0 %v16950_v39  ;;  %v922_v4 = vmul.f32 16.666666, %v858_v27  ;;  %v16951_v35 = vmax.f32 %v12224_v59, 0.0  ;;  %v16952_v6 = vmax.f32 %v12232_v3, 0.0  ;;  %v859_v29 = vmin.f32 %v12433_v2, 0.0  ;;  %v12455_v3 = vpop.eup %11384  ;;  %v16955_v39 = vld [vmem:[#allocation5_spill] sm:$0xff] }
 0x144   : > { %2174 = vmatmul.mubr.bf16.gmra.mrb[8].mxu1 %v12430_v25  ;;  %2367 = vmatmul.mubr.bf16.gmra.mrb[72].mxu0 %v12430_v25  ;;  %v9243_v0 = vadd.f32 -1.0, %v12348_v56  ;;  %v1163_v8 = vmul.f32 0.06, %v9241_v20  ;;  %v12447_v33 = vadd.f32 %v680_v46, %v11936_v23  ;;  %v16953_v17 = vcombine.low %v11951_v26, %v11958_v28  ;;  %v16956_v46 = vld [vmem:[#allocation6_spill] sm:$0xff]  ;;  %v16958_v20 = vld [vmem:[#allocation17_spill] sm:$0xff] }
 0x145   : > { %v1228_v53 = vadd.f32 %v1164_v47, %v16951_v35  ;;  %v1230_v38 = vadd.f32 %v1166_v14, %v16952_v6  ;;  %v16954_v59 = vcombine.low %v16948_v37, %v16949_v40  ;;  %v1011_v27 = vmul.f32 1.442695, %v921_v11  ;;  %v16959_v26 = vld [vmem:[#allocation18_spill] sm:$0xff]  ;;  %v688_v35 = vpop.f32.mrb[32].mxu0  ;;  %v16969_v37 = vld [vmem:[#allocation21_spill] sm:$0xff] }
 0x146   : > { %2518 = vmatpush1.bf16.msra.mxu1 %v16953_v17  ;;  %v923_v12 = vmul.f32 16.666666, %v859_v29  ;;  %v12460_v56 = vadd.f32 %v682_v21, %v11918_v19  ;;  %v16957_v14 = vcombine.high %v16955_v39, %v16956_v46  ;;  %v16960_v28 = vcombine.high %v16958_v20, %v16959_v26  ;;  %v16961_v21 = vld [vmem:[#allocation23_spill] sm:$0xff] }
 0x147   : > { %2711 = vmatpush1.bf16.msra.mxu0 %v16954_v59  ;;  %v12457_v47 = vpack.c.bf16 %v1230_v38, %v1228_v53  ;;  %11394 = vpow2.f32 %v1009_v63  ;;  %v1165_v11 = vmul.f32 0.06, %v9243_v0  ;;  %v1013_v53 = vmul.f32 1.442695, %v922_v4  ;;  %v690_v59 = vpop.f32.mrb[33].mxu0  ;;  %v11387_v63 = vpop.eup %11386 }
 0x148   : > { %2519 = vmatprep.subr.bf16.mxu1 %v16957_v14  ;;  %2712 = vmatprep.subr.bf16.mxu0 %v16960_v28  ;;  %v16962_v6 = vmax.f32 %v16961_v21, 0.0  ;;  %v860_v29 = vmin.f32 %v12447_v33, 0.0  ;;  %v861_v17 = vmin.f32 %v12460_v56, 0.0  ;;  %v16963_v14 = vmax.f32 %v12228_v62, 0.0  ;;  %v692_v50 = vpop.f32.mrb[34].mxu0  ;;  %v12487_v21 = vpop.eup %11388 }
 0x149   : > { %2183 = vmatprep.mubr.bf16.mxu1 %v12457_v47  ;;  %2376 = vmatprep.mubr.bf16.mxu0 %v12457_v47  ;;  %v12479_v0 = vadd.f32 %v684_v41, %v11936_v23  ;;  %v9246_v4 = vadd.f32 -1.0, %v11379_v32  ;;  %v9248_v40 = vadd.f32 -1.0, %v11383_v57  ;;  %v16964_v18 = vcombine.low %v16955_v39, %v16956_v46  ;;  %v694_v41 = vpop.f32.mrb[35].mxu0  ;;  %v16966_v32 = vld [vmem:[#allocation7_spill] sm:$0xff]  ;;  %v16967_v57 = vld [vmem:[#allocation8_spill] sm:$0xff]  ;;  %v16970_v39 = vld [vmem:[#allocation22_spill] sm:$0xff]  ;;  %v11391_v46 = vpop.eup %11390 }
 0x14a   : > { %v1227_v38 = vadd.f32 %v1163_v8, %v16962_v6  ;;  %v1229_v28 = vadd.f32 %v1165_v11, %v16963_v14  ;;  %v16965_v8 = vcombine.low %v16958_v20, %v16959_v26  ;;  %11396 = vpow2.f32 %v1011_v27 }
 0x14b   : > { %2520 = vmatpush1.bf16.msra.mxu1 %v16964_v18  ;;  %v1015_v6 = vmul.f32 1.442695, %v923_v12  ;;  %v924_v62 = vmul.f32 16.666666, %v860_v29  ;;  %v12490_v11 = vadd.f32 %v688_v35, %v11918_v19  ;;  %v16968_v14 = vcombine.high %v16966_v32, %v16967_v57 }
 0x14c   : > { %2713 = vmatpush1.bf16.msra.mxu0 %v16965_v8  ;;  %v16971_v18 = vcombine.high %v16969_v37, %v16970_v39  ;;  %v12498_v20 = vpack.c.bf16 %v1229_v28, %v1227_v38  ;;  %v925_v26 = vmul.f32 16.666666, %v861_v17  ;;  %v862_v27 = vmin.f32 %v12479_v0, 0.0  ;;  %v12505_v58 = vpop.eup %11392 }
 0x14d   : > { %2521 = vmatprep.subr.bf16.mxu1 %v16968_v14  ;;  %v1168_v12 = vmul.f32 0.06, %v9246_v4  ;;  %11398 = vpow2.f32 %v1013_v53  ;;  %v1170_v29 = vmul.f32 0.06, %v9248_v40  ;;  %v12503_v8 = vadd.f32 %v690_v59, %v11936_v23 }
 0x14e   : > { %2714 = vmatprep.subr.bf16.mxu0 %v16971_v18  ;;  %2184 = vmatmul.mubr.bf16.gmra.mrb[12].mxu1 %v12498_v20  ;;  %v1017_v14 = vmul.f32 1.442695, %v924_v62  ;;  %v926_v17 = vmul.f32 16.666666, %v862_v27  ;;  %v863_v28 = vmin.f32 %v12490_v11, 0.0  ;;  %v9245_v59 = vadd.f32 -1.0, %v12395_v30 }
 0x14f   : > { %2377 = vmatmul.mubr.bf16.gmra.mrb[76].mxu0 %v12498_v20  ;;  %v1232_v53 = vadd.f32 %v1168_v12, %v784_v61  ;;  %v1234_v40 = vadd.f32 %v1170_v29, %v786_v13  ;;  %v9247_v4 = vadd.f32 -1.0, %v12428_v24  ;;  %v16972_v18 = vcombine.low %v16966_v32, %v16967_v57  ;;  %v698_v12 = vpop.f32.mrb[36].mxu0  ;;  %v16975_v13 = vld [vmem:[#allocation10_spill] sm:$0xff] }
 0x150   : > { %v16973_v62 = vcombine.low %v16969_v37, %v16970_v39  ;;  %11400 = vpow2.f32 %v1015_v6  ;;  %v1019_v27 = vmul.f32 1.442695, %v925_v26  ;;  %v927_v61 = vmul.f32 16.666666, %v863_v28  ;;  %v700_v57 = vpop.f32.mrb[37].mxu0 }
 0x151   : > { %2522 = vmatpush1.bf16.msra.mxu1 %v16972_v18  ;;  %v16976_v29 = vcombine.high %v16974_v54, %v16975_v13  ;;  %v12527_v30 = vpack.c.bf16 %v1234_v40, %v1232_v53  ;;  %v1167_v24 = vmul.f32 0.06, %v9245_v59  ;;  %v1169_v38 = vmul.f32 0.06, %v9247_v4  ;;  %v12530_v18 = vpop.eup %11394  ;;  %v702_v28 = vpop.f32.mrb[38].mxu0 }
 0x152   : > { %2715 = vmatpush1.bf16.msra.mxu0 %v16973_v62  ;;  %v864_v32 = vmin.f32 %v12503_v8, 0.0  ;;  %v1021_v37 = vmul.f32 1.442695, %v926_v17  ;;  %v12534_v39 = vadd.f32 %v692_v50, %v11918_v19  ;;  %v12537_v26 = vadd.f32 %v694_v41, %v11936_v23  ;;  %v704_v4 = vpop.f32.mrb[39].mxu0 }
 0x153   : > { %2523 = vmatprep.subr.bf16.mxu1 %v16976_v29  ;;  %11402 = vpow2.f32 %v1017_v14  ;;  %2193 = vmatprep.mubr.bf16.mxu1 %v12527_v30  ;;  %v16977_v53 = vmax.f32 %v12246_v60, 0.0  ;;  %v1233_v17 = vadd.f32 %v1169_v38, %v785_v52  ;;  %v9250_v59 = vadd.f32 -1.0, %v11387_v63  ;;  %v16979_v63 = vld [vmem:[#allocation11_spill] sm:$0xff]  ;;  %v16980_v38 = vld [vmem:[#allocation12_spill] sm:$0xff] }
 0x154   : > { %2386 = vmatprep.mubr.bf16.mxu0 %v12527_v30  ;;  %11404 = vpow2.f32 %v1019_v27  ;;  %v1023_v50 = vmul.f32 1.442695, %v927_v61  ;;  %v928_v62 = vmul.f32 16.666666, %v864_v32  ;;  %v865_v41 = vmin.f32 %v12534_v39, 0.0  ;;  %v12549_v29 = vpop.eup %11396  ;;  %v16983_v32 = vld [vmem:[#allocation15_spill] sm:$0xff] }
 0x155   : > { %v1231_v40 = vadd.f32 %v1167_v24, %v16977_v53  ;;  %v16978_v14 = vcombine.low %v16974_v54, %v16975_v13  ;;  %v866_v36 = vmin.f32 %v12537_v26, 0.0  ;;  %v9252_v52 = vadd.f32 -1.0, %v11391_v46 }
 0x156   : > { %v16981_v27 = vcombine.high %v16979_v63, %v16980_v38  ;;  %11406 = vpow2.f32 %v1021_v37  ;;  %v1172_v61 = vmul.f32 0.06, %v9250_v59  ;;  %v12559_v24 = vadd.f32 %v698_v12, %v11918_v19  ;;  %v708_v12 = vpop.f32.mrb[40].mxu0 }
 0x157   : > { %2524 = vmatpush1.bf16.msra.mxu1 %v16978_v14  ;;  %v12551_v6 = vpack.c.bf16 %v1233_v17, %v1231_v40  ;;  %v9249_v54 = vadd.f32 -1.0, %v12455_v3  ;;  %v11399_v13 = vpop.eup %11398  ;;  %v929_v53 = vmul.f32 16.666666, %v865_v41  ;;  %v1174_v46 = vmul.f32 0.06, %v9252_v52 }
 0x158   : > { %2525 = vmatprep.subr.bf16.mxu1 %v16981_v27  ;;  %v9251_v40 = vadd.f32 -1.0, %v12487_v21  ;;  %11408 = vpow2.f32 %v1023_v50  ;;  %v1025_v17 = vmul.f32 1.442695, %v928_v62  ;;  %v930_v37 = vmul.f32 16.666666, %v866_v36  ;;  %v16984_v21 = vld [vmem:[#allocation16_spill] sm:$0xff] }
 0x159   : > { %2194 = vmatmul.mubr.bf16.gmra.mrb[16].mxu1 %v12551_v6  ;;  %2387 = vmatmul.mubr.bf16.gmra.mrb[80].mxu0 %v12551_v6  ;;  %v867_v59 = vmin.f32 %v12559_v24, 0.0  ;;  %v16982_v3 = vcombine.low %v16979_v63, %v16980_v38  ;;  %v1236_v14 = vadd.f32 %v1172_v61, %v788_v9  ;;  %v1238_v27 = vadd.f32 %v1174_v46, %v790_v48  ;;  %v710_v9 = vpop.f32.mrb[41].mxu0 }
 0x15a   : > { %v1171_v41 = vmul.f32 0.06, %v9249_v54  ;;  %v1173_v52 = vmul.f32 0.06, %v9251_v40  ;;  %v16985_v50 = vcombine.high %v16983_v32, %v16984_v21  ;;  %v12577_v62 = vpop.eup %11400  ;;  %v12581_v63 = vadd.f32 %v700_v57, %v11936_v23  ;;  %v712_v46 = vpop.f32.mrb[42].mxu0 }
 0x15b   : > { %2526 = vmatpush1.bf16.msra.mxu1 %v16982_v3  ;;  %v931_v60 = vmul.f32 16.666666, %v867_v59  ;;  %v12584_v7 = vadd.f32 %v702_v28, %v11918_v19  ;;  %v1027_v16 = vmul.f32 1.442695, %v929_v53  ;;  %v12586_v48 = vpack.c.bf16 %v1238_v27, %v1236_v14  ;;  %v714_v3 = vpop.f32.mrb[43].mxu0 }
 0x15c   : > { %2527 = vmatprep.subr.bf16.mxu1 %v16985_v50  ;;  %v1235_v38 = vadd.f32 %v1171_v41, %v787_v51  ;;  %v16987_v61 = vmax.f32 %v12328_v15, 0.0  ;;  %11410 = vpow2.f32 %v1025_v17  ;;  %v1029_v40 = vmul.f32 1.442695, %v930_v37 }
 0x15d   : > { %16986 = vst [vmem:[#allocation13_spill] sm:$0xff] %v12586_v48  ;;  %v868_v57 = vmin.f32 %v12581_v63, 0.0  ;;  %v16988_v28 = vcombine.low %v16983_v32, %v16984_v21  ;;  %v11403_v53 = vpop.eup %11402  ;;  %2203 = vmatprep.mubr.bf16.mxu1 %v12586_v48  ;;  %2396 = vmatprep.mubr.bf16.mxu0 %v12586_v48  ;;  %v869_v15 = vmin.f32 %v12584_v7, 0.0  ;;  %v12603_v51 = vadd.f32 %v704_v4, %v11936_v23  ;;  %v16991_v21 = vld [vmem:[#allocation20_spill] sm:$0xff] }
 0x15e   : > { %v1237_v54 = vadd.f32 %v1173_v52, %v16987_v61  ;;  %v9254_v17 = vadd.f32 -1.0, %v12530_v18  ;;  %v12606_v37 = vpop.eup %11404  ;;  %v1031_v14 = vmul.f32 1.442695, %v931_v60  ;;  %v9256_v32 = vadd.f32 -1.0, %v11399_v13  ;;  %v16990_v52 = vld [vmem:[#allocation19_spill] sm:$0xff] }
 0x15f   : > { %2528 = vmatpush1.bf16.msra.mxu1 %v16988_v28  ;;  %v932_v27 = vmul.f32 16.666666, %v868_v57  ;;  %v12609_v41 = vadd.f32 %v708_v12, %v11918_v19  ;;  %v16992_v50 = vcombine.high %v16990_v52, %v16991_v21  ;;  %11412 = vpow2.f32 %v1027_v16 }
 0x160   : > { %v12599_v5 = vpack.c.bf16 %v1237_v54, %v1235_v38  ;;  %v933_v4 = vmul.f32 16.666666, %v869_v15  ;;  %v870_v18 = vmin.f32 %v12603_v51, 0.0  ;;  %v1176_v38 = vmul.f32 0.06, %v9254_v17  ;;  %v11407_v61 = vpop.eup %11406  ;;  %v718_v15 = vpop.f32.mrb[44].mxu0 }
 0x161   : > { %2529 = vmatprep.subr.bf16.mxu1 %v16992_v50  ;;  %v1033_v13 = vmul.f32 1.442695, %v932_v27  ;;  %v1178_v54 = vmul.f32 0.06, %v9256_v32  ;;  %v871_v12 = vmin.f32 %v12609_v41, 0.0  ;;  %v16993_v57 = vcombine.low %v16990_v52, %v16991_v21  ;;  %v720_v35 = vpop.f32.mrb[45].mxu0 }
 0x162   : > { %16989 = vst [vmem:[#allocation14_spill] sm:$0xff] %v12599_v5  ;;  %2204 = vmatmul.mubr.bf16.gmra.mrb[20].mxu1 %v12599_v5  ;;  %2397 = vmatmul.mubr.bf16.gmra.mrb[84].mxu0 %v12599_v5  ;;  %11414 = vpow2.f32 %v1029_v40  ;;  %v1035_v16 = vmul.f32 1.442695, %v933_v4  ;;  %v934_v28 = vmul.f32 16.666666, %v870_v18  ;;  %v9253_v50 = vadd.f32 -1.0, %v12505_v58  ;;  %v12623_v59 = vpop.eup %11408 }
 0x163   : > { %2530 = vmatpush1.bf16.msra.mxu1 %v16993_v57  ;;  %v16994_v17 = vmax.f32 %v12371_v44, 0.0  ;;  %v16995_v27 = vmax.f32 %v12404_v43, 0.0  ;;  %v935_v60 = vmul.f32 16.666666, %v871_v12  ;;  %v9255_v42 = vadd.f32 -1.0, %v12549_v29  ;;  %v722_v58 = vpop.f32.mrb[46].mxu0 }
 0x164   : > { %11416 = vpow2.f32 %v1031_v14  ;;  %v1175_v52 = vmul.f32 0.06, %v9253_v50  ;;  %v12632_v21 = vadd.f32 %v710_v9, %v11936_v23  ;;  %v12637_v18 = vadd.f32 %v712_v46, %v11918_v19  ;;  %v724_v43 = vpop.f32.mrb[47].mxu0 }
 0x165   : > { %v1240_v36 = vadd.f32 %v1176_v38, %v16994_v17  ;;  %v1242_v32 = vadd.f32 %v1178_v54, %v16995_v27  ;;  %11418 = vpow2.f32 %v1033_v13  ;;  %v1177_v44 = vmul.f32 0.06, %v9255_v42 }
 0x166   : > { %11420 = vpow2.f32 %v1035_v16  ;;  %v1037_v38 = vmul.f32 1.442695, %v934_v28  ;;  %v872_v14 = vmin.f32 %v12632_v21, 0.0  ;;  %v12641_v54 = vpop.eup %11410  ;;  %v1039_v9 = vmul.f32 1.442695, %v935_v60  ;;  %v728_v60 = vpop.f32.mrb[48].mxu0 }
 0x167   : > { %v12634_v4 = vpack.c.bf16 %v1242_v32, %v1240_v36  ;;  %v16997_v36 = vmax.f32 %v12360_v45, 0.0  ;;  %v16998_v46 = vmax.f32 %v12401_v55, 0.0  ;;  %v873_v12 = vmin.f32 %v12637_v18, 0.0 }
 0x168   : > { %v936_v57 = vmul.f32 16.666666, %v872_v14  ;;  %v12651_v16 = vadd.f32 %v714_v3, %v11936_v23  ;;  %v9258_v28 = vadd.f32 -1.0, %v11403_v53  ;;  %v9260_v50 = vadd.f32 -1.0, %v11407_v61 }
 0x169   : > { %16996 = vst [vmem:[#allocation5_spill] sm:$0xff] %v12634_v4  ;;  %2213 = vmatprep.mubr.bf16.mxu1 %v12634_v4  ;;  %2406 = vmatprep.mubr.bf16.mxu0 %v12634_v4  ;;  %v1239_v42 = vadd.f32 %v1175_v52, %v16997_v36  ;;  %v1241_v13 = vadd.f32 %v1177_v44, %v16998_v46  ;;  %v937_v27 = vmul.f32 16.666666, %v873_v12  ;;  %v9257_v45 = vadd.f32 -1.0, %v12577_v62  ;;  %v12659_v52 = vpop.eup %11412  ;;  %v730_v46 = vpop.f32.mrb[49].mxu0 }
 0x16a   : > { %v12656_v32 = vadd.f32 %v718_v15, %v11918_v19  ;;  %11422 = vpow2.f32 %v1037_v38  ;;  %v874_v44 = vmin.f32 %v12651_v16, 0.0  ;;  %v1180_v3 = vmul.f32 0.06, %v9258_v28  ;;  %v12672_v53 = vpop.f32.mrb[50].mxu0 }
 0x16b   : > { %v12653_v17 = vpack.c.bf16 %v1241_v13, %v1239_v42  ;;  %v1041_v61 = vmul.f32 1.442695, %v936_v57  ;;  %v1182_v15 = vmul.f32 0.06, %v9260_v50  ;;  %11424 = vpow2.f32 %v1039_v9 }
 0x16c   : > { %v875_v14 = vmin.f32 %v12656_v32, 0.0  ;;  %v11415_v62 = vpop.eup %11414  ;;  %v1043_v36 = vmul.f32 1.442695, %v937_v27  ;;  %v938_v42 = vmul.f32 16.666666, %v874_v44  ;;  %v9259_v38 = vadd.f32 -1.0, %v12606_v37 }
 0x16d   : > { %16999 = vst [vmem:[#allocation6_spill] sm:$0xff] %v12653_v17  ;;  %2214 = vmatmul.mubr.bf16.gmra.mrb[24].mxu1 %v12653_v17  ;;  %2407 = vmatmul.mubr.bf16.gmra.mrb[88].mxu0 %v12653_v17  ;;  %v17000_v13 = vmax.f32 %v12447_v33, 0.0  ;;  %v17001_v28 = vmax.f32 %v12479_v0, 0.0  ;;  %v1179_v29 = vmul.f32 0.06, %v9257_v45  ;;  %v12678_v27 = vadd.f32 %v720_v35, %v11936_v23  ;;  %v734_v33 = vpop.f32.mrb[51].mxu0 }
 0x16e   : > { %v939_v40 = vmul.f32 16.666666, %v875_v14  ;;  %v12674_v57 = vpop.eup %11416  ;;  %v1181_v9 = vmul.f32 0.06, %v9259_v38  ;;  %v12681_v37 = vadd.f32 %v722_v58, %v11918_v19  ;;  %11426 = vpow2.f32 %v1041_v61 }
 0x16f   : > { %v1244_v12 = vadd.f32 %v1180_v3, %v17000_v13  ;;  %v1246_v55 = vadd.f32 %v1182_v15, %v17001_v28  ;;  %v11419_v44 = vpop.eup %11418  ;;  %v12687_v45 = vadd.f32 %v724_v43, %v11936_v23  ;;  %v1045_v14 = vmul.f32 1.442695, %v938_v42 }
 0x170   : > { %v12689_v15 = vpop.eup %11420  ;;  %v17003_v38 = vmax.f32 %v12433_v2, 0.0  ;;  %v17004_v13 = vmax.f32 %v12460_v56, 0.0  ;;  %v876_v28 = vmin.f32 %v12678_v27, 0.0  ;;  %11428 = vpow2.f32 %v1043_v36 }
 0x171   : > { %v12684_v3 = vpack.c.bf16 %v1246_v55, %v1244_v12  ;;  %v1047_v43 = vmul.f32 1.442695, %v939_v40  ;;  %v877_v61 = vmin.f32 %v12681_v37, 0.0  ;;  %v12700_v12 = vpop.f32.mrb[52].mxu0  ;;  %v878_v56 = vmin.f32 %v12687_v45, 0.0 }
 0x172   : > { %v1243_v35 = vadd.f32 %v1179_v29, %v17003_v38  ;;  %v1245_v58 = vadd.f32 %v1181_v9, %v17004_v13  ;;  %v940_v2 = vmul.f32 16.666666, %v876_v28  ;;  %v9262_v29 = vadd.f32 -1.0, %v12641_v54  ;;  %v12706_v9 = vpop.f32.mrb[53].mxu0 }
 0x173   : > { %17002 = vst [vmem:[#allocation17_spill] sm:$0xff] %v12684_v3  ;;  %2223 = vmatprep.mubr.bf16.mxu1 %v12684_v3  ;;  %2416 = vmatprep.mubr.bf16.mxu0 %v12684_v3  ;;  %v941_v36 = vmul.f32 16.666666, %v877_v61  ;;  %v9264_v38 = vadd.f32 -1.0, %v11415_v62  ;;  %v12709_v13 = vadd.f32 %v728_v60, %v11918_v19  ;;  %v9261_v40 = vadd.f32 -1.0, %v12623_v59  ;;  %v12712_v55 = vpop.f32.mrb[54].mxu0 }
 0x174   : > { %v12702_v42 = vpack.c.bf16 %v1245_v58, %v1243_v35  ;;  %v11423_v50 = vpop.eup %11422  ;;  %11430 = vpow2.f32 %v1045_v14  ;;  %v942_v35 = vmul.f32 16.666666, %v878_v56  ;;  %v1184_v58 = vmul.f32 0.06, %v9262_v29 }
 0x175   : > { %v12717_v54 = vadd.f32 %v730_v46, %v11936_v23  ;;  %v1049_v28 = vmul.f32 1.442695, %v940_v2  ;;  %v1186_v60 = vmul.f32 0.06, %v9264_v38  ;;  %v879_v61 = vmin.f32 %v12709_v13, 0.0  ;;  %v12721_v59 = vpop.eup %11424 }
 0x176   : > { %17005 = vst [vmem:[#allocation18_spill] sm:$0xff] %v12702_v42  ;;  %2224 = vmatmul.mubr.bf16.gmra.mrb[28].mxu1 %v12702_v42  ;;  %2417 = vmatmul.mubr.bf16.gmra.mrb[92].mxu0 %v12702_v42  ;;  %11432 = vpow2.f32 %v1047_v43  ;;  %v1051_v0 = vmul.f32 1.442695, %v941_v36  ;;  %v9263_v3 = vadd.f32 -1.0, %v12659_v52  ;;  %v12725_v42 = vpop.f32.mrb[55].mxu0  ;;  %v17006_v56 = vmax.f32 %v12503_v8, 0.0 }
 0x177   : > { %v17007_v29 = vmax.f32 %v12537_v26, 0.0  ;;  %v943_v2 = vmul.f32 16.666666, %v879_v61  ;;  %v1183_v38 = vmul.f32 0.06, %v9261_v40  ;;  %v880_v43 = vmin.f32 %v12717_v54, 0.0 }
 0x178   : > { %v1248_v46 = vadd.f32 %v1184_v58, %v17006_v56  ;;  %v1053_v4 = vmul.f32 1.442695, %v942_v35  ;;  %v1185_v5 = vmul.f32 0.06, %v9263_v3  ;;  %v12733_v14 = vpop.eup %11426  ;;  %11434 = vpow2.f32 %v1049_v28  ;;  %v12743_v58 = vpop.f32.mrb[56].mxu0 }
 0x179   : > { %v1250_v62 = vadd.f32 %v1186_v60, %v17007_v29  ;;  %v17009_v36 = vmax.f32 %v12490_v11, 0.0  ;;  %v12741_v26 = vadd.f32 %v12672_v53, %v11918_v19  ;;  %v17010_v40 = vmax.f32 %v12534_v39, 0.0  ;;  %v12750_v28 = vpop.f32.mrb[57].mxu0 }
 0x17a   : > { %v944_v3 = vmul.f32 16.666666, %v880_v43  ;;  %v12748_v60 = vadd.f32 %v734_v33, %v11936_v23  ;;  %v9266_v61 = vadd.f32 -1.0, %v11419_v44  ;;  %11436 = vpow2.f32 %v1051_v0  ;;  %v12757_v39 = vpop.f32.mrb[58].mxu0 }
 0x17b   : > { %v12735_v52 = vpack.c.bf16 %v1250_v62, %v1248_v46  ;;  %v1247_v8 = vadd.f32 %v1183_v38, %v17009_v36  ;;  %v1249_v35 = vadd.f32 %v1185_v5, %v17010_v40  ;;  %v12752_v62 = vpop.eup %11428  ;;  %v1055_v11 = vmul.f32 1.442695, %v943_v2  ;;  %v12763_v46 = vpop.f32.mrb[59].mxu0 }
 0x17c   : > { %v881_v53 = vmin.f32 %v12741_v26, 0.0  ;;  %v9268_v56 = vadd.f32 -1.0, %v11423_v50  ;;  %11438 = vpow2.f32 %v1053_v4  ;;  %v882_v44 = vmin.f32 %v12748_v60, 0.0 }
 0x17d   : > { %17008 = vst [vmem:[#allocation23_spill] sm:$0xff] %v12735_v52  ;;  %2233 = vmatprep.mubr.bf16.mxu1 %v12735_v52  ;;  %2426 = vmatprep.mubr.bf16.mxu0 %v12735_v52  ;;  %v12760_v33 = vpack.c.bf16 %v1249_v35, %v1247_v8  ;;  %v1188_v29 = vmul.f32 0.06, %v9266_v61  ;;  %v12767_v2 = vadd.f32 %v12700_v12, %v11918_v19  ;;  %v1057_v4 = vmul.f32 1.442695, %v944_v3 }
 0x17e   : > { %v945_v0 = vmul.f32 16.666666, %v881_v53  ;;  %v1190_v38 = vmul.f32 0.06, %v9268_v56  ;;  %v11431_v43 = vpop.eup %11430  ;;  %v946_v50 = vmul.f32 16.666666, %v882_v44  ;;  %11440 = vpow2.f32 %v1055_v11 }
 0x17f   : > { %17011 = vst [vmem:[#allocation7_spill] sm:$0xff] %v12760_v33  ;;  %2234 = vmatmul.mubr.bf16.gmra.mrb[32].mxu1 %v12760_v33  ;;  %2427 = vmatmul.mubr.bf16.gmra.mrb[96].mxu0 %v12760_v33  ;;  %v9265_v36 = vadd.f32 -1.0, %v12674_v57  ;;  %v9267_v8 = vadd.f32 -1.0, %v12689_v15  ;;  %v17012_v35 = vmax.f32 %v12581_v63, 0.0  ;;  %v17013_v12 = vmax.f32 %v12603_v51, 0.0  ;;  %v12792_v51 = vpop.f32.mrb[60].mxu0 }
 0x180   : > { %v12778_v56 = vpop.eup %11432  ;;  %v883_v3 = vmin.f32 %v12767_v2, 0.0  ;;  %v12784_v57 = vadd.f32 %v12706_v9, %v11936_v23  ;;  %v1059_v15 = vmul.f32 1.442695, %v945_v0  ;;  %v12790_v63 = vadd.f32 %v12712_v55, %v11918_v19 }
 0x181   : > { %v1252_v61 = vadd.f32 %v1188_v29, %v17012_v35  ;;  %v1254_v53 = vadd.f32 %v1190_v38, %v17013_v12  ;;  %v1187_v44 = vmul.f32 0.06, %v9265_v36  ;;  %v1189_v40 = vmul.f32 0.06, %v9267_v8  ;;  %v12795_v36 = vpop.f32.mrb[61].mxu0 }
 0x182   : > { %11442 = vpow2.f32 %v1057_v4  ;;  %v1061_v38 = vmul.f32 1.442695, %v946_v50  ;;  %v947_v35 = vmul.f32 16.666666, %v883_v3  ;;  %v11435_v12 = vpop.eup %11434  ;;  %v17015_v9 = vmax.f32 %v12559_v24, 0.0 }
 0x183   : > { %v12786_v11 = vpack.c.bf16 %v1254_v53, %v1252_v61  ;;  %v17016_v55 = vmax.f32 %v12584_v7, 0.0  ;;  %v884_v61 = vmin.f32 %v12784_v57, 0.0  ;;  %v885_v4 = vmin.f32 %v12790_v63, 0.0  ;;  %v12805_v53 = vpop.f32.mrb[62].mxu0 }
 0x184   : > { %v1251_v0 = vadd.f32 %v1187_v44, %v17015_v9  ;;  %v12810_v3 = vadd.f32 %v12725_v42, %v11936_v23  ;;  %v9270_v5 = vadd.f32 -1.0, %v12733_v14  ;;  %v9272_v29 = vadd.f32 -1.0, %v11431_v43  ;;  %v12813_v24 = vpop.f32.mrb[63].mxu0  ;;  %v11437_v44 = vpop.eup %11436 }
 0x185   : > { %17014 = vst [vmem:[#allocation8_spill] sm:$0xff] %v12786_v11  ;;  %2243 = vmatprep.mubr.bf16.mxu1 %v12786_v11  ;;  %2436 = vmatprep.mubr.bf16.mxu0 %v12786_v11  ;;  %v1253_v8 = vadd.f32 %v1189_v40, %v17016_v55  ;;  %v1063_v7 = vmul.f32 1.442695, %v947_v35  ;;  %v948_v9 = vmul.f32 16.666666, %v884_v61  ;;  %v12819_v55 = vadd.f32 %v12743_v58, %v11918_v19 }
 0x186   : > { %v11439_v17 = vpop.eup %11438  ;;  %11444 = vpow2.f32 %v1059_v15  ;;  %v949_v50 = vmul.f32 16.666666, %v885_v4  ;;  %v886_v42 = vmin.f32 %v12810_v3, 0.0  ;;  %v1192_v11 = vmul.f32 0.06, %v9270_v5 }
 0x187   : > { %v12815_v40 = vpack.c.bf16 %v1253_v8, %v1251_v0  ;;  %11446 = vpow2.f32 %v1061_v38  ;;  %v1194_v43 = vmul.f32 0.06, %v9272_v29  ;;  %v12827_v35 = vadd.f32 %v12750_v28, %v11936_v23 }
 0x188   : > { %v1065_v58 = vmul.f32 1.442695, %v948_v9  ;;  %v950_v15 = vmul.f32 16.666666, %v886_v42  ;;  %v887_v8 = vmin.f32 %v12819_v55, 0.0  ;;  %v12831_v61 = vpop.eup %11440  ;;  %v17018_v5 = vmax.f32 %v12632_v21, 0.0 }
 0x189   : > { %17017 = vst [vmem:[#allocation21_spill] sm:$0xff] %v12815_v40  ;;  %2244 = vmatmul.mubr.bf16.gmra.mrb[36].mxu1 %v12815_v40  ;;  %2437 = vmatmul.mubr.bf16.gmra.mrb[100].mxu0 %v12815_v40  ;;  %v17019_v4 = vmax.f32 %v12651_v16, 0.0  ;;  %v9269_v29 = vadd.f32 -1.0, %v12721_v59  ;;  %v9271_v14 = vadd.f32 -1.0, %v12752_v62  ;;  %11448 = vpow2.f32 %v1063_v7 }
 0x18a   : > { %v1256_v38 = vadd.f32 %v1192_v11, %v17018_v5  ;;  %v1067_v28 = vmul.f32 1.442695, %v949_v50  ;;  %v822_v9 = vmax.f32 %v12810_v3, 0.0  ;;  %v951_v0 = vmul.f32 16.666666, %v887_v8 }
 0x18b   : > { %v1258_v40 = vadd.f32 %v1194_v43, %v17019_v4  ;;  %v1191_v33 = vmul.f32 0.06, %v9269_v29  ;;  %v1193_v52 = vmul.f32 0.06, %v9271_v14  ;;  %v888_v48 = vmin.f32 %v12827_v35, 0.0 }
 0x18c   : > { %v11443_v21 = vpop.eup %11442  ;;  %11450 = vpow2.f32 %v1065_v58  ;;  %v1069_v11 = vmul.f32 1.442695, %v950_v15  ;;  %v12845_v16 = vadd.f32 %v12757_v39, %v11918_v19  ;;  %v12849_v59 = vadd.f32 %v12763_v46, %v11936_v23 }
 0x18d   : > { %v12840_v42 = vpack.c.bf16 %v1258_v40, %v1256_v38  ;;  %v17020_v62 = vmax.f32 %v12609_v41, 0.0  ;;  %v17021_v7 = vmax.f32 %v12637_v18, 0.0  ;;  %v952_v14 = vmul.f32 16.666666, %v888_v48 }
 0x18e   : > { %v9274_v43 = vadd.f32 -1.0, %v11435_v12  ;;  %11452 = vpow2.f32 %v1067_v28  ;;  %v823_v39 = vmax.f32 %v12819_v55, 0.0  ;;  %v1071_v58 = vmul.f32 1.442695, %v951_v0 }
 0x18f   : > { %2253 = vmatprep.mubr.bf16.mxu1 %v12840_v42  ;;  %2446 = vmatprep.mubr.bf16.mxu0 %v12840_v42  ;;  %v1255_v50 = vadd.f32 %v1191_v33, %v17020_v62  ;;  %v1257_v40 = vadd.f32 %v1193_v52, %v17021_v7  ;;  %v889_v15 = vmin.f32 %v12845_v16, 0.0  ;;  %v1073_v8 = vmul.f32 1.442695, %v952_v14 }
 0x190   : > { %v890_v5 = vmin.f32 %v12849_v59, 0.0  ;;  %v9276_v38 = vadd.f32 -1.0, %v11439_v17  ;;  %v12862_v4 = vpop.eup %11444  ;;  %v1196_v33 = vmul.f32 0.06, %v9274_v43  ;;  %v12866_v48 = vadd.f32 %v12792_v51, %v11918_v19 }
 0x191   : > { %v12859_v46 = vpack.c.bf16 %v1257_v40, %v1255_v50  ;;  %v953_v41 = vmul.f32 16.666666, %v889_v15  ;;  %v9273_v18 = vadd.f32 -1.0, %v12778_v56  ;;  %v11447_v52 = vpop.eup %11446  ;;  %11454 = vpow2.f32 %v1069_v11 }
 0x192   : > { %v954_v12 = vmul.f32 16.666666, %v890_v5  ;;  %v1198_v0 = vmul.f32 0.06, %v9276_v38  ;;  %v9275_v29 = vadd.f32 -1.0, %v11437_v44  ;;  %11456 = vpow2.f32 %v1071_v58 }
 0x193   : > { %2254 = vmatmul.mubr.bf16.gmra.mrb[40].mxu1 %v12859_v46  ;;  %2447 = vmatmul.mubr.bf16.gmra.mrb[104].mxu0 %v12859_v46  ;;  %v824_v17 = vmax.f32 %v12827_v35, 0.0  ;;  %v17022_v28 = vmax.f32 %v12678_v27, 0.0  ;;  %v891_v51 = vmin.f32 %v12866_v48, 0.0  ;;  %v17023_v56 = vmax.f32 %v12687_v45, 0.0  ;;  %v12877_v14 = vpop.eup %11448  ;;  %v1418_v35 = vld [vmem:[%s16567_s3 + $0x358] sm:$0xff] }
 0x194   : > { %v1077_v50 = vmul.f32 1.442695, %v954_v12  ;;  %v1195_v11 = vmul.f32 0.06, %v9273_v18  ;;  %v1197_v40 = vmul.f32 0.06, %v9275_v29  ;;  %v12881_v44 = vadd.f32 %v12795_v36, %v11936_v23 }
 0x195   : > { %v1260_v62 = vadd.f32 %v1196_v33, %v17022_v28  ;;  %v1262_v7 = vadd.f32 %v1198_v0, %v17023_v56  ;;  %v1075_v43 = vmul.f32 1.442695, %v953_v41  ;;  %v955_v15 = vmul.f32 16.666666, %v891_v51  ;;  %v1382_v0 = vld [vmem:[%s16567_s3 + $0x238] sm:$0xff]  ;;  %v11472_v51 = vld [vmem:[%s16567_s3 + $0x310] sm:$0xff] }
 0x196   : > { %v12885_v27 = vadd.f32 %v12805_v53, %v11918_v19  ;;  %11458 = vpow2.f32 %v1073_v8  ;;  %v17024_v45 = vmax.f32 %v12656_v32, 0.0  ;;  %v17025_v38 = vmax.f32 %v12681_v37, 0.0  ;;  %v11451_v18 = vpop.eup %11450  ;;  %v1378_v8 = vld [vmem:[%s16567_s3 + $0x218] sm:$0xff] }
 0x197   : > { %v12887_v58 = vpack.c.bf16 %v1262_v7, %v1260_v62  ;;  %v826_v41 = vmax.f32 %v12849_v59, 0.0  ;;  %11460 = vpow2.f32 %v1077_v50  ;;  %v1079_v12 = vmul.f32 1.442695, %v955_v15  ;;  %v1390_v7 = vld [vmem:[%s16567_s3 + $0x278] sm:$0xff] }
 0x198   : > { %v1259_v5 = vadd.f32 %v1195_v11, %v17024_v45  ;;  %v1261_v33 = vadd.f32 %v1197_v40, %v17025_v38  ;;  %v892_v36 = vmin.f32 %v12881_v44, 0.0  ;;  %v893_v53 = vmin.f32 %v12885_v27, 0.0  ;;  %v11453_v29 = vpop.eup %11452  ;;  %v1422_v59 = vld [vmem:[%s16567_s3 + $0x378] sm:$0xff] }
 0x199   : > { %2263 = vmatprep.mubr.bf16.mxu1 %v12887_v58  ;;  %2456 = vmatprep.mubr.bf16.mxu0 %v12887_v58  ;;  %v12902_v32 = vadd.f32 %v12813_v24, %v11936_v23  ;;  %v9278_v37 = vadd.f32 -1.0, %v11443_v21  ;;  %11462 = vpow2.f32 %v1075_v43  ;;  %v9280_v62 = vadd.f32 -1.0, %v11447_v52  ;;  %v11473_v23 = vld [vmem:[%s16567_s3 + $0x330] sm:$0xff]  ;;  %v1386_v21 = vld [vmem:[%s16567_s3 + $0x258] sm:$0xff] }
 0x19a   : > { %v12897_v19 = vpack.c.bf16 %v1261_v33, %v1259_v5  ;;  %v956_v28 = vmul.f32 16.666666, %v892_v36  ;;  %v9394_v24 = vcombine.high %v11472_v51, %v11473_v23  ;;  %11464 = vpow2.f32 %v1079_v12 }
 0x19b   : > { %v957_v50 = vmul.f32 16.666666, %v893_v53  ;;  %v894_v52 = vmin.f32 %v12902_v32, 0.0  ;;  %v1200_v56 = vmul.f32 0.06, %v9278_v37  ;;  %v9363_v43 = vcombine.low %v1378_v8, %v1382_v0  ;;  %v11455_v45 = vpop.eup %11454 }
 0x19c   : > { %2264 = vmatmul.mubr.bf16.gmra.mrb[44].mxu1 %v12897_v19  ;;  %2457 = vmatmul.mubr.bf16.gmra.mrb[108].mxu0 %v12897_v19  ;;  %v1081_v11 = vmul.f32 1.442695, %v956_v28  ;;  %v1202_v40 = vmul.f32 0.06, %v9280_v62  ;;  %v9364_v15 = vcombine.high %v1378_v8, %v1382_v0  ;;  %v17026_v33 = vmax.f32 %v12717_v54, 0.0  ;;  %v11457_v37 = vpop.eup %11456  ;;  %v1417_v54 = vld [vmem:[%s16567_s3 + $0x350] sm:$0xff] }
 0x19d   : > { %2531 = vmatprep.subr.bf16.mxu1 %v9394_v24  ;;  %v1083_v5 = vmul.f32 1.442695, %v957_v50  ;;  %v958_v38 = vmul.f32 16.666666, %v894_v52  ;;  %v9277_v36 = vadd.f32 -1.0, %v12831_v61  ;;  %v17027_v53 = vcombine.low %v12262_v49, %v12267_v31  ;;  %v1421_v61 = vld [vmem:[%s16567_s3 + $0x370] sm:$0xff] }
 0x19e   : > { %v1264_v12 = vadd.f32 %v1200_v56, %v17026_v33  ;;  %11466 = vpow2.f32 %v1081_v11  ;;  %v17028_v28 = vmax.f32 %v12748_v60, 0.0  ;;  %2716 = vmatprep.subr.bf16.mxu0 %v9364_v15  ;;  %v9279_v8 = vadd.f32 -1.0, %v12862_v4  ;;  %v1394_v60 = vld [vmem:[%s16567_s3 + $0x298] sm:$0xff] }
 0x19f   : > { %2532 = vmatpush1.bf16.msra.mxu1 %v17027_v53  ;;  %v9371_v0 = vcombine.low %v1386_v21, %v1390_v7  ;;  %11468 = vpow2.f32 %v1083_v5  ;;  %v1085_v49 = vmul.f32 1.442695, %v958_v38  ;;  %v1199_v31 = vmul.f32 0.06, %v9277_v36  ;;  %2717 = vmatpush1.bf16.msra.mxu0 %v9363_v43  ;;  %v1398_v4 = vld [vmem:[%s16567_s3 + $0x2b8] sm:$0xff] }
 0x1a0   : > { %v1266_v62 = vadd.f32 %v1202_v40, %v17028_v28  ;;  %v9372_v51 = vcombine.high %v1386_v21, %v1390_v7  ;;  %v1201_v24 = vmul.f32 0.06, %v9279_v8  ;;  %v9282_v50 = vadd.f32 -1.0, %v11451_v18  ;;  %v12951_v56 = vld [vmem:[%s16567_s3 + $0x2d8] sm:$0xff]  ;;  %v11459_v7 = vpop.eup %11458 }
 0x1a1   : > { %v9284_v52 = vadd.f32 -1.0, %v11455_v45  ;;  %v12956_v21 = vld [vmem:[%s16567_s3 + $0x2f8] sm:$0xff]  ;;  %11470 = vpow2.f32 %v1085_v49  ;;  %v17029_v11 = vmax.f32 %v12709_v13, 0.0  ;;  %v9401_v43 = vcombine.low %v1417_v54, %v1421_v61  ;;  %v11461_v18 = vpop.eup %11460 }
 0x1a2   : > { %v12946_v23 = vpack.c.bf16 %v1266_v62, %v1264_v12  ;;  %2718 = vmatprep.subr.bf16.mxu0 %v9372_v51  ;;  %v9402_v15 = vcombine.high %v1417_v54, %v1421_v61  ;;  %v17030_v45 = vmax.f32 %v12741_v26, 0.0  ;;  %v1204_v38 = vmul.f32 0.06, %v9282_v50  ;;  %v1425_v62 = vld [vmem:[%s16567_s3 + $0x390] sm:$0xff] }
 0x1a3   : > { %v1263_v40 = vadd.f32 %v1199_v31, %v17029_v11  ;;  %v1206_v33 = vmul.f32 0.06, %v9284_v52  ;;  %v9281_v12 = vadd.f32 -1.0, %v12877_v14  ;;  %2719 = vmatpush1.bf16.msra.mxu0 %v9371_v0  ;;  %v9283_v36 = vadd.f32 -1.0, %v11453_v29  ;;  %v1429_v26 = vld [vmem:[%s16567_s3 + $0x3b0] sm:$0xff]  ;;  %v11463_v8 = vpop.eup %11462 }
 0x1a4   : > { %2273 = vmatprep.mubr.bf16.mxu1 %v12946_v23  ;;  %2466 = vmatprep.mubr.bf16.mxu0 %v12946_v23  ;;  %v1265_v5 = vadd.f32 %v1201_v24, %v17030_v45  ;;  %v9379_v13 = vcombine.low %v1394_v60, %v1398_v4  ;;  %v9380_v53 = vcombine.high %v1394_v60, %v1398_v4  ;;  %v17031_v14 = vmax.f32 %v12784_v57, 0.0  ;;  %v11465_v49 = vpop.eup %11464  ;;  %v12984_v24 = vld [vmem:[%s16567_s3 + $0x318] sm:$0xff] }
 0x1a5   : > { %2533 = vmatprep.subr.bf16.mxu1 %v9402_v15  ;;  %v9387_v28 = vcombine.low %v12951_v56, %v12956_v21  ;;  %v1270_v29 = vadd.f32 %v1206_v33, %v822_v9  ;;  %v1203_v61 = vmul.f32 0.06, %v9281_v12  ;;  %v1205_v31 = vmul.f32 0.06, %v9283_v36  ;;  %v12989_v57 = vld [vmem:[%s16567_s3 + $0x338] sm:$0xff] }
 0x1a6   : > { %v12973_v54 = vpack.c.bf16 %v1265_v5, %v1263_v40  ;;  %v1268_v0 = vadd.f32 %v1204_v38, %v17031_v14  ;;  %2534 = vmatpush1.bf16.msra.mxu1 %v9401_v43  ;;  %2720 = vmatprep.subr.bf16.mxu0 %v9380_v53  ;;  %v9388_v51 = vcombine.high %v12951_v56, %v12956_v21  ;;  %v9286_v60 = vadd.f32 -1.0, %v11459_v7 }
 0x1a7   : > { %v9288_v4 = vadd.f32 -1.0, %v11461_v18  ;;  %v17032_v9 = vmax.f32 %v12767_v2, 0.0  ;;  %v9409_v52 = vcombine.low %v1425_v62, %v1429_v26  ;;  %v9285_v56 = vadd.f32 -1.0, %v11457_v37  ;;  %2721 = vmatpush1.bf16.msra.mxu0 %v9379_v13  ;;  %v1437_v37 = vld [vmem:[%s16567_s3 + $0x3f0] sm:$0xff] }
 0x1a8   : > { %2274 = vmatmul.mubr.bf16.gmra.mrb[48].mxu1 %v12973_v54  ;;  %2467 = vmatmul.mubr.bf16.gmra.mrb[112].mxu0 %v12973_v54  ;;  %v12993_v3 = vpack.c.bf16 %v1270_v29, %v1268_v0  ;;  %v17033_v21 = vmax.f32 %v12790_v63, 0.0  ;;  %v1208_v11 = vmul.f32 0.06, %v9286_v60  ;;  %v9410_v43 = vcombine.high %v1425_v62, %v1429_v26  ;;  %v11467_v15 = vpop.eup %11466  ;;  %v1433_v63 = vld [vmem:[%s16567_s3 + $0x3d0] sm:$0xff] }
 0x1a9   : > { %v1267_v50 = vadd.f32 %v1203_v61, %v17032_v9  ;;  %v1210_v40 = vmul.f32 0.06, %v9288_v4  ;;  %v825_v18 = vmax.f32 %v12845_v16, 0.0  ;;  %v9287_v45 = vadd.f32 -1.0, %v11463_v8  ;;  %v11469_v38 = vpop.eup %11468  ;;  %2722 = vmatprep.subr.bf16.mxu0 %v9388_v51  ;;  %v1426_v61 = vld [vmem:[%s16567_s3 + $0x398] sm:$0xff] }
 0x1aa   : > { %v1269_v7 = vadd.f32 %v1205_v31, %v17033_v21  ;;  %2283 = vmatprep.mubr.bf16.mxu1 %v12993_v3  ;;  %2476 = vmatprep.mubr.bf16.mxu0 %v12993_v3  ;;  %v1207_v5 = vmul.f32 0.06, %v9285_v56  ;;  %v9396_v2 = vcombine.high %v12984_v24, %v12989_v57  ;;  %v1272_v16 = vadd.f32 %v1208_v11, %v824_v17  ;;  %v1430_v4 = vld [vmem:[%s16567_s3 + $0x3b8] sm:$0xff] }
 0x1ab   : > { %v1274_v12 = vadd.f32 %v1210_v40, %v826_v41  ;;  %2535 = vmatprep.subr.bf16.mxu1 %v9410_v43  ;;  %v9290_v36 = vadd.f32 -1.0, %v11467_v15  ;;  %v827_v13 = vmax.f32 %v12866_v48, 0.0  ;;  %v1209_v53 = vmul.f32 0.06, %v9287_v45  ;;  %v11471_v17 = vpop.eup %11470  ;;  %2723 = vmatpush1.bf16.msra.mxu0 %v9387_v28  ;;  %v1434_v40 = vld [vmem:[%s16567_s3 + $0x3d8] sm:$0xff] }
 0x1ac   : > { %v13010_v33 = vpack.c.bf16 %v1269_v7, %v1267_v50  ;;  %v1271_v62 = vadd.f32 %v1207_v5, %v823_v39  ;;  %2536 = vmatpush1.bf16.msra.mxu1 %v9409_v52  ;;  %v9395_v26 = vcombine.low %v12984_v24, %v12989_v57  ;;  %v9417_v8 = vcombine.low %v1433_v63, %v1437_v37  ;;  %v1438_v43 = vld [vmem:[%s16567_s3 + $0x3f8] sm:$0xff] }
 0x1ad   : > { %v13027_v41 = vpack.c.bf16 %v1274_v12, %v1272_v16  ;;  %v1212_v48 = vmul.f32 0.06, %v9290_v36  ;;  %v9418_v55 = vcombine.high %v1433_v63, %v1437_v37  ;;  %v1273_v39 = vadd.f32 %v1209_v53, %v825_v18  ;;  %2724 = vmatprep.subr.bf16.mxu0 %v9396_v2  ;;  %v10781_v5 = vld [vmem:[%s16569_s5 + $0xc] ss:$16 sps:$4 sm:$0xff]   ;;  %v10752_v2 = vld [vmem:[%s16569_s5] ss:$16 sps:$4 sm:$0xff]  }
 0x1ae   : > { %v9292_v14 = vadd.f32 -1.0, %v11471_v17  ;;  %v9289_v0 = vadd.f32 -1.0, %v11465_v49  ;;  %v9291_v29 = vadd.f32 -1.0, %v11469_v38  ;;  %v828_v31 = vmax.f32 %v12881_v44, 0.0  ;;  %v10754_v49 = vld [vmem:[%s16569_s5 + $0x4] ss:$16 sps:$4 sm:$0xff]  }
 0x1af   : > { %v829_v51 = vmax.f32 %v12885_v27, 0.0  ;;  %v830_v28 = vmax.f32 %v12902_v32, 0.0  ;;  %v9404_v60 = vcombine.high %v1418_v35, %v1422_v59  ;;  %2537 = vmatprep.subr.bf16.mxu1 %v9418_v55  ;;  %v13043_v24 = vpack.c.bf16 %v1273_v39, %v1271_v62  ;;  %2725 = vmatpush1.bf16.msra.mxu0 %v9395_v26  ;;  %v10757_v63 = vld [vmem:[%s16569_s5 + $0x24] ss:$16 sps:$4 sm:$0xff]   ;;  %v10779_v37 = vld [vmem:[%s16569_s5 + $0x8] ss:$16 sps:$4 sm:$0xff]  }
 0x1b0   : > { %2284 = vmatmul.mubr.bf16.gmra.mrb[52].mxu1 %v13010_v33  ;;  %2477 = vmatmul.mubr.bf16.gmra.mrb[116].mxu0 %v13010_v33  ;;  %v1214_v44 = vmul.f32 0.06, %v9292_v14  ;;  %v1211_v27 = vmul.f32 0.06, %v9289_v0  ;;  %v1213_v57 = vmul.f32 0.06, %v9291_v29  ;;  %v9403_v32 = vcombine.low %v1418_v35, %v1422_v59 }
 0x1b1   : > { %2293 = vmatprep.mubr.bf16.mxu1 %v13027_v41  ;;  %2486 = vmatprep.mubr.bf16.mxu0 %v13027_v41  ;;  %v1276_v9 = vadd.f32 %v1212_v48, %v828_v31  ;;  %v9412_v21 = vcombine.high %v1426_v61, %v1430_v4  ;;  %v9411_v15 = vcombine.low %v1426_v61, %v1430_v4  ;;  %v17034_v38 = vld [vmem:[#allocation24_spill] sm:$0xff]  ;;  %v10782_v36 = vld [vmem:[%s16569_s5 + $0x28] ss:$16 sps:$4 sm:$0xff]   ;;  %v10793_v26 = vld [vmem:[%s16569_s5 + $0x6c] ss:$16 sps:$4 sm:$0xff]  }
 0x1b2   : > { %v1278_v50 = vadd.f32 %v1214_v44, %v830_v28  ;;  %v1275_v52 = vadd.f32 %v1211_v27, %v827_v13  ;;  %v1277_v56 = vadd.f32 %v1213_v57, %v829_v51  ;;  %2538 = vmatpush1.bf16.msra.mxu1 %v9417_v8  ;;  %2726 = vmatprep.subr.bf16.mxu0 %v9404_v60  ;;  %v10755_v16 = vld [vmem:[%s16569_s5 + $0x20] ss:$16 sps:$4 sm:$0xff]   ;;  %v10760_v12 = vld [vmem:[%s16569_s5 + $0x44] ss:$16 sps:$4 sm:$0xff]   ;;  %v10788_v62 = vld [vmem:[%s16569_s5 + $0x48] ss:$16 sps:$4 sm:$0xff]  }
 0x1b3   : > { %4131 = vmatprep.subr.bf16.mxu1 %v10754_v49  ;;  %2727 = vmatpush1.bf16.msra.mxu0 %v9403_v32  ;;  %v9420_v18 = vcombine.high %v1434_v40, %v1438_v43  ;;  %v9419_v45 = vcombine.low %v1434_v40, %v1438_v43  ;;  %v10758_v13 = vld [vmem:[%s16569_s5 + $0x40] ss:$16 sps:$4 sm:$0xff]   ;;  %v10763_v53 = vld [vmem:[%s16569_s5 + $0x64] ss:$16 sps:$4 sm:$0xff]   ;;  %v10799_v17 = vld [vmem:[%s16569_s5 + $0x8c] ss:$16 sps:$4 sm:$0xff]  }
 0x1b4   : > { %v13047_v7 = vpack.c.bf16 %v1278_v50, %v1276_v9  ;;  %v13049_v11 = vpack.c.bf16 %v1277_v56, %v1275_v52  ;;  %2728 = vmatprep.subr.bf16.mxu0 %v9412_v21  ;;  %v10761_v35 = vld [vmem:[%s16569_s5 + $0x60] ss:$16 sps:$4 sm:$0xff]   ;;  %v10766_v59 = vld [vmem:[%s16569_s5 + $0x84] ss:$16 sps:$4 sm:$0xff]   ;;  %v10797_v8 = vld [vmem:[%s16569_s5 + $0x88] ss:$16 sps:$4 sm:$0xff]  }
 0x1b5   : > { %v10769_v48 = vld [vmem:[%s16569_s5 + $0xa4] ss:$16 sps:$4 sm:$0xff]   ;;  %v10802_v55 = vld [vmem:[%s16569_s5 + $0xac] ss:$16 sps:$4 sm:$0xff]   ;;  %v10767_v39 = vld [vmem:[%s16569_s5 + $0xa0] ss:$16 sps:$4 sm:$0xff]  }
 0x1b6   : > { %v10772_v14 = vld [vmem:[%s16569_s5 + $0xc4] ss:$16 sps:$4 sm:$0xff]   ;;  %v10808_v0 = vld [vmem:[%s16569_s5 + $0xcc] ss:$16 sps:$4 sm:$0xff]   ;;  %v10806_v61 = vld [vmem:[%s16569_s5 + $0xc8] ss:$16 sps:$4 sm:$0xff]  }
 0x1b7   : > { %2729 = vmatpush1.bf16.msra.mxu0 %v9411_v15  ;;  %v10775_v29 = vld [vmem:[%s16569_s5 + $0xe4] ss:$16 sps:$4 sm:$0xff]   ;;  %v10811_v31 = vld [vmem:[%s16569_s5 + $0xec] ss:$16 sps:$4 sm:$0xff]   ;;  %v10773_v51 = vld [vmem:[%s16569_s5 + $0xe0] ss:$16 sps:$4 sm:$0xff]  }
 0x1b8   : > { %2294 = vmatmul.mubr.bf16.gmra.mrb[56].mxu1 %v13043_v24  ;;  %2487 = vmatmul.mubr.bf16.gmra.mrb[120].mxu0 %v13043_v24  ;;  %v10778_v28 = vld [vmem:[%s16569_s5 + $0x104] ss:$16 sps:$4 sm:$0xff]   ;;  %v10817_v60 = vld [vmem:[%s16569_s5 + $0x10c] ss:$16 sps:$4 sm:$0xff]   ;;  %v10815_v49 = vld [vmem:[%s16569_s5 + $0x108] ss:$16 sps:$4 sm:$0xff]  }
 0x1b9   : > { %2303 = vmatprep.mubr.bf16.mxu1 %v13047_v7  ;;  %2496 = vmatprep.mubr.bf16.mxu0 %v13047_v7  ;;  %v10787_v4 = vld [vmem:[%s16569_s5 + $0x124] ss:$16 sps:$4 sm:$0xff]   ;;  %v10820_v44 = vld [vmem:[%s16569_s5 + $0x12c] ss:$16 sps:$4 sm:$0xff]   ;;  %v10785_v57 = vld [vmem:[%s16569_s5 + $0x120] ss:$16 sps:$4 sm:$0xff]  }
 0x1ba   : > { %2730 = vmatprep.subr.bf16.mxu0 %v9420_v18  ;;  %v17035_v27 = vld [vmem:[#allocation13_spill] sm:$0xff]  ;;  %v10796_v32 = vld [vmem:[%s16569_s5 + $0x144] ss:$16 sps:$4 sm:$0xff]   ;;  %v10794_v9 = vld [vmem:[%s16569_s5 + $0x140] ss:$16 sps:$4 sm:$0xff]  }
 0x1bb   : > { %2731 = vmatpush1.bf16.msra.mxu0 %v9419_v45  ;;  %v10826_v50 = vld [vmem:[%s16569_s5 + $0x14c] ss:$16 sps:$4 sm:$0xff]   ;;  %v10805_v52 = vld [vmem:[%s16569_s5 + $0x164] ss:$16 sps:$4 sm:$0xff]   ;;  %v10824_v56 = vld [vmem:[%s16569_s5 + $0x148] ss:$16 sps:$4 sm:$0xff]  }
 0x1bc   : > { %4517 = vmatprep.subr.bf16.mxu0 %v10781_v5  ;;  %v17036_v21 = vld [vmem:[#allocation14_spill] sm:$0xff]  ;;  %v10829_v40 = vld [vmem:[%s16569_s5 + $0x16c] ss:$16 sps:$4 sm:$0xff]   ;;  %v10827_v45 = vld [vmem:[%s16569_s5 + $0x168] ss:$16 sps:$4 sm:$0xff]  }
 0x1bd   : > { %v17037_v43 = vld [vmem:[#allocation5_spill] sm:$0xff]  ;;  %v10803_v15 = vld [vmem:[%s16569_s5 + $0x160] ss:$16 sps:$4 sm:$0xff]   ;;  %v10814_v18 = vld [vmem:[%s16569_s5 + $0x184] ss:$16 sps:$4 sm:$0xff]  }
 0x1be   : > { %v10812_v5 = vld [vmem:[%s16569_s5 + $0x180] ss:$16 sps:$4 sm:$0xff]  }
 0x1c0   : > { %2304 = vmatmul.mubr.bf16.gmra.mrb[60].mxu1 %v13049_v11  ;;  %2497 = vmatmul.mubr.bf16.gmra.mrb[124].mxu0 %v13049_v11 }
 0x1c1   : > { %2539 = vmatprep.mubr.bf16.mxu1 %v12241_v34  ;;  %2732 = vmatprep.mubr.bf16.mxu0 %v12241_v34  ;;  %v10784_v34 = vld [vmem:[%s16569_s5 + $0x2c] ss:$16 sps:$4 sm:$0xff]  }
 0x1c8   : > { %2540 = vmatmul.mubr.bf16.vlgmr.msra.gmra.mrb[64].mxu1 %v17034_v38  ;;  %2733 = vmatmul.mubr.bf16.vlgmr.msra.gmra.mrb[128].mxu0 %v17034_v38  ;;  %v17038_v38 = vld [vmem:[#allocation6_spill] sm:$0xff] }
 0x1c9   : > { %4132 = vmatpush1.bf16.msra.mxu1 %v10752_v2  ;;  %2549 = vmatprep.mubr.bf16.mxu1 %v12311_v10  ;;  %v10835_v2 = vld [vmem:[%s16569_s5 + $0x18c] ss:$16 sps:$4 sm:$0xff]  }
 0x1ca   : > { %2742 = vmatprep.mubr.bf16.mxu0 %v12311_v10  ;;  %4133 = vmatprep.subr.bf16.mxu1 %v10757_v63  ;;  %v10790_v10 = vld [vmem:[%s16569_s5 + $0x4c] ss:$16 sps:$4 sm:$0xff]   ;;  %v10823_v63 = vld [vmem:[%s16569_s5 + $0x1a4] ss:$16 sps:$4 sm:$0xff]  }
 0x1cb   : > { %4518 = vmatpush1.bf16.msra.mxu0 %v10779_v37  ;;  %v10833_v37 = vld [vmem:[%s16569_s5 + $0x188] ss:$16 sps:$4 sm:$0xff]  }
 0x1cc   : > { %4519 = vmatprep.subr.bf16.mxu0 %v10784_v34  ;;  %v10838_v34 = vld [vmem:[%s16569_s5 + $0x1ac] ss:$16 sps:$4 sm:$0xff]  }
 0x1cd   : > { %4134 = vmatpush1.bf16.msra.mxu1 %v10755_v16  ;;  %v17039_v16 = vld [vmem:[#allocation17_spill] sm:$0xff] }
 0x1ce   : > { %4135 = vmatprep.subr.bf16.mxu1 %v10760_v12  ;;  %v10821_v12 = vld [vmem:[%s16569_s5 + $0x1a0] ss:$16 sps:$4 sm:$0xff]  }
 0x1cf   : > { %4520 = vmatpush1.bf16.msra.mxu0 %v10782_v36  ;;  %v10832_v36 = vld [vmem:[%s16569_s5 + $0x1c4] ss:$16 sps:$4 sm:$0xff]  }
 0x1d0   : > { %2550 = vmatmul.mubr.bf16.gmra.mrb[68].mxu1 %v12350_v1  ;;  %2743 = vmatmul.mubr.bf16.gmra.mrb[132].mxu0 %v12350_v1  ;;  %v10791_v1 = vld [vmem:[%s16569_s5 + $0x68] ss:$16 sps:$4 sm:$0xff]  }
 0x1d1   : > { %2559 = vmatprep.mubr.bf16.mxu1 %v12397_v22  ;;  %2752 = vmatprep.mubr.bf16.mxu0 %v12397_v22  ;;  %v10764_v22 = vld [vmem:[%s16569_s5 + $0x80] ss:$16 sps:$4 sm:$0xff]  }
 0x1d2   : > { %4136 = vmatpush1.bf16.msra.mxu1 %v10758_v13  ;;  %4521 = vmatprep.subr.bf16.mxu0 %v10790_v10  ;;  %v10836_v13 = vld [vmem:[%s16569_s5 + $0x1a8] ss:$16 sps:$4 sm:$0xff]   ;;  %v10830_v10 = vld [vmem:[%s16569_s5 + $0x1c0] ss:$16 sps:$4 sm:$0xff]  }
 0x1d3   : > { %4137 = vmatprep.subr.bf16.mxu1 %v10763_v53  ;;  %4522 = vmatpush1.bf16.msra.mxu0 %v10788_v62  ;;  %v10844_v53 = vld [vmem:[%s16569_s5 + $0x1cc] ss:$16 sps:$4 sm:$0xff]   ;;  %v10841_v62 = vld [vmem:[%s16569_s5 + $0x1e4] ss:$16 sps:$4 sm:$0xff]  }
 0x1d4   : > { %4523 = vmatprep.subr.bf16.mxu0 %v10793_v26  ;;  %v10842_v26 = vld [vmem:[%s16569_s5 + $0x1c8] ss:$16 sps:$4 sm:$0xff]  }
 0x1d6   : > { %4138 = vmatpush1.bf16.msra.mxu1 %v10761_v35  ;;  %v17040_v35 = vld [vmem:[#allocation18_spill] sm:$0xff] }
 0x1d7   : > { %4139 = vmatprep.subr.bf16.mxu1 %v10766_v59  ;;  %4524 = vmatpush1.bf16.msra.mxu0 %v10791_v1  ;;  %v17041_v59 = vld [vmem:[#allocation2_spill] sm:$0xff] }
 0x1d8   : > { %2560 = vmatmul.mubr.bf16.gmra.mrb[72].mxu1 %v12430_v25  ;;  %2753 = vmatmul.mubr.bf16.gmra.mrb[136].mxu0 %v12430_v25  ;;  %v10800_v25 = vld [vmem:[%s16569_s5 + $0xa8] ss:$16 sps:$4 sm:$0xff]   ;;  %v13276_v1 = vsub.s32 2, %v17041_v59 }
 0x1d9   : > { %2569 = vmatprep.mubr.bf16.mxu1 %v12457_v47  ;;  %2762 = vmatprep.mubr.bf16.mxu0 %v12457_v47  ;;  %v10770_v47 = vld [vmem:[%s16569_s5 + $0xc0] ss:$16 sps:$4 sm:$0xff]  }
 0x1da   : > { %4140 = vmatpush1.bf16.msra.mxu1 %v10764_v22  ;;  %4525 = vmatprep.subr.bf16.mxu0 %v10799_v17  ;;  %17042 = vst [vmem:[#allocation22_spill] sm:$0xff] %v13276_v1  ;;  %v10847_v22 = vld [vmem:[%s16569_s5 + $0x1ec] ss:$16 sps:$4 sm:$0xff]  }
 0x1db   : > { %4141 = vmatprep.subr.bf16.mxu1 %v10769_v48  ;;  %4526 = vmatpush1.bf16.msra.mxu0 %v10797_v8  ;;  %v17043_v17 = vld [vmem:[#allocation23_spill] sm:$0xff]  ;;  %v1439_v48 = vld [vmem:[%s16568_s4] sm:$0xff]  ;;  %v13287_v8 = vsub.s32 3, %v17041_v59 }
 0x1dc   : > { %4527 = vmatprep.subr.bf16.mxu0 %v10802_v55  ;;  %v10839_v55 = vld [vmem:[%s16569_s5 + $0x1e0] ss:$16 sps:$4 sm:$0xff]  }
 0x1dd   : > { %17044 = vst [vmem:[#allocation9_spill] sm:$0xff] %v13287_v8 }
 0x1de   : > { %4142 = vmatpush1.bf16.msra.mxu1 %v10767_v39  ;;  %v10845_v39 = vld [vmem:[%s16569_s5 + $0x1e8] ss:$16 sps:$4 sm:$0xff]  }
 0x1df   : > { %4143 = vmatprep.subr.bf16.mxu1 %v10772_v14  ;;  %4528 = vmatpush1.bf16.msra.mxu0 %v10800_v25  ;;  %v10850_v14 = vld [vmem:[%s16569_s5 + $0x204] ss:$16 sps:$4 sm:$0xff]   ;;  %v17045_v25 = vld [vmem:[#allocation3_spill] sm:$0xff] }
 0x1e0   : > { %2570 = vmatmul.mubr.bf16.gmra.mrb[76].mxu1 %v12498_v20  ;;  %2763 = vmatmul.mubr.bf16.gmra.mrb[140].mxu0 %v12498_v20  ;;  %v10809_v20 = vld [vmem:[%s16569_s5 + $0xe8] ss:$16 sps:$4 sm:$0xff]  }
 0x1e1   : > { %2579 = vmatprep.mubr.bf16.mxu1 %v12527_v30  ;;  %2772 = vmatprep.mubr.bf16.mxu0 %v12527_v30  ;;  %v10776_v30 = vld [vmem:[%s16569_s5 + $0x100] ss:$16 sps:$4 sm:$0xff]  }
 0x1e2   : > { %4144 = vmatpush1.bf16.msra.mxu1 %v10770_v47  ;;  %4529 = vmatprep.subr.bf16.mxu0 %v10808_v0  ;;  %v13299_v47 = vrot.slane %v1439_v48, %v17045_v25  ;;  %v13302_v0 = vrot.slane %v1439_v48, %v13276_v1 }
 0x1e3   : > { %4145 = vmatprep.subr.bf16.mxu1 %v10775_v29  ;;  %4530 = vmatpush1.bf16.msra.mxu0 %v10806_v61  ;;  %v17046_v29 = vld [vmem:[#allocation4_spill] sm:$0xff] }
 0x1e4   : > { %4531 = vmatprep.subr.bf16.mxu0 %v10811_v31  ;;  %v13305_v61 = vrot.slane %v1439_v48, %v17046_v29  ;;  %v13308_v31 = vrot.slane %v1439_v48, %v13287_v8 }
 0x1e6   : > { %4146 = vmatpush1.bf16.msra.mxu1 %v10773_v51 }
 0x1e7   : > { %4147 = vmatprep.subr.bf16.mxu1 %v10778_v28  ;;  %4532 = vmatpush1.bf16.msra.mxu0 %v10809_v20  ;;  %v17047_v20 = vld [vmem:[#allocation7_spill] sm:$0xff] }
 0x1e8   : > { %2580 = vmatmul.mubr.bf16.gmra.mrb[80].mxu1 %v12551_v6  ;;  %2773 = vmatmul.mubr.bf16.gmra.mrb[144].mxu0 %v12551_v6  ;;  %v10818_v6 = vld [vmem:[%s16569_s5 + $0x128] ss:$16 sps:$4 sm:$0xff]  }
 0x1e9   : > { %2589 = vmatprep.mubr.bf16.mxu1 %v17035_v27  ;;  %2782 = vmatprep.mubr.bf16.mxu0 %v17035_v27 }
 0x1ea   : > { %4148 = vmatpush1.bf16.msra.mxu1 %v10776_v30  ;;  %4533 = vmatprep.subr.bf16.mxu0 %v10817_v60 }
 0x1eb   : > { %4149 = vmatprep.subr.bf16.mxu1 %v10787_v4  ;;  %4534 = vmatpush1.bf16.msra.mxu0 %v10815_v49 }
 0x1ec   : > { %4535 = vmatprep.subr.bf16.mxu0 %v10820_v44  ;;  %v17048_v44 = vld [vmem:[#allocation8_spill] sm:$0xff] }
 0x1ee   : > { %4150 = vmatpush1.bf16.msra.mxu1 %v10785_v57 }
 0x1ef   : > { %4151 = vmatprep.subr.bf16.mxu1 %v10796_v32  ;;  %4536 = vmatpush1.bf16.msra.mxu0 %v10818_v6 }
 0x1f0   : > { %2590 = vmatmul.mubr.bf16.gmra.mrb[84].mxu1 %v17036_v21  ;;  %2783 = vmatmul.mubr.bf16.gmra.mrb[148].mxu0 %v17036_v21 }
 0x1f1   : > { %2599 = vmatprep.mubr.bf16.mxu1 %v17037_v43  ;;  %2792 = vmatprep.mubr.bf16.mxu0 %v17037_v43 }
 0x1f2   : > { %4152 = vmatpush1.bf16.msra.mxu1 %v10794_v9  ;;  %4537 = vmatprep.subr.bf16.mxu0 %v10826_v50 }
 0x1f3   : > { %4153 = vmatprep.subr.bf16.mxu1 %v10805_v52  ;;  %4538 = vmatpush1.bf16.msra.mxu0 %v10824_v56 }
 0x1f4   : > { %4539 = vmatprep.subr.bf16.mxu0 %v10829_v40 }
 0x1f6   : > { %4154 = vmatpush1.bf16.msra.mxu1 %v10803_v15 }
 0x1f7   : > { %4155 = vmatprep.subr.bf16.mxu1 %v10814_v18  ;;  %4540 = vmatpush1.bf16.msra.mxu0 %v10827_v45 }
 0x1f8   : > { %2600 = vmatmul.mubr.bf16.gmra.mrb[88].mxu1 %v17038_v38  ;;  %2793 = vmatmul.mubr.bf16.gmra.mrb[152].mxu0 %v17038_v38 }
 0x1f9   : > { %2609 = vmatprep.mubr.bf16.mxu1 %v17039_v16  ;;  %2802 = vmatprep.mubr.bf16.mxu0 %v17039_v16 }
 0x1fa   : > { %4156 = vmatpush1.bf16.msra.mxu1 %v10812_v5  ;;  %4541 = vmatprep.subr.bf16.mxu0 %v10835_v2  ;;  %v10877_v5 = vld [vmem:[%s16569_s5 + $0x20c] ss:$16 sps:$4 sm:$0xff]  }
 0x1fb   : > { %4157 = vmatprep.subr.bf16.mxu1 %v10823_v63  ;;  %4542 = vmatpush1.bf16.msra.mxu0 %v10833_v37 }
 0x1fc   : > { %4543 = vmatprep.subr.bf16.mxu0 %v10838_v34  ;;  %v2155_v51 = vpop.f32.mrb[0].mxu1  ;;  %v2348_v28 = vpop.f32.mrb[64].mxu0 }
 0x1fd   : > { %v2156_v30 = vadd.f32 %v2155_v51, %v13299_v47  ;;  %v2349_v60 = vadd.f32 %v2348_v28, %v13302_v0  ;;  %v2157_v4 = vpop.f32.mrb[1].mxu1  ;;  %v2350_v49 = vpop.f32.mrb[65].mxu0 }
 0x1fe   : > { %4158 = vmatpush1.bf16.msra.mxu1 %v10821_v12  ;;  %v2158_v27 = vadd.f32 %v2157_v4, %v13305_v61  ;;  %v2351_v57 = vadd.f32 %v2350_v49, %v13308_v31  ;;  %v2159_v32 = vpop.f32.mrb[2].mxu1  ;;  %v2352_v6 = vpop.f32.mrb[66].mxu0 }
 0x1ff   : > { %4159 = vmatprep.subr.bf16.mxu1 %v10832_v36  ;;  %4544 = vmatpush1.bf16.msra.mxu0 %v10836_v13  ;;  %v2893_v9 = vmax.f32 %v2156_v30, 0.0  ;;  %v2895_v50 = vmax.f32 %v2349_v60, 0.0  ;;  %v2160_v52 = vadd.f32 %v2159_v32, %v13299_v47  ;;  %v2353_v56 = vadd.f32 %v2352_v6, %v13302_v0  ;;  %v2161_v21 = vpop.f32.mrb[3].mxu1  ;;  %v2354_v40 = vpop.f32.mrb[67].mxu0  ;;  %v17049_v13 = vld [vmem:[#allocation21_spill] sm:$0xff] }
 0x200   : > { %2610 = vmatmul.mubr.bf16.gmra.mrb[92].mxu1 %v17040_v35  ;;  %2803 = vmatmul.mubr.bf16.gmra.mrb[156].mxu0 %v17040_v35  ;;  %v2894_v43 = vmax.f32 %v2158_v27, 0.0  ;;  %v2896_v15 = vmax.f32 %v2351_v57, 0.0  ;;  %v2162_v18 = vadd.f32 %v2161_v21, %v13305_v61  ;;  %v2355_v45 = vadd.f32 %v2354_v40, %v13308_v31 }
 0x201   : > { %2619 = vmatprep.mubr.bf16.mxu1 %v17043_v17  ;;  %2812 = vmatprep.mubr.bf16.mxu0 %v17043_v17  ;;  %v2901_v2 = vmax.f32 %v2160_v52, 0.0  ;;  %v2903_v63 = vmax.f32 %v2353_v56, 0.0 }
 0x202   : > { %4160 = vmatpush1.bf16.msra.mxu1 %v10830_v10  ;;  %4545 = vmatprep.subr.bf16.mxu0 %v10844_v53  ;;  %v3149_v37 = vadd.f32 %v2894_v43, %v2893_v9  ;;  %v2902_v38 = vmax.f32 %v2162_v18, 0.0  ;;  %v2904_v34 = vmax.f32 %v2355_v45, 0.0  ;;  %v3181_v16 = vadd.f32 %v2896_v15, %v2895_v50 }
 0x203   : > { %4161 = vmatprep.subr.bf16.mxu1 %v10841_v62  ;;  %4546 = vmatpush1.bf16.msra.mxu0 %v10842_v26 }
 0x204   : > { %4547 = vmatprep.subr.bf16.mxu0 %v10847_v22  ;;  %v3150_v12 = vadd.f32 %v2902_v38, %v2901_v2  ;;  %v3182_v36 = vadd.f32 %v2904_v34, %v2903_v63 }
 0x206   : > { %4162 = vmatpush1.bf16.msra.mxu1 %v10839_v55  ;;  %v13329_v10 = vpack.c.bf16 %v3150_v12, %v3149_v37  ;;  %v13331_v53 = vpack.c.bf16 %v3182_v36, %v3181_v16 }
 0x207   : > { %4548 = vmatpush1.bf16.msra.mxu0 %v10845_v39  ;;  %4324 = vmatprep.subr.bf16.mxu1 %v10850_v14 }
 0x208   : > { %2620 = vmatmul.mubr.bf16.gmra.mrb[96].mxu1 %v17047_v20  ;;  %2813 = vmatmul.mubr.bf16.gmra.mrb[160].mxu0 %v17047_v20 }
 0x209   : > { %2629 = vmatprep.mubr.bf16.mxu1 %v17048_v44  ;;  %2822 = vmatprep.mubr.bf16.mxu0 %v17048_v44  ;;  %v2165_v62 = vpop.f32.mrb[4].mxu1  ;;  %v2358_v26 = vpop.f32.mrb[68].mxu0 }
 0x20a   : > { %4710 = vmatprep.subr.bf16.mxu0 %v10877_v5  ;;  %v2166_v35 = vadd.f32 %v2165_v62, %v13299_v47  ;;  %v2359_v22 = vadd.f32 %v2358_v26, %v13302_v0  ;;  %v2167_v17 = vpop.f32.mrb[5].mxu1  ;;  %v2360_v48 = vpop.f32.mrb[69].mxu0 }
 0x20b   : > { %v2168_v55 = vadd.f32 %v2167_v17, %v13305_v61  ;;  %v2361_v39 = vadd.f32 %v2360_v48, %v13308_v31  ;;  %v2169_v14 = vpop.f32.mrb[6].mxu1  ;;  %v2362_v51 = vpop.f32.mrb[70].mxu0 }
 0x20c   : > { %v2909_v28 = vmax.f32 %v2166_v35, 0.0  ;;  %v2170_v20 = vadd.f32 %v2169_v14, %v13299_v47  ;;  %v2363_v30 = vadd.f32 %v2362_v51, %v13302_v0  ;;  %v2171_v60 = vpop.f32.mrb[7].mxu1  ;;  %v2364_v4 = vpop.f32.mrb[71].mxu0 }
 0x20d   : > { %v2910_v49 = vmax.f32 %v2168_v55, 0.0  ;;  %v2912_v44 = vmax.f32 %v2361_v39, 0.0  ;;  %v2172_v27 = vadd.f32 %v2171_v60, %v13305_v61  ;;  %v2365_v57 = vadd.f32 %v2364_v4, %v13308_v31 }
 0x20e   : > { %v2917_v32 = vmax.f32 %v2170_v20, 0.0  ;;  %v2919_v6 = vmax.f32 %v2363_v30, 0.0 }
 0x20f   : > { %v2918_v9 = vmax.f32 %v2172_v27, 0.0  ;;  %v2920_v50 = vmax.f32 %v2365_v57, 0.0  ;;  %v3151_v56 = vadd.f32 %v2910_v49, %v2909_v28 }
 0x210   : > { %2630 = vmatmul.mubr.bf16.gmra.mrb[100].mxu1 %v17049_v13  ;;  %2823 = vmatmul.mubr.bf16.gmra.mrb[164].mxu0 %v17049_v13 }
 0x211   : > { %2639 = vmatprep.mubr.bf16.mxu1 %v12840_v42  ;;  %2832 = vmatprep.mubr.bf16.mxu0 %v12840_v42  ;;  %v2911_v42 = vmax.f32 %v2359_v22, 0.0  ;;  %v3184_v21 = vadd.f32 %v2920_v50, %v2919_v6  ;;  %v3152_v40 = vadd.f32 %v2918_v9, %v2917_v32 }
 0x213   : > { %v3183_v52 = vadd.f32 %v2912_v44, %v2911_v42  ;;  %v13347_v15 = vpack.c.bf16 %v3152_v40, %v3151_v56 }
 0x215   : > { %v13345_v43 = vpack.c.bf16 %v3184_v21, %v3183_v52 }
 0x217   : > { %v2175_v18 = vpop.f32.mrb[8].mxu1  ;;  %v2368_v45 = vpop.f32.mrb[72].mxu0 }
 0x218   : > { %2640 = vmatmul.mubr.bf16.gmra.mrb[104].mxu1 %v12859_v46  ;;  %2833 = vmatmul.mubr.bf16.gmra.mrb[168].mxu0 %v12859_v46  ;;  %v2176_v5 = vadd.f32 %v2175_v18, %v13299_v47  ;;  %v2369_v46 = vadd.f32 %v2368_v45, %v13302_v0  ;;  %v2177_v2 = vpop.f32.mrb[9].mxu1  ;;  %v2370_v63 = vpop.f32.mrb[73].mxu0 }
 0x219   : > { %2649 = vmatprep.mubr.bf16.mxu1 %v12887_v58  ;;  %2842 = vmatprep.mubr.bf16.mxu0 %v12887_v58  ;;  %v2178_v37 = vadd.f32 %v2177_v2, %v13305_v61  ;;  %v2371_v38 = vadd.f32 %v2370_v63, %v13308_v31  ;;  %v2179_v34 = vpop.f32.mrb[10].mxu1  ;;  %v2372_v58 = vpop.f32.mrb[74].mxu0 }
 0x21a   : > { %v2925_v16 = vmax.f32 %v2176_v5, 0.0  ;;  %v2927_v12 = vmax.f32 %v2369_v46, 0.0  ;;  %v2180_v36 = vadd.f32 %v2179_v34, %v13299_v47  ;;  %v2373_v13 = vadd.f32 %v2372_v58, %v13302_v0  ;;  %v2181_v62 = vpop.f32.mrb[11].mxu1  ;;  %v2374_v26 = vpop.f32.mrb[75].mxu0 }
 0x21b   : > { %v2926_v35 = vmax.f32 %v2178_v37, 0.0  ;;  %v2928_v22 = vmax.f32 %v2371_v38, 0.0  ;;  %v2182_v17 = vadd.f32 %v2181_v62, %v13305_v61  ;;  %v2375_v48 = vadd.f32 %v2374_v26, %v13308_v31 }
 0x21c   : > { %v2933_v55 = vmax.f32 %v2180_v36, 0.0 }
 0x21d   : > { %v2934_v39 = vmax.f32 %v2182_v17, 0.0  ;;  %v2936_v14 = vmax.f32 %v2375_v48, 0.0  ;;  %v3185_v51 = vadd.f32 %v2928_v22, %v2927_v12  ;;  %v3153_v28 = vadd.f32 %v2926_v35, %v2925_v16 }
 0x21f   : > { %v3154_v20 = vadd.f32 %v2934_v39, %v2933_v55 }
 0x220   : > { %2650 = vmatmul.mubr.bf16.gmra.mrb[108].mxu1 %v12897_v19  ;;  %2843 = vmatmul.mubr.bf16.gmra.mrb[172].mxu0 %v12897_v19  ;;  %v2935_v19 = vmax.f32 %v2373_v13, 0.0 }
 0x221   : > { %2659 = vmatprep.mubr.bf16.mxu1 %v12946_v23  ;;  %2852 = vmatprep.mubr.bf16.mxu0 %v12946_v23  ;;  %v2185_v30 = vpop.f32.mrb[12].mxu1  ;;  %v13365_v57 = vpack.c.bf16 %v3154_v20, %v3153_v28 }
 0x222   : > { %v3186_v42 = vadd.f32 %v2936_v14, %v2935_v19  ;;  %v2378_v60 = vpop.f32.mrb[76].mxu0  ;;  %v2186_v4 = vadd.f32 %v2185_v30, %v13299_v47  ;;  %v2187_v49 = vpop.f32.mrb[13].mxu1 }
 0x223   : > { %v2379_v23 = vadd.f32 %v2378_v60, %v13302_v0  ;;  %v2380_v44 = vpop.f32.mrb[77].mxu0  ;;  %v2188_v32 = vadd.f32 %v2187_v49, %v13305_v61  ;;  %v2189_v9 = vpop.f32.mrb[14].mxu1 }
 0x224   : > { %v13363_v27 = vpack.c.bf16 %v3186_v42, %v3185_v51  ;;  %v2381_v6 = vadd.f32 %v2380_v44, %v13308_v31  ;;  %v2382_v50 = vpop.f32.mrb[78].mxu0  ;;  %v2941_v52 = vmax.f32 %v2186_v4, 0.0  ;;  %v2190_v21 = vadd.f32 %v2189_v9, %v13299_v47  ;;  %v2191_v18 = vpop.f32.mrb[15].mxu1 }
 0x225   : > { %v2943_v56 = vmax.f32 %v2379_v23, 0.0  ;;  %v2383_v40 = vadd.f32 %v2382_v50, %v13302_v0  ;;  %v2384_v45 = vpop.f32.mrb[79].mxu0  ;;  %v2942_v5 = vmax.f32 %v2188_v32, 0.0  ;;  %v2192_v46 = vadd.f32 %v2191_v18, %v13305_v61 }
 0x226   : > { %v2385_v2 = vadd.f32 %v2384_v45, %v13308_v31  ;;  %v2949_v63 = vmax.f32 %v2190_v21, 0.0 }
 0x227   : > { %v2951_v37 = vmax.f32 %v2383_v40, 0.0  ;;  %v2950_v38 = vmax.f32 %v2192_v46, 0.0 }
 0x228   : > { %2660 = vmatmul.mubr.bf16.gmra.mrb[112].mxu1 %v12973_v54  ;;  %2853 = vmatmul.mubr.bf16.gmra.mrb[176].mxu0 %v12973_v54  ;;  %v2944_v54 = vmax.f32 %v2381_v6, 0.0  ;;  %v2952_v34 = vmax.f32 %v2385_v2, 0.0 }
 0x229   : > { %2669 = vmatprep.mubr.bf16.mxu1 %v12993_v3  ;;  %2862 = vmatprep.mubr.bf16.mxu0 %v12993_v3  ;;  %v3155_v3 = vadd.f32 %v2942_v5, %v2941_v52  ;;  %v3156_v12 = vadd.f32 %v2950_v38, %v2949_v63 }
 0x22a   : > { %v3187_v58 = vadd.f32 %v2944_v54, %v2943_v56  ;;  %v3188_v16 = vadd.f32 %v2952_v34, %v2951_v37 }
 0x22b   : > { %v13387_v14 = vpack.c.bf16 %v3156_v12, %v3155_v3 }
 0x22c   : > { %v2195_v36 = vpop.f32.mrb[16].mxu1  ;;  %v2388_v13 = vpop.f32.mrb[80].mxu0  ;;  %v13381_v17 = vpack.c.bf16 %v3188_v16, %v3187_v58 }
 0x22d   : > { %v2196_v62 = vadd.f32 %v2195_v36, %v13299_v47  ;;  %v2389_v26 = vadd.f32 %v2388_v13, %v13302_v0  ;;  %v2197_v35 = vpop.f32.mrb[17].mxu1  ;;  %v2390_v22 = vpop.f32.mrb[81].mxu0 }
 0x22e   : > { %v2198_v48 = vadd.f32 %v2197_v35, %v13305_v61  ;;  %v2391_v55 = vadd.f32 %v2390_v22, %v13308_v31  ;;  %v2199_v19 = vpop.f32.mrb[18].mxu1  ;;  %v2392_v39 = vpop.f32.mrb[82].mxu0 }
 0x22f   : > { %v2959_v51 = vmax.f32 %v2389_v26, 0.0  ;;  %v2200_v28 = vadd.f32 %v2199_v19, %v13299_v47  ;;  %v2393_v42 = vadd.f32 %v2392_v39, %v13302_v0  ;;  %v2201_v20 = vpop.f32.mrb[19].mxu1  ;;  %v2394_v30 = vpop.f32.mrb[83].mxu0 }
 0x230   : > { %2670 = vmatmul.mubr.bf16.gmra.mrb[116].mxu1 %v13010_v33  ;;  %2863 = vmatmul.mubr.bf16.gmra.mrb[180].mxu0 %v13010_v33  ;;  %v2957_v33 = vmax.f32 %v2196_v62, 0.0  ;;  %v2958_v60 = vmax.f32 %v2198_v48, 0.0  ;;  %v2960_v4 = vmax.f32 %v2391_v55, 0.0  ;;  %v2395_v23 = vadd.f32 %v2394_v30, %v13308_v31 }
 0x231   : > { %2679 = vmatprep.mubr.bf16.mxu1 %v13027_v41  ;;  %2872 = vmatprep.mubr.bf16.mxu0 %v13027_v41  ;;  %v2202_v41 = vadd.f32 %v2201_v20, %v13305_v61  ;;  %v2965_v49 = vmax.f32 %v2200_v28, 0.0  ;;  %v2967_v44 = vmax.f32 %v2393_v42, 0.0 }
 0x232   : > { %v2968_v6 = vmax.f32 %v2395_v23, 0.0  ;;  %v3189_v9 = vadd.f32 %v2960_v4, %v2959_v51  ;;  %v3157_v50 = vadd.f32 %v2958_v60, %v2957_v33 }
 0x233   : > { %v2966_v32 = vmax.f32 %v2202_v41, 0.0 }
 0x234   : > { %v3190_v21 = vadd.f32 %v2968_v6, %v2967_v44 }
 0x235   : > { %v2205_v52 = vpop.f32.mrb[20].mxu1  ;;  %v2398_v56 = vpop.f32.mrb[84].mxu0  ;;  %v3158_v40 = vadd.f32 %v2966_v32, %v2965_v49 }
 0x236   : > { %v2206_v18 = vadd.f32 %v2205_v52, %v13299_v47  ;;  %v2399_v45 = vadd.f32 %v2398_v56, %v13302_v0  ;;  %v2207_v5 = vpop.f32.mrb[21].mxu1  ;;  %v2400_v54 = vpop.f32.mrb[85].mxu0  ;;  %v13401_v38 = vpack.c.bf16 %v3190_v21, %v3189_v9 }
 0x237   : > { %v2208_v46 = vadd.f32 %v2207_v5, %v13305_v61  ;;  %v2401_v2 = vadd.f32 %v2400_v54, %v13308_v31  ;;  %v2209_v63 = vpop.f32.mrb[22].mxu1  ;;  %v2402_v37 = vpop.f32.mrb[86].mxu0  ;;  %v13407_v22 = vpack.c.bf16 %v3158_v40, %v3157_v50  ;;  %v10853_v54 = vld [vmem:[%s16569_s5 + $0x224] ss:$16 sps:$4 sm:$0xff]  }
 0x238   : > { %2680 = vmatmul.mubr.bf16.gmra.mrb[120].mxu1 %v13043_v24  ;;  %2873 = vmatmul.mubr.bf16.gmra.mrb[184].mxu0 %v13043_v24  ;;  %v2973_v34 = vmax.f32 %v2206_v18, 0.0  ;;  %v2975_v24 = vmax.f32 %v2399_v45, 0.0  ;;  %v2210_v58 = vadd.f32 %v2209_v63, %v13299_v47  ;;  %v2403_v3 = vadd.f32 %v2402_v37, %v13302_v0  ;;  %v2211_v16 = vpop.f32.mrb[23].mxu1  ;;  %v2404_v12 = vpop.f32.mrb[87].mxu0  ;;  %v10875_v63 = vld [vmem:[%s16569_s5 + $0x208] ss:$16 sps:$4 sm:$0xff]  }
 0x239   : > { %2689 = vmatprep.mubr.bf16.mxu1 %v13047_v7  ;;  %2882 = vmatprep.mubr.bf16.mxu0 %v13047_v7  ;;  %v2974_v36 = vmax.f32 %v2208_v46, 0.0  ;;  %v2976_v13 = vmax.f32 %v2401_v2, 0.0  ;;  %v2212_v7 = vadd.f32 %v2211_v16, %v13305_v61  ;;  %v2405_v62 = vadd.f32 %v2404_v12, %v13308_v31  ;;  %v10851_v16 = vld [vmem:[%s16569_s5 + $0x220] ss:$16 sps:$4 sm:$0xff]  }
 0x23a   : > { %v2981_v26 = vmax.f32 %v2210_v58, 0.0  ;;  %v2983_v35 = vmax.f32 %v2403_v3, 0.0  ;;  %v10880_v3 = vld [vmem:[%s16569_s5 + $0x22c] ss:$16 sps:$4 sm:$0xff]  }
 0x23b   : > { %v2982_v48 = vmax.f32 %v2212_v7, 0.0  ;;  %v2984_v55 = vmax.f32 %v2405_v62, 0.0  ;;  %v3191_v19 = vadd.f32 %v2976_v13, %v2975_v24  ;;  %v3159_v39 = vadd.f32 %v2974_v36, %v2973_v34  ;;  %v10878_v62 = vld [vmem:[%s16569_s5 + $0x228] ss:$16 sps:$4 sm:$0xff]  }
 0x23d   : > { %v3192_v33 = vadd.f32 %v2984_v55, %v2983_v35  ;;  %v3160_v51 = vadd.f32 %v2982_v48, %v2981_v26 }
 0x23f   : > { %v13413_v28 = vpack.c.bf16 %v3192_v33, %v3191_v19  ;;  %v13415_v42 = vpack.c.bf16 %v3160_v51, %v3159_v39 }
 0x240   : > { %2690 = vmatmul.mubr.bf16.gmra.mrb[124].mxu1 %v13049_v11  ;;  %2883 = vmatmul.mubr.bf16.gmra.mrb[188].mxu0 %v13049_v11  ;;  %v2215_v20 = vpop.f32.mrb[24].mxu1  ;;  %v2408_v30 = vpop.f32.mrb[88].mxu0 }
 0x241   : > { %4163 = vmatprep.mubr.bf16.mxu1 %v13331_v53  ;;  %4549 = vmatprep.mubr.bf16.mxu0 %v13331_v53  ;;  %v2216_v60 = vadd.f32 %v2215_v20, %v13299_v47  ;;  %v2409_v4 = vadd.f32 %v2408_v30, %v13302_v0  ;;  %v2217_v41 = vpop.f32.mrb[25].mxu1  ;;  %v2410_v23 = vpop.f32.mrb[89].mxu0  ;;  %v10848_v53 = vld [vmem:[%s16569_s5 + $0x200] ss:$16 sps:$4 sm:$0xff]  }
 0x242   : > { %v2218_v49 = vadd.f32 %v2217_v41, %v13305_v61  ;;  %v2411_v11 = vadd.f32 %v2410_v23, %v13308_v31  ;;  %v2219_v44 = vpop.f32.mrb[26].mxu1  ;;  %v2412_v32 = vpop.f32.mrb[90].mxu0  ;;  %v10854_v30 = vld [vmem:[%s16569_s5 + $0x240] ss:$16 sps:$4 sm:$0xff]  }
 0x243   : > { %v2989_v6 = vmax.f32 %v2216_v60, 0.0  ;;  %v2991_v9 = vmax.f32 %v2409_v4, 0.0  ;;  %v2220_v50 = vadd.f32 %v2219_v44, %v13299_v47  ;;  %v2413_v52 = vadd.f32 %v2412_v32, %v13302_v0  ;;  %v2221_v56 = vpop.f32.mrb[27].mxu1  ;;  %v2414_v21 = vpop.f32.mrb[91].mxu0  ;;  %v10886_v44 = vld [vmem:[%s16569_s5 + $0x24c] ss:$16 sps:$4 sm:$0xff]  }
 0x244   : > { %v2990_v40 = vmax.f32 %v2218_v49, 0.0  ;;  %v2992_v18 = vmax.f32 %v2411_v11, 0.0  ;;  %v2222_v45 = vadd.f32 %v2221_v56, %v13305_v61  ;;  %v2415_v5 = vadd.f32 %v2414_v21, %v13308_v31 }
 0x245   : > { %v2997_v46 = vmax.f32 %v2220_v50, 0.0  ;;  %v2999_v2 = vmax.f32 %v2413_v52, 0.0  ;;  %v10859_v50 = vld [vmem:[%s16569_s5 + $0x264] ss:$16 sps:$4 sm:$0xff]   ;;  %v10884_v52 = vld [vmem:[%s16569_s5 + $0x248] ss:$16 sps:$4 sm:$0xff]  }
 0x246   : > { %v2998_v37 = vmax.f32 %v2222_v45, 0.0  ;;  %v3000_v34 = vmax.f32 %v2415_v5, 0.0  ;;  %v3193_v24 = vadd.f32 %v2992_v18, %v2991_v9  ;;  %v3161_v58 = vadd.f32 %v2990_v40, %v2989_v6  ;;  %v10889_v40 = vld [vmem:[%s16569_s5 + $0x26c] ss:$16 sps:$4 sm:$0xff]  }
 0x248   : > { %4164 = vmatmul.mubr.bf16.vlgmr.msra.gmra.mrb[128].mxu1 %v13329_v10  ;;  %4550 = vmatmul.mubr.bf16.vlgmr.msra.gmra.mrb[192].mxu0 %v13329_v10  ;;  %v10856_v10 = vld [vmem:[%s16569_s5 + $0x244] ss:$16 sps:$4 sm:$0xff]   ;;  %v3194_v12 = vadd.f32 %v3000_v34, %v2999_v2  ;;  %v3162_v36 = vadd.f32 %v2998_v37, %v2997_v46  ;;  %v10857_v46 = vld [vmem:[%s16569_s5 + $0x260] ss:$16 sps:$4 sm:$0xff]  }
 0x249   : > { %4325 = vmatpush1.bf16.msra.mxu1 %v10848_v53  ;;  %4173 = vmatprep.mubr.bf16.mxu1 %v13345_v43  ;;  %v2225_v13 = vpop.f32.mrb[28].mxu1  ;;  %v2418_v7 = vpop.f32.mrb[92].mxu0 }
 0x24a   : > { %4559 = vmatprep.mubr.bf16.mxu0 %v13345_v43  ;;  %4326 = vmatprep.subr.bf16.mxu1 %v10853_v54  ;;  %v2226_v26 = vadd.f32 %v2225_v13, %v13299_v47  ;;  %v2419_v35 = vadd.f32 %v2418_v7, %v13302_v0  ;;  %v2227_v48 = vpop.f32.mrb[29].mxu1  ;;  %v2420_v43 = vpop.f32.mrb[93].mxu0  ;;  %v13452_v55 = vpack.c.bf16 %v3194_v12, %v3193_v24  ;;  %v10895_v13 = vld [vmem:[%s16569_s5 + $0x28c] ss:$16 sps:$4 sm:$0xff]  }
 0x24b   : > { %4711 = vmatpush1.bf16.msra.mxu0 %v10875_v63  ;;  %v13454_v19 = vpack.c.bf16 %v3162_v36, %v3161_v58  ;;  %v2228_v39 = vadd.f32 %v2227_v48, %v13305_v61  ;;  %v2421_v33 = vadd.f32 %v2420_v43, %v13308_v31  ;;  %v2229_v51 = vpop.f32.mrb[30].mxu1  ;;  %v2422_v20 = vpop.f32.mrb[94].mxu0  ;;  %v10860_v36 = vld [vmem:[%s16569_s5 + $0x280] ss:$16 sps:$4 sm:$0xff]   ;;  %v10865_v48 = vld [vmem:[%s16569_s5 + $0x2a4] ss:$16 sps:$4 sm:$0xff]  }
 0x24c   : > { %4712 = vmatprep.subr.bf16.mxu0 %v10880_v3  ;;  %v3005_v60 = vmax.f32 %v2226_v26, 0.0  ;;  %v3007_v4 = vmax.f32 %v2419_v35, 0.0  ;;  %v2230_v41 = vadd.f32 %v2229_v51, %v13299_v47  ;;  %v2423_v23 = vadd.f32 %v2422_v20, %v13302_v0  ;;  %v2231_v49 = vpop.f32.mrb[31].mxu1  ;;  %v2424_v11 = vpop.f32.mrb[95].mxu0  ;;  %v10893_v43 = vld [vmem:[%s16569_s5 + $0x288] ss:$16 sps:$4 sm:$0xff]  }
 0x24d   : > { %4327 = vmatpush1.bf16.msra.mxu1 %v10851_v16  ;;  %v3006_v32 = vmax.f32 %v2228_v39, 0.0  ;;  %v3008_v53 = vmax.f32 %v2421_v33, 0.0  ;;  %v2232_v6 = vadd.f32 %v2231_v49, %v13305_v61  ;;  %v2425_v9 = vadd.f32 %v2424_v11, %v13308_v31 }
 0x24e   : > { %4328 = vmatprep.subr.bf16.mxu1 %v10856_v10  ;;  %v3013_v56 = vmax.f32 %v2230_v41, 0.0  ;;  %v3015_v21 = vmax.f32 %v2423_v23, 0.0 }
 0x24f   : > { %4713 = vmatpush1.bf16.msra.mxu0 %v10878_v62  ;;  %v3014_v18 = vmax.f32 %v2232_v6, 0.0  ;;  %v3016_v45 = vmax.f32 %v2425_v9, 0.0  ;;  %v3195_v5 = vadd.f32 %v3008_v53, %v3007_v4  ;;  %v3163_v54 = vadd.f32 %v3006_v32, %v3005_v60  ;;  %v10898_v4 = vld [vmem:[%s16569_s5 + $0x2ac] ss:$16 sps:$4 sm:$0xff]   ;;  %v10863_v32 = vld [vmem:[%s16569_s5 + $0x2a0] ss:$16 sps:$4 sm:$0xff]  }
 0x250   : > { %4174 = vmatmul.mubr.bf16.gmra.mrb[132].mxu1 %v13347_v15  ;;  %4560 = vmatmul.mubr.bf16.gmra.mrb[196].mxu0 %v13347_v15  ;;  %v10862_v15 = vld [vmem:[%s16569_s5 + $0x284] ss:$16 sps:$4 sm:$0xff]  }
 0x251   : > { %4183 = vmatprep.mubr.bf16.mxu1 %v13363_v27  ;;  %4569 = vmatprep.mubr.bf16.mxu0 %v13363_v27  ;;  %v3196_v2 = vadd.f32 %v3016_v45, %v3015_v21  ;;  %v3164_v63 = vadd.f32 %v3014_v18, %v3013_v56  ;;  %v10887_v27 = vld [vmem:[%s16569_s5 + $0x268] ss:$16 sps:$4 sm:$0xff]   ;;  %v10866_v18 = vld [vmem:[%s16569_s5 + $0x2c0] ss:$16 sps:$4 sm:$0xff]  }
 0x252   : > { %4329 = vmatpush1.bf16.msra.mxu1 %v10854_v30  ;;  %4714 = vmatprep.subr.bf16.mxu0 %v10886_v44  ;;  %v2235_v37 = vpop.f32.mrb[32].mxu1  ;;  %v2428_v34 = vpop.f32.mrb[96].mxu0  ;;  %v10896_v45 = vld [vmem:[%s16569_s5 + $0x2a8] ss:$16 sps:$4 sm:$0xff]  }
 0x253   : > { %4330 = vmatprep.subr.bf16.mxu1 %v10859_v50  ;;  %4715 = vmatpush1.bf16.msra.mxu0 %v10884_v52  ;;  %v13490_v24 = vpack.c.bf16 %v3196_v2, %v3195_v5  ;;  %v13492_v58 = vpack.c.bf16 %v3164_v63, %v3163_v54  ;;  %v2236_v3 = vadd.f32 %v2235_v37, %v13299_v47  ;;  %v2237_v10 = vpop.f32.mrb[33].mxu1  ;;  %v2430_v12 = vpop.f32.mrb[97].mxu0  ;;  %v10871_v2 = vld [vmem:[%s16569_s5 + $0x2e4] ss:$16 sps:$4 sm:$0xff]   ;;  %v10904_v37 = vld [vmem:[%s16569_s5 + $0x2cc] ss:$16 sps:$4 sm:$0xff]  }
 0x254   : > { %4716 = vmatprep.subr.bf16.mxu0 %v10889_v40  ;;  %v2429_v16 = vadd.f32 %v2428_v34, %v13302_v0  ;;  %v2238_v7 = vadd.f32 %v2237_v10, %v13305_v61  ;;  %v2431_v62 = vadd.f32 %v2430_v12, %v13308_v31  ;;  %v2239_v26 = vpop.f32.mrb[34].mxu1  ;;  %v2432_v35 = vpop.f32.mrb[98].mxu0 }
 0x255   : > { %v3021_v39 = vmax.f32 %v2236_v3, 0.0  ;;  %v2240_v51 = vadd.f32 %v2239_v26, %v13299_v47  ;;  %v2433_v20 = vadd.f32 %v2432_v35, %v13302_v0  ;;  %v2241_v30 = vpop.f32.mrb[35].mxu1  ;;  %v2434_v60 = vpop.f32.mrb[99].mxu0 }
 0x256   : > { %4331 = vmatpush1.bf16.msra.mxu1 %v10857_v46  ;;  %v3023_v33 = vmax.f32 %v2429_v16, 0.0  ;;  %v3022_v41 = vmax.f32 %v2238_v7, 0.0  ;;  %v3024_v23 = vmax.f32 %v2431_v62, 0.0  ;;  %v2435_v49 = vadd.f32 %v2434_v60, %v13308_v31 }
 0x257   : > { %4332 = vmatprep.subr.bf16.mxu1 %v10862_v15  ;;  %4717 = vmatpush1.bf16.msra.mxu0 %v10887_v27  ;;  %v3029_v11 = vmax.f32 %v2240_v51, 0.0  ;;  %v3031_v44 = vmax.f32 %v2433_v20, 0.0  ;;  %v10874_v20 = vld [vmem:[%s16569_s5 + $0x304] ss:$16 sps:$4 sm:$0xff]  }
 0x258   : > { %4184 = vmatmul.mubr.bf16.gmra.mrb[136].mxu1 %v13365_v57  ;;  %4570 = vmatmul.mubr.bf16.gmra.mrb[200].mxu0 %v13365_v57  ;;  %v2242_v57 = vadd.f32 %v2241_v30, %v13305_v61  ;;  %v3032_v6 = vmax.f32 %v2435_v49, 0.0  ;;  %v3197_v9 = vadd.f32 %v3024_v23, %v3023_v33  ;;  %v3165_v50 = vadd.f32 %v3022_v41, %v3021_v39  ;;  %v10869_v39 = vld [vmem:[%s16569_s5 + $0x2e0] ss:$16 sps:$4 sm:$0xff]   ;;  %v10907_v30 = vld [vmem:[%s16569_s5 + $0x2ec] ss:$16 sps:$4 sm:$0xff]  }
 0x259   : > { %4193 = vmatprep.mubr.bf16.mxu1 %v13381_v17  ;;  %4579 = vmatprep.mubr.bf16.mxu0 %v13381_v17  ;;  %v10868_v17 = vld [vmem:[%s16569_s5 + $0x2c4] ss:$16 sps:$4 sm:$0xff]  }
 0x25a   : > { %4333 = vmatpush1.bf16.msra.mxu1 %v10860_v36  ;;  %4718 = vmatprep.subr.bf16.mxu0 %v10895_v13  ;;  %v3030_v53 = vmax.f32 %v2242_v57, 0.0  ;;  %v3198_v52 = vadd.f32 %v3032_v6, %v3031_v44  ;;  %v10872_v57 = vld [vmem:[%s16569_s5 + $0x300] ss:$16 sps:$4 sm:$0xff]   ;;  %v10905_v44 = vld [vmem:[%s16569_s5 + $0x2e8] ss:$16 sps:$4 sm:$0xff]  }
 0x25b   : > { %4334 = vmatprep.subr.bf16.mxu1 %v10865_v48  ;;  %4719 = vmatpush1.bf16.msra.mxu0 %v10893_v43 }
 0x25c   : > { %4720 = vmatprep.subr.bf16.mxu0 %v10898_v4  ;;  %v3166_v56 = vadd.f32 %v3030_v53, %v3029_v11  ;;  %v2245_v21 = vpop.f32.mrb[36].mxu1  ;;  %v2438_v40 = vpop.f32.mrb[100].mxu0  ;;  %v13538_v63 = vpack.c.bf16 %v3198_v52, %v3197_v9  ;;  %v10913_v53 = vld [vmem:[%s16569_s5 + $0x30c] ss:$16 sps:$4 sm:$0xff]  }
 0x25d   : > { %v2246_v5 = vadd.f32 %v2245_v21, %v13299_v47  ;;  %v2439_v54 = vadd.f32 %v2438_v40, %v13302_v0  ;;  %v2247_v46 = vpop.f32.mrb[37].mxu1  ;;  %v2440_v15 = vpop.f32.mrb[101].mxu0 }
 0x25e   : > { %4335 = vmatpush1.bf16.msra.mxu1 %v10863_v32  ;;  %v13540_v27 = vpack.c.bf16 %v3166_v56, %v3165_v50  ;;  %v2248_v34 = vadd.f32 %v2247_v46, %v13305_v61  ;;  %v2441_v3 = vadd.f32 %v2440_v15, %v13308_v31  ;;  %v2249_v16 = vpop.f32.mrb[38].mxu1  ;;  %v2442_v10 = vpop.f32.mrb[102].mxu0  ;;  %v10883_v32 = vld [vmem:[%s16569_s5 + $0x324] ss:$16 sps:$4 sm:$0xff]   ;;  %v10911_v46 = vld [vmem:[%s16569_s5 + $0x308] ss:$16 sps:$4 sm:$0xff]  }
 0x25f   : > { %4336 = vmatprep.subr.bf16.mxu1 %v10868_v17  ;;  %v3037_v12 = vmax.f32 %v2246_v5, 0.0  ;;  %v3039_v36 = vmax.f32 %v2439_v54, 0.0  ;;  %v2250_v13 = vadd.f32 %v2249_v16, %v13299_v47  ;;  %v2443_v7 = vadd.f32 %v2442_v10, %v13302_v0  ;;  %v2251_v62 = vpop.f32.mrb[39].mxu1  ;;  %v2444_v26 = vpop.f32.mrb[103].mxu0  ;;  %4721 = vmatpush1.bf16.msra.mxu0 %v10896_v45  ;;  %v10916_v10 = vld [vmem:[%s16569_s5 + $0x32c] ss:$16 sps:$4 sm:$0xff]  }
 0x260   : > { %4194 = vmatmul.mubr.bf16.gmra.mrb[140].mxu1 %v13387_v14  ;;  %4580 = vmatmul.mubr.bf16.gmra.mrb[204].mxu0 %v13387_v14  ;;  %v3038_v35 = vmax.f32 %v2248_v34, 0.0  ;;  %v3040_v14 = vmax.f32 %v2441_v3, 0.0  ;;  %v2252_v48 = vadd.f32 %v2251_v62, %v13305_v61  ;;  %v2445_v43 = vadd.f32 %v2444_v26, %v13308_v31 }
 0x261   : > { %4203 = vmatprep.mubr.bf16.mxu1 %v13401_v38  ;;  %4589 = vmatprep.mubr.bf16.mxu0 %v13401_v38  ;;  %v10902_v38 = vld [vmem:[%s16569_s5 + $0x2c8] ss:$16 sps:$4 sm:$0xff]   ;;  %v3045_v33 = vmax.f32 %v2250_v13, 0.0  ;;  %v3047_v51 = vmax.f32 %v2443_v7, 0.0 }
 0x262   : > { %4337 = vmatpush1.bf16.msra.mxu1 %v10866_v18  ;;  %4722 = vmatprep.subr.bf16.mxu0 %v10904_v37  ;;  %v3046_v60 = vmax.f32 %v2252_v48, 0.0  ;;  %v3048_v4 = vmax.f32 %v2445_v43, 0.0  ;;  %v3199_v41 = vadd.f32 %v3040_v14, %v3039_v36  ;;  %v3167_v23 = vadd.f32 %v3038_v35, %v3037_v12  ;;  %v10890_v43 = vld [vmem:[%s16569_s5 + $0x340] ss:$16 sps:$4 sm:$0xff]  }
 0x263   : > { %4338 = vmatprep.subr.bf16.mxu1 %v10871_v2  ;;  %4723 = vmatpush1.bf16.msra.mxu0 %v10902_v38  ;;  %v10901_v38 = vld [vmem:[%s16569_s5 + $0x364] ss:$16 sps:$4 sm:$0xff]  }
 0x264   : > { %v3200_v49 = vadd.f32 %v3048_v4, %v3047_v51  ;;  %v3168_v11 = vadd.f32 %v3046_v60, %v3045_v33  ;;  %4724 = vmatprep.subr.bf16.mxu0 %v10907_v30  ;;  %v10914_v33 = vld [vmem:[%s16569_s5 + $0x328] ss:$16 sps:$4 sm:$0xff]   ;;  %v10922_v4 = vld [vmem:[%s16569_s5 + $0x34c] ss:$16 sps:$4 sm:$0xff]  }
 0x266   : > { %4339 = vmatpush1.bf16.msra.mxu1 %v10869_v39  ;;  %v2255_v6 = vpop.f32.mrb[40].mxu1  ;;  %v2448_v17 = vpop.f32.mrb[104].mxu0  ;;  %v13581_v9 = vpack.c.bf16 %v3200_v49, %v3199_v41  ;;  %v13583_v50 = vpack.c.bf16 %v3168_v11, %v3167_v23 }
 0x267   : > { %4340 = vmatprep.subr.bf16.mxu1 %v10874_v20  ;;  %v2256_v52 = vadd.f32 %v2255_v6, %v13299_v47  ;;  %v2449_v56 = vadd.f32 %v2448_v17, %v13302_v0  ;;  %v2257_v21 = vpop.f32.mrb[41].mxu1  ;;  %v2450_v40 = vpop.f32.mrb[105].mxu0  ;;  %4725 = vmatpush1.bf16.msra.mxu0 %v10905_v44  ;;  %v10910_v17 = vld [vmem:[%s16569_s5 + $0x384] ss:$16 sps:$4 sm:$0xff]  }
 0x268   : > { %4204 = vmatmul.mubr.bf16.gmra.mrb[144].mxu1 %v13407_v22  ;;  %4590 = vmatmul.mubr.bf16.gmra.mrb[208].mxu0 %v13407_v22  ;;  %v10881_v22 = vld [vmem:[%s16569_s5 + $0x320] ss:$16 sps:$4 sm:$0xff]   ;;  %v2258_v18 = vadd.f32 %v2257_v21, %v13305_v61  ;;  %v2451_v45 = vadd.f32 %v2450_v40, %v13308_v31  ;;  %v2259_v5 = vpop.f32.mrb[42].mxu1  ;;  %v2452_v54 = vpop.f32.mrb[106].mxu0 }
 0x269   : > { %4213 = vmatprep.mubr.bf16.mxu1 %v13413_v28  ;;  %4599 = vmatprep.mubr.bf16.mxu0 %v13413_v28  ;;  %v10892_v28 = vld [vmem:[%s16569_s5 + $0x344] ss:$16 sps:$4 sm:$0xff]   ;;  %v3053_v15 = vmax.f32 %v2256_v52, 0.0  ;;  %v3055_v2 = vmax.f32 %v2449_v56, 0.0  ;;  %v2260_v37 = vadd.f32 %v2259_v5, %v13299_v47  ;;  %v2453_v34 = vadd.f32 %v2452_v54, %v13302_v0  ;;  %v2261_v3 = vpop.f32.mrb[43].mxu1  ;;  %v2454_v16 = vpop.f32.mrb[107].mxu0 }
 0x26a   : > { %4341 = vmatpush1.bf16.msra.mxu1 %v10872_v57  ;;  %4726 = vmatprep.subr.bf16.mxu0 %v10913_v53  ;;  %v3054_v12 = vmax.f32 %v2258_v18, 0.0  ;;  %v3056_v36 = vmax.f32 %v2451_v45, 0.0  ;;  %v2262_v13 = vadd.f32 %v2261_v3, %v13305_v61  ;;  %v2455_v7 = vadd.f32 %v2454_v16, %v13308_v31  ;;  %v10920_v45 = vld [vmem:[%s16569_s5 + $0x348] ss:$16 sps:$4 sm:$0xff]  }
 0x26b   : > { %4342 = vmatprep.subr.bf16.mxu1 %v10883_v32  ;;  %v3061_v62 = vmax.f32 %v2260_v37, 0.0  ;;  %v3063_v26 = vmax.f32 %v2453_v34, 0.0  ;;  %4727 = vmatpush1.bf16.msra.mxu0 %v10911_v46 }
 0x26c   : > { %v3062_v35 = vmax.f32 %v2262_v13, 0.0  ;;  %v3064_v14 = vmax.f32 %v2455_v7, 0.0  ;;  %v3201_v48 = vadd.f32 %v3056_v36, %v3055_v2  ;;  %v3169_v39 = vadd.f32 %v3054_v12, %v3053_v15  ;;  %4728 = vmatprep.subr.bf16.mxu0 %v10916_v10  ;;  %v10908_v10 = vld [vmem:[%s16569_s5 + $0x380] ss:$16 sps:$4 sm:$0xff]   ;;  %v10925_v12 = vld [vmem:[%s16569_s5 + $0x36c] ss:$16 sps:$4 sm:$0xff]  }
 0x26d   : > { %v10919_v36 = vld [vmem:[%s16569_s5 + $0x3a4] ss:$16 sps:$4 sm:$0xff]   ;;  %v10923_v13 = vld [vmem:[%s16569_s5 + $0x368] ss:$16 sps:$4 sm:$0xff]  }
 0x26e   : > { %4343 = vmatpush1.bf16.msra.mxu1 %v10881_v22  ;;  %v3202_v30 = vadd.f32 %v3064_v14, %v3063_v26  ;;  %v3170_v60 = vadd.f32 %v3062_v35, %v3061_v62  ;;  %v10931_v26 = vld [vmem:[%s16569_s5 + $0x38c] ss:$16 sps:$4 sm:$0xff]  }
 0x26f   : > { %4344 = vmatprep.subr.bf16.mxu1 %v10892_v28  ;;  %v2265_v51 = vpop.f32.mrb[44].mxu1  ;;  %v2458_v20 = vpop.f32.mrb[108].mxu0  ;;  %4729 = vmatpush1.bf16.msra.mxu0 %v10914_v33 }
 0x270   : > { %4214 = vmatmul.mubr.bf16.gmra.mrb[148].mxu1 %v13415_v42  ;;  %4600 = vmatmul.mubr.bf16.gmra.mrb[212].mxu0 %v13415_v42  ;;  %v2266_v41 = vadd.f32 %v2265_v51, %v13299_v47  ;;  %v2459_v23 = vadd.f32 %v2458_v20, %v13302_v0  ;;  %v2267_v57 = vpop.f32.mrb[45].mxu1  ;;  %v2460_v49 = vpop.f32.mrb[109].mxu0  ;;  %v13627_v53 = vpack.c.bf16 %v3202_v30, %v3201_v48  ;;  %v10917_v48 = vld [vmem:[%s16569_s5 + $0x3a0] ss:$16 sps:$4 sm:$0xff]  }
 0x271   : > { %4223 = vmatprep.mubr.bf16.mxu1 %v13452_v55  ;;  %4609 = vmatprep.mubr.bf16.mxu0 %v13452_v55  ;;  %v2268_v42 = vadd.f32 %v2267_v57, %v13305_v61  ;;  %v2461_v11 = vadd.f32 %v2460_v49, %v13308_v31  ;;  %v2269_v44 = vpop.f32.mrb[46].mxu1  ;;  %v2462_v32 = vpop.f32.mrb[110].mxu0  ;;  %v13629_v6 = vpack.c.bf16 %v3170_v60, %v3169_v39  ;;  %v10899_v55 = vld [vmem:[%s16569_s5 + $0x360] ss:$16 sps:$4 sm:$0xff]   ;;  %v10928_v39 = vld [vmem:[%s16569_s5 + $0x3c4] ss:$16 sps:$4 sm:$0xff]  }
 0x272   : > { %4345 = vmatpush1.bf16.msra.mxu1 %v10890_v43  ;;  %v3069_v52 = vmax.f32 %v2266_v41, 0.0  ;;  %v3071_v56 = vmax.f32 %v2459_v23, 0.0  ;;  %v2270_v21 = vadd.f32 %v2269_v44, %v13299_v47  ;;  %v2463_v40 = vadd.f32 %v2462_v32, %v13302_v0  ;;  %v2271_v22 = vpop.f32.mrb[47].mxu1  ;;  %v2464_v18 = vpop.f32.mrb[111].mxu0  ;;  %4730 = vmatprep.subr.bf16.mxu0 %v10922_v4  ;;  %v10926_v23 = vld [vmem:[%s16569_s5 + $0x3c0] ss:$16 sps:$4 sm:$0xff]  }
 0x273   : > { %4346 = vmatprep.subr.bf16.mxu1 %v10901_v38  ;;  %v3070_v5 = vmax.f32 %v2268_v42, 0.0  ;;  %v3072_v54 = vmax.f32 %v2461_v11, 0.0  ;;  %v2272_v28 = vadd.f32 %v2271_v22, %v13305_v61  ;;  %v2465_v46 = vadd.f32 %v2464_v18, %v13308_v31  ;;  %4731 = vmatpush1.bf16.msra.mxu0 %v10920_v45  ;;  %v10937_v22 = vld [vmem:[%s16569_s5 + $0x3e4] ss:$16 sps:$4 sm:$0xff]  }
 0x274   : > { %v3077_v15 = vmax.f32 %v2270_v21, 0.0  ;;  %v3079_v2 = vmax.f32 %v2463_v40, 0.0  ;;  %4732 = vmatprep.subr.bf16.mxu0 %v10925_v12  ;;  %v10932_v40 = vld [vmem:[%s16569_s5 + $0x3a8] ss:$16 sps:$4 sm:$0xff]  }
 0x275   : > { %v3078_v37 = vmax.f32 %v2272_v28, 0.0  ;;  %v3080_v34 = vmax.f32 %v2465_v46, 0.0  ;;  %v3203_v3 = vadd.f32 %v3072_v54, %v3071_v56  ;;  %v3171_v16 = vadd.f32 %v3070_v5, %v3069_v52  ;;  %v10940_v5 = vld [vmem:[%s16569_s5 + $0x3cc] ss:$16 sps:$4 sm:$0xff]  }
 0x276   : > { %4347 = vmatpush1.bf16.msra.mxu1 %v10899_v55  ;;  %v10934_v55 = vld [vmem:[%s16569_s5 + $0x3ac] ss:$16 sps:$4 sm:$0xff]  }
 0x277   : > { %4348 = vmatprep.subr.bf16.mxu1 %v10910_v17  ;;  %v3204_v7 = vadd.f32 %v3080_v34, %v3079_v2  ;;  %v3172_v62 = vadd.f32 %v3078_v37, %v3077_v15  ;;  %4733 = vmatpush1.bf16.msra.mxu0 %v10923_v13  ;;  %v10935_v2 = vld [vmem:[%s16569_s5 + $0x3e0] ss:$16 sps:$4 sm:$0xff]  }
 0x278   : > { %4224 = vmatmul.mubr.bf16.gmra.mrb[152].mxu1 %v13454_v19  ;;  %4610 = vmatmul.mubr.bf16.gmra.mrb[216].mxu0 %v13454_v19 }
 0x279   : > { %4233 = vmatprep.mubr.bf16.mxu1 %v13490_v24  ;;  %4619 = vmatprep.mubr.bf16.mxu0 %v13490_v24  ;;  %v13663_v35 = vpack.c.bf16 %v3204_v7, %v3203_v3  ;;  %v13665_v14 = vpack.c.bf16 %v3172_v62, %v3171_v16  ;;  %v10929_v24 = vld [vmem:[%s16569_s5 + $0x388] ss:$16 sps:$4 sm:$0xff]  }
 0x27a   : > { %4349 = vmatpush1.bf16.msra.mxu1 %v10908_v10  ;;  %4734 = vmatprep.subr.bf16.mxu0 %v10931_v26  ;;  %v10938_v16 = vld [vmem:[%s16569_s5 + $0x3c8] ss:$16 sps:$4 sm:$0xff]  }
 0x27b   : > { %v2275_v19 = vpop.f32.mrb[48].mxu1  ;;  %v2468_v43 = vpop.f32.mrb[112].mxu0  ;;  %4350 = vmatprep.subr.bf16.mxu1 %v10919_v36  ;;  %4735 = vmatpush1.bf16.msra.mxu0 %v10929_v24 }
 0x27c   : > { %v2276_v38 = vadd.f32 %v2275_v19, %v13299_v47  ;;  %v2469_v33 = vadd.f32 %v2468_v43, %v13302_v0  ;;  %v2277_v51 = vpop.f32.mrb[49].mxu1  ;;  %v2470_v20 = vpop.f32.mrb[113].mxu0  ;;  %4736 = vmatprep.subr.bf16.mxu0 %v10934_v55 }
 0x27d   : > { %v2278_v30 = vadd.f32 %v2277_v51, %v13305_v61  ;;  %v2471_v60 = vadd.f32 %v2470_v20, %v13308_v31  ;;  %v2279_v4 = vpop.f32.mrb[50].mxu1  ;;  %v2472_v41 = vpop.f32.mrb[114].mxu0  ;;  %v10943_v20 = vld [vmem:[%s16569_s5 + $0x3ec] ss:$16 sps:$4 sm:$0xff]  }
 0x27e   : > { %v3085_v57 = vmax.f32 %v2276_v38, 0.0  ;;  %v3087_v49 = vmax.f32 %v2469_v33, 0.0  ;;  %v2280_v42 = vadd.f32 %v2279_v4, %v13299_v47  ;;  %v2473_v11 = vadd.f32 %v2472_v41, %v13302_v0  ;;  %v2281_v44 = vpop.f32.mrb[51].mxu1  ;;  %v2474_v32 = vpop.f32.mrb[115].mxu0  ;;  %4351 = vmatpush1.bf16.msra.mxu1 %v10917_v48 }
 0x27f   : > { %v3086_v17 = vmax.f32 %v2278_v30, 0.0  ;;  %v3088_v52 = vmax.f32 %v2471_v60, 0.0  ;;  %v2282_v56 = vadd.f32 %v2281_v44, %v13305_v61  ;;  %v2475_v21 = vadd.f32 %v2474_v32, %v13308_v31  ;;  %4352 = vmatprep.subr.bf16.mxu1 %v10928_v39  ;;  %4737 = vmatpush1.bf16.msra.mxu0 %v10932_v40 }
 0x280   : > { %v3093_v18 = vmax.f32 %v2280_v42, 0.0  ;;  %v3095_v45 = vmax.f32 %v2473_v11, 0.0  ;;  %4234 = vmatmul.mubr.bf16.gmra.mrb[156].mxu1 %v13492_v58  ;;  %4620 = vmatmul.mubr.bf16.gmra.mrb[220].mxu0 %v13492_v58 }
 0x281   : > { %v3094_v54 = vmax.f32 %v2282_v56, 0.0  ;;  %v3096_v28 = vmax.f32 %v2475_v21, 0.0  ;;  %4243 = vmatprep.mubr.bf16.mxu1 %v13538_v63  ;;  %4629 = vmatprep.mubr.bf16.mxu0 %v13538_v63  ;;  %v3205_v46 = vadd.f32 %v3088_v52, %v3087_v49  ;;  %v3173_v15 = vadd.f32 %v3086_v17, %v3085_v57 }
 0x282   : > { %4353 = vmatpush1.bf16.msra.mxu1 %v10926_v23  ;;  %4738 = vmatprep.subr.bf16.mxu0 %v10940_v5  ;;  %v10941_v23 = vld [vmem:[%s16569_s5 + $0x3e8] ss:$16 sps:$4 sm:$0xff]  }
 0x283   : > { %v2285_v37 = vpop.f32.mrb[52].mxu1  ;;  %v2478_v58 = vpop.f32.mrb[116].mxu0  ;;  %v3206_v34 = vadd.f32 %v3096_v28, %v3095_v45  ;;  %v3174_v3 = vadd.f32 %v3094_v54, %v3093_v18  ;;  %4354 = vmatprep.subr.bf16.mxu1 %v10937_v22  ;;  %4739 = vmatpush1.bf16.msra.mxu0 %v10938_v16  ;;  %v1459_v18 = vsub.s32 4, %v17041_v59 }
 0x284   : > { %v2286_v63 = vadd.f32 %v2285_v37, %v13299_v47  ;;  %v2479_v10 = vadd.f32 %v2478_v58, %v13302_v0  ;;  %v2287_v12 = vpop.f32.mrb[53].mxu1  ;;  %v2480_v36 = vpop.f32.mrb[117].mxu0  ;;  %4740 = vmatprep.subr.bf16.mxu0 %v10943_v20 }
 0x285   : > { %v2288_v13 = vadd.f32 %v2287_v12, %v13305_v61  ;;  %v2481_v7 = vadd.f32 %v2480_v36, %v13308_v31  ;;  %v2289_v62 = vpop.f32.mrb[54].mxu1  ;;  %v2482_v26 = vpop.f32.mrb[118].mxu0  ;;  %v13713_v48 = vpack.c.bf16 %v3206_v34, %v3205_v46  ;;  %v13715_v19 = vpack.c.bf16 %v3174_v3, %v3173_v15 }
 0x286   : > { %v3101_v43 = vmax.f32 %v2286_v63, 0.0  ;;  %v3103_v39 = vmax.f32 %v2479_v10, 0.0  ;;  %v2290_v24 = vadd.f32 %v2289_v62, %v13299_v47  ;;  %v2483_v38 = vadd.f32 %v2482_v26, %v13302_v0  ;;  %v2291_v33 = vpop.f32.mrb[55].mxu1  ;;  %v2484_v51 = vpop.f32.mrb[119].mxu0  ;;  %4355 = vmatpush1.bf16.msra.mxu1 %v10935_v2 }
 0x287   : > { %v3102_v30 = vmax.f32 %v2288_v13, 0.0  ;;  %v3104_v60 = vmax.f32 %v2481_v7, 0.0  ;;  %v2292_v4 = vadd.f32 %v2291_v33, %v13305_v61  ;;  %v2485_v41 = vadd.f32 %v2484_v51, %v13308_v31  ;;  %4741 = vmatpush1.bf16.msra.mxu0 %v10941_v23  ;;  %v11474_v33 = vld [vmem:[%s16568_s4] sm:$0xff] }
 0x288   : > { %v3109_v57 = vmax.f32 %v2290_v24, 0.0  ;;  %v3111_v49 = vmax.f32 %v2483_v38, 0.0  ;;  %4244 = vmatmul.mubr.bf16.gmra.mrb[160].mxu1 %v13540_v27  ;;  %4630 = vmatmul.mubr.bf16.gmra.mrb[224].mxu0 %v13540_v27  ;;  %v1467_v7 = vsub.s32 6, %v17041_v59  ;;  %v13752_v51 = vrot.slane %v11474_v33, %v1459_v18 }
 0x289   : > { %v3110_v42 = vmax.f32 %v2292_v4, 0.0  ;;  %v3112_v11 = vmax.f32 %v2485_v41, 0.0  ;;  %4253 = vmatprep.mubr.bf16.mxu1 %v13581_v9  ;;  %4639 = vmatprep.mubr.bf16.mxu0 %v13581_v9  ;;  %v3207_v44 = vadd.f32 %v3104_v60, %v3103_v39  ;;  %v3175_v32 = vadd.f32 %v3102_v30, %v3101_v43 }
 0x28a   : > { %v13757_v23 = vrot.slane %v11474_v33, %v1467_v7 }
 0x28b   : > { %v2295_v55 = vpop.f32.mrb[56].mxu1  ;;  %v2488_v17 = vpop.f32.mrb[120].mxu0  ;;  %v3208_v52 = vadd.f32 %v3112_v11, %v3111_v49  ;;  %v3176_v56 = vadd.f32 %v3110_v42, %v3109_v57  ;;  %v1471_v57 = vsub.s32 7, %v17041_v59 }
 0x28c   : > { %v2296_v21 = vadd.f32 %v2295_v55, %v13299_v47  ;;  %v2489_v40 = vadd.f32 %v2488_v17, %v13302_v0  ;;  %v2297_v22 = vpop.f32.mrb[57].mxu1  ;;  %v2490_v27 = vpop.f32.mrb[121].mxu0 }
 0x28d   : > { %v2298_v45 = vadd.f32 %v2297_v22, %v13305_v61  ;;  %v2491_v9 = vadd.f32 %v2490_v27, %v13308_v31  ;;  %v2299_v5 = vpop.f32.mrb[58].mxu1  ;;  %v2492_v54 = vpop.f32.mrb[122].mxu0  ;;  %v13736_v28 = vpack.c.bf16 %v3208_v52, %v3207_v44  ;;  %v13738_v46 = vpack.c.bf16 %v3176_v56, %v3175_v32 }
 0x28e   : > { %v3117_v15 = vmax.f32 %v2296_v21, 0.0  ;;  %v3119_v2 = vmax.f32 %v2489_v40, 0.0  ;;  %v2300_v37 = vadd.f32 %v2299_v5, %v13299_v47  ;;  %v2493_v58 = vadd.f32 %v2492_v54, %v13302_v0  ;;  %v2301_v34 = vpop.f32.mrb[59].mxu1  ;;  %v2494_v3 = vpop.f32.mrb[123].mxu0 }
 0x28f   : > { %v3118_v16 = vmax.f32 %v2298_v45, 0.0  ;;  %v3120_v63 = vmax.f32 %v2491_v9, 0.0  ;;  %v2302_v10 = vadd.f32 %v2301_v34, %v13305_v61  ;;  %v2495_v12 = vadd.f32 %v2494_v3, %v13308_v31 }
 0x290   : > { %v3125_v36 = vmax.f32 %v2300_v37, 0.0  ;;  %v3127_v13 = vmax.f32 %v2493_v58, 0.0  ;;  %4254 = vmatmul.mubr.bf16.gmra.mrb[164].mxu1 %v13583_v50  ;;  %4640 = vmatmul.mubr.bf16.gmra.mrb[228].mxu0 %v13583_v50  ;;  %v1463_v50 = vsub.s32 5, %v17041_v59 }
 0x291   : > { %v3126_v62 = vmax.f32 %v2302_v10, 0.0  ;;  %v3128_v26 = vmax.f32 %v2495_v12, 0.0  ;;  %4263 = vmatprep.mubr.bf16.mxu1 %v13627_v53  ;;  %4649 = vmatprep.mubr.bf16.mxu0 %v13627_v53  ;;  %v3209_v43 = vadd.f32 %v3120_v63, %v3119_v2  ;;  %v3177_v39 = vadd.f32 %v3118_v16, %v3117_v15 }
 0x292   : > { %v13772_v54 = vrot.slane %v11474_v33, %v1463_v50  ;;  %v13774_v15 = vrot.slane %v11474_v33, %v1471_v57 }
 0x293   : > { %v2305_v24 = vpop.f32.mrb[60].mxu1  ;;  %v2498_v38 = vpop.f32.mrb[124].mxu0  ;;  %v3210_v20 = vadd.f32 %v3128_v26, %v3127_v13  ;;  %v3178_v30 = vadd.f32 %v3126_v62, %v3125_v36 }
 0x294   : > { %v2306_v60 = vadd.f32 %v2305_v24, %v13299_v47  ;;  %v2499_v4 = vadd.f32 %v2498_v38, %v13302_v0  ;;  %v2307_v41 = vpop.f32.mrb[61].mxu1  ;;  %v2500_v53 = vpop.f32.mrb[125].mxu0 }
 0x295   : > { %v2308_v49 = vadd.f32 %v2307_v41, %v13305_v61  ;;  %v2501_v42 = vadd.f32 %v2500_v53, %v13308_v31  ;;  %v2309_v11 = vpop.f32.mrb[62].mxu1  ;;  %v2502_v44 = vpop.f32.mrb[126].mxu0  ;;  %v13762_v32 = vpack.c.bf16 %v3210_v20, %v3209_v43  ;;  %v13764_v55 = vpack.c.bf16 %v3178_v30, %v3177_v39 }
 0x296   : > { %v3133_v17 = vmax.f32 %v2306_v60, 0.0  ;;  %v3135_v52 = vmax.f32 %v2499_v4, 0.0  ;;  %v2310_v56 = vadd.f32 %v2309_v11, %v13299_v47  ;;  %v2503_v21 = vadd.f32 %v2502_v44, %v13302_v0  ;;  %v2311_v40 = vpop.f32.mrb[63].mxu1  ;;  %v2504_v22 = vpop.f32.mrb[127].mxu0 }
 0x297   : > { %v3134_v27 = vmax.f32 %v2308_v49, 0.0  ;;  %v3136_v59 = vmax.f32 %v2501_v42, 0.0  ;;  %v2312_v18 = vadd.f32 %v2311_v40, %v13305_v61  ;;  %v2505_v45 = vadd.f32 %v2504_v22, %v13308_v31  ;;  %v10946_v42 = vld [vmem:[%s16571_s7 + $0x4] ss:$16 sps:$4 sm:$0xff]  }
 0x298   : > { %v3141_v9 = vmax.f32 %v2310_v56, 0.0  ;;  %v3143_v5 = vmax.f32 %v2503_v21, 0.0  ;;  %4264 = vmatmul.mubr.bf16.gmra.mrb[168].mxu1 %v13629_v6  ;;  %4650 = vmatmul.mubr.bf16.gmra.mrb[232].mxu0 %v13629_v6 }
 0x299   : > { %v3142_v47 = vmax.f32 %v2312_v18, 0.0  ;;  %v3144_v0 = vmax.f32 %v2505_v45, 0.0  ;;  %4273 = vmatprep.mubr.bf16.mxu1 %v13663_v35  ;;  %4659 = vmatprep.mubr.bf16.mxu0 %v13663_v35  ;;  %v3211_v2 = vadd.f32 %v3136_v59, %v3135_v52  ;;  %v3179_v61 = vadd.f32 %v3134_v27, %v3133_v17 }
 0x29a   : > { %5885 = vmatprep.subr.bf16.mxu1 %v10946_v42 }
 0x29b   : > { %v2541_v37 = vpop.f32.mrb[64].mxu1  ;;  %v2734_v31 = vpop.f32.mrb[128].mxu0  ;;  %v3212_v58 = vadd.f32 %v3144_v0, %v3143_v5  ;;  %v3180_v34 = vadd.f32 %v3142_v47, %v3141_v9 }
 0x29c   : > { %v2542_v3 = vadd.f32 %v2541_v37, %v13752_v51  ;;  %v2735_v6 = vadd.f32 %v2734_v31, %v13757_v23  ;;  %v2543_v16 = vpop.f32.mrb[65].mxu1  ;;  %v2736_v63 = vpop.f32.mrb[129].mxu0 }
 0x29d   : > { %v2544_v10 = vadd.f32 %v2543_v16, %v13772_v54  ;;  %v2737_v12 = vadd.f32 %v2736_v63, %v13774_v15  ;;  %v2545_v36 = vpop.f32.mrb[66].mxu1  ;;  %v2738_v13 = vpop.f32.mrb[130].mxu0  ;;  %v13782_v7 = vpack.c.bf16 %v3212_v58, %v3211_v2  ;;  %v13784_v35 = vpack.c.bf16 %v3180_v34, %v3179_v61 }
 0x29e   : > { %v2897_v62 = vmax.f32 %v2542_v3, 0.0  ;;  %v2899_v26 = vmax.f32 %v2735_v6, 0.0  ;;  %v2546_v43 = vadd.f32 %v2545_v36, %v13752_v51  ;;  %v2739_v39 = vadd.f32 %v2738_v13, %v13757_v23  ;;  %v2547_v24 = vpop.f32.mrb[67].mxu1  ;;  %v2740_v38 = vpop.f32.mrb[131].mxu0 }
 0x29f   : > { %v2898_v33 = vmax.f32 %v2544_v10, 0.0  ;;  %v2900_v50 = vmax.f32 %v2737_v12, 0.0  ;;  %v2548_v20 = vadd.f32 %v2547_v24, %v13772_v54  ;;  %v2741_v30 = vadd.f32 %v2740_v38, %v13774_v15 }
 0x2a0   : > { %v2905_v60 = vmax.f32 %v2546_v43, 0.0  ;;  %v2907_v4 = vmax.f32 %v2739_v39, 0.0  ;;  %4274 = vmatmul.mubr.bf16.gmra.mrb[172].mxu1 %v13665_v14  ;;  %4660 = vmatmul.mubr.bf16.gmra.mrb[236].mxu0 %v13665_v14 }
 0x2a1   : > { %v3213_v41 = vadd.f32 %v2898_v33, %v2897_v62  ;;  %v2906_v53 = vmax.f32 %v2548_v20, 0.0  ;;  %v2908_v57 = vmax.f32 %v2741_v30, 0.0  ;;  %4283 = vmatprep.mubr.bf16.mxu1 %v13713_v48  ;;  %4669 = vmatprep.mubr.bf16.mxu0 %v13713_v48  ;;  %v3245_v49 = vadd.f32 %v2900_v50, %v2899_v26 }
 0x2a3   : > { %v3214_v11 = vadd.f32 %v2906_v53, %v2905_v60  ;;  %v2551_v44 = vpop.f32.mrb[68].mxu1  ;;  %v2744_v17 = vpop.f32.mrb[132].mxu0  ;;  %v3246_v52 = vadd.f32 %v2908_v57, %v2907_v4 }
 0x2a4   : > { %v2552_v56 = vadd.f32 %v2551_v44, %v13752_v51  ;;  %v2745_v14 = vadd.f32 %v2744_v17, %v13757_v23  ;;  %v2553_v21 = vpop.f32.mrb[69].mxu1  ;;  %v2746_v40 = vpop.f32.mrb[133].mxu0 }
 0x2a5   : > { %v13799_v22 = vpack.c.bf16 %v3214_v11, %v3213_v41  ;;  %v2554_v48 = vadd.f32 %v2553_v21, %v13772_v54  ;;  %v2747_v27 = vadd.f32 %v2746_v40, %v13774_v15  ;;  %v2555_v59 = vpop.f32.mrb[70].mxu1  ;;  %v2748_v18 = vpop.f32.mrb[134].mxu0  ;;  %v13803_v45 = vpack.c.bf16 %v3246_v52, %v3245_v49 }
 0x2a6   : > { %v2913_v9 = vmax.f32 %v2552_v56, 0.0  ;;  %v2915_v5 = vmax.f32 %v2745_v14, 0.0  ;;  %v2556_v47 = vadd.f32 %v2555_v59, %v13752_v51  ;;  %v2749_v0 = vadd.f32 %v2748_v18, %v13757_v23  ;;  %v2557_v2 = vpop.f32.mrb[71].mxu1  ;;  %v2750_v61 = vpop.f32.mrb[135].mxu0 }
 0x2a7   : > { %v2914_v37 = vmax.f32 %v2554_v48, 0.0  ;;  %v2916_v31 = vmax.f32 %v2747_v27, 0.0  ;;  %v2558_v58 = vadd.f32 %v2557_v2, %v13772_v54  ;;  %v2751_v34 = vadd.f32 %v2750_v61, %v13774_v15 }
 0x2a8   : > { %v2921_v3 = vmax.f32 %v2556_v47, 0.0  ;;  %v2923_v6 = vmax.f32 %v2749_v0, 0.0  ;;  %4284 = vmatmul.mubr.bf16.gmra.mrb[176].mxu1 %v13715_v19  ;;  %4670 = vmatmul.mubr.bf16.gmra.mrb[240].mxu0 %v13715_v19 }
 0x2a9   : > { %v2922_v16 = vmax.f32 %v2558_v58, 0.0  ;;  %v2924_v63 = vmax.f32 %v2751_v34, 0.0  ;;  %4293 = vmatprep.mubr.bf16.mxu1 %v13736_v28  ;;  %4679 = vmatprep.mubr.bf16.mxu0 %v13736_v28  ;;  %v3247_v10 = vadd.f32 %v2916_v31, %v2915_v5  ;;  %v3215_v12 = vadd.f32 %v2914_v37, %v2913_v9 }
 0x2ab   : > { %v2561_v36 = vpop.f32.mrb[72].mxu1  ;;  %v2754_v13 = vpop.f32.mrb[136].mxu0  ;;  %v3248_v62 = vadd.f32 %v2924_v63, %v2923_v6  ;;  %v3216_v26 = vadd.f32 %v2922_v16, %v2921_v3 }
 0x2ac   : > { %v2562_v43 = vadd.f32 %v2561_v36, %v13752_v51  ;;  %v2755_v39 = vadd.f32 %v2754_v13, %v13757_v23  ;;  %v2563_v24 = vpop.f32.mrb[73].mxu1  ;;  %v2756_v38 = vpop.f32.mrb[137].mxu0 }
 0x2ad   : > { %v2564_v19 = vadd.f32 %v2563_v24, %v13772_v54  ;;  %v2757_v33 = vadd.f32 %v2756_v38, %v13774_v15  ;;  %v2565_v50 = vpop.f32.mrb[74].mxu1  ;;  %v2758_v20 = vpop.f32.mrb[138].mxu0  ;;  %v13817_v30 = vpack.c.bf16 %v3248_v62, %v3247_v10  ;;  %v13819_v28 = vpack.c.bf16 %v3216_v26, %v3215_v12 }
 0x2ae   : > { %v2929_v60 = vmax.f32 %v2562_v43, 0.0  ;;  %v2931_v4 = vmax.f32 %v2755_v39, 0.0  ;;  %v2566_v41 = vadd.f32 %v2565_v50, %v13752_v51  ;;  %v2759_v53 = vadd.f32 %v2758_v20, %v13757_v23  ;;  %v2567_v57 = vpop.f32.mrb[75].mxu1  ;;  %v2760_v49 = vpop.f32.mrb[139].mxu0 }
 0x2af   : > { %v2930_v42 = vmax.f32 %v2564_v19, 0.0  ;;  %v2932_v11 = vmax.f32 %v2757_v33, 0.0  ;;  %v2568_v44 = vadd.f32 %v2567_v57, %v13772_v54  ;;  %v2761_v17 = vadd.f32 %v2760_v49, %v13774_v15 }
 0x2b0   : > { %v2937_v52 = vmax.f32 %v2566_v41, 0.0  ;;  %v2939_v56 = vmax.f32 %v2759_v53, 0.0  ;;  %4294 = vmatmul.mubr.bf16.gmra.mrb[180].mxu1 %v13738_v46  ;;  %4680 = vmatmul.mubr.bf16.gmra.mrb[244].mxu0 %v13738_v46 }
 0x2b1   : > { %v3249_v14 = vadd.f32 %v2932_v11, %v2931_v4  ;;  %v2938_v21 = vmax.f32 %v2568_v44, 0.0  ;;  %v2940_v40 = vmax.f32 %v2761_v17, 0.0  ;;  %4303 = vmatprep.mubr.bf16.mxu1 %v13762_v32  ;;  %4689 = vmatprep.mubr.bf16.mxu0 %v13762_v32  ;;  %v3217_v48 = vadd.f32 %v2930_v42, %v2929_v60 }
 0x2b3   : > { %v3250_v27 = vadd.f32 %v2940_v40, %v2939_v56  ;;  %v2571_v59 = vpop.f32.mrb[76].mxu1  ;;  %v2764_v18 = vpop.f32.mrb[140].mxu0  ;;  %v3218_v9 = vadd.f32 %v2938_v21, %v2937_v52 }
 0x2b4   : > { %v2572_v5 = vadd.f32 %v2571_v59, %v13752_v51  ;;  %v2765_v47 = vadd.f32 %v2764_v18, %v13757_v23  ;;  %v2573_v0 = vpop.f32.mrb[77].mxu1  ;;  %v2766_v2 = vpop.f32.mrb[141].mxu0 }
 0x2b5   : > { %v2574_v46 = vadd.f32 %v2573_v0, %v13772_v54  ;;  %v2767_v61 = vadd.f32 %v2766_v2, %v13774_v15  ;;  %v2575_v37 = vpop.f32.mrb[78].mxu1  ;;  %v2768_v31 = vpop.f32.mrb[142].mxu0  ;;  %v13833_v58 = vpack.c.bf16 %v3250_v27, %v3249_v14  ;;  %v13835_v32 = vpack.c.bf16 %v3218_v9, %v3217_v48 }
 0x2b6   : > { %v2945_v34 = vmax.f32 %v2572_v5, 0.0  ;;  %v2947_v3 = vmax.f32 %v2765_v47, 0.0  ;;  %v2576_v6 = vadd.f32 %v2575_v37, %v13752_v51  ;;  %v2769_v16 = vadd.f32 %v2768_v31, %v13757_v23  ;;  %v2577_v63 = vpop.f32.mrb[79].mxu1  ;;  %v2770_v10 = vpop.f32.mrb[143].mxu0 }
 0x2b7   : > { %v2946_v12 = vmax.f32 %v2574_v46, 0.0  ;;  %v2948_v36 = vmax.f32 %v2767_v61, 0.0  ;;  %v2578_v13 = vadd.f32 %v2577_v63, %v13772_v54  ;;  %v2771_v62 = vadd.f32 %v2770_v10, %v13774_v15 }
 0x2b8   : > { %v2953_v26 = vmax.f32 %v2576_v6, 0.0  ;;  %v2955_v43 = vmax.f32 %v2769_v16, 0.0  ;;  %4304 = vmatmul.mubr.bf16.gmra.mrb[184].mxu1 %v13764_v55  ;;  %4690 = vmatmul.mubr.bf16.gmra.mrb[248].mxu0 %v13764_v55 }
 0x2b9   : > { %v3251_v39 = vadd.f32 %v2948_v36, %v2947_v3  ;;  %v2954_v24 = vmax.f32 %v2578_v13, 0.0  ;;  %v2956_v38 = vmax.f32 %v2771_v62, 0.0  ;;  %4313 = vmatprep.mubr.bf16.mxu1 %v13782_v7  ;;  %4699 = vmatprep.mubr.bf16.mxu0 %v13782_v7  ;;  %v3219_v19 = vadd.f32 %v2946_v12, %v2945_v34  ;;  %v10944_v62 = vld [vmem:[%s16571_s7] ss:$16 sps:$4 sm:$0xff]  }
 0x2bb   : > { %v3252_v33 = vadd.f32 %v2956_v38, %v2955_v43  ;;  %v2581_v50 = vpop.f32.mrb[80].mxu1  ;;  %v2774_v20 = vpop.f32.mrb[144].mxu0  ;;  %v3220_v60 = vadd.f32 %v2954_v24, %v2953_v26  ;;  %v10973_v26 = vld [vmem:[%s16571_s7 + $0xc] ss:$16 sps:$4 sm:$0xff]  }
 0x2bc   : > { %v2582_v4 = vadd.f32 %v2581_v50, %v13752_v51  ;;  %v2775_v41 = vadd.f32 %v2774_v20, %v13757_v23  ;;  %v2583_v53 = vpop.f32.mrb[81].mxu1  ;;  %v2776_v57 = vpop.f32.mrb[145].mxu0  ;;  %v10971_v50 = vld [vmem:[%s16571_s7 + $0x8] ss:$16 sps:$4 sm:$0xff]   ;;  %6271 = vmatprep.subr.bf16.mxu0 %v10973_v26 }
 0x2bd   : > { %v2584_v55 = vadd.f32 %v2583_v53, %v13772_v54  ;;  %v2777_v49 = vadd.f32 %v2776_v57, %v13774_v15  ;;  %v2585_v42 = vpop.f32.mrb[82].mxu1  ;;  %v2778_v11 = vpop.f32.mrb[146].mxu0  ;;  %v13849_v44 = vpack.c.bf16 %v3252_v33, %v3251_v39  ;;  %v13851_v7 = vpack.c.bf16 %v3220_v60, %v3219_v19  ;;  %v10949_v53 = vld [vmem:[%s16571_s7 + $0x24] ss:$16 sps:$4 sm:$0xff]   ;;  %v10976_v57 = vld [vmem:[%s16571_s7 + $0x2c] ss:$16 sps:$4 sm:$0xff]  }
 0x2be   : > { %v2961_v17 = vmax.f32 %v2582_v4, 0.0  ;;  %v2963_v52 = vmax.f32 %v2775_v41, 0.0  ;;  %v2586_v56 = vadd.f32 %v2585_v42, %v13752_v51  ;;  %v2779_v14 = vadd.f32 %v2778_v11, %v13757_v23  ;;  %v2587_v21 = vpop.f32.mrb[83].mxu1  ;;  %v2780_v40 = vpop.f32.mrb[147].mxu0 }
 0x2bf   : > { %v2962_v48 = vmax.f32 %v2584_v55, 0.0  ;;  %v2964_v27 = vmax.f32 %v2777_v49, 0.0  ;;  %v2588_v59 = vadd.f32 %v2587_v21, %v13772_v54  ;;  %v2781_v18 = vadd.f32 %v2780_v40, %v13774_v15 }
 0x2c0   : > { %v2969_v9 = vmax.f32 %v2586_v56, 0.0  ;;  %v2971_v5 = vmax.f32 %v2779_v14, 0.0  ;;  %4314 = vmatmul.mubr.bf16.gmra.mrb[188].mxu1 %v13784_v35  ;;  %4700 = vmatmul.mubr.bf16.gmra.mrb[252].mxu0 %v13784_v35  ;;  %v10947_v56 = vld [vmem:[%s16571_s7 + $0x20] ss:$16 sps:$4 sm:$0xff]   ;;  %v10974_v14 = vld [vmem:[%s16571_s7 + $0x28] ss:$16 sps:$4 sm:$0xff]  }
 0x2c1   : > { %v3253_v47 = vadd.f32 %v2964_v27, %v2963_v52  ;;  %v2970_v0 = vmax.f32 %v2588_v59, 0.0  ;;  %v2972_v2 = vmax.f32 %v2781_v18, 0.0  ;;  %4356 = vmatprep.mubr.bf16.mxu1 %v13803_v45  ;;  %4742 = vmatprep.mubr.bf16.mxu0 %v13803_v45  ;;  %v3221_v46 = vadd.f32 %v2962_v48, %v2961_v17  ;;  %v10982_v27 = vld [vmem:[%s16571_s7 + $0x4c] ss:$16 sps:$4 sm:$0xff]  }
 0x2c3   : > { %v3254_v61 = vadd.f32 %v2972_v2, %v2971_v5  ;;  %v2591_v37 = vpop.f32.mrb[84].mxu1  ;;  %v2784_v31 = vpop.f32.mrb[148].mxu0  ;;  %v3222_v34 = vadd.f32 %v2970_v0, %v2969_v9 }
 0x2c4   : > { %v2592_v3 = vadd.f32 %v2591_v37, %v13752_v51  ;;  %v2785_v6 = vadd.f32 %v2784_v31, %v13757_v23  ;;  %v2593_v16 = vpop.f32.mrb[85].mxu1  ;;  %v2786_v63 = vpop.f32.mrb[149].mxu0  ;;  %v10950_v31 = vld [vmem:[%s16571_s7 + $0x40] ss:$16 sps:$4 sm:$0xff]  }
 0x2c5   : > { %v2594_v35 = vadd.f32 %v2593_v16, %v13772_v54  ;;  %v2787_v10 = vadd.f32 %v2786_v63, %v13774_v15  ;;  %v2595_v12 = vpop.f32.mrb[86].mxu1  ;;  %v2788_v36 = vpop.f32.mrb[150].mxu0  ;;  %v13865_v13 = vpack.c.bf16 %v3254_v61, %v3253_v47  ;;  %v13867_v45 = vpack.c.bf16 %v3222_v34, %v3221_v46 }
 0x2c6   : > { %v2977_v43 = vmax.f32 %v2592_v3, 0.0  ;;  %v2979_v39 = vmax.f32 %v2785_v6, 0.0  ;;  %v2596_v24 = vadd.f32 %v2595_v12, %v13752_v51  ;;  %v2789_v38 = vadd.f32 %v2788_v36, %v13757_v23  ;;  %v2597_v19 = vpop.f32.mrb[87].mxu1  ;;  %v2790_v33 = vpop.f32.mrb[151].mxu0 }
 0x2c7   : > { %v2978_v20 = vmax.f32 %v2594_v35, 0.0  ;;  %v2980_v60 = vmax.f32 %v2787_v10, 0.0  ;;  %v2598_v4 = vadd.f32 %v2597_v19, %v13772_v54  ;;  %v2791_v41 = vadd.f32 %v2790_v33, %v13774_v15  ;;  %v10980_v10 = vld [vmem:[%s16571_s7 + $0x48] ss:$16 sps:$4 sm:$0xff]  }
 0x2c8   : > { %v2985_v55 = vmax.f32 %v2596_v24, 0.0  ;;  %v2987_v49 = vmax.f32 %v2789_v38, 0.0  ;;  %4357 = vmatmul.mubr.bf16.vlgmr.msra.gmra.mrb[128].mxu1 %v13799_v22  ;;  %4743 = vmatmul.mubr.bf16.vlgmr.msra.gmra.mrb[192].mxu0 %v13799_v22 }
 0x2c9   : > { %v3255_v42 = vadd.f32 %v2980_v60, %v2979_v39  ;;  %v2986_v11 = vmax.f32 %v2598_v4, 0.0  ;;  %v2988_v17 = vmax.f32 %v2791_v41, 0.0  ;;  %4366 = vmatprep.mubr.bf16.mxu1 %v13817_v30  ;;  %4752 = vmatprep.mubr.bf16.mxu0 %v13817_v30  ;;  %v3223_v52 = vadd.f32 %v2978_v20, %v2977_v43  ;;  %v10952_v30 = vld [vmem:[%s16571_s7 + $0x44] ss:$16 sps:$4 sm:$0xff]   ;;  %v10985_v39 = vld [vmem:[%s16571_s7 + $0x6c] ss:$16 sps:$4 sm:$0xff]  }
 0x2ca   : > { %5886 = vmatpush1.bf16.msra.mxu1 %v10944_v62  ;;  %6272 = vmatpush1.bf16.msra.mxu0 %v10971_v50  ;;  %v10955_v43 = vld [vmem:[%s16571_s7 + $0x64] ss:$16 sps:$4 sm:$0xff]   ;;  %v10953_v60 = vld [vmem:[%s16571_s7 + $0x60] ss:$16 sps:$4 sm:$0xff]   ;;  %v10983_v4 = vld [vmem:[%s16571_s7 + $0x68] ss:$16 sps:$4 sm:$0xff]  }
 0x2cb   : > { %v3256_v21 = vadd.f32 %v2988_v17, %v2987_v49  ;;  %v2601_v22 = vpop.f32.mrb[88].mxu1  ;;  %v2794_v40 = vpop.f32.mrb[152].mxu0  ;;  %v3224_v48 = vadd.f32 %v2986_v11, %v2985_v55  ;;  %5887 = vmatprep.subr.bf16.mxu1 %v10949_v53  ;;  %6273 = vmatprep.subr.bf16.mxu0 %v10976_v57  ;;  %v10991_v55 = vld [vmem:[%s16571_s7 + $0x8c] ss:$16 sps:$4 sm:$0xff]  }
 0x2cc   : > { %v2602_v59 = vadd.f32 %v2601_v22, %v13752_v51  ;;  %v2795_v18 = vadd.f32 %v2794_v40, %v13757_v23  ;;  %v2603_v9 = vpop.f32.mrb[89].mxu1  ;;  %v2796_v5 = vpop.f32.mrb[153].mxu0 }
 0x2cd   : > { %v2604_v47 = vadd.f32 %v2603_v9, %v13772_v54  ;;  %v2797_v0 = vadd.f32 %v2796_v5, %v13774_v15  ;;  %v2605_v2 = vpop.f32.mrb[90].mxu1  ;;  %v2798_v46 = vpop.f32.mrb[154].mxu0  ;;  %v13908_v61 = vpack.c.bf16 %v3256_v21, %v3255_v42  ;;  %v13910_v37 = vpack.c.bf16 %v3224_v48, %v3223_v52  ;;  %v10956_v48 = vld [vmem:[%s16571_s7 + $0x80] ss:$16 sps:$4 sm:$0xff]  }
 0x2ce   : > { %v2993_v34 = vmax.f32 %v2602_v59, 0.0  ;;  %v2995_v3 = vmax.f32 %v2795_v18, 0.0  ;;  %v2606_v6 = vadd.f32 %v2605_v2, %v13752_v51  ;;  %v2799_v16 = vadd.f32 %v2798_v46, %v13757_v23  ;;  %v2607_v63 = vpop.f32.mrb[91].mxu1  ;;  %v2800_v35 = vpop.f32.mrb[155].mxu0  ;;  %5888 = vmatpush1.bf16.msra.mxu1 %v10947_v56  ;;  %6274 = vmatpush1.bf16.msra.mxu0 %v10974_v14 }
 0x2cf   : > { %v2994_v12 = vmax.f32 %v2604_v47, 0.0  ;;  %v2996_v36 = vmax.f32 %v2797_v0, 0.0  ;;  %v2608_v62 = vadd.f32 %v2607_v63, %v13772_v54  ;;  %v2801_v26 = vadd.f32 %v2800_v35, %v13774_v15  ;;  %5889 = vmatprep.subr.bf16.mxu1 %v10952_v30  ;;  %6275 = vmatprep.subr.bf16.mxu0 %v10982_v27  ;;  %v10989_v47 = vld [vmem:[%s16571_s7 + $0x88] ss:$16 sps:$4 sm:$0xff]  }
 0x2d0   : > { %v3001_v24 = vmax.f32 %v2606_v6, 0.0  ;;  %v3003_v38 = vmax.f32 %v2799_v16, 0.0  ;;  %4367 = vmatmul.mubr.bf16.gmra.mrb[132].mxu1 %v13819_v28  ;;  %4753 = vmatmul.mubr.bf16.gmra.mrb[196].mxu0 %v13819_v28 }
 0x2d1   : > { %v3257_v19 = vadd.f32 %v2996_v36, %v2995_v3  ;;  %v3002_v33 = vmax.f32 %v2608_v62, 0.0  ;;  %v3004_v50 = vmax.f32 %v2801_v26, 0.0  ;;  %4376 = vmatprep.mubr.bf16.mxu1 %v13833_v58  ;;  %4762 = vmatprep.mubr.bf16.mxu0 %v13833_v58  ;;  %v3225_v20 = vadd.f32 %v2994_v12, %v2993_v34  ;;  %v10958_v58 = vld [vmem:[%s16571_s7 + $0x84] ss:$16 sps:$4 sm:$0xff]   ;;  %v10994_v3 = vld [vmem:[%s16571_s7 + $0xac] ss:$16 sps:$4 sm:$0xff]  }
 0x2d2   : > { %5890 = vmatpush1.bf16.msra.mxu1 %v10950_v31  ;;  %6276 = vmatpush1.bf16.msra.mxu0 %v10980_v10  ;;  %v10961_v34 = vld [vmem:[%s16571_s7 + $0xa4] ss:$16 sps:$4 sm:$0xff]   ;;  %v10959_v36 = vld [vmem:[%s16571_s7 + $0xa0] ss:$16 sps:$4 sm:$0xff]   ;;  %v10992_v62 = vld [vmem:[%s16571_s7 + $0xa8] ss:$16 sps:$4 sm:$0xff]  }
 0x2d3   : > { %v3258_v41 = vadd.f32 %v3004_v50, %v3003_v38  ;;  %v2611_v28 = vpop.f32.mrb[92].mxu1  ;;  %v2804_v53 = vpop.f32.mrb[156].mxu0  ;;  %v3226_v57 = vadd.f32 %v3002_v33, %v3001_v24  ;;  %5891 = vmatprep.subr.bf16.mxu1 %v10955_v43  ;;  %6277 = vmatprep.subr.bf16.mxu0 %v10985_v39  ;;  %v11000_v24 = vld [vmem:[%s16571_s7 + $0xcc] ss:$16 sps:$4 sm:$0xff]  }
 0x2d4   : > { %v2612_v49 = vadd.f32 %v2611_v28, %v13752_v51  ;;  %v2805_v42 = vadd.f32 %v2804_v53, %v13757_v23  ;;  %v2613_v11 = vpop.f32.mrb[93].mxu1  ;;  %v2806_v17 = vpop.f32.mrb[157].mxu0 }
 0x2d5   : > { %v2614_v52 = vadd.f32 %v2613_v11, %v13772_v54  ;;  %v2807_v56 = vadd.f32 %v2806_v17, %v13774_v15  ;;  %v2615_v14 = vpop.f32.mrb[94].mxu1  ;;  %v2808_v21 = vpop.f32.mrb[158].mxu0  ;;  %v13948_v22 = vpack.c.bf16 %v3258_v41, %v3257_v19  ;;  %v13950_v40 = vpack.c.bf16 %v3226_v57, %v3225_v20  ;;  %v10962_v57 = vld [vmem:[%s16571_s7 + $0xc0] ss:$16 sps:$4 sm:$0xff]  }
 0x2d6   : > { %v3009_v30 = vmax.f32 %v2612_v49, 0.0  ;;  %v3011_v27 = vmax.f32 %v2805_v42, 0.0  ;;  %v2616_v59 = vadd.f32 %v2615_v14, %v13752_v51  ;;  %v2809_v18 = vadd.f32 %v2808_v21, %v13757_v23  ;;  %v2617_v9 = vpop.f32.mrb[95].mxu1  ;;  %v2810_v5 = vpop.f32.mrb[159].mxu0  ;;  %5892 = vmatpush1.bf16.msra.mxu1 %v10953_v60  ;;  %6278 = vmatpush1.bf16.msra.mxu0 %v10983_v4 }
 0x2d7   : > { %v3010_v0 = vmax.f32 %v2614_v52, 0.0  ;;  %v3012_v2 = vmax.f32 %v2807_v56, 0.0  ;;  %v2618_v46 = vadd.f32 %v2617_v9, %v13772_v54  ;;  %v2811_v31 = vadd.f32 %v2810_v5, %v13774_v15  ;;  %5893 = vmatprep.subr.bf16.mxu1 %v10958_v58  ;;  %6279 = vmatprep.subr.bf16.mxu0 %v10991_v55  ;;  %v10998_v52 = vld [vmem:[%s16571_s7 + $0xc8] ss:$16 sps:$4 sm:$0xff]  }
 0x2d8   : > { %v3017_v6 = vmax.f32 %v2616_v59, 0.0  ;;  %v3019_v16 = vmax.f32 %v2809_v18, 0.0  ;;  %4377 = vmatmul.mubr.bf16.gmra.mrb[136].mxu1 %v13835_v32  ;;  %4763 = vmatmul.mubr.bf16.gmra.mrb[200].mxu0 %v13835_v32 }
 0x2d9   : > { %v3259_v63 = vadd.f32 %v3012_v2, %v3011_v27  ;;  %v3018_v35 = vmax.f32 %v2618_v46, 0.0  ;;  %v3020_v10 = vmax.f32 %v2811_v31, 0.0  ;;  %4386 = vmatprep.mubr.bf16.mxu1 %v13849_v44  ;;  %4772 = vmatprep.mubr.bf16.mxu0 %v13849_v44  ;;  %v3227_v12 = vadd.f32 %v3010_v0, %v3009_v30  ;;  %v10964_v44 = vld [vmem:[%s16571_s7 + $0xc4] ss:$16 sps:$4 sm:$0xff]   ;;  %v11003_v27 = vld [vmem:[%s16571_s7 + $0xec] ss:$16 sps:$4 sm:$0xff]  }
 0x2da   : > { %5894 = vmatpush1.bf16.msra.mxu1 %v10956_v48  ;;  %6280 = vmatpush1.bf16.msra.mxu0 %v10989_v47  ;;  %v10967_v30 = vld [vmem:[%s16571_s7 + $0xe4] ss:$16 sps:$4 sm:$0xff]   ;;  %v10965_v2 = vld [vmem:[%s16571_s7 + $0xe0] ss:$16 sps:$4 sm:$0xff]   ;;  %v11001_v46 = vld [vmem:[%s16571_s7 + $0xe8] ss:$16 sps:$4 sm:$0xff]  }
 0x2db   : > { %v3260_v26 = vadd.f32 %v3020_v10, %v3019_v16  ;;  %v2621_v32 = vpop.f32.mrb[96].mxu1  ;;  %v2814_v43 = vpop.f32.mrb[160].mxu0  ;;  %v3228_v39 = vadd.f32 %v3018_v35, %v3017_v6  ;;  %5895 = vmatprep.subr.bf16.mxu1 %v10961_v34  ;;  %6281 = vmatprep.subr.bf16.mxu0 %v10994_v3  ;;  %v11009_v6 = vld [vmem:[%s16571_s7 + $0x10c] ss:$16 sps:$4 sm:$0xff]  }
 0x2dc   : > { %v2622_v38 = vadd.f32 %v2621_v32, %v13752_v51  ;;  %v2815_v19 = vadd.f32 %v2814_v43, %v13757_v23  ;;  %v2623_v33 = vpop.f32.mrb[97].mxu1  ;;  %v2816_v50 = vpop.f32.mrb[161].mxu0 }
 0x2dd   : > { %v2624_v20 = vadd.f32 %v2623_v33, %v13772_v54  ;;  %v2817_v60 = vadd.f32 %v2816_v50, %v13774_v15  ;;  %v2625_v4 = vpop.f32.mrb[98].mxu1  ;;  %v2818_v41 = vpop.f32.mrb[162].mxu0  ;;  %v13988_v28 = vpack.c.bf16 %v3260_v26, %v3259_v63  ;;  %v13990_v53 = vpack.c.bf16 %v3228_v39, %v3227_v12  ;;  %v10968_v39 = vld [vmem:[%s16571_s7 + $0x100] ss:$16 sps:$4 sm:$0xff]  }
 0x2de   : > { %v3025_v58 = vmax.f32 %v2622_v38, 0.0  ;;  %v3027_v55 = vmax.f32 %v2815_v19, 0.0  ;;  %v2626_v49 = vadd.f32 %v2625_v4, %v13752_v51  ;;  %v2819_v42 = vadd.f32 %v2818_v41, %v13757_v23  ;;  %v2627_v11 = vpop.f32.mrb[99].mxu1  ;;  %v2820_v17 = vpop.f32.mrb[163].mxu0  ;;  %5896 = vmatpush1.bf16.msra.mxu1 %v10959_v36  ;;  %6282 = vmatpush1.bf16.msra.mxu0 %v10992_v62 }
 0x2df   : > { %v3026_v56 = vmax.f32 %v2624_v20, 0.0  ;;  %v3028_v14 = vmax.f32 %v2817_v60, 0.0  ;;  %v2628_v21 = vadd.f32 %v2627_v11, %v13772_v54  ;;  %v2821_v48 = vadd.f32 %v2820_v17, %v13774_v15  ;;  %5897 = vmatprep.subr.bf16.mxu1 %v10964_v44  ;;  %6283 = vmatprep.subr.bf16.mxu0 %v11000_v24  ;;  %v11007_v20 = vld [vmem:[%s16571_s7 + $0x108] ss:$16 sps:$4 sm:$0xff]  }
 0x2e0   : > { %v3033_v59 = vmax.f32 %v2626_v49, 0.0  ;;  %v3035_v18 = vmax.f32 %v2819_v42, 0.0  ;;  %4387 = vmatmul.mubr.bf16.gmra.mrb[140].mxu1 %v13851_v7  ;;  %4773 = vmatmul.mubr.bf16.gmra.mrb[204].mxu0 %v13851_v7 }
 0x2e1   : > { %v3261_v9 = vadd.f32 %v3028_v14, %v3027_v55  ;;  %v3034_v5 = vmax.f32 %v2628_v21, 0.0  ;;  %v3036_v47 = vmax.f32 %v2821_v48, 0.0  ;;  %4396 = vmatprep.mubr.bf16.mxu1 %v13865_v13  ;;  %4782 = vmatprep.mubr.bf16.mxu0 %v13865_v13  ;;  %v3229_v0 = vadd.f32 %v3026_v56, %v3025_v58  ;;  %v10970_v13 = vld [vmem:[%s16571_s7 + $0x104] ss:$16 sps:$4 sm:$0xff]   ;;  %v11012_v55 = vld [vmem:[%s16571_s7 + $0x12c] ss:$16 sps:$4 sm:$0xff]  }
 0x2e2   : > { %5898 = vmatpush1.bf16.msra.mxu1 %v10962_v57  ;;  %6284 = vmatpush1.bf16.msra.mxu0 %v10998_v52  ;;  %v10979_v58 = vld [vmem:[%s16571_s7 + $0x124] ss:$16 sps:$4 sm:$0xff]   ;;  %v10977_v14 = vld [vmem:[%s16571_s7 + $0x120] ss:$16 sps:$4 sm:$0xff]   ;;  %v11010_v21 = vld [vmem:[%s16571_s7 + $0x128] ss:$16 sps:$4 sm:$0xff]  }
 0x2e3   : > { %v3262_v31 = vadd.f32 %v3036_v47, %v3035_v18  ;;  %v2631_v7 = vpop.f32.mrb[100].mxu1  ;;  %v2824_v34 = vpop.f32.mrb[164].mxu0  ;;  %v3230_v3 = vadd.f32 %v3034_v5, %v3033_v59  ;;  %5899 = vmatprep.subr.bf16.mxu1 %v10967_v30  ;;  %6285 = vmatprep.subr.bf16.mxu0 %v11003_v27  ;;  %v11018_v59 = vld [vmem:[%s16571_s7 + $0x14c] ss:$16 sps:$4 sm:$0xff]  }
 0x2e4   : > { %v2632_v16 = vadd.f32 %v2631_v7, %v13752_v51  ;;  %v2825_v63 = vadd.f32 %v2824_v34, %v13757_v23  ;;  %v2633_v35 = vpop.f32.mrb[101].mxu1  ;;  %v2826_v10 = vpop.f32.mrb[165].mxu0 }
 0x2e5   : > { %v2634_v12 = vadd.f32 %v2633_v35, %v13772_v54  ;;  %v2827_v36 = vadd.f32 %v2826_v10, %v13774_v15  ;;  %v2635_v62 = vpop.f32.mrb[102].mxu1  ;;  %v2828_v26 = vpop.f32.mrb[166].mxu0  ;;  %v14028_v32 = vpack.c.bf16 %v3262_v31, %v3261_v9  ;;  %v14030_v43 = vpack.c.bf16 %v3230_v3, %v3229_v0  ;;  %v10986_v3 = vld [vmem:[%s16571_s7 + $0x140] ss:$16 sps:$4 sm:$0xff]  }
 0x2e6   : > { %v3041_v44 = vmax.f32 %v2632_v16, 0.0  ;;  %v3043_v24 = vmax.f32 %v2825_v63, 0.0  ;;  %v2636_v38 = vadd.f32 %v2635_v62, %v13752_v51  ;;  %v2829_v19 = vadd.f32 %v2828_v26, %v13757_v23  ;;  %v2637_v33 = vpop.f32.mrb[103].mxu1  ;;  %v2830_v50 = vpop.f32.mrb[167].mxu0  ;;  %5900 = vmatpush1.bf16.msra.mxu1 %v10965_v2  ;;  %6286 = vmatpush1.bf16.msra.mxu0 %v11001_v46 }
 0x2e7   : > { %v3042_v60 = vmax.f32 %v2634_v12, 0.0  ;;  %v3044_v4 = vmax.f32 %v2827_v36, 0.0  ;;  %v2638_v41 = vadd.f32 %v2637_v33, %v13772_v54  ;;  %v2831_v57 = vadd.f32 %v2830_v50, %v13774_v15  ;;  %5901 = vmatprep.subr.bf16.mxu1 %v10970_v13  ;;  %6287 = vmatprep.subr.bf16.mxu0 %v11009_v6  ;;  %v11016_v12 = vld [vmem:[%s16571_s7 + $0x148] ss:$16 sps:$4 sm:$0xff]  }
 0x2e8   : > { %v3049_v49 = vmax.f32 %v2636_v38, 0.0  ;;  %v3051_v42 = vmax.f32 %v2829_v19, 0.0  ;;  %4397 = vmatmul.mubr.bf16.gmra.mrb[144].mxu1 %v13867_v45  ;;  %4783 = vmatmul.mubr.bf16.gmra.mrb[208].mxu0 %v13867_v45 }
 0x2e9   : > { %v3263_v11 = vadd.f32 %v3044_v4, %v3043_v24  ;;  %v3050_v17 = vmax.f32 %v2638_v41, 0.0  ;;  %v3052_v52 = vmax.f32 %v2831_v57, 0.0  ;;  %4406 = vmatprep.mubr.bf16.mxu1 %v13908_v61  ;;  %4792 = vmatprep.mubr.bf16.mxu0 %v13908_v61  ;;  %v3231_v56 = vadd.f32 %v3042_v60, %v3041_v44  ;;  %v10988_v61 = vld [vmem:[%s16571_s7 + $0x144] ss:$16 sps:$4 sm:$0xff]   ;;  %v11021_v24 = vld [vmem:[%s16571_s7 + $0x16c] ss:$16 sps:$4 sm:$0xff]  }
 0x2ea   : > { %5902 = vmatpush1.bf16.msra.mxu1 %v10968_v39  ;;  %6288 = vmatpush1.bf16.msra.mxu0 %v11007_v20  ;;  %v10997_v44 = vld [vmem:[%s16571_s7 + $0x164] ss:$16 sps:$4 sm:$0xff]   ;;  %v10995_v4 = vld [vmem:[%s16571_s7 + $0x160] ss:$16 sps:$4 sm:$0xff]   ;;  %v11019_v41 = vld [vmem:[%s16571_s7 + $0x168] ss:$16 sps:$4 sm:$0xff]  }
 0x2eb   : > { %v3264_v48 = vadd.f32 %v3052_v52, %v3051_v42  ;;  %v2641_v45 = vpop.f32.mrb[104].mxu1  ;;  %v2834_v30 = vpop.f32.mrb[168].mxu0  ;;  %v3232_v27 = vadd.f32 %v3050_v17, %v3049_v49  ;;  %5903 = vmatprep.subr.bf16.mxu1 %v10979_v58  ;;  %6289 = vmatprep.subr.bf16.mxu0 %v11012_v55  ;;  %v11027_v49 = vld [vmem:[%s16571_s7 + $0x18c] ss:$16 sps:$4 sm:$0xff]  }
 0x2ec   : > { %v2642_v18 = vadd.f32 %v2641_v45, %v13752_v51  ;;  %v2835_v9 = vadd.f32 %v2834_v30, %v13757_v23  ;;  %v2643_v5 = vpop.f32.mrb[105].mxu1  ;;  %v2836_v47 = vpop.f32.mrb[169].mxu0 }
 0x2ed   : > { %v2644_v0 = vadd.f32 %v2643_v5, %v13772_v54  ;;  %v2837_v2 = vadd.f32 %v2836_v47, %v13774_v15  ;;  %v2645_v46 = vpop.f32.mrb[106].mxu1  ;;  %v2838_v31 = vpop.f32.mrb[170].mxu0  ;;  %v14068_v7 = vpack.c.bf16 %v3264_v48, %v3263_v11  ;;  %v14070_v34 = vpack.c.bf16 %v3232_v27, %v3231_v56  ;;  %v11004_v27 = vld [vmem:[%s16571_s7 + $0x180] ss:$16 sps:$4 sm:$0xff]  }
 0x2ee   : > { %v3057_v13 = vmax.f32 %v2642_v18, 0.0  ;;  %v3059_v6 = vmax.f32 %v2835_v9, 0.0  ;;  %v2646_v16 = vadd.f32 %v2645_v46, %v13752_v51  ;;  %v2839_v63 = vadd.f32 %v2838_v31, %v13757_v23  ;;  %v2647_v35 = vpop.f32.mrb[107].mxu1  ;;  %v2840_v10 = vpop.f32.mrb[171].mxu0  ;;  %5904 = vmatpush1.bf16.msra.mxu1 %v10977_v14  ;;  %6290 = vmatpush1.bf16.msra.mxu0 %v11010_v21 }
 0x2ef   : > { %v3058_v36 = vmax.f32 %v2644_v0, 0.0  ;;  %v3060_v62 = vmax.f32 %v2837_v2, 0.0  ;;  %v2648_v26 = vadd.f32 %v2647_v35, %v13772_v54  ;;  %v2841_v39 = vadd.f32 %v2840_v10, %v13774_v15  ;;  %5905 = vmatprep.subr.bf16.mxu1 %v10988_v61  ;;  %6291 = vmatprep.subr.bf16.mxu0 %v11018_v59  ;;  %v11025_v0 = vld [vmem:[%s16571_s7 + $0x188] ss:$16 sps:$4 sm:$0xff]  }
 0x2f0   : > { %v3065_v38 = vmax.f32 %v2646_v16, 0.0  ;;  %v3067_v19 = vmax.f32 %v2839_v63, 0.0  ;;  %4407 = vmatmul.mubr.bf16.gmra.mrb[148].mxu1 %v13910_v37  ;;  %4793 = vmatmul.mubr.bf16.gmra.mrb[212].mxu0 %v13910_v37 }
 0x2f1   : > { %v3265_v33 = vadd.f32 %v3060_v62, %v3059_v6  ;;  %v3066_v50 = vmax.f32 %v2648_v26, 0.0  ;;  %v3068_v20 = vmax.f32 %v2841_v39, 0.0  ;;  %4416 = vmatprep.mubr.bf16.mxu1 %v13948_v22  ;;  %4802 = vmatprep.mubr.bf16.mxu0 %v13948_v22  ;;  %v3233_v60 = vadd.f32 %v3058_v36, %v3057_v13  ;;  %v11006_v22 = vld [vmem:[%s16571_s7 + $0x184] ss:$16 sps:$4 sm:$0xff]   ;;  %v11030_v6 = vld [vmem:[%s16571_s7 + $0x1ac] ss:$16 sps:$4 sm:$0xff]  }
 0x2f2   : > { %5906 = vmatpush1.bf16.msra.mxu1 %v10986_v3  ;;  %6292 = vmatpush1.bf16.msra.mxu0 %v11016_v12  ;;  %v11015_v13 = vld [vmem:[%s16571_s7 + $0x1a4] ss:$16 sps:$4 sm:$0xff]   ;;  %v11013_v62 = vld [vmem:[%s16571_s7 + $0x1a0] ss:$16 sps:$4 sm:$0xff]   ;;  %v11028_v26 = vld [vmem:[%s16571_s7 + $0x1a8] ss:$16 sps:$4 sm:$0xff]  }
 0x2f3   : > { %v3266_v57 = vadd.f32 %v3068_v20, %v3067_v19  ;;  %v2651_v37 = vpop.f32.mrb[108].mxu1  ;;  %v2844_v58 = vpop.f32.mrb[172].mxu0  ;;  %v3234_v55 = vadd.f32 %v3066_v50, %v3065_v38  ;;  %5907 = vmatprep.subr.bf16.mxu1 %v10997_v44  ;;  %6293 = vmatprep.subr.bf16.mxu0 %v11021_v24 }
 0x2f4   : > { %v2652_v42 = vadd.f32 %v2651_v37, %v13752_v51  ;;  %v2845_v11 = vadd.f32 %v2844_v58, %v13757_v23  ;;  %v2653_v17 = vpop.f32.mrb[109].mxu1  ;;  %v2846_v52 = vpop.f32.mrb[173].mxu0 }
 0x2f5   : > { %v2654_v56 = vadd.f32 %v2653_v17, %v13772_v54  ;;  %v2847_v14 = vadd.f32 %v2846_v52, %v13774_v15  ;;  %v2655_v21 = vpop.f32.mrb[110].mxu1  ;;  %v2848_v48 = vpop.f32.mrb[174].mxu0  ;;  %v14108_v45 = vpack.c.bf16 %v3266_v57, %v3265_v33  ;;  %v14110_v30 = vpack.c.bf16 %v3234_v55, %v3233_v60  ;;  %v11022_v17 = vld [vmem:[%s16571_s7 + $0x1c0] ss:$16 sps:$4 sm:$0xff]  }
 0x2f6   : > { %v3073_v61 = vmax.f32 %v2652_v42, 0.0  ;;  %v3075_v59 = vmax.f32 %v2845_v11, 0.0  ;;  %v2656_v18 = vadd.f32 %v2655_v21, %v13752_v51  ;;  %v2849_v9 = vadd.f32 %v2848_v48, %v13757_v23  ;;  %v2657_v5 = vpop.f32.mrb[111].mxu1  ;;  %v2850_v47 = vpop.f32.mrb[175].mxu0  ;;  %5908 = vmatpush1.bf16.msra.mxu1 %v10995_v4  ;;  %6294 = vmatpush1.bf16.msra.mxu0 %v11019_v41 }
 0x2f7   : > { %v3074_v2 = vmax.f32 %v2654_v56, 0.0  ;;  %v3076_v46 = vmax.f32 %v2847_v14, 0.0  ;;  %v2658_v31 = vadd.f32 %v2657_v5, %v13772_v54  ;;  %v2851_v3 = vadd.f32 %v2850_v47, %v13774_v15  ;;  %5909 = vmatprep.subr.bf16.mxu1 %v11006_v22  ;;  %6295 = vmatprep.subr.bf16.mxu0 %v11027_v49 }
 0x2f8   : > { %v3081_v16 = vmax.f32 %v2656_v18, 0.0  ;;  %v3083_v63 = vmax.f32 %v2849_v9, 0.0  ;;  %4417 = vmatmul.mubr.bf16.gmra.mrb[152].mxu1 %v13950_v40  ;;  %4803 = vmatmul.mubr.bf16.gmra.mrb[216].mxu0 %v13950_v40 }
 0x2f9   : > { %v3267_v35 = vadd.f32 %v3076_v46, %v3075_v59  ;;  %v3082_v10 = vmax.f32 %v2658_v31, 0.0  ;;  %v3084_v12 = vmax.f32 %v2851_v3, 0.0  ;;  %4426 = vmatprep.mubr.bf16.mxu1 %v13988_v28  ;;  %4812 = vmatprep.mubr.bf16.mxu0 %v13988_v28  ;;  %v3235_v36 = vadd.f32 %v3074_v2, %v3073_v61  ;;  %v11024_v28 = vld [vmem:[%s16571_s7 + $0x1c4] ss:$16 sps:$4 sm:$0xff]  }
 0x2fa   : > { %5910 = vmatpush1.bf16.msra.mxu1 %v11004_v27  ;;  %6296 = vmatpush1.bf16.msra.mxu0 %v11025_v0 }
 0x2fb   : > { %v3268_v39 = vadd.f32 %v3084_v12, %v3083_v63  ;;  %v2661_v40 = vpop.f32.mrb[112].mxu1  ;;  %v2854_v44 = vpop.f32.mrb[176].mxu0  ;;  %v3236_v24 = vadd.f32 %v3082_v10, %v3081_v16  ;;  %5911 = vmatprep.subr.bf16.mxu1 %v11015_v13  ;;  %6297 = vmatprep.subr.bf16.mxu0 %v11030_v6 }
 0x2fc   : > { %v2662_v38 = vadd.f32 %v2661_v40, %v13752_v51  ;;  %v2855_v19 = vadd.f32 %v2854_v44, %v13757_v23  ;;  %v2663_v33 = vpop.f32.mrb[113].mxu1  ;;  %v2856_v50 = vpop.f32.mrb[177].mxu0 }
 0x2fd   : > { %v2664_v20 = vadd.f32 %v2663_v33, %v13772_v54  ;;  %v2857_v60 = vadd.f32 %v2856_v50, %v13774_v15  ;;  %v2665_v4 = vpop.f32.mrb[114].mxu1  ;;  %v2858_v41 = vpop.f32.mrb[178].mxu0  ;;  %v14145_v57 = vpack.c.bf16 %v3268_v39, %v3267_v35  ;;  %v14147_v37 = vpack.c.bf16 %v3236_v24, %v3235_v36 }
 0x2fe   : > { %v3089_v58 = vmax.f32 %v2662_v38, 0.0  ;;  %v3091_v55 = vmax.f32 %v2855_v19, 0.0  ;;  %v2666_v22 = vadd.f32 %v2665_v4, %v13752_v51  ;;  %v2859_v49 = vadd.f32 %v2858_v41, %v13757_v23  ;;  %v2667_v42 = vpop.f32.mrb[115].mxu1  ;;  %v2860_v11 = vpop.f32.mrb[179].mxu0  ;;  %5912 = vmatpush1.bf16.msra.mxu1 %v11013_v62  ;;  %6298 = vmatpush1.bf16.msra.mxu0 %v11028_v26 }
 0x2ff   : > { %v3090_v52 = vmax.f32 %v2664_v20, 0.0  ;;  %v3092_v56 = vmax.f32 %v2857_v60, 0.0  ;;  %v2668_v14 = vadd.f32 %v2667_v42, %v13772_v54  ;;  %v2861_v21 = vadd.f32 %v2860_v11, %v13774_v15  ;;  %5913 = vmatprep.subr.bf16.mxu1 %v11024_v28 }
 0x300   : > { %v3097_v48 = vmax.f32 %v2666_v22, 0.0  ;;  %v3099_v27 = vmax.f32 %v2859_v49, 0.0  ;;  %4427 = vmatmul.mubr.bf16.gmra.mrb[156].mxu1 %v13990_v53  ;;  %4813 = vmatmul.mubr.bf16.gmra.mrb[220].mxu0 %v13990_v53 }
 0x301   : > { %v3269_v61 = vadd.f32 %v3092_v56, %v3091_v55  ;;  %v3098_v59 = vmax.f32 %v2668_v14, 0.0  ;;  %v3100_v18 = vmax.f32 %v2861_v21, 0.0  ;;  %4436 = vmatprep.mubr.bf16.mxu1 %v14028_v32  ;;  %4822 = vmatprep.mubr.bf16.mxu0 %v14028_v32  ;;  %v3237_v9 = vadd.f32 %v3090_v52, %v3089_v58 }
 0x302   : > { %5914 = vmatpush1.bf16.msra.mxu1 %v11022_v17 }
 0x303   : > { %v3270_v5 = vadd.f32 %v3100_v18, %v3099_v27  ;;  %v2671_v47 = vpop.f32.mrb[116].mxu1  ;;  %v2864_v0 = vpop.f32.mrb[180].mxu0  ;;  %v3238_v2 = vadd.f32 %v3098_v59, %v3097_v48 }
 0x304   : > { %v2672_v46 = vadd.f32 %v2671_v47, %v13752_v51  ;;  %v2865_v31 = vadd.f32 %v2864_v0, %v13757_v23  ;;  %v2673_v3 = vpop.f32.mrb[117].mxu1  ;;  %v2866_v13 = vpop.f32.mrb[181].mxu0 }
 0x305   : > { %v2674_v53 = vadd.f32 %v2673_v3, %v13772_v54  ;;  %v2867_v6 = vadd.f32 %v2866_v13, %v13774_v15  ;;  %v2675_v16 = vpop.f32.mrb[118].mxu1  ;;  %v2868_v63 = vpop.f32.mrb[182].mxu0  ;;  %v14164_v35 = vpack.c.bf16 %v3270_v5, %v3269_v61  ;;  %v14166_v32 = vpack.c.bf16 %v3238_v2, %v3237_v9 }
 0x306   : > { %v3105_v10 = vmax.f32 %v2672_v46, 0.0  ;;  %v3107_v12 = vmax.f32 %v2865_v31, 0.0  ;;  %v2676_v36 = vadd.f32 %v2675_v16, %v13752_v51  ;;  %v2869_v62 = vadd.f32 %v2868_v63, %v13757_v23  ;;  %v2677_v26 = vpop.f32.mrb[119].mxu1  ;;  %v2870_v39 = vpop.f32.mrb[183].mxu0 }
 0x307   : > { %v3106_v40 = vmax.f32 %v2674_v53, 0.0  ;;  %v3108_v44 = vmax.f32 %v2867_v6, 0.0  ;;  %v2678_v24 = vadd.f32 %v2677_v26, %v13772_v54  ;;  %v2871_v28 = vadd.f32 %v2870_v39, %v13774_v15 }
 0x308   : > { %v3113_v38 = vmax.f32 %v2676_v36, 0.0  ;;  %v3115_v19 = vmax.f32 %v2869_v62, 0.0  ;;  %4437 = vmatmul.mubr.bf16.gmra.mrb[160].mxu1 %v14030_v43  ;;  %4823 = vmatmul.mubr.bf16.gmra.mrb[224].mxu0 %v14030_v43 }
 0x309   : > { %v3271_v33 = vadd.f32 %v3108_v44, %v3107_v12  ;;  %v3114_v50 = vmax.f32 %v2678_v24, 0.0  ;;  %v3116_v20 = vmax.f32 %v2871_v28, 0.0  ;;  %4446 = vmatprep.mubr.bf16.mxu1 %v14068_v7  ;;  %4832 = vmatprep.mubr.bf16.mxu0 %v14068_v7  ;;  %v3239_v60 = vadd.f32 %v3106_v40, %v3105_v10 }
 0x30b   : > { %v3272_v4 = vadd.f32 %v3116_v20, %v3115_v19  ;;  %v2681_v41 = vpop.f32.mrb[120].mxu1  ;;  %v2874_v58 = vpop.f32.mrb[184].mxu0  ;;  %v3240_v55 = vadd.f32 %v3114_v50, %v3113_v38 }
 0x30c   : > { %v2682_v22 = vadd.f32 %v2681_v41, %v13752_v51  ;;  %v2875_v49 = vadd.f32 %v2874_v58, %v13757_v23  ;;  %v2683_v42 = vpop.f32.mrb[121].mxu1  ;;  %v2876_v11 = vpop.f32.mrb[185].mxu0 }
 0x30d   : > { %v2684_v43 = vadd.f32 %v2683_v42, %v13772_v54  ;;  %v2877_v17 = vadd.f32 %v2876_v11, %v13774_v15  ;;  %v2685_v52 = vpop.f32.mrb[122].mxu1  ;;  %v2878_v56 = vpop.f32.mrb[186].mxu0  ;;  %v14180_v14 = vpack.c.bf16 %v3272_v4, %v3271_v33  ;;  %v14182_v7 = vpack.c.bf16 %v3240_v55, %v3239_v60 }
 0x30e   : > { %v3121_v21 = vmax.f32 %v2682_v22, 0.0  ;;  %v3123_v48 = vmax.f32 %v2875_v49, 0.0  ;;  %v2686_v27 = vadd.f32 %v2685_v52, %v13752_v51  ;;  %v2879_v61 = vadd.f32 %v2878_v56, %v13757_v23  ;;  %v2687_v59 = vpop.f32.mrb[123].mxu1  ;;  %v2880_v18 = vpop.f32.mrb[187].mxu0  ;;  %v11033_v52 = vld [vmem:[%s16571_s7 + $0x1e4] ss:$16 sps:$4 sm:$0xff]  }
 0x30f   : > { %v3122_v9 = vmax.f32 %v2684_v43, 0.0  ;;  %v3124_v5 = vmax.f32 %v2877_v17, 0.0  ;;  %v2688_v47 = vadd.f32 %v2687_v59, %v13772_v54  ;;  %v2881_v0 = vadd.f32 %v2880_v18, %v13774_v15  ;;  %v11039_v56 = vld [vmem:[%s16571_s7 + $0x1ec] ss:$16 sps:$4 sm:$0xff]   ;;  %5915 = vmatprep.subr.bf16.mxu1 %v11033_v52 }
 0x310   : > { %v3129_v2 = vmax.f32 %v2686_v27, 0.0  ;;  %v3131_v46 = vmax.f32 %v2879_v61, 0.0  ;;  %4447 = vmatmul.mubr.bf16.gmra.mrb[164].mxu1 %v14070_v34  ;;  %4833 = vmatmul.mubr.bf16.gmra.mrb[228].mxu0 %v14070_v34 }
 0x311   : > { %v3241_v31 = vadd.f32 %v3122_v9, %v3121_v21  ;;  %v3273_v3 = vadd.f32 %v3124_v5, %v3123_v48  ;;  %v3130_v13 = vmax.f32 %v2688_v47, 0.0  ;;  %v3132_v53 = vmax.f32 %v2881_v0, 0.0  ;;  %4456 = vmatprep.mubr.bf16.mxu1 %v14108_v45  ;;  %4842 = vmatprep.mubr.bf16.mxu0 %v14108_v45 }
 0x313   : > { %v3242_v6 = vadd.f32 %v3130_v13, %v3129_v2  ;;  %v3274_v16 = vadd.f32 %v3132_v53, %v3131_v46  ;;  %v2691_v63 = vpop.f32.mrb[124].mxu1  ;;  %v2884_v10 = vpop.f32.mrb[188].mxu0 }
 0x314   : > { %v2692_v12 = vadd.f32 %v2691_v63, %v13752_v51  ;;  %v2885_v36 = vadd.f32 %v2884_v10, %v13757_v23  ;;  %v2693_v62 = vpop.f32.mrb[125].mxu1  ;;  %v2886_v26 = vpop.f32.mrb[189].mxu0 }
 0x315   : > { %v2694_v34 = vadd.f32 %v2693_v62, %v13772_v54  ;;  %v2887_v39 = vadd.f32 %v2886_v26, %v13774_v15  ;;  %v2695_v40 = vpop.f32.mrb[126].mxu1  ;;  %v2888_v44 = vpop.f32.mrb[190].mxu0  ;;  %v3336_v24 = vpack.c.bf16 %v3274_v16, %v3273_v3  ;;  %v3335_v28 = vpack.c.bf16 %v3242_v6, %v3241_v31 }
 0x316   : > { %v3137_v38 = vmax.f32 %v2692_v12, 0.0  ;;  %v3139_v45 = vmax.f32 %v2885_v36, 0.0  ;;  %v2696_v19 = vadd.f32 %v2695_v40, %v13752_v51  ;;  %v2889_v33 = vadd.f32 %v2888_v44, %v13757_v23  ;;  %v2697_v50 = vpop.f32.mrb[127].mxu1  ;;  %v2890_v20 = vpop.f32.mrb[191].mxu0  ;;  %v11040_v12 = vld [vmem:[%s16571_s7 + $0x200] ss:$16 sps:$4 sm:$0xff]  }
 0x317   : > { %v3138_v60 = vmax.f32 %v2694_v34, 0.0  ;;  %v3140_v4 = vmax.f32 %v2887_v39, 0.0  ;;  %v2698_v41 = vadd.f32 %v2697_v50, %v13772_v54  ;;  %v2891_v58 = vadd.f32 %v2890_v20, %v13774_v15  ;;  %v11036_v15 = vld [vmem:[%s16571_s7 + $0x1cc] ss:$16 sps:$4 sm:$0xff]   ;;  %v11067_v36 = vld [vmem:[%s16571_s7 + $0x208] ss:$16 sps:$4 sm:$0xff]  }
 0x318   : > { %v3145_v55 = vmax.f32 %v2696_v19, 0.0  ;;  %v3147_v22 = vmax.f32 %v2889_v33, 0.0  ;;  %4457 = vmatmul.mubr.bf16.gmra.mrb[168].mxu1 %v14110_v30  ;;  %4843 = vmatmul.mubr.bf16.gmra.mrb[232].mxu0 %v14110_v30  ;;  %v11034_v30 = vld [vmem:[%s16571_s7 + $0x1c8] ss:$16 sps:$4 sm:$0xff]   ;;  %v11045_v39 = vld [vmem:[%s16571_s7 + $0x224] ss:$16 sps:$4 sm:$0xff]  }
 0x319   : > { %v3243_v49 = vadd.f32 %v3138_v60, %v3137_v38  ;;  %v3275_v42 = vadd.f32 %v3140_v4, %v3139_v45  ;;  %v3146_v11 = vmax.f32 %v2698_v41, 0.0  ;;  %v3148_v51 = vmax.f32 %v2891_v58, 0.0  ;;  %4466 = vmatprep.mubr.bf16.mxu1 %v14145_v57  ;;  %4852 = vmatprep.mubr.bf16.mxu0 %v14145_v57  ;;  %v11031_v57 = vld [vmem:[%s16571_s7 + $0x1e0] ss:$16 sps:$4 sm:$0xff]   ;;  %v11072_v40 = vld [vmem:[%s16571_s7 + $0x22c] ss:$16 sps:$4 sm:$0xff]  }
 0x31a   : > { %6299 = vmatprep.subr.bf16.mxu0 %v11036_v15  ;;  %5916 = vmatpush1.bf16.msra.mxu1 %v11031_v57  ;;  %v11043_v20 = vld [vmem:[%s16571_s7 + $0x220] ss:$16 sps:$4 sm:$0xff]   ;;  %v11070_v60 = vld [vmem:[%s16571_s7 + $0x228] ss:$16 sps:$4 sm:$0xff]   ;;  %v11048_v41 = vld [vmem:[%s16571_s7 + $0x244] ss:$16 sps:$4 sm:$0xff]  }
 0x31b   : > { %v3244_v23 = vadd.f32 %v3146_v11, %v3145_v55  ;;  %v3276_v43 = vadd.f32 %v3148_v51, %v3147_v22  ;;  %6300 = vmatpush1.bf16.msra.mxu0 %v11034_v30  ;;  %v11078_v58 = vld [vmem:[%s16571_s7 + $0x24c] ss:$16 sps:$4 sm:$0xff]   ;;  %v11051_v30 = vld [vmem:[%s16571_s7 + $0x264] ss:$16 sps:$4 sm:$0xff]  }
 0x31c   : > { %6301 = vmatprep.subr.bf16.mxu0 %v11039_v56  ;;  %v11081_v57 = vld [vmem:[%s16571_s7 + $0x26c] ss:$16 sps:$4 sm:$0xff]  }
 0x31d   : > { %v3340_v17 = vpack.c.bf16 %v3276_v43, %v3275_v42  ;;  %v3339_v54 = vpack.c.bf16 %v3244_v23, %v3243_v49  ;;  %v11046_v23 = vld [vmem:[%s16571_s7 + $0x240] ss:$16 sps:$4 sm:$0xff]   ;;  %v11076_v43 = vld [vmem:[%s16571_s7 + $0x248] ss:$16 sps:$4 sm:$0xff]  }
 0x320   : > { %4467 = vmatmul.mubr.bf16.gmra.mrb[172].mxu1 %v14147_v37  ;;  %4853 = vmatmul.mubr.bf16.gmra.mrb[236].mxu0 %v14147_v37  ;;  %v11037_v37 = vld [vmem:[%s16571_s7 + $0x1e8] ss:$16 sps:$4 sm:$0xff]  }
 0x321   : > { %4476 = vmatprep.mubr.bf16.mxu1 %v14164_v35  ;;  %4862 = vmatprep.mubr.bf16.mxu0 %v14164_v35  ;;  %v11042_v35 = vld [vmem:[%s16571_s7 + $0x204] ss:$16 sps:$4 sm:$0xff]  }
 0x322   : > { %6302 = vmatpush1.bf16.msra.mxu0 %v11037_v37  ;;  %6078 = vmatprep.subr.bf16.mxu1 %v11042_v35 }
 0x328   : > { %4477 = vmatmul.mubr.bf16.gmra.mrb[176].mxu1 %v14166_v32  ;;  %4863 = vmatmul.mubr.bf16.gmra.mrb[240].mxu0 %v14166_v32  ;;  %v11069_v32 = vld [vmem:[%s16571_s7 + $0x20c] ss:$16 sps:$4 sm:$0xff]  }
 0x329   : > { %4486 = vmatprep.mubr.bf16.mxu1 %v14180_v14  ;;  %4872 = vmatprep.mubr.bf16.mxu0 %v14180_v14  ;;  %v14241_v14 = vld [vmem:[%s16570_s6] sm:$0xf] }
 0x32a   : > { %6464 = vmatprep.subr.bf16.mxu0 %v11069_v32  ;;  %v14249_v21 = vrot.slane %v14241_v14, %v17045_v25 }
 0x330   : > { %4487 = vmatmul.mubr.bf16.gmra.mrb[180].mxu1 %v14182_v7  ;;  %4873 = vmatmul.mubr.bf16.gmra.mrb[244].mxu0 %v14182_v7  ;;  %v14245_v7 = vrot.slane %v14241_v14, %v17046_v29 }
 0x331   : > { %4496 = vmatprep.mubr.bf16.mxu1 %v3336_v24  ;;  %4882 = vmatprep.mubr.bf16.mxu0 %v3336_v24 }
 0x338   : > { %4497 = vmatmul.mubr.bf16.gmra.mrb[184].mxu1 %v3335_v28  ;;  %4883 = vmatmul.mubr.bf16.gmra.mrb[248].mxu0 %v3335_v28 }
 0x339   : > { %4506 = vmatprep.mubr.bf16.mxu1 %v3340_v17  ;;  %4892 = vmatprep.mubr.bf16.mxu0 %v3340_v17 }
 0x340   : > { %4507 = vmatmul.mubr.bf16.gmra.mrb[188].mxu1 %v3339_v54  ;;  %4893 = vmatmul.mubr.bf16.gmra.mrb[252].mxu0 %v3339_v54 }
 0x39b   : > { %v4358_v48 = vpop.f32.mrb[128].mxu1  ;;  %v14251_v27 = vpop.f32.mrb[192].mxu0 }
 0x39c   : > { %v4360_v61 = vpop.f32.mrb[129].mxu1  ;;  %v14253_v59 = vpop.f32.mrb[193].mxu0  ;;  %v14261_v47 = vadd.f32 %v4358_v48, %v14249_v21 }
 0x39d   : > { %v14256_v18 = vadd.f32 %v4360_v61, %v14245_v7  ;;  %v4362_v9 = vpop.f32.mrb[130].mxu1  ;;  %v14258_v5 = vpop.f32.mrb[194].mxu0 }
 0x39e   : > { %17051 = vst [vmem:[#allocation11_spill] sm:$0xff] %v14261_v47  ;;  %v14264_v0 = vadd.f32 %v4362_v9, %v14249_v21  ;;  %v4364_v2 = vpop.f32.mrb[131].mxu1  ;;  %v14266_v46 = vpop.f32.mrb[195].mxu0  ;;  %v16659_v6 = vmax.f32 %v14261_v47, 0.0 }
 0x39f   : > { %17050 = vst [vmem:[#allocation10_spill] sm:$0xff] %v14256_v18  ;;  %v14269_v31 = vadd.f32 %v4364_v2, %v14245_v7  ;;  %v16658_v13 = vmax.f32 %v14256_v18, 0.0  ;;  %v11049_v2 = vld [vmem:[%s16571_s7 + $0x260] ss:$16 sps:$4 sm:$0xff]  }
 0x3a0   : > { %17052 = vst [vmem:[#allocation12_spill] sm:$0xff] %v14264_v0  ;;  %v16655_v3 = vmax.f32 %v14264_v0, 0.0 }
 0x3a1   : > { %17053 = vst [vmem:[#allocation15_spill] sm:$0xff] %v14269_v31  ;;  %v16654_v53 = vmax.f32 %v14269_v31, 0.0 }
 0x3a2   : > { %v5031_v62 = vpack.c.bf16 %v16655_v3, %v16659_v6 }
 0x3a3   : > { %v5032_v16 = vpack.c.bf16 %v16654_v53, %v16658_v13  ;;  %v4368_v63 = vpop.f32.mrb[132].mxu1  ;;  %v14279_v10 = vpop.f32.mrb[196].mxu0 }
 0x3a4   : > { %v4370_v26 = vpop.f32.mrb[133].mxu1  ;;  %v14291_v34 = vpop.f32.mrb[197].mxu0  ;;  %v14305_v38 = vadd.f32 %v4368_v63, %v14249_v21 }
 0x3a5   : > { %v14300_v44 = vadd.f32 %v4370_v26, %v14245_v7  ;;  %v4372_v24 = vpop.f32.mrb[134].mxu1  ;;  %v14302_v28 = vpop.f32.mrb[198].mxu0  ;;  %5917 = vmatprep.mubr.bf16.mxu1 %v5032_v16  ;;  %6303 = vmatprep.mubr.bf16.mxu0 %v5032_v16  ;;  %v11079_v16 = vld [vmem:[%s16571_s7 + $0x268] ss:$16 sps:$4 sm:$0xff]  }
 0x3a6   : > { %17055 = vst [vmem:[#allocation19_spill] sm:$0xff] %v14305_v38  ;;  %v14308_v45 = vadd.f32 %v4372_v24, %v14249_v21  ;;  %v4374_v19 = vpop.f32.mrb[135].mxu1  ;;  %v14310_v33 = vpop.f32.mrb[199].mxu0  ;;  %5918 = vmatmul.mubr.bf16.vlgmr.msra.gmra.mrb[192].mxu1 %v5031_v62  ;;  %6304 = vmatmul.mubr.bf16.vlgmr.msra.gmra.mrb[0].mxu0 %v5031_v62  ;;  %v16653_v49 = vmax.f32 %v14305_v38, 0.0 }
 0x3a7   : > { %17054 = vst [vmem:[#allocation16_spill] sm:$0xff] %v14300_v44  ;;  %v14313_v50 = vadd.f32 %v4374_v19, %v14245_v7  ;;  %6079 = vmatpush1.bf16.msra.mxu1 %v11040_v12  ;;  %6465 = vmatpush1.bf16.msra.mxu0 %v11067_v36  ;;  %v16652_v55 = vmax.f32 %v14300_v44, 0.0  ;;  %v11054_v12 = vld [vmem:[%s16571_s7 + $0x284] ss:$16 sps:$4 sm:$0xff]   ;;  %v11087_v36 = vld [vmem:[%s16571_s7 + $0x28c] ss:$16 sps:$4 sm:$0xff]  }
 0x3a8   : > { %17056 = vst [vmem:[#allocation20_spill] sm:$0xff] %v14308_v45  ;;  %v16651_v4 = vmax.f32 %v14308_v45, 0.0  ;;  %6080 = vmatprep.subr.bf16.mxu1 %v11045_v39  ;;  %6466 = vmatprep.subr.bf16.mxu0 %v11072_v40 }
 0x3a9   : > { %17057 = vst [vmem:[#allocation24_spill] sm:$0xff] %v14313_v50  ;;  %v16650_v22 = vmax.f32 %v14313_v50, 0.0 }
 0x3aa   : > { %v5035_v17 = vpack.c.bf16 %v16651_v4, %v16653_v49  ;;  %v11103_v49 = vld [vmem:[%s16571_s7 + $0x308] ss:$16 sps:$4 sm:$0xff]  }
 0x3ab   : > { %v5036_v42 = vpack.c.bf16 %v16650_v22, %v16652_v55  ;;  %v4378_v11 = vpop.f32.mrb[136].mxu1  ;;  %v14335_v51 = vpop.f32.mrb[200].mxu0  ;;  %6081 = vmatpush1.bf16.msra.mxu1 %v11043_v20  ;;  %6467 = vmatpush1.bf16.msra.mxu0 %v11070_v60  ;;  %v11052_v20 = vld [vmem:[%s16571_s7 + $0x280] ss:$16 sps:$4 sm:$0xff]   ;;  %v11085_v60 = vld [vmem:[%s16571_s7 + $0x288] ss:$16 sps:$4 sm:$0xff]  }
 0x3ac   : > { %v4380_v54 = vpop.f32.mrb[137].mxu1  ;;  %v14347_v15 = vpop.f32.mrb[201].mxu0  ;;  %6082 = vmatprep.subr.bf16.mxu1 %v11048_v41  ;;  %6468 = vmatprep.subr.bf16.mxu0 %v11078_v58  ;;  %v14361_v35 = vadd.f32 %v4378_v11, %v14249_v21  ;;  %v11057_v11 = vld [vmem:[%s16571_s7 + $0x2a4] ss:$16 sps:$4 sm:$0xff]  }
 0x3ad   : > { %v14356_v52 = vadd.f32 %v4380_v54, %v14245_v7  ;;  %v4382_v37 = vpop.f32.mrb[138].mxu1  ;;  %v14358_v56 = vpop.f32.mrb[202].mxu0  ;;  %5927 = vmatprep.mubr.bf16.mxu1 %v5036_v42  ;;  %6313 = vmatprep.mubr.bf16.mxu0 %v5036_v42 }
 0x3ae   : > { %17059 = vst [vmem:[#allocation14_spill] sm:$0xff] %v14361_v35  ;;  %v14364_v32 = vadd.f32 %v4382_v37, %v14249_v21  ;;  %v4384_v48 = vpop.f32.mrb[139].mxu1  ;;  %v14366_v61 = vpop.f32.mrb[203].mxu0  ;;  %5928 = vmatmul.mubr.bf16.gmra.mrb[196].mxu1 %v5035_v17  ;;  %6314 = vmatmul.mubr.bf16.gmra.mrb[4].mxu0 %v5035_v17  ;;  %v16647_v39 = vmax.f32 %v14361_v35, 0.0 }
 0x3af   : > { %17058 = vst [vmem:[#allocation13_spill] sm:$0xff] %v14356_v52  ;;  %v14369_v9 = vadd.f32 %v4384_v48, %v14245_v7  ;;  %6083 = vmatpush1.bf16.msra.mxu1 %v11046_v23  ;;  %6469 = vmatpush1.bf16.msra.mxu0 %v11076_v43  ;;  %v16646_v62 = vmax.f32 %v14356_v52, 0.0  ;;  %v11090_v23 = vld [vmem:[%s16571_s7 + $0x2ac] ss:$16 sps:$4 sm:$0xff]   ;;  %v11130_v52 = vld [vmem:[%s16571_s7 + $0x3c8] ss:$16 sps:$4 sm:$0xff]  }
 0x3b0   : > { %17060 = vst [vmem:[#allocation5_spill] sm:$0xff] %v14364_v32  ;;  %v16643_v63 = vmax.f32 %v14364_v32, 0.0  ;;  %6084 = vmatprep.subr.bf16.mxu1 %v11051_v30  ;;  %6470 = vmatprep.subr.bf16.mxu0 %v11081_v57 }
 0x3b1   : > { %17061 = vst [vmem:[#allocation6_spill] sm:$0xff] %v14369_v9  ;;  %v16642_v26 = vmax.f32 %v14369_v9, 0.0 }
 0x3b2   : > { %v5039_v41 = vpack.c.bf16 %v16643_v63, %v16647_v39 }
 0x3b3   : > { %v5040_v40 = vpack.c.bf16 %v16642_v26, %v16646_v62  ;;  %v4388_v24 = vpop.f32.mrb[140].mxu1  ;;  %v14391_v19 = vpop.f32.mrb[204].mxu0  ;;  %6085 = vmatpush1.bf16.msra.mxu1 %v11049_v2  ;;  %6471 = vmatpush1.bf16.msra.mxu0 %v11079_v16  ;;  %v11055_v16 = vld [vmem:[%s16571_s7 + $0x2a0] ss:$16 sps:$4 sm:$0xff]  }
 0x3b4   : > { %v4390_v58 = vpop.f32.mrb[141].mxu1  ;;  %v14403_v42 = vpop.f32.mrb[205].mxu0  ;;  %6086 = vmatprep.subr.bf16.mxu1 %v11054_v12  ;;  %6472 = vmatprep.subr.bf16.mxu0 %v11087_v36  ;;  %v14417_v30 = vadd.f32 %v4388_v24, %v14249_v21  ;;  %v11088_v12 = vld [vmem:[%s16571_s7 + $0x2a8] ss:$16 sps:$4 sm:$0xff]   ;;  %v11096_v24 = vld [vmem:[%s16571_s7 + $0x2cc] ss:$16 sps:$4 sm:$0xff]  }
 0x3b5   : > { %v14412_v43 = vadd.f32 %v4390_v58, %v14245_v7  ;;  %v4392_v17 = vpop.f32.mrb[142].mxu1  ;;  %v14414_v54 = vpop.f32.mrb[206].mxu0  ;;  %5937 = vmatprep.mubr.bf16.mxu1 %v5040_v40  ;;  %6323 = vmatprep.mubr.bf16.mxu0 %v5040_v40  ;;  %v11060_v40 = vld [vmem:[%s16571_s7 + $0x2c4] ss:$16 sps:$4 sm:$0xff]  }
 0x3b6   : > { %17063 = vst [vmem:[#allocation18_spill] sm:$0xff] %v14417_v30  ;;  %v14420_v57 = vadd.f32 %v4392_v17, %v14249_v21  ;;  %v4394_v37 = vpop.f32.mrb[143].mxu1  ;;  %v14422_v48 = vpop.f32.mrb[207].mxu0  ;;  %5938 = vmatmul.mubr.bf16.gmra.mrb[200].mxu1 %v5039_v41  ;;  %6324 = vmatmul.mubr.bf16.gmra.mrb[8].mxu0 %v5039_v41  ;;  %v16649_v41 = vmax.f32 %v14417_v30, 0.0 }
 0x3b7   : > { %17062 = vst [vmem:[#allocation17_spill] sm:$0xff] %v14412_v43  ;;  %v14425_v2 = vadd.f32 %v4394_v37, %v14245_v7  ;;  %6087 = vmatpush1.bf16.msra.mxu1 %v11052_v20  ;;  %6473 = vmatpush1.bf16.msra.mxu0 %v11085_v60  ;;  %v16645_v20 = vmax.f32 %v14412_v43, 0.0  ;;  %v11094_v37 = vld [vmem:[%s16571_s7 + $0x2c8] ss:$16 sps:$4 sm:$0xff]  }
 0x3b8   : > { %17064 = vst [vmem:[#allocation2_spill] sm:$0xff] %v14420_v57  ;;  %v16648_v36 = vmax.f32 %v14420_v57, 0.0  ;;  %6088 = vmatprep.subr.bf16.mxu1 %v11057_v11  ;;  %6474 = vmatprep.subr.bf16.mxu0 %v11090_v23  ;;  %v11058_v23 = vld [vmem:[%s16571_s7 + $0x2c0] ss:$16 sps:$4 sm:$0xff]   ;;  %v11121_v43 = vld [vmem:[%s16571_s7 + $0x388] ss:$16 sps:$4 sm:$0xff]  }
 0x3b9   : > { %17065 = vst [vmem:[#allocation23_spill] sm:$0xff] %v14425_v2  ;;  %v16644_v60 = vmax.f32 %v14425_v2, 0.0 }
 0x3ba   : > { %v5043_v26 = vpack.c.bf16 %v16648_v36, %v16649_v41 }
 0x3bb   : > { %v5044_v58 = vpack.c.bf16 %v16644_v60, %v16645_v20  ;;  %v4398_v11 = vpop.f32.mrb[144].mxu1  ;;  %v14447_v17 = vpop.f32.mrb[208].mxu0  ;;  %6089 = vmatpush1.bf16.msra.mxu1 %v11055_v16  ;;  %6475 = vmatpush1.bf16.msra.mxu0 %v11088_v12  ;;  %v11063_v16 = vld [vmem:[%s16571_s7 + $0x2e4] ss:$16 sps:$4 sm:$0xff]   ;;  %v11099_v12 = vld [vmem:[%s16571_s7 + $0x2ec] ss:$16 sps:$4 sm:$0xff]  }
 0x3bc   : > { %v4400_v63 = vpop.f32.mrb[145].mxu1  ;;  %v14459_v60 = vpop.f32.mrb[209].mxu0  ;;  %6090 = vmatprep.subr.bf16.mxu1 %v11060_v40  ;;  %6476 = vmatprep.subr.bf16.mxu0 %v11096_v24  ;;  %v14473_v36 = vadd.f32 %v4398_v11, %v14249_v21 }
 0x3bd   : > { %v14468_v20 = vadd.f32 %v4400_v63, %v14245_v7  ;;  %v4402_v62 = vpop.f32.mrb[146].mxu1  ;;  %v14470_v39 = vpop.f32.mrb[210].mxu0  ;;  %5947 = vmatprep.mubr.bf16.mxu1 %v5044_v58  ;;  %6333 = vmatprep.mubr.bf16.mxu0 %v5044_v58  ;;  %v11061_v63 = vld [vmem:[%s16571_s7 + $0x2e0] ss:$16 sps:$4 sm:$0xff]   ;;  %v11097_v58 = vld [vmem:[%s16571_s7 + $0x2e8] ss:$16 sps:$4 sm:$0xff]  }
 0x3be   : > { %17067 = vst [vmem:[#allocation8_spill] sm:$0xff] %v14473_v36  ;;  %v14476_v40 = vadd.f32 %v4402_v62, %v14249_v21  ;;  %v4404_v41 = vpop.f32.mrb[147].mxu1  ;;  %v14478_v24 = vpop.f32.mrb[211].mxu0  ;;  %5948 = vmatmul.mubr.bf16.gmra.mrb[204].mxu1 %v5043_v26  ;;  %6334 = vmatmul.mubr.bf16.gmra.mrb[12].mxu0 %v5043_v26  ;;  %v11066_v26 = vld [vmem:[%s16571_s7 + $0x304] ss:$16 sps:$4 sm:$0xff]  }
 0x3bf   : > { %17066 = vst [vmem:[#allocation7_spill] sm:$0xff] %v14468_v20  ;;  %v14481_v22 = vadd.f32 %v4404_v41, %v14245_v7  ;;  %6091 = vmatpush1.bf16.msra.mxu1 %v11058_v23  ;;  %6477 = vmatpush1.bf16.msra.mxu0 %v11094_v37  ;;  %v11105_v41 = vld [vmem:[%s16571_s7 + $0x30c] ss:$16 sps:$4 sm:$0xff]   ;;  %v16657_v11 = vmax.f32 %v14468_v20, 0.0  ;;  %v16661_v37 = vmax.f32 %v14473_v36, 0.0 }
 0x3c0   : > { %17068 = vst [vmem:[#allocation21_spill] sm:$0xff] %v14476_v40  ;;  %v16660_v62 = vmax.f32 %v14476_v40, 0.0  ;;  %6092 = vmatprep.subr.bf16.mxu1 %v11063_v16  ;;  %6478 = vmatprep.subr.bf16.mxu0 %v11099_v12  ;;  %v11064_v12 = vld [vmem:[%s16571_s7 + $0x300] ss:$16 sps:$4 sm:$0xff]   ;;  %v11112_v20 = vld [vmem:[%s16571_s7 + $0x348] ss:$16 sps:$4 sm:$0xff]  }
 0x3c1   : > { %17069 = vst [vmem:[#allocation25_spill] sm:$0xff] %v14481_v22  ;;  %v16656_v23 = vmax.f32 %v14481_v22, 0.0 }
 0x3c2   : > { %v5047_v53 = vpack.c.bf16 %v16660_v62, %v16661_v37 }
 0x3c3   : > { %v5048_v16 = vpack.c.bf16 %v16656_v23, %v16657_v11  ;;  %v4408_v4 = vpop.f32.mrb[148].mxu1  ;;  %v14503_v55 = vpop.f32.mrb[212].mxu0  ;;  %6093 = vmatpush1.bf16.msra.mxu1 %v11061_v63  ;;  %6479 = vmatpush1.bf16.msra.mxu0 %v11097_v58  ;;  %v11075_v63 = vld [vmem:[%s16571_s7 + $0x324] ss:$16 sps:$4 sm:$0xff]   ;;  %v11108_v58 = vld [vmem:[%s16571_s7 + $0x32c] ss:$16 sps:$4 sm:$0xff]  }
 0x3c4   : > { %v4410_v3 = vpop.f32.mrb[149].mxu1  ;;  %v14515_v23 = vpop.f32.mrb[213].mxu0  ;;  %6094 = vmatprep.subr.bf16.mxu1 %v11066_v26  ;;  %6480 = vmatprep.subr.bf16.mxu0 %v11105_v41  ;;  %v14529_v62 = vadd.f32 %v4408_v4, %v14249_v21  ;;  %v11106_v4 = vld [vmem:[%s16571_s7 + $0x328] ss:$16 sps:$4 sm:$0xff]  }
 0x3c5   : > { %v14524_v11 = vadd.f32 %v4410_v3, %v14245_v7  ;;  %v4412_v13 = vpop.f32.mrb[150].mxu1  ;;  %v14526_v6 = vpop.f32.mrb[214].mxu0  ;;  %5957 = vmatprep.mubr.bf16.mxu1 %v5048_v16  ;;  %6343 = vmatprep.mubr.bf16.mxu0 %v5048_v16  ;;  %v11073_v3 = vld [vmem:[%s16571_s7 + $0x320] ss:$16 sps:$4 sm:$0xff]  }
 0x3c6   : > { %17071 = vst [vmem:[#allocation27_spill] sm:$0xff] %v14529_v62  ;;  %v14532_v26 = vadd.f32 %v4412_v13, %v14249_v21  ;;  %v4414_v37 = vpop.f32.mrb[151].mxu1  ;;  %v14534_v41 = vpop.f32.mrb[215].mxu0  ;;  %5958 = vmatmul.mubr.bf16.gmra.mrb[208].mxu1 %v5047_v53  ;;  %6344 = vmatmul.mubr.bf16.gmra.mrb[16].mxu0 %v5047_v53  ;;  %v11084_v53 = vld [vmem:[%s16571_s7 + $0x344] ss:$16 sps:$4 sm:$0xff]  }
 0x3c7   : > { %17070 = vst [vmem:[#allocation26_spill] sm:$0xff] %v14524_v11  ;;  %v14537_v22 = vadd.f32 %v4414_v37, %v14245_v7  ;;  %6095 = vmatpush1.bf16.msra.mxu1 %v11064_v12  ;;  %6481 = vmatpush1.bf16.msra.mxu0 %v11103_v49  ;;  %v11114_v37 = vld [vmem:[%s16571_s7 + $0x34c] ss:$16 sps:$4 sm:$0xff]   ;;  %v16669_v16 = vmax.f32 %v14524_v11, 0.0  ;;  %v16672_v12 = vmax.f32 %v14529_v62, 0.0 }
 0x3c8   : > { %17072 = vst [vmem:[#allocation28_spill] sm:$0xff] %v14532_v26  ;;  %6096 = vmatprep.subr.bf16.mxu1 %v11075_v63  ;;  %6482 = vmatprep.subr.bf16.mxu0 %v11108_v58  ;;  %v11082_v58 = vld [vmem:[%s16571_s7 + $0x340] ss:$16 sps:$4 sm:$0xff]   ;;  %v17074_v11 = vmax.f32 %v14532_v26, 0.0 }
 0x3c9   : > { %17073 = vst [vmem:[#allocation29_spill] sm:$0xff] %v14537_v22  ;;  %v16668_v49 = vmax.f32 %v14537_v22, 0.0 }
 0x3ca   : > { %v5051_v36 = vpack.c.bf16 %v17074_v11, %v16672_v12 }
 0x3cb   : > { %v5052_v63 = vpack.c.bf16 %v16668_v49, %v16669_v16  ;;  %v4418_v13 = vpop.f32.mrb[152].mxu1  ;;  %v14559_v40 = vpop.f32.mrb[216].mxu0  ;;  %6097 = vmatpush1.bf16.msra.mxu1 %v11073_v3  ;;  %6483 = vmatpush1.bf16.msra.mxu0 %v11106_v4  ;;  %v11093_v3 = vld [vmem:[%s16571_s7 + $0x364] ss:$16 sps:$4 sm:$0xff]   ;;  %v11117_v4 = vld [vmem:[%s16571_s7 + $0x36c] ss:$16 sps:$4 sm:$0xff]  }
 0x3cc   : > { %v4420_v22 = vpop.f32.mrb[153].mxu1  ;;  %v14571_v49 = vpop.f32.mrb[217].mxu0  ;;  %6098 = vmatprep.subr.bf16.mxu1 %v11084_v53  ;;  %6484 = vmatprep.subr.bf16.mxu0 %v11114_v37  ;;  %v14585_v11 = vadd.f32 %v4418_v13, %v14249_v21  ;;  %v11115_v13 = vld [vmem:[%s16571_s7 + $0x368] ss:$16 sps:$4 sm:$0xff]  }
 0x3cd   : > { %v14580_v16 = vadd.f32 %v4420_v22, %v14245_v7  ;;  %v4422_v62 = vpop.f32.mrb[154].mxu1  ;;  %v14582_v2 = vpop.f32.mrb[218].mxu0  ;;  %5967 = vmatprep.mubr.bf16.mxu1 %v5052_v63  ;;  %6353 = vmatprep.mubr.bf16.mxu0 %v5052_v63  ;;  %v11091_v22 = vld [vmem:[%s16571_s7 + $0x360] ss:$16 sps:$4 sm:$0xff]  }
 0x3ce   : > { %17076 = vst [vmem:[#allocation31_spill] sm:$0xff] %v14585_v11  ;;  %v14588_v53 = vadd.f32 %v4422_v62, %v14249_v21  ;;  %v4424_v12 = vpop.f32.mrb[155].mxu1  ;;  %v14590_v37 = vpop.f32.mrb[219].mxu0  ;;  %5968 = vmatmul.mubr.bf16.gmra.mrb[212].mxu1 %v5051_v36  ;;  %6354 = vmatmul.mubr.bf16.gmra.mrb[20].mxu0 %v5051_v36  ;;  %v11102_v36 = vld [vmem:[%s16571_s7 + $0x384] ss:$16 sps:$4 sm:$0xff]  }
 0x3cf   : > { %17075 = vst [vmem:[#allocation30_spill] sm:$0xff] %v14580_v16  ;;  %v14593_v26 = vadd.f32 %v4424_v12, %v14245_v7  ;;  %6099 = vmatpush1.bf16.msra.mxu1 %v11082_v58  ;;  %6485 = vmatpush1.bf16.msra.mxu0 %v11112_v20  ;;  %v11123_v12 = vld [vmem:[%s16571_s7 + $0x38c] ss:$16 sps:$4 sm:$0xff]   ;;  %v16680_v63 = vmax.f32 %v14580_v16, 0.0  ;;  %v16683_v58 = vmax.f32 %v14585_v11, 0.0 }
 0x3d0   : > { %17077 = vst [vmem:[#allocation32_spill] sm:$0xff] %v14588_v53  ;;  %6100 = vmatprep.subr.bf16.mxu1 %v11093_v3  ;;  %6486 = vmatprep.subr.bf16.mxu0 %v11117_v4  ;;  %v11100_v4 = vld [vmem:[%s16571_s7 + $0x380] ss:$16 sps:$4 sm:$0xff]   ;;  %v17079_v16 = vmax.f32 %v14588_v53, 0.0 }
 0x3d1   : > { %17078 = vst [vmem:[#allocation33_spill] sm:$0xff] %v14593_v26  ;;  %v16679_v20 = vmax.f32 %v14593_v26, 0.0 }
 0x3d2   : > { %v5055_v30 = vpack.c.bf16 %v17079_v16, %v16683_v58 }
 0x3d3   : > { %v5056_v3 = vpack.c.bf16 %v16679_v20, %v16680_v63  ;;  %v4428_v62 = vpop.f32.mrb[156].mxu1  ;;  %v14615_v57 = vpop.f32.mrb[220].mxu0  ;;  %6101 = vmatpush1.bf16.msra.mxu1 %v11091_v22  ;;  %6487 = vmatpush1.bf16.msra.mxu0 %v11115_v13  ;;  %v11111_v22 = vld [vmem:[%s16571_s7 + $0x3a4] ss:$16 sps:$4 sm:$0xff]   ;;  %v11126_v13 = vld [vmem:[%s16571_s7 + $0x3ac] ss:$16 sps:$4 sm:$0xff]  }
 0x3d4   : > { %v4430_v26 = vpop.f32.mrb[157].mxu1  ;;  %v14627_v20 = vpop.f32.mrb[221].mxu0  ;;  %6102 = vmatprep.subr.bf16.mxu1 %v11102_v36  ;;  %6488 = vmatprep.subr.bf16.mxu0 %v11123_v12  ;;  %v14641_v16 = vadd.f32 %v4428_v62, %v14249_v21  ;;  %v11124_v62 = vld [vmem:[%s16571_s7 + $0x3a8] ss:$16 sps:$4 sm:$0xff]  }
 0x3d5   : > { %v14636_v63 = vadd.f32 %v4430_v26, %v14245_v7  ;;  %v4432_v11 = vpop.f32.mrb[158].mxu1  ;;  %v14638_v9 = vpop.f32.mrb[222].mxu0  ;;  %5977 = vmatprep.mubr.bf16.mxu1 %v5056_v3  ;;  %6363 = vmatprep.mubr.bf16.mxu0 %v5056_v3  ;;  %v11109_v26 = vld [vmem:[%s16571_s7 + $0x3a0] ss:$16 sps:$4 sm:$0xff]  }
 0x3d6   : > { %17081 = vst [vmem:[#allocation35_spill] sm:$0xff] %v14641_v16  ;;  %v14644_v36 = vadd.f32 %v4432_v11, %v14249_v21  ;;  %v4434_v58 = vpop.f32.mrb[159].mxu1  ;;  %v14646_v12 = vpop.f32.mrb[223].mxu0  ;;  %5978 = vmatmul.mubr.bf16.gmra.mrb[216].mxu1 %v5055_v30  ;;  %6364 = vmatmul.mubr.bf16.gmra.mrb[24].mxu0 %v5055_v30  ;;  %v11120_v30 = vld [vmem:[%s16571_s7 + $0x3c4] ss:$16 sps:$4 sm:$0xff]  }
 0x3d7   : > { %17080 = vst [vmem:[#allocation34_spill] sm:$0xff] %v14636_v63  ;;  %v14649_v53 = vadd.f32 %v4434_v58, %v14245_v7  ;;  %6103 = vmatpush1.bf16.msra.mxu1 %v11100_v4  ;;  %6489 = vmatpush1.bf16.msra.mxu0 %v11121_v43  ;;  %v11132_v58 = vld [vmem:[%s16571_s7 + $0x3cc] ss:$16 sps:$4 sm:$0xff]   ;;  %v16691_v3 = vmax.f32 %v14636_v63, 0.0  ;;  %v16694_v4 = vmax.f32 %v14641_v16, 0.0 }
 0x3d8   : > { %17082 = vst [vmem:[#allocation36_spill] sm:$0xff] %v14644_v36  ;;  %6104 = vmatprep.subr.bf16.mxu1 %v11111_v22  ;;  %6490 = vmatprep.subr.bf16.mxu0 %v11126_v13  ;;  %v11118_v13 = vld [vmem:[%s16571_s7 + $0x3c0] ss:$16 sps:$4 sm:$0xff]   ;;  %v17084_v63 = vmax.f32 %v14644_v36, 0.0 }
 0x3d9   : > { %17083 = vst [vmem:[#allocation37_spill] sm:$0xff] %v14649_v53  ;;  %v16690_v43 = vmax.f32 %v14649_v53, 0.0 }
 0x3da   : > { %v5059_v35 = vpack.c.bf16 %v17084_v63, %v16694_v4 }
 0x3db   : > { %v5060_v22 = vpack.c.bf16 %v16690_v43, %v16691_v3  ;;  %v4438_v11 = vpop.f32.mrb[160].mxu1  ;;  %v14671_v32 = vpop.f32.mrb[224].mxu0  ;;  %6105 = vmatpush1.bf16.msra.mxu1 %v11109_v26  ;;  %6491 = vmatpush1.bf16.msra.mxu0 %v11124_v62  ;;  %v11129_v26 = vld [vmem:[%s16571_s7 + $0x3e4] ss:$16 sps:$4 sm:$0xff]   ;;  %v11135_v62 = vld [vmem:[%s16571_s7 + $0x3ec] ss:$16 sps:$4 sm:$0xff]  }
 0x3dc   : > { %v4440_v53 = vpop.f32.mrb[161].mxu1  ;;  %v14683_v43 = vpop.f32.mrb[225].mxu0  ;;  %6106 = vmatprep.subr.bf16.mxu1 %v11120_v30  ;;  %6492 = vmatprep.subr.bf16.mxu0 %v11132_v58  ;;  %v14697_v63 = vadd.f32 %v4438_v11, %v14249_v21  ;;  %v11133_v11 = vld [vmem:[%s16571_s7 + $0x3e8] ss:$16 sps:$4 sm:$0xff]  }
 0x3dd   : > { %v14692_v3 = vadd.f32 %v4440_v53, %v14245_v7  ;;  %v4442_v16 = vpop.f32.mrb[162].mxu1  ;;  %v14694_v50 = vpop.f32.mrb[226].mxu0  ;;  %5987 = vmatprep.mubr.bf16.mxu1 %v5060_v22  ;;  %6373 = vmatprep.mubr.bf16.mxu0 %v5060_v22  ;;  %v11127_v53 = vld [vmem:[%s16571_s7 + $0x3e0] ss:$16 sps:$4 sm:$0xff]  }
 0x3de   : > { %17086 = vst [vmem:[#allocation39_spill] sm:$0xff] %v14697_v63  ;;  %v14700_v30 = vadd.f32 %v4442_v16, %v14249_v21  ;;  %v4444_v4 = vpop.f32.mrb[163].mxu1  ;;  %v14702_v58 = vpop.f32.mrb[227].mxu0  ;;  %5988 = vmatmul.mubr.bf16.gmra.mrb[220].mxu1 %v5059_v35  ;;  %6374 = vmatmul.mubr.bf16.gmra.mrb[28].mxu0 %v5059_v35 }
 0x3df   : > { %17085 = vst [vmem:[#allocation38_spill] sm:$0xff] %v14692_v3  ;;  %v14705_v36 = vadd.f32 %v4444_v4, %v14245_v7  ;;  %6107 = vmatpush1.bf16.msra.mxu1 %v11118_v13  ;;  %6493 = vmatpush1.bf16.msra.mxu0 %v11130_v52  ;;  %v16702_v22 = vmax.f32 %v14692_v3, 0.0  ;;  %v16704_v4 = vmax.f32 %v14697_v63, 0.0 }
 0x3e0   : > { %17087 = vst [vmem:[#allocation40_spill] sm:$0xff] %v14700_v30  ;;  %v16703_v16 = vmax.f32 %v14700_v30, 0.0  ;;  %6108 = vmatprep.subr.bf16.mxu1 %v11129_v26  ;;  %6494 = vmatprep.subr.bf16.mxu0 %v11135_v62 }
 0x3e1   : > { %17088 = vst [vmem:[#allocation41_spill] sm:$0xff] %v14705_v36  ;;  %v16701_v35 = vmax.f32 %v14705_v36, 0.0 }
 0x3e2   : > { %v5063_v26 = vpack.c.bf16 %v16703_v16, %v16704_v4 }
 0x3e3   : > { %v5064_v13 = vpack.c.bf16 %v16701_v35, %v16702_v22  ;;  %v4448_v52 = vpop.f32.mrb[164].mxu1  ;;  %v14721_v45 = vpop.f32.mrb[228].mxu0  ;;  %6109 = vmatpush1.bf16.msra.mxu1 %v11127_v53  ;;  %6495 = vmatpush1.bf16.msra.mxu0 %v11133_v11 }
 0x3e4   : > { %v4450_v62 = vpop.f32.mrb[165].mxu1  ;;  %v14727_v44 = vpop.f32.mrb[229].mxu0  ;;  %v14735_v35 = vadd.f32 %v4448_v52, %v14249_v21 }
 0x3e5   : > { %v14730_v38 = vadd.f32 %v4450_v62, %v14245_v7  ;;  %v4452_v3 = vpop.f32.mrb[166].mxu1  ;;  %v14732_v31 = vpop.f32.mrb[230].mxu0  ;;  %5997 = vmatprep.mubr.bf16.mxu1 %v5064_v13  ;;  %6383 = vmatprep.mubr.bf16.mxu0 %v5064_v13 }
 0x3e6   : > { %17090 = vst [vmem:[#allocation43_spill] sm:$0xff] %v14735_v35  ;;  %v14738_v53 = vadd.f32 %v4452_v3, %v14249_v21  ;;  %v4454_v11 = vpop.f32.mrb[167].mxu1  ;;  %v14740_v22 = vpop.f32.mrb[231].mxu0  ;;  %5998 = vmatmul.mubr.bf16.gmra.mrb[224].mxu1 %v5063_v26  ;;  %6384 = vmatmul.mubr.bf16.gmra.mrb[32].mxu0 %v5063_v26  ;;  %v16716_v52 = vmax.f32 %v14735_v35, 0.0 }
 0x3e7   : > { %17089 = vst [vmem:[#allocation42_spill] sm:$0xff] %v14730_v38  ;;  %v14743_v16 = vadd.f32 %v4454_v11, %v14245_v7  ;;  %v16712_v4 = vmax.f32 %v14730_v38, 0.0 }
 0x3e8   : > { %17091 = vst [vmem:[#allocation44_spill] sm:$0xff] %v14738_v53  ;;  %v16715_v62 = vmax.f32 %v14738_v53, 0.0 }
 0x3e9   : > { %17092 = vst [vmem:[#allocation45_spill] sm:$0xff] %v14743_v16  ;;  %v16711_v13 = vmax.f32 %v14743_v16, 0.0 }
 0x3ea   : > { %v5067_v26 = vpack.c.bf16 %v16715_v62, %v16716_v52 }
 0x3eb   : > { %v5068_v3 = vpack.c.bf16 %v16711_v13, %v16712_v4  ;;  %v4458_v36 = vpop.f32.mrb[168].mxu1  ;;  %v14753_v30 = vpop.f32.mrb[232].mxu0 }
 0x3ec   : > { %17093 = vst [vmem:[#allocation46_spill] sm:$0xff] %v14753_v30  ;;  %v4460_v11 = vpop.f32.mrb[169].mxu1  ;;  %v14759_v63 = vpop.f32.mrb[233].mxu0  ;;  %v14767_v13 = vadd.f32 %v4458_v36, %v14249_v21 }
 0x3ed   : > { %v14762_v0 = vadd.f32 %v4460_v11, %v14245_v7  ;;  %v4462_v18 = vpop.f32.mrb[170].mxu1  ;;  %v14764_v47 = vpop.f32.mrb[234].mxu0  ;;  %6007 = vmatprep.mubr.bf16.mxu1 %v5068_v3  ;;  %6393 = vmatprep.mubr.bf16.mxu0 %v5068_v3 }
 0x3ee   : > { %17095 = vst [vmem:[#allocation48_spill] sm:$0xff] %v14764_v47  ;;  %17096 = vst [vmem:[#allocation49_spill] sm:$0xff] %v14767_v13  ;;  %v14770_v4 = vadd.f32 %v4462_v18, %v14249_v21  ;;  %v4464_v16 = vpop.f32.mrb[171].mxu1  ;;  %v14772_v53 = vpop.f32.mrb[235].mxu0  ;;  %6008 = vmatmul.mubr.bf16.gmra.mrb[228].mxu1 %v5067_v26  ;;  %6394 = vmatmul.mubr.bf16.gmra.mrb[36].mxu0 %v5067_v26  ;;  %v16726_v36 = vmax.f32 %v14767_v13, 0.0 }
 0x3ef   : > { %17094 = vst [vmem:[#allocation47_spill] sm:$0xff] %v14762_v0  ;;  %v14775_v62 = vadd.f32 %v4464_v16, %v14245_v7  ;;  %v16722_v52 = vmax.f32 %v14762_v0, 0.0 }
 0x3f0   : > { %17097 = vst [vmem:[#allocation50_spill] sm:$0xff] %v14770_v4  ;;  %v16725_v11 = vmax.f32 %v14770_v4, 0.0 }
 0x3f1   : > { %17098 = vst [vmem:[#allocation51_spill] sm:$0xff] %v14775_v62  ;;  %v16721_v3 = vmax.f32 %v14775_v62, 0.0 }
 0x3f2   : > { %v5071_v16 = vpack.c.bf16 %v16725_v11, %v16726_v36 }
 0x3f3   : > { %v5072_v18 = vpack.c.bf16 %v16721_v3, %v16722_v52  ;;  %v4468_v38 = vpop.f32.mrb[172].mxu1  ;;  %v14785_v35 = vpop.f32.mrb[236].mxu0 }
 0x3f4   : > { %17099 = vst [vmem:[#allocation52_spill] sm:$0xff] %v14785_v35  ;;  %v4470_v26 = vpop.f32.mrb[173].mxu1  ;;  %v14791_v29 = vpop.f32.mrb[237].mxu0  ;;  %v14799_v3 = vadd.f32 %v4468_v38, %v14249_v21 }
 0x3f5   : > { %17100 = vst [vmem:[#allocation53_spill] sm:$0xff] %v14791_v29  ;;  %v14794_v25 = vadd.f32 %v4470_v26, %v14245_v7  ;;  %v4472_v30 = vpop.f32.mrb[174].mxu1  ;;  %v14796_v47 = vpop.f32.mrb[238].mxu0  ;;  %6017 = vmatprep.mubr.bf16.mxu1 %v5072_v18  ;;  %6403 = vmatprep.mubr.bf16.mxu0 %v5072_v18 }
 0x3f6   : > { %17102 = vst [vmem:[#allocation55_spill] sm:$0xff] %v14796_v47  ;;  %17103 = vst [vmem:[#allocation56_spill] sm:$0xff] %v14799_v3  ;;  %v14802_v52 = vadd.f32 %v4472_v30, %v14249_v21  ;;  %v4474_v62 = vpop.f32.mrb[175].mxu1  ;;  %v14804_v4 = vpop.f32.mrb[239].mxu0  ;;  %6018 = vmatmul.mubr.bf16.gmra.mrb[232].mxu1 %v5071_v16  ;;  %6404 = vmatmul.mubr.bf16.gmra.mrb[40].mxu0 %v5071_v16  ;;  %v16734_v38 = vmax.f32 %v14799_v3, 0.0 }
 0x3f7   : > { %17101 = vst [vmem:[#allocation54_spill] sm:$0xff] %v14794_v25  ;;  %17105 = vst [vmem:[#allocation58_spill] sm:$0xff] %v14804_v4  ;;  %v14807_v11 = vadd.f32 %v4474_v62, %v14245_v7  ;;  %v16730_v36 = vmax.f32 %v14794_v25, 0.0 }
 0x3f8   : > { %17104 = vst [vmem:[#allocation57_spill] sm:$0xff] %v14802_v52  ;;  %v16733_v26 = vmax.f32 %v14802_v52, 0.0 }
 0x3f9   : > { %17106 = vst [vmem:[#allocation59_spill] sm:$0xff] %v14807_v11  ;;  %v16729_v18 = vmax.f32 %v14807_v11, 0.0 }
 0x3fa   : > { %v5075_v62 = vpack.c.bf16 %v16733_v26, %v16734_v38 }
 0x3fb   : > { %v5076_v30 = vpack.c.bf16 %v16729_v18, %v16730_v36  ;;  %v4478_v0 = vpop.f32.mrb[176].mxu1  ;;  %v14817_v13 = vpop.f32.mrb[240].mxu0 }
 0x3fc   : > { %17107 = vst [vmem:[#allocation60_spill] sm:$0xff] %v14817_v13  ;;  %v4480_v16 = vpop.f32.mrb[177].mxu1  ;;  %v14823_v35 = vpop.f32.mrb[241].mxu0  ;;  %v14831_v18 = vadd.f32 %v4478_v0, %v14249_v21  ;;  %v11141_v0 = vld [vmem:[%s16573_s9 + $0xc] ss:$16 sps:$4 sm:$0xff]  }
 0x3fd   : > { %17108 = vst [vmem:[#allocation61_spill] sm:$0xff] %v14823_v35  ;;  %v14826_v47 = vadd.f32 %v4480_v16, %v14245_v7  ;;  %v4482_v29 = vpop.f32.mrb[178].mxu1  ;;  %v14828_v4 = vpop.f32.mrb[242].mxu0  ;;  %6027 = vmatprep.mubr.bf16.mxu1 %v5076_v30  ;;  %6413 = vmatprep.mubr.bf16.mxu0 %v5076_v30  ;;  %v11138_v16 = vld [vmem:[%s16573_s9 + $0x4] ss:$16 sps:$4 sm:$0xff]  }
 0x3fe   : > { %17110 = vst [vmem:[#allocation63_spill] sm:$0xff] %v14828_v4  ;;  %17111 = vst [vmem:[#allocation64_spill] sm:$0xff] %v14831_v18  ;;  %v14834_v36 = vadd.f32 %v4482_v29, %v14249_v21  ;;  %v4484_v11 = vpop.f32.mrb[179].mxu1  ;;  %v14836_v52 = vpop.f32.mrb[243].mxu0  ;;  %6028 = vmatmul.mubr.bf16.gmra.mrb[236].mxu1 %v5075_v62  ;;  %6414 = vmatmul.mubr.bf16.gmra.mrb[44].mxu0 %v5075_v62  ;;  %v16742_v62 = vmax.f32 %v14831_v18, 0.0 }
 0x3ff   : > { %17109 = vst [vmem:[#allocation62_spill] sm:$0xff] %v14826_v47  ;;  %17113 = vst [vmem:[#allocation66_spill] sm:$0xff] %v14836_v52  ;;  %v14839_v26 = vadd.f32 %v4484_v11, %v14245_v7  ;;  %v16738_v29 = vmax.f32 %v14826_v47, 0.0  ;;  %7639 = vmatprep.subr.bf16.mxu1 %v11138_v16  ;;  %8025 = vmatprep.subr.bf16.mxu0 %v11141_v0 }
 0x400   : > { %17112 = vst [vmem:[#allocation65_spill] sm:$0xff] %v14834_v36  ;;  %v16741_v30 = vmax.f32 %v14834_v36, 0.0 }
 0x401   : > { %17114 = vst [vmem:[#allocation67_spill] sm:$0xff] %v14839_v26  ;;  %v16737_v38 = vmax.f32 %v14839_v26, 0.0 }
 0x402   : > { %v5079_v13 = vpack.c.bf16 %v16741_v30, %v16742_v62 }
 0x403   : > { %v5080_v11 = vpack.c.bf16 %v16737_v38, %v16738_v29  ;;  %v4488_v25 = vpop.f32.mrb[180].mxu1  ;;  %v14855_v3 = vpop.f32.mrb[244].mxu0 }
 0x404   : > { %17115 = vst [vmem:[#allocation68_spill] sm:$0xff] %v14855_v3  ;;  %v4490_v4 = vpop.f32.mrb[181].mxu1  ;;  %v14861_v35 = vpop.f32.mrb[245].mxu0  ;;  %v14869_v38 = vadd.f32 %v4488_v25, %v14249_v21 }
 0x405   : > { %17116 = vst [vmem:[#allocation69_spill] sm:$0xff] %v14861_v35  ;;  %v14864_v16 = vadd.f32 %v4490_v4, %v14245_v7  ;;  %v4492_v0 = vpop.f32.mrb[182].mxu1  ;;  %v14866_v52 = vpop.f32.mrb[246].mxu0  ;;  %6037 = vmatprep.mubr.bf16.mxu1 %v5080_v11  ;;  %6423 = vmatprep.mubr.bf16.mxu0 %v5080_v11 }
 0x406   : > { %17118 = vst [vmem:[#allocation71_spill] sm:$0xff] %v14866_v52  ;;  %17119 = vst [vmem:[#allocation72_spill] sm:$0xff] %v14869_v38  ;;  %v14872_v29 = vadd.f32 %v4492_v0, %v14249_v21  ;;  %v4494_v26 = vpop.f32.mrb[183].mxu1  ;;  %v14874_v36 = vpop.f32.mrb[247].mxu0  ;;  %6038 = vmatmul.mubr.bf16.gmra.mrb[240].mxu1 %v5079_v13  ;;  %6424 = vmatmul.mubr.bf16.gmra.mrb[48].mxu0 %v5079_v13  ;;  %v16750_v25 = vmax.f32 %v14869_v38, 0.0 }
 0x407   : > { %17117 = vst [vmem:[#allocation70_spill] sm:$0xff] %v14864_v16  ;;  %17121 = vst [vmem:[#allocation74_spill] sm:$0xff] %v14874_v36  ;;  %v14877_v30 = vadd.f32 %v4494_v26, %v14245_v7  ;;  %v16746_v62 = vmax.f32 %v14864_v16, 0.0 }
 0x408   : > { %17120 = vst [vmem:[#allocation73_spill] sm:$0xff] %v14872_v29  ;;  %v16749_v4 = vmax.f32 %v14872_v29, 0.0 }
 0x409   : > { %17122 = vst [vmem:[#allocation75_spill] sm:$0xff] %v14877_v30  ;;  %v16745_v11 = vmax.f32 %v14877_v30, 0.0 }
 0x40a   : > { %v5083_v13 = vpack.c.bf16 %v16749_v4, %v16750_v25 }
 0x40b   : > { %v5084_v0 = vpack.c.bf16 %v16745_v11, %v16746_v62  ;;  %v4498_v47 = vpop.f32.mrb[184].mxu1  ;;  %v14887_v18 = vpop.f32.mrb[248].mxu0 }
 0x40c   : > { %17123 = vst [vmem:[#allocation76_spill] sm:$0xff] %v14887_v18  ;;  %v4500_v26 = vpop.f32.mrb[185].mxu1  ;;  %v14893_v3 = vpop.f32.mrb[249].mxu0  ;;  %v14901_v11 = vadd.f32 %v4498_v47, %v14249_v21 }
 0x40d   : > { %v14896_v52 = vadd.f32 %v4500_v26, %v14245_v7  ;;  %v4502_v35 = vpop.f32.mrb[186].mxu1  ;;  %v14898_v36 = vpop.f32.mrb[250].mxu0  ;;  %6047 = vmatprep.mubr.bf16.mxu1 %v5084_v0  ;;  %6433 = vmatprep.mubr.bf16.mxu0 %v5084_v0 }
 0x40e   : > { %17125 = vst [vmem:[#allocation78_spill] sm:$0xff] %v14898_v36  ;;  %17126 = vst [vmem:[#allocation79_spill] sm:$0xff] %v14901_v11  ;;  %v14904_v62 = vadd.f32 %v4502_v35, %v14249_v21  ;;  %v4504_v30 = vpop.f32.mrb[187].mxu1  ;;  %v14906_v29 = vpop.f32.mrb[251].mxu0  ;;  %6048 = vmatmul.mubr.bf16.gmra.mrb[244].mxu1 %v5083_v13  ;;  %6434 = vmatmul.mubr.bf16.gmra.mrb[52].mxu0 %v5083_v13  ;;  %v16760_v47 = vmax.f32 %v14901_v11, 0.0  ;;  %v14917_v35 = vrot.slane %v14241_v14, %v13287_v8 }
 0x40f   : > { %17124 = vst [vmem:[#allocation77_spill] sm:$0xff] %v14896_v52  ;;  %v14909_v4 = vadd.f32 %v4504_v30, %v14245_v7  ;;  %v16758_v25 = vmax.f32 %v14896_v52, 0.0 }
 0x410   : > { %17127 = vst [vmem:[#allocation80_spill] sm:$0xff] %v14904_v62  ;;  %v16759_v26 = vmax.f32 %v14904_v62, 0.0  ;;  %v14933_v8 = vadd.f32 %v14266_v46, %v14917_v35  ;;  %v14950_v46 = vadd.f32 %v14253_v59, %v14917_v35 }
 0x411   : > { %17128 = vst [vmem:[#allocation81_spill] sm:$0xff] %v14909_v4  ;;  %v16757_v0 = vmax.f32 %v14909_v4, 0.0 }
 0x412   : > { %v5087_v38 = vpack.c.bf16 %v16759_v26, %v16760_v47  ;;  %v16770_v59 = vmax.f32 %v14950_v46, 0.0 }
 0x413   : > { %v5088_v13 = vpack.c.bf16 %v16757_v0, %v16758_v25  ;;  %v4508_v16 = vpop.f32.mrb[188].mxu1  ;;  %v14923_v30 = vpop.f32.mrb[252].mxu0 }
 0x414   : > { %v4510_v18 = vpop.f32.mrb[189].mxu1  ;;  %v14929_v36 = vpop.f32.mrb[253].mxu0  ;;  %v14941_v25 = vadd.f32 %v4508_v16, %v14249_v21 }
 0x415   : > { %v14936_v52 = vadd.f32 %v4510_v18, %v14245_v7  ;;  %v4512_v4 = vpop.f32.mrb[190].mxu1  ;;  %v14938_v0 = vpop.f32.mrb[254].mxu0  ;;  %6057 = vmatprep.mubr.bf16.mxu1 %v5088_v13  ;;  %6443 = vmatprep.mubr.bf16.mxu0 %v5088_v13 }
 0x416   : > { %17130 = vst [vmem:[#allocation83_spill] sm:$0xff] %v14941_v25  ;;  %v14944_v26 = vadd.f32 %v4512_v4, %v14249_v21  ;;  %v4514_v47 = vpop.f32.mrb[191].mxu1  ;;  %v14946_v62 = vpop.f32.mrb[255].mxu0  ;;  %6058 = vmatmul.mubr.bf16.gmra.mrb[248].mxu1 %v5087_v38  ;;  %6444 = vmatmul.mubr.bf16.gmra.mrb[56].mxu0 %v5087_v38  ;;  %v14961_v4 = vrot.slane %v14241_v14, %v13276_v1  ;;  %v16769_v38 = vmax.f32 %v14941_v25, 0.0  ;;  %v17133_v14 = vmax.f32 %v14933_v8, 0.0 }
 0x417   : > { %17129 = vst [vmem:[#allocation82_spill] sm:$0xff] %v14936_v52  ;;  %v14953_v18 = vadd.f32 %v4514_v47, %v14245_v7  ;;  %v16768_v11 = vmax.f32 %v14936_v52, 0.0  ;;  %v14983_v52 = vadd.f32 %v14310_v33, %v14917_v35 }
 0x418   : > { %17131 = vst [vmem:[#allocation84_spill] sm:$0xff] %v14944_v26  ;;  %v16767_v13 = vmax.f32 %v14944_v26, 0.0  ;;  %v14971_v47 = vadd.f32 %v14258_v5, %v14961_v4  ;;  %v5034_v1 = vpack.c.bf16 %v17133_v14, %v16770_v59  ;;  %v14987_v5 = vadd.f32 %v14251_v27, %v14961_v4  ;;  %v11147_v59 = vld [vmem:[%s16573_s9 + $0x2c] ss:$16 sps:$4 sm:$0xff]  }
 0x419   : > { %17132 = vst [vmem:[#allocation85_spill] sm:$0xff] %v14953_v18  ;;  %v16766_v21 = vmax.f32 %v14953_v18, 0.0  ;;  %17134 = vst [vmem:[#allocation86_spill] sm:$0xff] %v14983_v52 }
 0x41a   : > { %v5091_v16 = vpack.c.bf16 %v16767_v13, %v16769_v38  ;;  %v16771_v14 = vmax.f32 %v14971_v47, 0.0  ;;  %v16772_v13 = vmax.f32 %v14983_v52, 0.0  ;;  %v16774_v33 = vmax.f32 %v14987_v5, 0.0 }
 0x41b   : > { %v5092_v7 = vpack.c.bf16 %v16766_v21, %v16768_v11  ;;  %v14991_v21 = vadd.f32 %v14291_v34, %v14917_v35  ;;  %v11139_v34 = vld [vmem:[%s16573_s9 + $0x8] ss:$16 sps:$4 sm:$0xff]   ;;  %v15017_v38 = vadd.f32 %v14366_v61, %v14917_v35 }
 0x41c   : > { %v5033_v27 = vpack.c.bf16 %v16771_v14, %v16774_v33  ;;  %v15027_v14 = vadd.f32 %v14279_v10, %v14961_v4  ;;  %v11145_v10 = vld [vmem:[%s16573_s9 + $0x28] ss:$16 sps:$4 sm:$0xff]  }
 0x41d   : > { %6067 = vmatprep.mubr.bf16.mxu1 %v5092_v7  ;;  %6453 = vmatprep.mubr.bf16.mxu0 %v5092_v7  ;;  %17135 = vst [vmem:[#allocation87_spill] sm:$0xff] %v14991_v21  ;;  %v16773_v7 = vmax.f32 %v14991_v21, 0.0  ;;  %17137 = vst [vmem:[#allocation89_spill] sm:$0xff] %v15017_v38  ;;  %v17141_v18 = vmax.f32 %v15017_v38, 0.0 }
 0x41e   : > { %6068 = vmatmul.mubr.bf16.gmra.mrb[252].mxu1 %v5091_v16  ;;  %6454 = vmatmul.mubr.bf16.gmra.mrb[60].mxu0 %v5091_v16  ;;  %v15003_v16 = vadd.f32 %v14302_v28, %v14961_v4  ;;  %v11144_v28 = vld [vmem:[%s16573_s9 + $0x24] ss:$16 sps:$4 sm:$0xff]   ;;  %17138 = vst [vmem:[#allocation90_spill] sm:$0xff] %v15027_v14 }
 0x41f   : > { %6110 = vmatprep.mubr.bf16.mxu1 %v5034_v1  ;;  %6496 = vmatprep.mubr.bf16.mxu0 %v5034_v1  ;;  %v11136_v1 = vld [vmem:[%s16573_s9] ss:$16 sps:$4 sm:$0xff]   ;;  %v5038_v11 = vpack.c.bf16 %v16772_v13, %v16773_v7  ;;  %v15031_v13 = vadd.f32 %v14347_v15, %v14917_v35  ;;  %v11150_v15 = vld [vmem:[%s16573_s9 + $0x44] ss:$16 sps:$4 sm:$0xff]  }
 0x420   : > { %17136 = vst [vmem:[#allocation88_spill] sm:$0xff] %v15003_v16  ;;  %v16777_v61 = vmax.f32 %v15003_v16, 0.0  ;;  %v11142_v7 = vld [vmem:[%s16573_s9 + $0x20] ss:$16 sps:$4 sm:$0xff]  }
 0x421   : > { %17139 = vst [vmem:[#allocation91_spill] sm:$0xff] %v15031_v13 }
 0x426   : > { %6111 = vmatmul.mubr.bf16.vlgmr.msra.gmra.mrb[192].mxu1 %v5033_v27  ;;  %6497 = vmatmul.mubr.bf16.vlgmr.msra.gmra.mrb[0].mxu0 %v5033_v27  ;;  %v11151_v27 = vld [vmem:[%s16573_s9 + $0x48] ss:$16 sps:$4 sm:$0xff]  }
 0x427   : > { %6120 = vmatprep.mubr.bf16.mxu1 %v5038_v11  ;;  %6506 = vmatprep.mubr.bf16.mxu0 %v5038_v11  ;;  %v11153_v11 = vld [vmem:[%s16573_s9 + $0x4c] ss:$16 sps:$4 sm:$0xff]  }
 0x428   : > { %7640 = vmatpush1.bf16.msra.mxu1 %v11136_v1  ;;  %8026 = vmatpush1.bf16.msra.mxu0 %v11139_v34  ;;  %v16779_v1 = vmax.f32 %v15027_v14, 0.0  ;;  %v16778_v34 = vmax.f32 %v15031_v13, 0.0 }
 0x429   : > { %7641 = vmatprep.subr.bf16.mxu1 %v11144_v28  ;;  %8027 = vmatprep.subr.bf16.mxu0 %v11147_v59  ;;  %v15055_v59 = vadd.f32 %v14358_v56, %v14961_v4  ;;  %v11148_v28 = vld [vmem:[%s16573_s9 + $0x40] ss:$16 sps:$4 sm:$0xff]   ;;  %v11156_v56 = vld [vmem:[%s16573_s9 + $0x64] ss:$16 sps:$4 sm:$0xff]  }
 0x42a   : > { %v5037_v33 = vpack.c.bf16 %v16777_v61, %v16779_v1  ;;  %v5042_v26 = vpack.c.bf16 %v17141_v18, %v16778_v34  ;;  %v15069_v61 = vadd.f32 %v14422_v48, %v14917_v35  ;;  %v15083_v48 = vadd.f32 %v14403_v42, %v14917_v35  ;;  %v11162_v42 = vld [vmem:[%s16573_s9 + $0x84] ss:$16 sps:$4 sm:$0xff]   ;;  %v11163_v34 = vld [vmem:[%s16573_s9 + $0x88] ss:$16 sps:$4 sm:$0xff]  }
 0x42b   : > { %17140 = vst [vmem:[#allocation92_spill] sm:$0xff] %v15055_v59  ;;  %v16780_v18 = vmax.f32 %v15055_v59, 0.0 }
 0x42c   : > { %7642 = vmatpush1.bf16.msra.mxu1 %v11142_v7  ;;  %8028 = vmatpush1.bf16.msra.mxu0 %v11145_v10  ;;  %17142 = vst [vmem:[#allocation93_spill] sm:$0xff] %v15069_v61  ;;  %v11159_v7 = vld [vmem:[%s16573_s9 + $0x6c] ss:$16 sps:$4 sm:$0xff]   ;;  %v15079_v10 = vadd.f32 %v14335_v51, %v14961_v4  ;;  %17144 = vst [vmem:[#allocation95_spill] sm:$0xff] %v15083_v48  ;;  %v11157_v51 = vld [vmem:[%s16573_s9 + $0x68] ss:$16 sps:$4 sm:$0xff]  }
 0x42d   : > { %7643 = vmatprep.subr.bf16.mxu1 %v11150_v15  ;;  %8029 = vmatprep.subr.bf16.mxu0 %v11153_v11  ;;  %v11154_v15 = vld [vmem:[%s16573_s9 + $0x60] ss:$16 sps:$4 sm:$0xff]   ;;  %v16782_v11 = vmax.f32 %v15083_v48, 0.0 }
 0x42e   : > { %17143 = vst [vmem:[#allocation94_spill] sm:$0xff] %v15079_v10  ;;  %6121 = vmatmul.mubr.bf16.gmra.mrb[196].mxu1 %v5037_v33  ;;  %6507 = vmatmul.mubr.bf16.gmra.mrb[4].mxu0 %v5037_v33  ;;  %v16781_v33 = vmax.f32 %v15069_v61, 0.0 }
 0x42f   : > { %6130 = vmatprep.mubr.bf16.mxu1 %v5042_v26  ;;  %6516 = vmatprep.mubr.bf16.mxu0 %v5042_v26  ;;  %v11165_v26 = vld [vmem:[%s16573_s9 + $0x8c] ss:$16 sps:$4 sm:$0xff]  }
 0x430   : > { %7644 = vmatpush1.bf16.msra.mxu1 %v11148_v28  ;;  %8030 = vmatpush1.bf16.msra.mxu0 %v11151_v27  ;;  %v16783_v27 = vmax.f32 %v15079_v10, 0.0  ;;  %v5046_v1 = vpack.c.bf16 %v16781_v33, %v16782_v11  ;;  %v11175_v11 = vld [vmem:[%s16573_s9 + $0xc8] ss:$16 sps:$4 sm:$0xff]  }
 0x431   : > { %7645 = vmatprep.subr.bf16.mxu1 %v11156_v56  ;;  %8031 = vmatprep.subr.bf16.mxu0 %v11159_v7  ;;  %v15107_v56 = vadd.f32 %v14414_v54, %v14961_v4  ;;  %v11160_v7 = vld [vmem:[%s16573_s9 + $0x80] ss:$16 sps:$4 sm:$0xff]   ;;  %v11168_v54 = vld [vmem:[%s16573_s9 + $0xa4] ss:$16 sps:$4 sm:$0xff]  }
 0x432   : > { %v5041_v28 = vpack.c.bf16 %v16780_v18, %v16783_v27  ;;  %v15121_v18 = vadd.f32 %v14478_v24, %v14917_v35  ;;  %v15135_v24 = vadd.f32 %v14459_v60, %v14917_v35  ;;  %v11174_v60 = vld [vmem:[%s16573_s9 + $0xc4] ss:$16 sps:$4 sm:$0xff]  }
 0x433   : > { %17145 = vst [vmem:[#allocation96_spill] sm:$0xff] %v15107_v56 }
 0x434   : > { %7646 = vmatpush1.bf16.msra.mxu1 %v11154_v15  ;;  %8032 = vmatpush1.bf16.msra.mxu0 %v11157_v51  ;;  %17146 = vst [vmem:[#allocation97_spill] sm:$0xff] %v15121_v18  ;;  %v11171_v15 = vld [vmem:[%s16573_s9 + $0xac] ss:$16 sps:$4 sm:$0xff]   ;;  %v15131_v51 = vadd.f32 %v14391_v19, %v14961_v4  ;;  %17148 = vst [vmem:[#allocation99_spill] sm:$0xff] %v15135_v24  ;;  %v11169_v19 = vld [vmem:[%s16573_s9 + $0xa8] ss:$16 sps:$4 sm:$0xff]  }
 0x435   : > { %7647 = vmatprep.subr.bf16.mxu1 %v11162_v42  ;;  %8033 = vmatprep.subr.bf16.mxu0 %v11165_v26  ;;  %v16784_v42 = vmax.f32 %v15107_v56, 0.0  ;;  %v11166_v26 = vld [vmem:[%s16573_s9 + $0xa0] ss:$16 sps:$4 sm:$0xff]  }
 0x436   : > { %17147 = vst [vmem:[#allocation98_spill] sm:$0xff] %v15131_v51  ;;  %6131 = vmatmul.mubr.bf16.gmra.mrb[200].mxu1 %v5041_v28  ;;  %6517 = vmatmul.mubr.bf16.gmra.mrb[8].mxu0 %v5041_v28  ;;  %v16785_v28 = vmax.f32 %v15121_v18, 0.0 }
 0x437   : > { %6140 = vmatprep.mubr.bf16.mxu1 %v5046_v1  ;;  %6526 = vmatprep.mubr.bf16.mxu0 %v5046_v1  ;;  %v11177_v1 = vld [vmem:[%s16573_s9 + $0xcc] ss:$16 sps:$4 sm:$0xff]  }
 0x438   : > { %7648 = vmatpush1.bf16.msra.mxu1 %v11160_v7  ;;  %8034 = vmatpush1.bf16.msra.mxu0 %v11163_v34  ;;  %v16787_v34 = vmax.f32 %v15131_v51, 0.0  ;;  %v16786_v7 = vmax.f32 %v15135_v24, 0.0 }
 0x439   : > { %7649 = vmatprep.subr.bf16.mxu1 %v11168_v54  ;;  %8035 = vmatprep.subr.bf16.mxu0 %v11171_v15  ;;  %v15159_v54 = vadd.f32 %v14470_v39, %v14961_v4  ;;  %v11172_v15 = vld [vmem:[%s16573_s9 + $0xc0] ss:$16 sps:$4 sm:$0xff]   ;;  %v11180_v39 = vld [vmem:[%s16573_s9 + $0xe4] ss:$16 sps:$4 sm:$0xff]  }
 0x43a   : > { %v5045_v33 = vpack.c.bf16 %v16784_v42, %v16787_v34  ;;  %v5050_v27 = vpack.c.bf16 %v16785_v28, %v16786_v7  ;;  %v15173_v42 = vadd.f32 %v14534_v41, %v14917_v35  ;;  %v15187_v41 = vadd.f32 %v14515_v23, %v14917_v35  ;;  %v11186_v23 = vld [vmem:[%s16573_s9 + $0x104] ss:$16 sps:$4 sm:$0xff]   ;;  %v11187_v7 = vld [vmem:[%s16573_s9 + $0x108] ss:$16 sps:$4 sm:$0xff]  }
 0x43b   : > { %17149 = vst [vmem:[#allocation100_spill] sm:$0xff] %v15159_v54 }
 0x43c   : > { %7650 = vmatpush1.bf16.msra.mxu1 %v11166_v26  ;;  %8036 = vmatpush1.bf16.msra.mxu0 %v11169_v19  ;;  %17150 = vst [vmem:[#allocation101_spill] sm:$0xff] %v15173_v42  ;;  %v11183_v26 = vld [vmem:[%s16573_s9 + $0xec] ss:$16 sps:$4 sm:$0xff]   ;;  %v15183_v19 = vadd.f32 %v14447_v17, %v14961_v4  ;;  %17152 = vst [vmem:[#allocation103_spill] sm:$0xff] %v15187_v41  ;;  %v11181_v17 = vld [vmem:[%s16573_s9 + $0xe8] ss:$16 sps:$4 sm:$0xff]  }
 0x43d   : > { %7651 = vmatprep.subr.bf16.mxu1 %v11174_v60  ;;  %8037 = vmatprep.subr.bf16.mxu0 %v11177_v1  ;;  %v16788_v60 = vmax.f32 %v15159_v54, 0.0  ;;  %v11178_v1 = vld [vmem:[%s16573_s9 + $0xe0] ss:$16 sps:$4 sm:$0xff]  }
 0x43e   : > { %17151 = vst [vmem:[#allocation102_spill] sm:$0xff] %v15183_v19  ;;  %6141 = vmatmul.mubr.bf16.gmra.mrb[204].mxu1 %v5045_v33  ;;  %6527 = vmatmul.mubr.bf16.gmra.mrb[12].mxu0 %v5045_v33  ;;  %v16789_v33 = vmax.f32 %v15173_v42, 0.0 }
 0x43f   : > { %6150 = vmatprep.mubr.bf16.mxu1 %v5050_v27  ;;  %6536 = vmatprep.mubr.bf16.mxu0 %v5050_v27  ;;  %v11189_v27 = vld [vmem:[%s16573_s9 + $0x10c] ss:$16 sps:$4 sm:$0xff]  }
 0x440   : > { %7652 = vmatpush1.bf16.msra.mxu1 %v11172_v15  ;;  %8038 = vmatpush1.bf16.msra.mxu0 %v11175_v11  ;;  %v16791_v11 = vmax.f32 %v15183_v19, 0.0  ;;  %v16790_v15 = vmax.f32 %v15187_v41, 0.0 }
 0x441   : > { %7653 = vmatprep.subr.bf16.mxu1 %v11180_v39  ;;  %8039 = vmatprep.subr.bf16.mxu0 %v11183_v26  ;;  %v15211_v39 = vadd.f32 %v14526_v6, %v14961_v4  ;;  %v11184_v26 = vld [vmem:[%s16573_s9 + $0x100] ss:$16 sps:$4 sm:$0xff]   ;;  %v11192_v6 = vld [vmem:[%s16573_s9 + $0x124] ss:$16 sps:$4 sm:$0xff]  }
 0x442   : > { %v5049_v28 = vpack.c.bf16 %v16788_v60, %v16791_v11  ;;  %v5054_v34 = vpack.c.bf16 %v16789_v33, %v16790_v15  ;;  %v15225_v60 = vadd.f32 %v14590_v37, %v14917_v35  ;;  %v15239_v37 = vadd.f32 %v14571_v49, %v14917_v35  ;;  %v11198_v49 = vld [vmem:[%s16573_s9 + $0x144] ss:$16 sps:$4 sm:$0xff]   ;;  %v11199_v15 = vld [vmem:[%s16573_s9 + $0x148] ss:$16 sps:$4 sm:$0xff]  }
 0x443   : > { %17153 = vst [vmem:[#allocation104_spill] sm:$0xff] %v15211_v39 }
 0x444   : > { %7654 = vmatpush1.bf16.msra.mxu1 %v11178_v1  ;;  %8040 = vmatpush1.bf16.msra.mxu0 %v11181_v17  ;;  %17154 = vst [vmem:[#allocation105_spill] sm:$0xff] %v15225_v60  ;;  %v11195_v1 = vld [vmem:[%s16573_s9 + $0x12c] ss:$16 sps:$4 sm:$0xff]   ;;  %v15235_v17 = vadd.f32 %v14503_v55, %v14961_v4  ;;  %17156 = vst [vmem:[#allocation107_spill] sm:$0xff] %v15239_v37  ;;  %v11193_v55 = vld [vmem:[%s16573_s9 + $0x128] ss:$16 sps:$4 sm:$0xff]  }
 0x445   : > { %7655 = vmatprep.subr.bf16.mxu1 %v11186_v23  ;;  %8041 = vmatprep.subr.bf16.mxu0 %v11189_v27  ;;  %v16792_v23 = vmax.f32 %v15211_v39, 0.0  ;;  %v11190_v27 = vld [vmem:[%s16573_s9 + $0x120] ss:$16 sps:$4 sm:$0xff]  }
 0x446   : > { %17155 = vst [vmem:[#allocation106_spill] sm:$0xff] %v15235_v17  ;;  %6151 = vmatmul.mubr.bf16.gmra.mrb[208].mxu1 %v5049_v28  ;;  %6537 = vmatmul.mubr.bf16.gmra.mrb[16].mxu0 %v5049_v28  ;;  %v16793_v28 = vmax.f32 %v15225_v60, 0.0 }
 0x447   : > { %6160 = vmatprep.mubr.bf16.mxu1 %v5054_v34  ;;  %6546 = vmatprep.mubr.bf16.mxu0 %v5054_v34  ;;  %v11201_v34 = vld [vmem:[%s16573_s9 + $0x14c] ss:$16 sps:$4 sm:$0xff]  }
 0x448   : > { %7656 = vmatpush1.bf16.msra.mxu1 %v11184_v26  ;;  %8042 = vmatpush1.bf16.msra.mxu0 %v11187_v7  ;;  %v16795_v7 = vmax.f32 %v15235_v17, 0.0  ;;  %v16794_v26 = vmax.f32 %v15239_v37, 0.0 }
 0x449   : > { %7657 = vmatprep.subr.bf16.mxu1 %v11192_v6  ;;  %8043 = vmatprep.subr.bf16.mxu0 %v11195_v1  ;;  %v15263_v6 = vadd.f32 %v14582_v2, %v14961_v4  ;;  %v11196_v1 = vld [vmem:[%s16573_s9 + $0x140] ss:$16 sps:$4 sm:$0xff]   ;;  %v11204_v2 = vld [vmem:[%s16573_s9 + $0x164] ss:$16 sps:$4 sm:$0xff]  }
 0x44a   : > { %v5053_v33 = vpack.c.bf16 %v16792_v23, %v16795_v7  ;;  %v5058_v11 = vpack.c.bf16 %v16793_v28, %v16794_v26  ;;  %v15277_v23 = vadd.f32 %v14646_v12, %v14917_v35  ;;  %v15291_v12 = vadd.f32 %v14627_v20, %v14917_v35  ;;  %v11210_v20 = vld [vmem:[%s16573_s9 + $0x184] ss:$16 sps:$4 sm:$0xff]   ;;  %v11211_v26 = vld [vmem:[%s16573_s9 + $0x188] ss:$16 sps:$4 sm:$0xff]  }
 0x44b   : > { %17157 = vst [vmem:[#allocation108_spill] sm:$0xff] %v15263_v6 }
 0x44c   : > { %7658 = vmatpush1.bf16.msra.mxu1 %v11190_v27  ;;  %8044 = vmatpush1.bf16.msra.mxu0 %v11193_v55  ;;  %17158 = vst [vmem:[#allocation109_spill] sm:$0xff] %v15277_v23  ;;  %v11207_v27 = vld [vmem:[%s16573_s9 + $0x16c] ss:$16 sps:$4 sm:$0xff]   ;;  %v15287_v55 = vadd.f32 %v14559_v40, %v14961_v4  ;;  %17160 = vst [vmem:[#allocation111_spill] sm:$0xff] %v15291_v12  ;;  %v11205_v40 = vld [vmem:[%s16573_s9 + $0x168] ss:$16 sps:$4 sm:$0xff]  }
 0x44d   : > { %7659 = vmatprep.subr.bf16.mxu1 %v11198_v49  ;;  %8045 = vmatprep.subr.bf16.mxu0 %v11201_v34  ;;  %v16796_v49 = vmax.f32 %v15263_v6, 0.0  ;;  %v11202_v34 = vld [vmem:[%s16573_s9 + $0x160] ss:$16 sps:$4 sm:$0xff]  }
 0x44e   : > { %17159 = vst [vmem:[#allocation110_spill] sm:$0xff] %v15287_v55  ;;  %6161 = vmatmul.mubr.bf16.gmra.mrb[212].mxu1 %v5053_v33  ;;  %6547 = vmatmul.mubr.bf16.gmra.mrb[20].mxu0 %v5053_v33  ;;  %v16797_v33 = vmax.f32 %v15277_v23, 0.0 }
 0x44f   : > { %6170 = vmatprep.mubr.bf16.mxu1 %v5058_v11  ;;  %6556 = vmatprep.mubr.bf16.mxu0 %v5058_v11  ;;  %v11213_v11 = vld [vmem:[%s16573_s9 + $0x18c] ss:$16 sps:$4 sm:$0xff]  }
 0x450   : > { %7660 = vmatpush1.bf16.msra.mxu1 %v11196_v1  ;;  %8046 = vmatpush1.bf16.msra.mxu0 %v11199_v15  ;;  %v16799_v15 = vmax.f32 %v15287_v55, 0.0  ;;  %v16798_v1 = vmax.f32 %v15291_v12, 0.0 }
 0x451   : > { %7661 = vmatprep.subr.bf16.mxu1 %v11204_v2  ;;  %8047 = vmatprep.subr.bf16.mxu0 %v11207_v27  ;;  %v15315_v2 = vadd.f32 %v14638_v9, %v14961_v4  ;;  %v11208_v27 = vld [vmem:[%s16573_s9 + $0x180] ss:$16 sps:$4 sm:$0xff]   ;;  %v11216_v9 = vld [vmem:[%s16573_s9 + $0x1a4] ss:$16 sps:$4 sm:$0xff]  }
 0x452   : > { %v5057_v28 = vpack.c.bf16 %v16796_v49, %v16799_v15  ;;  %v5062_v7 = vpack.c.bf16 %v16797_v33, %v16798_v1  ;;  %v15329_v49 = vadd.f32 %v14702_v58, %v14917_v35  ;;  %v15343_v58 = vadd.f32 %v14683_v43, %v14917_v35  ;;  %v11222_v43 = vld [vmem:[%s16573_s9 + $0x1c4] ss:$16 sps:$4 sm:$0xff]   ;;  %v11223_v1 = vld [vmem:[%s16573_s9 + $0x1c8] ss:$16 sps:$4 sm:$0xff]  }
 0x453   : > { %17161 = vst [vmem:[#allocation112_spill] sm:$0xff] %v15315_v2 }
 0x454   : > { %7662 = vmatpush1.bf16.msra.mxu1 %v11202_v34  ;;  %8048 = vmatpush1.bf16.msra.mxu0 %v11205_v40  ;;  %17162 = vst [vmem:[#allocation113_spill] sm:$0xff] %v15329_v49  ;;  %v11219_v34 = vld [vmem:[%s16573_s9 + $0x1ac] ss:$16 sps:$4 sm:$0xff]   ;;  %v15339_v40 = vadd.f32 %v14615_v57, %v14961_v4  ;;  %17164 = vst [vmem:[#allocation115_spill] sm:$0xff] %v15343_v58  ;;  %v11217_v57 = vld [vmem:[%s16573_s9 + $0x1a8] ss:$16 sps:$4 sm:$0xff]  }
 0x455   : > { %7663 = vmatprep.subr.bf16.mxu1 %v11210_v20  ;;  %8049 = vmatprep.subr.bf16.mxu0 %v11213_v11  ;;  %v16800_v20 = vmax.f32 %v15315_v2, 0.0  ;;  %v11214_v11 = vld [vmem:[%s16573_s9 + $0x1a0] ss:$16 sps:$4 sm:$0xff]  }
 0x456   : > { %17163 = vst [vmem:[#allocation114_spill] sm:$0xff] %v15339_v40  ;;  %6171 = vmatmul.mubr.bf16.gmra.mrb[216].mxu1 %v5057_v28  ;;  %6557 = vmatmul.mubr.bf16.gmra.mrb[24].mxu0 %v5057_v28  ;;  %v16803_v28 = vmax.f32 %v15329_v49, 0.0 }
 0x457   : > { %6180 = vmatprep.mubr.bf16.mxu1 %v5062_v7  ;;  %6566 = vmatprep.mubr.bf16.mxu0 %v5062_v7  ;;  %v11225_v7 = vld [vmem:[%s16573_s9 + $0x1cc] ss:$16 sps:$4 sm:$0xff]  }
 0x458   : > { %7664 = vmatpush1.bf16.msra.mxu1 %v11208_v27  ;;  %8050 = vmatpush1.bf16.msra.mxu0 %v11211_v26  ;;  %v16811_v26 = vmax.f32 %v15339_v40, 0.0  ;;  %v16805_v27 = vmax.f32 %v15343_v58, 0.0 }
 0x459   : > { %7665 = vmatprep.subr.bf16.mxu1 %v11216_v9  ;;  %8051 = vmatprep.subr.bf16.mxu0 %v11219_v34  ;;  %v15367_v9 = vadd.f32 %v14694_v50, %v14961_v4  ;;  %v11220_v34 = vld [vmem:[%s16573_s9 + $0x1c0] ss:$16 sps:$4 sm:$0xff]   ;;  %v15385_v50 = vadd.f32 %v14671_v32, %v14961_v4 }
 0x45a   : > { %v5061_v33 = vpack.c.bf16 %v16800_v20, %v16811_v26  ;;  %v5066_v15 = vpack.c.bf16 %v16803_v28, %v16805_v27  ;;  %v15381_v20 = vadd.f32 %v14740_v22, %v14917_v35  ;;  %v17177_v27 = vld [vmem:[#allocation46_spill] sm:$0xff] }
 0x45b   : > { %17165 = vst [vmem:[#allocation116_spill] sm:$0xff] %v15367_v9  ;;  %17167 = vst [vmem:[#allocation118_spill] sm:$0xff] %v15385_v50 }
 0x45c   : > { %7666 = vmatpush1.bf16.msra.mxu1 %v11214_v11  ;;  %8052 = vmatpush1.bf16.msra.mxu0 %v11217_v57  ;;  %17166 = vst [vmem:[#allocation117_spill] sm:$0xff] %v15381_v20  ;;  %v15389_v11 = vadd.f32 %v14727_v44, %v14917_v35  ;;  %v16804_v57 = vmax.f32 %v15367_v9, 0.0  ;;  %v16801_v22 = vmax.f32 %v15381_v20, 0.0  ;;  %v15401_v44 = vadd.f32 %v14732_v31, %v14961_v4 }
 0x45d   : > { %7667 = vmatprep.subr.bf16.mxu1 %v11222_v43  ;;  %8053 = vmatprep.subr.bf16.mxu0 %v11225_v7  ;;  %v16806_v43 = vmax.f32 %v15385_v50, 0.0 }
 0x45e   : > { %6181 = vmatmul.mubr.bf16.gmra.mrb[220].mxu1 %v5061_v33  ;;  %6567 = vmatmul.mubr.bf16.gmra.mrb[28].mxu0 %v5061_v33  ;;  %17168 = vst [vmem:[#allocation119_spill] sm:$0xff] %v15389_v11  ;;  %v16802_v7 = vmax.f32 %v15389_v11, 0.0  ;;  %17169 = vst [vmem:[#allocation120_spill] sm:$0xff] %v15401_v44  ;;  %v16807_v31 = vmax.f32 %v15401_v44, 0.0 }
 0x45f   : > { %6190 = vmatprep.mubr.bf16.mxu1 %v5066_v15  ;;  %6576 = vmatprep.mubr.bf16.mxu0 %v5066_v15  ;;  %v5065_v32 = vpack.c.bf16 %v16804_v57, %v16806_v43  ;;  %v15409_v15 = vadd.f32 %v14772_v53, %v14917_v35  ;;  %v15441_v43 = vadd.f32 %v17177_v27, %v14961_v4 }
 0x460   : > { %7668 = vmatpush1.bf16.msra.mxu1 %v11220_v34  ;;  %8054 = vmatpush1.bf16.msra.mxu0 %v11223_v1  ;;  %v5070_v33 = vpack.c.bf16 %v16801_v22, %v16802_v7  ;;  %v15413_v1 = vadd.f32 %v14721_v45, %v14961_v4  ;;  %v15417_v34 = vadd.f32 %v14759_v63, %v14917_v35 }
 0x461   : > { %17170 = vst [vmem:[#allocation121_spill] sm:$0xff] %v15409_v15  ;;  %v16809_v22 = vmax.f32 %v15409_v15, 0.0  ;;  %17178 = vst [vmem:[#allocation46_spill] sm:$0xff] %v15441_v43  ;;  %v17185_v15 = vld [vmem:[#allocation52_spill] sm:$0xff] }
 0x462   : > { %17171 = vst [vmem:[#allocation122_spill] sm:$0xff] %v15413_v1  ;;  %17172 = vst [vmem:[#allocation123_spill] sm:$0xff] %v15417_v34  ;;  %v16808_v7 = vmax.f32 %v15413_v1, 0.0  ;;  %v16810_v53 = vmax.f32 %v15417_v34, 0.0  ;;  %v15469_v34 = vadd.f32 %v17185_v15, %v14961_v4 }
 0x464   : > { %v5069_v45 = vpack.c.bf16 %v16807_v31, %v16808_v7  ;;  %v5074_v63 = vpack.c.bf16 %v16809_v22, %v16810_v53  ;;  %v17179_v31 = vld [vmem:[#allocation53_spill] sm:$0xff]  ;;  %v16816_v53 = vmax.f32 %v15441_v43, 0.0  ;;  %17186 = vst [vmem:[#allocation52_spill] sm:$0xff] %v15469_v34 }
 0x465   : > { %v15445_v7 = vadd.f32 %v17179_v31, %v14917_v35 }
 0x466   : > { %6191 = vmatmul.mubr.bf16.gmra.mrb[224].mxu1 %v5065_v32  ;;  %6577 = vmatmul.mubr.bf16.gmra.mrb[32].mxu0 %v5065_v32  ;;  %v17173_v32 = vld [vmem:[#allocation48_spill] sm:$0xff] }
 0x467   : > { %6200 = vmatprep.mubr.bf16.mxu1 %v5070_v33  ;;  %6586 = vmatprep.mubr.bf16.mxu0 %v5070_v33  ;;  %v15429_v28 = vadd.f32 %v17173_v32, %v14961_v4  ;;  %v17175_v33 = vld [vmem:[#allocation58_spill] sm:$0xff]  ;;  %17180 = vst [vmem:[#allocation53_spill] sm:$0xff] %v15445_v7 }
 0x468   : > { %v15437_v57 = vadd.f32 %v17175_v33, %v14917_v35  ;;  %v16818_v33 = vmax.f32 %v15445_v7, 0.0 }
 0x469   : > { %17174 = vst [vmem:[#allocation48_spill] sm:$0xff] %v15429_v28  ;;  %v16815_v32 = vmax.f32 %v15429_v28, 0.0  ;;  %v17193_v28 = vld [vmem:[#allocation60_spill] sm:$0xff] }
 0x46a   : > { %17176 = vst [vmem:[#allocation58_spill] sm:$0xff] %v15437_v57  ;;  %v16817_v22 = vmax.f32 %v15437_v57, 0.0  ;;  %v15497_v43 = vadd.f32 %v17193_v28, %v14961_v4 }
 0x46b   : > { %v5073_v27 = vpack.c.bf16 %v16815_v32, %v16816_v53  ;;  %v17187_v32 = vld [vmem:[#allocation61_spill] sm:$0xff] }
 0x46c   : > { %v5078_v31 = vpack.c.bf16 %v16817_v22, %v16818_v33  ;;  %v15473_v53 = vadd.f32 %v17187_v32, %v14917_v35  ;;  %v16824_v33 = vmax.f32 %v15469_v34, 0.0  ;;  %17194 = vst [vmem:[#allocation60_spill] sm:$0xff] %v15497_v43 }
 0x46e   : > { %6201 = vmatmul.mubr.bf16.gmra.mrb[228].mxu1 %v5069_v45  ;;  %6587 = vmatmul.mubr.bf16.gmra.mrb[36].mxu0 %v5069_v45  ;;  %v17181_v45 = vld [vmem:[#allocation55_spill] sm:$0xff]  ;;  %17188 = vst [vmem:[#allocation61_spill] sm:$0xff] %v15473_v53 }
 0x46f   : > { %6210 = vmatprep.mubr.bf16.mxu1 %v5074_v63  ;;  %6596 = vmatprep.mubr.bf16.mxu0 %v5074_v63  ;;  %v15457_v26 = vadd.f32 %v17181_v45, %v14961_v4  ;;  %v17183_v63 = vld [vmem:[#allocation66_spill] sm:$0xff] }
 0x470   : > { %v15465_v25 = vadd.f32 %v17183_v63, %v14917_v35  ;;  %v16826_v63 = vmax.f32 %v15473_v53, 0.0 }
 0x471   : > { %17182 = vst [vmem:[#allocation55_spill] sm:$0xff] %v15457_v26  ;;  %v16823_v45 = vmax.f32 %v15457_v26, 0.0 }
 0x472   : > { %17184 = vst [vmem:[#allocation66_spill] sm:$0xff] %v15465_v25  ;;  %v16825_v22 = vmax.f32 %v15465_v25, 0.0  ;;  %v17197_v25 = vld [vmem:[#allocation71_spill] sm:$0xff] }
 0x473   : > { %v5077_v15 = vpack.c.bf16 %v16823_v45, %v16824_v33  ;;  %v17195_v45 = vld [vmem:[#allocation69_spill] sm:$0xff]  ;;  %v15525_v53 = vadd.f32 %v17197_v25, %v14961_v4  ;;  %v15541_v25 = vadd.f32 %v14893_v3, %v14917_v35 }
 0x474   : > { %v5082_v32 = vpack.c.bf16 %v16825_v22, %v16826_v63  ;;  %v15501_v33 = vadd.f32 %v17195_v45, %v14917_v35  ;;  %v11226_v22 = vld [vmem:[%s16573_s9 + $0x1e0] ss:$16 sps:$4 sm:$0xff]   ;;  %v11231_v45 = vld [vmem:[%s16573_s9 + $0x1ec] ss:$16 sps:$4 sm:$0xff]  }
 0x475   : > { %8055 = vmatprep.subr.bf16.mxu0 %v11231_v45  ;;  %17198 = vst [vmem:[#allocation71_spill] sm:$0xff] %v15525_v53  ;;  %17203 = vst [vmem:[#allocation125_spill] sm:$0xff] %v15541_v25  ;;  %v16837_v3 = vmax.f32 %v15541_v25, 0.0 }
 0x476   : > { %6211 = vmatmul.mubr.bf16.gmra.mrb[232].mxu1 %v5073_v27  ;;  %6597 = vmatmul.mubr.bf16.gmra.mrb[40].mxu0 %v5073_v27  ;;  %v17189_v27 = vld [vmem:[#allocation63_spill] sm:$0xff]  ;;  %17196 = vst [vmem:[#allocation69_spill] sm:$0xff] %v15501_v33  ;;  %v16831_v63 = vmax.f32 %v15501_v33, 0.0 }
 0x477   : > { %6220 = vmatprep.mubr.bf16.mxu1 %v5078_v31  ;;  %6606 = vmatprep.mubr.bf16.mxu0 %v5078_v31  ;;  %v15485_v57 = vadd.f32 %v17189_v27, %v14961_v4  ;;  %v17191_v31 = vld [vmem:[#allocation74_spill] sm:$0xff] }
 0x478   : > { %v15493_v7 = vadd.f32 %v17191_v31, %v14917_v35  ;;  %v11228_v31 = vld [vmem:[%s16573_s9 + $0x1e4] ss:$16 sps:$4 sm:$0xff]  }
 0x479   : > { %17190 = vst [vmem:[#allocation63_spill] sm:$0xff] %v15485_v57  ;;  %v16832_v27 = vmax.f32 %v15485_v57, 0.0  ;;  %7669 = vmatprep.subr.bf16.mxu1 %v11228_v31  ;;  %v15533_v31 = vadd.f32 %v14906_v29, %v14917_v35 }
 0x47a   : > { %17192 = vst [vmem:[#allocation74_spill] sm:$0xff] %v15493_v7  ;;  %7670 = vmatpush1.bf16.msra.mxu1 %v11226_v22  ;;  %v17199_v26 = vmax.f32 %v15493_v7, 0.0  ;;  %v17201_v22 = vld [vmem:[#allocation68_spill] sm:$0xff] }
 0x47b   : > { %17200 = vst [vmem:[#allocation124_spill] sm:$0xff] %v15533_v31  ;;  %v15537_v45 = vadd.f32 %v17201_v22, %v14961_v4  ;;  %v16836_v29 = vmax.f32 %v15533_v31, 0.0  ;;  %v11237_v22 = vld [vmem:[%s16573_s9 + $0x20c] ss:$16 sps:$4 sm:$0xff]  }
 0x47c   : > { %v5086_v34 = vpack.c.bf16 %v17199_v26, %v16831_v63  ;;  %v11234_v26 = vld [vmem:[%s16573_s9 + $0x204] ss:$16 sps:$4 sm:$0xff]  }
 0x47d   : > { %17202 = vst [vmem:[#allocation68_spill] sm:$0xff] %v15537_v45  ;;  %7832 = vmatprep.subr.bf16.mxu1 %v11234_v26  ;;  %v17204_v63 = vld [vmem:[#allocation78_spill] sm:$0xff]  ;;  %v15567_v26 = vadd.f32 %v14946_v62, %v14917_v35 }
 0x47e   : > { %6221 = vmatmul.mubr.bf16.gmra.mrb[236].mxu1 %v5077_v15  ;;  %6607 = vmatmul.mubr.bf16.gmra.mrb[44].mxu0 %v5077_v15  ;;  %v11229_v15 = vld [vmem:[%s16573_s9 + $0x1e8] ss:$16 sps:$4 sm:$0xff]  }
 0x47f   : > { %6230 = vmatprep.mubr.bf16.mxu1 %v5082_v32  ;;  %6616 = vmatprep.mubr.bf16.mxu0 %v5082_v32  ;;  %v16833_v32 = vmax.f32 %v15497_v43, 0.0  ;;  %17206 = vst [vmem:[#allocation126_spill] sm:$0xff] %v15567_v26 }
 0x480   : > { %8056 = vmatpush1.bf16.msra.mxu0 %v11229_v15  ;;  %v16835_v15 = vmax.f32 %v15525_v53, 0.0 }
 0x481   : > { %v5081_v28 = vpack.c.bf16 %v16832_v27, %v16833_v32  ;;  %8218 = vmatprep.subr.bf16.mxu0 %v11237_v22  ;;  %v15559_v27 = vadd.f32 %v17204_v63, %v14961_v4  ;;  %v5090_v32 = vpack.c.bf16 %v16836_v29, %v16837_v3  ;;  %v17207_v22 = vld [vmem:[#allocation76_spill] sm:$0xff]  ;;  %v16839_v29 = vmax.f32 %v15567_v26, 0.0 }
 0x482   : > { %v15571_v7 = vadd.f32 %v17207_v22, %v14961_v4 }
 0x483   : > { %17205 = vst [vmem:[#allocation78_spill] sm:$0xff] %v15559_v27  ;;  %v16838_v63 = vmax.f32 %v15559_v27, 0.0 }
 0x484   : > { %17208 = vst [vmem:[#allocation76_spill] sm:$0xff] %v15571_v7  ;;  %v16841_v3 = vmax.f32 %v15571_v7, 0.0 }
 0x486   : > { %6231 = vmatmul.mubr.bf16.gmra.mrb[240].mxu1 %v5081_v28  ;;  %6617 = vmatmul.mubr.bf16.gmra.mrb[48].mxu0 %v5081_v28  ;;  %v16842_v28 = vmax.f32 %v15537_v45, 0.0  ;;  %v5089_v22 = vpack.c.bf16 %v16838_v63, %v16841_v3 }
 0x487   : > { %6240 = vmatprep.mubr.bf16.mxu1 %v5086_v34  ;;  %6626 = vmatprep.mubr.bf16.mxu0 %v5086_v34 }
 0x488   : > { %v5085_v34 = vpack.c.bf16 %v16835_v15, %v16842_v28  ;;  %v15575_v15 = vadd.f32 %v14929_v36, %v14917_v35  ;;  %v15595_v35 = vadd.f32 %v14923_v30, %v14961_v4  ;;  %v5223_v30 = vld [vmem:[%s16572_s8] sm:$0xf]  ;;  %v17215_v28 = vld [vmem:[#allocation9_spill] sm:$0xff] }
 0x489   : > { %v15616_v26 = vrot.slane %v5223_v30, %v17215_v28 }
 0x48a   : > { %17209 = vst [vmem:[#allocation127_spill] sm:$0xff] %v15575_v15  ;;  %v16840_v62 = vmax.f32 %v15575_v15, 0.0  ;;  %17211 = vst [vmem:[#allocation129_spill] sm:$0xff] %v15595_v35  ;;  %v16846_v63 = vmax.f32 %v15595_v35, 0.0 }
 0x48c   : > { %v5094_v36 = vpack.c.bf16 %v16839_v29, %v16840_v62  ;;  %v17214_v62 = vld [vmem:[#allocation4_spill] sm:$0xff] }
 0x48d   : > { %v15613_v3 = vrot.slane %v5223_v30, %v17214_v62 }
 0x48e   : > { %6241 = vmatmul.mubr.bf16.gmra.mrb[244].mxu1 %v5085_v34  ;;  %6627 = vmatmul.mubr.bf16.gmra.mrb[52].mxu0 %v5085_v34  ;;  %v15587_v34 = vadd.f32 %v14938_v0, %v14961_v4  ;;  %v17212_v4 = vld [vmem:[#allocation3_spill] sm:$0xff] }
 0x48f   : > { %6250 = vmatprep.mubr.bf16.mxu1 %v5090_v32  ;;  %6636 = vmatprep.mubr.bf16.mxu0 %v5090_v32  ;;  %v15607_v29 = vrot.slane %v5223_v30, %v17212_v4 }
 0x490   : > { %17210 = vst [vmem:[#allocation128_spill] sm:$0xff] %v15587_v34  ;;  %v16845_v32 = vmax.f32 %v15587_v34, 0.0 }
 0x492   : > { %v5093_v0 = vpack.c.bf16 %v16845_v32, %v16846_v63 }
 0x496   : > { %6251 = vmatmul.mubr.bf16.gmra.mrb[248].mxu1 %v5089_v22  ;;  %6637 = vmatmul.mubr.bf16.gmra.mrb[56].mxu0 %v5089_v22  ;;  %v17213_v22 = vld [vmem:[#allocation22_spill] sm:$0xff] }
 0x497   : > { %6260 = vmatprep.mubr.bf16.mxu1 %v5094_v36  ;;  %6646 = vmatprep.mubr.bf16.mxu0 %v5094_v36  ;;  %v15610_v36 = vrot.slane %v5223_v30, %v17213_v22 }
 0x49e   : > { %6261 = vmatmul.mubr.bf16.gmra.mrb[252].mxu1 %v5093_v0  ;;  %6647 = vmatmul.mubr.bf16.gmra.mrb[60].mxu0 %v5093_v0 }
 0x4f9   : > { %v6112_v34 = vpop.f32.mrb[192].mxu1  ;;  %v6498_v32 = vpop.f32.mrb[0].mxu0 }
 0x4fa   : > { %v10079_v0 = vadd.f32 %v6112_v34, %v15607_v29  ;;  %v10143_v63 = vadd.f32 %v6498_v32, %v15610_v36  ;;  %v6114_v15 = vpop.f32.mrb[193].mxu1  ;;  %v6500_v35 = vpop.f32.mrb[1].mxu0 }
 0x4fb   : > { %v10080_v31 = vadd.f32 %v6114_v15, %v15613_v3  ;;  %v10144_v27 = vadd.f32 %v6500_v35, %v15616_v26  ;;  %v6116_v25 = vpop.f32.mrb[194].mxu1  ;;  %v6502_v7 = vpop.f32.mrb[2].mxu0 }
 0x4fc   : > { %v10081_v53 = vadd.f32 %v6116_v25, %v15607_v29  ;;  %v10145_v33 = vadd.f32 %v6502_v7, %v15610_v36  ;;  %v6118_v30 = vpop.f32.mrb[195].mxu1  ;;  %v6504_v45 = vpop.f32.mrb[3].mxu0  ;;  %v6657_v43 = vmax.f32 %v10079_v0, 0.0  ;;  %v6659_v32 = vmax.f32 %v10143_v63, 0.0 }
 0x4fd   : > { %v10082_v57 = vadd.f32 %v6118_v30, %v15613_v3  ;;  %v10146_v34 = vadd.f32 %v6504_v45, %v15616_v26  ;;  %v6658_v11 = vmax.f32 %v10080_v31, 0.0  ;;  %v6660_v15 = vmax.f32 %v10144_v27, 0.0  ;;  %v11232_v45 = vld [vmem:[%s16573_s9 + $0x200] ss:$16 sps:$4 sm:$0xff]  }
 0x4fe   : > { %v6661_v20 = vmax.f32 %v10081_v53, 0.0  ;;  %v6663_v44 = vmax.f32 %v10145_v33, 0.0  ;;  %v11235_v53 = vld [vmem:[%s16573_s9 + $0x208] ss:$16 sps:$4 sm:$0xff]  }
 0x4ff   : > { %v6662_v1 = vmax.f32 %v10082_v57, 0.0  ;;  %v6664_v35 = vmax.f32 %v10146_v34, 0.0 }
 0x500   : > { %v6785_v49 = vpack.c.bf16 %v6661_v20, %v6657_v43  ;;  %v15626_v9 = vpack.c.bf16 %v6663_v44, %v6659_v32  ;;  %v11243_v44 = vld [vmem:[%s16573_s9 + $0x22c] ss:$16 sps:$4 sm:$0xff]  }
 0x501   : > { %v6786_v25 = vpack.c.bf16 %v6662_v1, %v6658_v11  ;;  %v15628_v58 = vpack.c.bf16 %v6664_v35, %v6660_v15  ;;  %v6122_v7 = vpop.f32.mrb[196].mxu1  ;;  %v6508_v50 = vpop.f32.mrb[4].mxu0  ;;  %v11240_v11 = vld [vmem:[%s16573_s9 + $0x224] ss:$16 sps:$4 sm:$0xff]   ;;  %v11238_v35 = vld [vmem:[%s16573_s9 + $0x220] ss:$16 sps:$4 sm:$0xff]  }
 0x502   : > { %v10083_v33 = vadd.f32 %v6122_v7, %v15607_v29  ;;  %v10147_v57 = vadd.f32 %v6508_v50, %v15610_v36  ;;  %v6124_v20 = vpop.f32.mrb[197].mxu1  ;;  %v6510_v43 = vpop.f32.mrb[5].mxu0  ;;  %v11246_v7 = vld [vmem:[%s16573_s9 + $0x244] ss:$16 sps:$4 sm:$0xff]  }
 0x503   : > { %v10084_v1 = vadd.f32 %v6124_v20, %v15613_v3  ;;  %v10148_v27 = vadd.f32 %v6510_v43, %v15616_v26  ;;  %v6126_v31 = vpop.f32.mrb[198].mxu1  ;;  %v6512_v63 = vpop.f32.mrb[6].mxu0  ;;  %7671 = vmatprep.mubr.bf16.mxu1 %v6786_v25  ;;  %8057 = vmatprep.mubr.bf16.mxu0 %v6786_v25  ;;  %v11241_v25 = vld [vmem:[%s16573_s9 + $0x228] ss:$16 sps:$4 sm:$0xff]  }
 0x504   : > { %v10085_v50 = vadd.f32 %v6126_v31, %v15607_v29  ;;  %v10149_v0 = vadd.f32 %v6512_v63, %v15610_v36  ;;  %v6128_v30 = vpop.f32.mrb[199].mxu1  ;;  %v6514_v34 = vpop.f32.mrb[7].mxu0  ;;  %7672 = vmatmul.mubr.bf16.vlgmr.msra.gmra.mrb[0].mxu1 %v6785_v49  ;;  %8058 = vmatmul.mubr.bf16.vlgmr.msra.gmra.mrb[64].mxu0 %v6785_v49  ;;  %v6665_v20 = vmax.f32 %v10083_v33, 0.0  ;;  %v6667_v49 = vmax.f32 %v10147_v57, 0.0 }
 0x505   : > { %v10086_v32 = vadd.f32 %v6128_v30, %v15613_v3  ;;  %v10150_v15 = vadd.f32 %v6514_v34, %v15616_v26  ;;  %7833 = vmatpush1.bf16.msra.mxu1 %v11232_v45  ;;  %8219 = vmatpush1.bf16.msra.mxu0 %v11235_v53  ;;  %v11249_v45 = vld [vmem:[%s16573_s9 + $0x24c] ss:$16 sps:$4 sm:$0xff]   ;;  %v6666_v53 = vmax.f32 %v10084_v1, 0.0  ;;  %v6668_v63 = vmax.f32 %v10148_v27, 0.0 }
 0x506   : > { %v6669_v43 = vmax.f32 %v10085_v50, 0.0  ;;  %v6671_v31 = vmax.f32 %v10149_v0, 0.0  ;;  %7834 = vmatprep.subr.bf16.mxu1 %v11240_v11  ;;  %8220 = vmatprep.subr.bf16.mxu0 %v11243_v44  ;;  %v11244_v11 = vld [vmem:[%s16573_s9 + $0x240] ss:$16 sps:$4 sm:$0xff]   ;;  %v11247_v44 = vld [vmem:[%s16573_s9 + $0x248] ss:$16 sps:$4 sm:$0xff]  }
 0x507   : > { %v6670_v30 = vmax.f32 %v10086_v32, 0.0  ;;  %v6672_v34 = vmax.f32 %v10150_v15, 0.0  ;;  %v11252_v32 = vld [vmem:[%s16573_s9 + $0x264] ss:$16 sps:$4 sm:$0xff]   ;;  %v11255_v15 = vld [vmem:[%s16573_s9 + $0x26c] ss:$16 sps:$4 sm:$0xff]  }
 0x508   : > { %v6789_v23 = vpack.c.bf16 %v6669_v43, %v6665_v20  ;;  %v15662_v2 = vpack.c.bf16 %v6671_v31, %v6667_v49 }
 0x509   : > { %v6790_v12 = vpack.c.bf16 %v6670_v30, %v6666_v53  ;;  %v15664_v40 = vpack.c.bf16 %v6672_v34, %v6668_v63  ;;  %v6132_v33 = vpop.f32.mrb[200].mxu1  ;;  %v6518_v57 = vpop.f32.mrb[8].mxu0  ;;  %7835 = vmatpush1.bf16.msra.mxu1 %v11238_v35  ;;  %8221 = vmatpush1.bf16.msra.mxu0 %v11241_v25  ;;  %v11250_v30 = vld [vmem:[%s16573_s9 + $0x260] ss:$16 sps:$4 sm:$0xff]   ;;  %v11258_v34 = vld [vmem:[%s16573_s9 + $0x284] ss:$16 sps:$4 sm:$0xff]  }
 0x50a   : > { %v10087_v1 = vadd.f32 %v6132_v33, %v15607_v29  ;;  %v10151_v27 = vadd.f32 %v6518_v57, %v15610_v36  ;;  %v6134_v50 = vpop.f32.mrb[201].mxu1  ;;  %v6520_v0 = vpop.f32.mrb[9].mxu0  ;;  %7836 = vmatprep.subr.bf16.mxu1 %v11246_v7  ;;  %8222 = vmatprep.subr.bf16.mxu0 %v11249_v45 }
 0x50b   : > { %v10088_v35 = vadd.f32 %v6134_v50, %v15613_v3  ;;  %v10152_v25 = vadd.f32 %v6520_v0, %v15616_v26  ;;  %v6136_v20 = vpop.f32.mrb[202].mxu1  ;;  %v6522_v49 = vpop.f32.mrb[10].mxu0  ;;  %7681 = vmatprep.mubr.bf16.mxu1 %v6790_v12  ;;  %8067 = vmatprep.mubr.bf16.mxu0 %v6790_v12  ;;  %v11253_v12 = vld [vmem:[%s16573_s9 + $0x268] ss:$16 sps:$4 sm:$0xff]  }
 0x50c   : > { %v10089_v43 = vadd.f32 %v6136_v20, %v15607_v29  ;;  %v10153_v7 = vadd.f32 %v6522_v49, %v15610_v36  ;;  %v6138_v31 = vpop.f32.mrb[203].mxu1  ;;  %v6524_v45 = vpop.f32.mrb[11].mxu0  ;;  %7682 = vmatmul.mubr.bf16.gmra.mrb[4].mxu1 %v6789_v23  ;;  %8068 = vmatmul.mubr.bf16.gmra.mrb[68].mxu0 %v6789_v23  ;;  %v6673_v33 = vmax.f32 %v10087_v1, 0.0  ;;  %v6675_v23 = vmax.f32 %v10151_v27, 0.0 }
 0x50d   : > { %v10090_v53 = vadd.f32 %v6138_v31, %v15613_v3  ;;  %v10154_v63 = vadd.f32 %v6524_v45, %v15616_v26  ;;  %7837 = vmatpush1.bf16.msra.mxu1 %v11244_v11  ;;  %8223 = vmatpush1.bf16.msra.mxu0 %v11247_v44  ;;  %v11261_v11 = vld [vmem:[%s16573_s9 + $0x28c] ss:$16 sps:$4 sm:$0xff]   ;;  %v6674_v44 = vmax.f32 %v10088_v35, 0.0  ;;  %v6676_v0 = vmax.f32 %v10152_v25, 0.0 }
 0x50e   : > { %v6677_v57 = vmax.f32 %v10089_v43, 0.0  ;;  %v6679_v50 = vmax.f32 %v10153_v7, 0.0  ;;  %7838 = vmatprep.subr.bf16.mxu1 %v11252_v32  ;;  %8224 = vmatprep.subr.bf16.mxu0 %v11255_v15  ;;  %v11256_v32 = vld [vmem:[%s16573_s9 + $0x280] ss:$16 sps:$4 sm:$0xff]   ;;  %v11259_v15 = vld [vmem:[%s16573_s9 + $0x288] ss:$16 sps:$4 sm:$0xff]  }
 0x50f   : > { %v6678_v20 = vmax.f32 %v10090_v53, 0.0  ;;  %v6680_v49 = vmax.f32 %v10154_v63, 0.0  ;;  %v11264_v53 = vld [vmem:[%s16573_s9 + $0x2a4] ss:$16 sps:$4 sm:$0xff]   ;;  %v11267_v63 = vld [vmem:[%s16573_s9 + $0x2ac] ss:$16 sps:$4 sm:$0xff]  }
 0x510   : > { %v6793_v31 = vpack.c.bf16 %v6677_v57, %v6673_v33  ;;  %v15698_v45 = vpack.c.bf16 %v6679_v50, %v6675_v23 }
 0x511   : > { %v6794_v60 = vpack.c.bf16 %v6678_v20, %v6674_v44  ;;  %v15700_v6 = vpack.c.bf16 %v6680_v49, %v6676_v0  ;;  %v6142_v1 = vpop.f32.mrb[204].mxu1  ;;  %v6528_v27 = vpop.f32.mrb[12].mxu0  ;;  %7839 = vmatpush1.bf16.msra.mxu1 %v11250_v30  ;;  %8225 = vmatpush1.bf16.msra.mxu0 %v11253_v12  ;;  %v11262_v20 = vld [vmem:[%s16573_s9 + $0x2a0] ss:$16 sps:$4 sm:$0xff]   ;;  %v11270_v49 = vld [vmem:[%s16573_s9 + $0x2c4] ss:$16 sps:$4 sm:$0xff]  }
 0x512   : > { %v10091_v35 = vadd.f32 %v6142_v1, %v15607_v29  ;;  %v10155_v25 = vadd.f32 %v6528_v27, %v15610_v36  ;;  %v6144_v43 = vpop.f32.mrb[205].mxu1  ;;  %v6530_v7 = vpop.f32.mrb[13].mxu0  ;;  %7840 = vmatprep.subr.bf16.mxu1 %v11258_v34  ;;  %8226 = vmatprep.subr.bf16.mxu0 %v11261_v11 }
 0x513   : > { %v10092_v30 = vadd.f32 %v6144_v43, %v15613_v3  ;;  %v10156_v12 = vadd.f32 %v6530_v7, %v15616_v26  ;;  %v6146_v33 = vpop.f32.mrb[206].mxu1  ;;  %v6532_v23 = vpop.f32.mrb[14].mxu0  ;;  %7691 = vmatprep.mubr.bf16.mxu1 %v6794_v60  ;;  %8077 = vmatprep.mubr.bf16.mxu0 %v6794_v60  ;;  %v11265_v60 = vld [vmem:[%s16573_s9 + $0x2a8] ss:$16 sps:$4 sm:$0xff]  }
 0x514   : > { %v10093_v57 = vadd.f32 %v6146_v33, %v15607_v29  ;;  %v10157_v34 = vadd.f32 %v6532_v23, %v15610_v36  ;;  %v6148_v50 = vpop.f32.mrb[207].mxu1  ;;  %v6534_v11 = vpop.f32.mrb[15].mxu0  ;;  %7692 = vmatmul.mubr.bf16.gmra.mrb[8].mxu1 %v6793_v31  ;;  %8078 = vmatmul.mubr.bf16.gmra.mrb[72].mxu0 %v6793_v31  ;;  %v6681_v1 = vmax.f32 %v10091_v35, 0.0  ;;  %v6683_v31 = vmax.f32 %v10155_v25, 0.0 }
 0x515   : > { %v10094_v44 = vadd.f32 %v6148_v50, %v15613_v3  ;;  %v10158_v0 = vadd.f32 %v6534_v11, %v15616_v26  ;;  %7841 = vmatpush1.bf16.msra.mxu1 %v11256_v32  ;;  %8227 = vmatpush1.bf16.msra.mxu0 %v11259_v15  ;;  %v11273_v32 = vld [vmem:[%s16573_s9 + $0x2cc] ss:$16 sps:$4 sm:$0xff]   ;;  %v6682_v15 = vmax.f32 %v10092_v30, 0.0  ;;  %v6684_v7 = vmax.f32 %v10156_v12, 0.0 }
 0x516   : > { %v6685_v27 = vmax.f32 %v10093_v57, 0.0  ;;  %v6687_v43 = vmax.f32 %v10157_v34, 0.0  ;;  %7842 = vmatprep.subr.bf16.mxu1 %v11264_v53  ;;  %8228 = vmatprep.subr.bf16.mxu0 %v11267_v63  ;;  %v11268_v53 = vld [vmem:[%s16573_s9 + $0x2c0] ss:$16 sps:$4 sm:$0xff]   ;;  %v11271_v63 = vld [vmem:[%s16573_s9 + $0x2c8] ss:$16 sps:$4 sm:$0xff]  }
 0x517   : > { %v6686_v33 = vmax.f32 %v10094_v44, 0.0  ;;  %v6688_v23 = vmax.f32 %v10158_v0, 0.0  ;;  %v11276_v44 = vld [vmem:[%s16573_s9 + $0x2e4] ss:$16 sps:$4 sm:$0xff]   ;;  %v11279_v0 = vld [vmem:[%s16573_s9 + $0x2ec] ss:$16 sps:$4 sm:$0xff]  }
 0x518   : > { %v6797_v50 = vpack.c.bf16 %v6685_v27, %v6681_v1  ;;  %v15734_v11 = vpack.c.bf16 %v6687_v43, %v6683_v31 }
 0x519   : > { %v6798_v37 = vpack.c.bf16 %v6686_v33, %v6682_v15  ;;  %v15736_v55 = vpack.c.bf16 %v6688_v23, %v6684_v7  ;;  %v6152_v35 = vpop.f32.mrb[208].mxu1  ;;  %v6538_v25 = vpop.f32.mrb[16].mxu0  ;;  %7843 = vmatpush1.bf16.msra.mxu1 %v11262_v20  ;;  %8229 = vmatpush1.bf16.msra.mxu0 %v11265_v60  ;;  %v11274_v33 = vld [vmem:[%s16573_s9 + $0x2e0] ss:$16 sps:$4 sm:$0xff]   ;;  %v11282_v23 = vld [vmem:[%s16573_s9 + $0x304] ss:$16 sps:$4 sm:$0xff]  }
 0x51a   : > { %v10095_v30 = vadd.f32 %v6152_v35, %v15607_v29  ;;  %v10159_v12 = vadd.f32 %v6538_v25, %v15610_v36  ;;  %v6154_v57 = vpop.f32.mrb[209].mxu1  ;;  %v6540_v34 = vpop.f32.mrb[17].mxu0  ;;  %7844 = vmatprep.subr.bf16.mxu1 %v11270_v49  ;;  %8230 = vmatprep.subr.bf16.mxu0 %v11273_v32 }
 0x51b   : > { %v10096_v20 = vadd.f32 %v6154_v57, %v15613_v3  ;;  %v10160_v60 = vadd.f32 %v6540_v34, %v15616_v26  ;;  %v6156_v1 = vpop.f32.mrb[210].mxu1  ;;  %v6542_v31 = vpop.f32.mrb[18].mxu0  ;;  %7701 = vmatprep.mubr.bf16.mxu1 %v6798_v37  ;;  %8087 = vmatprep.mubr.bf16.mxu0 %v6798_v37  ;;  %v11277_v37 = vld [vmem:[%s16573_s9 + $0x2e8] ss:$16 sps:$4 sm:$0xff]  }
 0x51c   : > { %v10097_v27 = vadd.f32 %v6156_v1, %v15607_v29  ;;  %v10161_v49 = vadd.f32 %v6542_v31, %v15610_v36  ;;  %v6158_v43 = vpop.f32.mrb[211].mxu1  ;;  %v6544_v32 = vpop.f32.mrb[19].mxu0  ;;  %7702 = vmatmul.mubr.bf16.gmra.mrb[12].mxu1 %v6797_v50  ;;  %8088 = vmatmul.mubr.bf16.gmra.mrb[76].mxu0 %v6797_v50  ;;  %v6689_v35 = vmax.f32 %v10095_v30, 0.0  ;;  %v6691_v50 = vmax.f32 %v10159_v12, 0.0 }
 0x51d   : > { %v10098_v15 = vadd.f32 %v6158_v43, %v15613_v3  ;;  %v10162_v7 = vadd.f32 %v6544_v32, %v15616_v26  ;;  %7845 = vmatpush1.bf16.msra.mxu1 %v11268_v53  ;;  %8231 = vmatpush1.bf16.msra.mxu0 %v11271_v63  ;;  %v11285_v53 = vld [vmem:[%s16573_s9 + $0x30c] ss:$16 sps:$4 sm:$0xff]   ;;  %v6690_v63 = vmax.f32 %v10096_v20, 0.0  ;;  %v6692_v34 = vmax.f32 %v10160_v60, 0.0 }
 0x51e   : > { %v6693_v25 = vmax.f32 %v10097_v27, 0.0  ;;  %v6695_v57 = vmax.f32 %v10161_v49, 0.0  ;;  %7846 = vmatprep.subr.bf16.mxu1 %v11276_v44  ;;  %8232 = vmatprep.subr.bf16.mxu0 %v11279_v0  ;;  %v11280_v44 = vld [vmem:[%s16573_s9 + $0x300] ss:$16 sps:$4 sm:$0xff]   ;;  %v11283_v0 = vld [vmem:[%s16573_s9 + $0x308] ss:$16 sps:$4 sm:$0xff]  }
 0x51f   : > { %v6694_v1 = vmax.f32 %v10098_v15, 0.0  ;;  %v6696_v31 = vmax.f32 %v10162_v7, 0.0  ;;  %v11288_v15 = vld [vmem:[%s16573_s9 + $0x324] ss:$16 sps:$4 sm:$0xff]   ;;  %v11291_v7 = vld [vmem:[%s16573_s9 + $0x32c] ss:$16 sps:$4 sm:$0xff]  }
 0x520   : > { %v6801_v43 = vpack.c.bf16 %v6693_v25, %v6689_v35  ;;  %v15770_v32 = vpack.c.bf16 %v6695_v57, %v6691_v50 }
 0x521   : > { %v6802_v42 = vpack.c.bf16 %v6694_v1, %v6690_v63  ;;  %v15772_v39 = vpack.c.bf16 %v6696_v31, %v6692_v34  ;;  %v6162_v30 = vpop.f32.mrb[212].mxu1  ;;  %v6548_v12 = vpop.f32.mrb[20].mxu0  ;;  %7847 = vmatpush1.bf16.msra.mxu1 %v11274_v33  ;;  %8233 = vmatpush1.bf16.msra.mxu0 %v11277_v37  ;;  %v11286_v1 = vld [vmem:[%s16573_s9 + $0x320] ss:$16 sps:$4 sm:$0xff]   ;;  %v11294_v31 = vld [vmem:[%s16573_s9 + $0x344] ss:$16 sps:$4 sm:$0xff]  }
 0x522   : > { %v10099_v20 = vadd.f32 %v6162_v30, %v15607_v29  ;;  %v10163_v60 = vadd.f32 %v6548_v12, %v15610_v36  ;;  %v6164_v27 = vpop.f32.mrb[213].mxu1  ;;  %v6550_v49 = vpop.f32.mrb[21].mxu0  ;;  %7848 = vmatprep.subr.bf16.mxu1 %v11282_v23  ;;  %8234 = vmatprep.subr.bf16.mxu0 %v11285_v53 }
 0x523   : > { %v10100_v33 = vadd.f32 %v6164_v27, %v15613_v3  ;;  %v10164_v37 = vadd.f32 %v6550_v49, %v15616_v26  ;;  %v6166_v35 = vpop.f32.mrb[214].mxu1  ;;  %v6552_v50 = vpop.f32.mrb[22].mxu0  ;;  %7711 = vmatprep.mubr.bf16.mxu1 %v6802_v42  ;;  %8097 = vmatprep.mubr.bf16.mxu0 %v6802_v42  ;;  %v11289_v42 = vld [vmem:[%s16573_s9 + $0x328] ss:$16 sps:$4 sm:$0xff]  }
 0x524   : > { %v10101_v25 = vadd.f32 %v6166_v35, %v15607_v29  ;;  %v10165_v23 = vadd.f32 %v6552_v50, %v15610_v36  ;;  %v6168_v57 = vpop.f32.mrb[215].mxu1  ;;  %v6554_v53 = vpop.f32.mrb[23].mxu0  ;;  %7712 = vmatmul.mubr.bf16.gmra.mrb[16].mxu1 %v6801_v43  ;;  %8098 = vmatmul.mubr.bf16.gmra.mrb[80].mxu0 %v6801_v43  ;;  %v6697_v30 = vmax.f32 %v10099_v20, 0.0  ;;  %v6699_v43 = vmax.f32 %v10163_v60, 0.0 }
 0x525   : > { %v10102_v63 = vadd.f32 %v6168_v57, %v15613_v3  ;;  %v10166_v34 = vadd.f32 %v6554_v53, %v15616_v26  ;;  %7849 = vmatpush1.bf16.msra.mxu1 %v11280_v44  ;;  %8235 = vmatpush1.bf16.msra.mxu0 %v11283_v0  ;;  %v11297_v44 = vld [vmem:[%s16573_s9 + $0x34c] ss:$16 sps:$4 sm:$0xff]   ;;  %v6698_v0 = vmax.f32 %v10100_v33, 0.0  ;;  %v6700_v49 = vmax.f32 %v10164_v37, 0.0 }
 0x526   : > { %v6701_v12 = vmax.f32 %v10101_v25, 0.0  ;;  %v6703_v27 = vmax.f32 %v10165_v23, 0.0  ;;  %7850 = vmatprep.subr.bf16.mxu1 %v11288_v15  ;;  %8236 = vmatprep.subr.bf16.mxu0 %v11291_v7  ;;  %v11292_v15 = vld [vmem:[%s16573_s9 + $0x340] ss:$16 sps:$4 sm:$0xff]   ;;  %v11295_v7 = vld [vmem:[%s16573_s9 + $0x348] ss:$16 sps:$4 sm:$0xff]  }
 0x527   : > { %v6702_v35 = vmax.f32 %v10102_v63, 0.0  ;;  %v6704_v50 = vmax.f32 %v10166_v34, 0.0  ;;  %v11300_v63 = vld [vmem:[%s16573_s9 + $0x364] ss:$16 sps:$4 sm:$0xff]   ;;  %v11303_v34 = vld [vmem:[%s16573_s9 + $0x36c] ss:$16 sps:$4 sm:$0xff]  }
 0x528   : > { %v6805_v57 = vpack.c.bf16 %v6701_v12, %v6697_v30  ;;  %v15806_v53 = vpack.c.bf16 %v6703_v27, %v6699_v43 }
 0x529   : > { %v6806_v41 = vpack.c.bf16 %v6702_v35, %v6698_v0  ;;  %v15808_v17 = vpack.c.bf16 %v6704_v50, %v6700_v49  ;;  %v6172_v20 = vpop.f32.mrb[216].mxu1  ;;  %v6558_v60 = vpop.f32.mrb[24].mxu0  ;;  %7851 = vmatpush1.bf16.msra.mxu1 %v11286_v1  ;;  %8237 = vmatpush1.bf16.msra.mxu0 %v11289_v42  ;;  %v11298_v35 = vld [vmem:[%s16573_s9 + $0x360] ss:$16 sps:$4 sm:$0xff]   ;;  %v11306_v50 = vld [vmem:[%s16573_s9 + $0x384] ss:$16 sps:$4 sm:$0xff]  }
 0x52a   : > { %v10103_v33 = vadd.f32 %v6172_v20, %v15607_v29  ;;  %v10167_v37 = vadd.f32 %v6558_v60, %v15610_v36  ;;  %v6174_v25 = vpop.f32.mrb[217].mxu1  ;;  %v6560_v23 = vpop.f32.mrb[25].mxu0  ;;  %7852 = vmatprep.subr.bf16.mxu1 %v11294_v31  ;;  %8238 = vmatprep.subr.bf16.mxu0 %v11297_v44 }
 0x52b   : > { %v10104_v1 = vadd.f32 %v6174_v25, %v15613_v3  ;;  %v10168_v42 = vadd.f32 %v6560_v23, %v15616_v26  ;;  %v6176_v30 = vpop.f32.mrb[218].mxu1  ;;  %v6562_v43 = vpop.f32.mrb[26].mxu0  ;;  %7721 = vmatprep.mubr.bf16.mxu1 %v6806_v41  ;;  %8107 = vmatprep.mubr.bf16.mxu0 %v6806_v41  ;;  %v11301_v41 = vld [vmem:[%s16573_s9 + $0x368] ss:$16 sps:$4 sm:$0xff]  }
 0x52c   : > { %v10105_v12 = vadd.f32 %v6176_v30, %v15607_v29  ;;  %v10169_v31 = vadd.f32 %v6562_v43, %v15610_v36  ;;  %v6178_v27 = vpop.f32.mrb[219].mxu1  ;;  %v6564_v44 = vpop.f32.mrb[27].mxu0  ;;  %7722 = vmatmul.mubr.bf16.gmra.mrb[20].mxu1 %v6805_v57  ;;  %8108 = vmatmul.mubr.bf16.gmra.mrb[84].mxu0 %v6805_v57  ;;  %v6705_v20 = vmax.f32 %v10103_v33, 0.0  ;;  %v6707_v57 = vmax.f32 %v10167_v37, 0.0 }
 0x52d   : > { %v10106_v0 = vadd.f32 %v6178_v27, %v15613_v3  ;;  %v10170_v49 = vadd.f32 %v6564_v44, %v15616_v26  ;;  %7853 = vmatpush1.bf16.msra.mxu1 %v11292_v15  ;;  %8239 = vmatpush1.bf16.msra.mxu0 %v11295_v7  ;;  %v11309_v15 = vld [vmem:[%s16573_s9 + $0x38c] ss:$16 sps:$4 sm:$0xff]   ;;  %v6706_v7 = vmax.f32 %v10104_v1, 0.0  ;;  %v6708_v23 = vmax.f32 %v10168_v42, 0.0 }
 0x52e   : > { %v6709_v60 = vmax.f32 %v10105_v12, 0.0  ;;  %v6711_v25 = vmax.f32 %v10169_v31, 0.0  ;;  %7854 = vmatprep.subr.bf16.mxu1 %v11300_v63  ;;  %8240 = vmatprep.subr.bf16.mxu0 %v11303_v34  ;;  %v11304_v63 = vld [vmem:[%s16573_s9 + $0x380] ss:$16 sps:$4 sm:$0xff]   ;;  %v11307_v34 = vld [vmem:[%s16573_s9 + $0x388] ss:$16 sps:$4 sm:$0xff]  }
 0x52f   : > { %v6710_v30 = vmax.f32 %v10106_v0, 0.0  ;;  %v6712_v43 = vmax.f32 %v10170_v49, 0.0  ;;  %v11312_v0 = vld [vmem:[%s16573_s9 + $0x3a4] ss:$16 sps:$4 sm:$0xff]   ;;  %v11315_v49 = vld [vmem:[%s16573_s9 + $0x3ac] ss:$16 sps:$4 sm:$0xff]  }
 0x530   : > { %v6809_v27 = vpack.c.bf16 %v6709_v60, %v6705_v20  ;;  %v15842_v44 = vpack.c.bf16 %v6711_v25, %v6707_v57 }
 0x531   : > { %v6810_v18 = vpack.c.bf16 %v6710_v30, %v6706_v7  ;;  %v15844_v54 = vpack.c.bf16 %v6712_v43, %v6708_v23  ;;  %v6182_v33 = vpop.f32.mrb[220].mxu1  ;;  %v6568_v37 = vpop.f32.mrb[28].mxu0  ;;  %7855 = vmatpush1.bf16.msra.mxu1 %v11298_v35  ;;  %8241 = vmatpush1.bf16.msra.mxu0 %v11301_v41  ;;  %v11310_v30 = vld [vmem:[%s16573_s9 + $0x3a0] ss:$16 sps:$4 sm:$0xff]   ;;  %v11318_v43 = vld [vmem:[%s16573_s9 + $0x3c4] ss:$16 sps:$4 sm:$0xff]  }
 0x532   : > { %v10107_v1 = vadd.f32 %v6182_v33, %v15607_v29  ;;  %v10171_v42 = vadd.f32 %v6568_v37, %v15610_v36  ;;  %v6184_v12 = vpop.f32.mrb[221].mxu1  ;;  %v6570_v31 = vpop.f32.mrb[29].mxu0  ;;  %7856 = vmatprep.subr.bf16.mxu1 %v11306_v50  ;;  %8242 = vmatprep.subr.bf16.mxu0 %v11309_v15 }
 0x533   : > { %v10108_v35 = vadd.f32 %v6184_v12, %v15613_v3  ;;  %v10172_v41 = vadd.f32 %v6570_v31, %v15616_v26  ;;  %v6186_v20 = vpop.f32.mrb[222].mxu1  ;;  %v6572_v57 = vpop.f32.mrb[30].mxu0  ;;  %7731 = vmatprep.mubr.bf16.mxu1 %v6810_v18  ;;  %8117 = vmatprep.mubr.bf16.mxu0 %v6810_v18  ;;  %v11313_v18 = vld [vmem:[%s16573_s9 + $0x3a8] ss:$16 sps:$4 sm:$0xff]  }
 0x534   : > { %v10109_v60 = vadd.f32 %v6186_v20, %v15607_v29  ;;  %v10173_v50 = vadd.f32 %v6572_v57, %v15610_v36  ;;  %v6188_v25 = vpop.f32.mrb[223].mxu1  ;;  %v6574_v15 = vpop.f32.mrb[31].mxu0  ;;  %7732 = vmatmul.mubr.bf16.gmra.mrb[24].mxu1 %v6809_v27  ;;  %8118 = vmatmul.mubr.bf16.gmra.mrb[88].mxu0 %v6809_v27  ;;  %v6713_v33 = vmax.f32 %v10107_v1, 0.0  ;;  %v6715_v27 = vmax.f32 %v10171_v42, 0.0 }
 0x535   : > { %v10110_v7 = vadd.f32 %v6188_v25, %v15613_v3  ;;  %v10174_v23 = vadd.f32 %v6574_v15, %v15616_v26  ;;  %7857 = vmatpush1.bf16.msra.mxu1 %v11304_v63  ;;  %8243 = vmatpush1.bf16.msra.mxu0 %v11307_v34  ;;  %v11321_v63 = vld [vmem:[%s16573_s9 + $0x3cc] ss:$16 sps:$4 sm:$0xff]   ;;  %v6714_v34 = vmax.f32 %v10108_v35, 0.0  ;;  %v6716_v31 = vmax.f32 %v10172_v41, 0.0 }
 0x536   : > { %v6717_v37 = vmax.f32 %v10109_v60, 0.0  ;;  %v6719_v12 = vmax.f32 %v10173_v50, 0.0  ;;  %7858 = vmatprep.subr.bf16.mxu1 %v11312_v0  ;;  %8244 = vmatprep.subr.bf16.mxu0 %v11315_v49  ;;  %v11316_v0 = vld [vmem:[%s16573_s9 + $0x3c0] ss:$16 sps:$4 sm:$0xff]   ;;  %v11319_v49 = vld [vmem:[%s16573_s9 + $0x3c8] ss:$16 sps:$4 sm:$0xff]  }
 0x537   : > { %v6718_v20 = vmax.f32 %v10110_v7, 0.0  ;;  %v6720_v57 = vmax.f32 %v10174_v23, 0.0  ;;  %v11324_v7 = vld [vmem:[%s16573_s9 + $0x3e4] ss:$16 sps:$4 sm:$0xff]   ;;  %v11327_v23 = vld [vmem:[%s16573_s9 + $0x3ec] ss:$16 sps:$4 sm:$0xff]  }
 0x538   : > { %v6813_v25 = vpack.c.bf16 %v6717_v37, %v6713_v33  ;;  %v15878_v15 = vpack.c.bf16 %v6719_v12, %v6715_v27 }
 0x539   : > { %v6814_v24 = vpack.c.bf16 %v6718_v20, %v6714_v34  ;;  %v15880_v19 = vpack.c.bf16 %v6720_v57, %v6716_v31  ;;  %v6192_v1 = vpop.f32.mrb[224].mxu1  ;;  %v6578_v42 = vpop.f32.mrb[32].mxu0  ;;  %7859 = vmatpush1.bf16.msra.mxu1 %v11310_v30  ;;  %8245 = vmatpush1.bf16.msra.mxu0 %v11313_v18  ;;  %v11322_v20 = vld [vmem:[%s16573_s9 + $0x3e0] ss:$16 sps:$4 sm:$0xff]  }
 0x53a   : > { %v10111_v35 = vadd.f32 %v6192_v1, %v15607_v29  ;;  %v10175_v41 = vadd.f32 %v6578_v42, %v15610_v36  ;;  %v6194_v60 = vpop.f32.mrb[225].mxu1  ;;  %v6580_v50 = vpop.f32.mrb[33].mxu0  ;;  %7860 = vmatprep.subr.bf16.mxu1 %v11318_v43  ;;  %8246 = vmatprep.subr.bf16.mxu0 %v11321_v63 }
 0x53b   : > { %v10112_v30 = vadd.f32 %v6194_v60, %v15613_v3  ;;  %v10176_v18 = vadd.f32 %v6580_v50, %v15616_v26  ;;  %v6196_v33 = vpop.f32.mrb[226].mxu1  ;;  %v6582_v27 = vpop.f32.mrb[34].mxu0  ;;  %7741 = vmatprep.mubr.bf16.mxu1 %v6814_v24  ;;  %8127 = vmatprep.mubr.bf16.mxu0 %v6814_v24  ;;  %v11325_v24 = vld [vmem:[%s16573_s9 + $0x3e8] ss:$16 sps:$4 sm:$0xff]  }
 0x53c   : > { %v10113_v37 = vadd.f32 %v6196_v33, %v15607_v29  ;;  %v10177_v43 = vadd.f32 %v6582_v27, %v15610_v36  ;;  %v6198_v12 = vpop.f32.mrb[227].mxu1  ;;  %v6584_v63 = vpop.f32.mrb[35].mxu0  ;;  %7742 = vmatmul.mubr.bf16.gmra.mrb[28].mxu1 %v6813_v25  ;;  %8128 = vmatmul.mubr.bf16.gmra.mrb[92].mxu0 %v6813_v25  ;;  %v6721_v57 = vmax.f32 %v10111_v35, 0.0  ;;  %v6723_v1 = vmax.f32 %v10175_v41, 0.0 }
 0x53d   : > { %v10114_v34 = vadd.f32 %v6198_v12, %v15613_v3  ;;  %v10178_v31 = vadd.f32 %v6584_v63, %v15616_v26  ;;  %7861 = vmatpush1.bf16.msra.mxu1 %v11316_v0  ;;  %8247 = vmatpush1.bf16.msra.mxu0 %v11319_v49  ;;  %v6722_v25 = vmax.f32 %v10112_v30, 0.0  ;;  %v6724_v50 = vmax.f32 %v10176_v18, 0.0 }
 0x53e   : > { %v6725_v42 = vmax.f32 %v10113_v37, 0.0  ;;  %v6727_v60 = vmax.f32 %v10177_v43, 0.0  ;;  %7862 = vmatprep.subr.bf16.mxu1 %v11324_v7  ;;  %8248 = vmatprep.subr.bf16.mxu0 %v11327_v23 }
 0x53f   : > { %v6726_v33 = vmax.f32 %v10114_v34, 0.0  ;;  %v6728_v27 = vmax.f32 %v10178_v31, 0.0 }
 0x540   : > { %v6817_v0 = vpack.c.bf16 %v6725_v42, %v6721_v57  ;;  %v15908_v49 = vpack.c.bf16 %v6727_v60, %v6723_v1 }
 0x541   : > { %v6818_v12 = vpack.c.bf16 %v6726_v33, %v6722_v25  ;;  %v15910_v63 = vpack.c.bf16 %v6728_v27, %v6724_v50  ;;  %v6202_v61 = vpop.f32.mrb[228].mxu1  ;;  %v6588_v56 = vpop.f32.mrb[36].mxu0  ;;  %7863 = vmatpush1.bf16.msra.mxu1 %v11322_v20  ;;  %8249 = vmatpush1.bf16.msra.mxu0 %v11325_v24 }
 0x542   : > { %v10115_v35 = vadd.f32 %v6202_v61, %v15607_v29  ;;  %v10179_v41 = vadd.f32 %v6588_v56, %v15610_v36  ;;  %v6204_v7 = vpop.f32.mrb[229].mxu1  ;;  %v6590_v23 = vpop.f32.mrb[37].mxu0 }
 0x543   : > { %v10116_v30 = vadd.f32 %v6204_v7, %v15613_v3  ;;  %v10180_v18 = vadd.f32 %v6590_v23, %v15616_v26  ;;  %v6206_v37 = vpop.f32.mrb[230].mxu1  ;;  %v6592_v43 = vpop.f32.mrb[38].mxu0  ;;  %7751 = vmatprep.mubr.bf16.mxu1 %v6818_v12  ;;  %8137 = vmatprep.mubr.bf16.mxu0 %v6818_v12 }
 0x544   : > { %v10117_v34 = vadd.f32 %v6206_v37, %v15607_v29  ;;  %v10181_v31 = vadd.f32 %v6592_v43, %v15610_v36  ;;  %v6208_v20 = vpop.f32.mrb[231].mxu1  ;;  %v6594_v24 = vpop.f32.mrb[39].mxu0  ;;  %7752 = vmatmul.mubr.bf16.gmra.mrb[32].mxu1 %v6817_v0  ;;  %8138 = vmatmul.mubr.bf16.gmra.mrb[96].mxu0 %v6817_v0  ;;  %v6729_v57 = vmax.f32 %v10115_v35, 0.0  ;;  %v6731_v1 = vmax.f32 %v10179_v41, 0.0 }
 0x545   : > { %v10118_v61 = vadd.f32 %v6208_v20, %v15613_v3  ;;  %v10182_v56 = vadd.f32 %v6594_v24, %v15616_v26  ;;  %v6730_v25 = vmax.f32 %v10116_v30, 0.0  ;;  %v6732_v50 = vmax.f32 %v10180_v18, 0.0 }
 0x546   : > { %v6733_v42 = vmax.f32 %v10117_v34, 0.0  ;;  %v6735_v60 = vmax.f32 %v10181_v31, 0.0 }
 0x547   : > { %v6734_v33 = vmax.f32 %v10118_v61, 0.0  ;;  %v6736_v27 = vmax.f32 %v10182_v56, 0.0 }
 0x548   : > { %v6821_v12 = vpack.c.bf16 %v6733_v42, %v6729_v57  ;;  %v15920_v7 = vpack.c.bf16 %v6735_v60, %v6731_v1 }
 0x549   : > { %v6822_v23 = vpack.c.bf16 %v6734_v33, %v6730_v25  ;;  %v15922_v37 = vpack.c.bf16 %v6736_v27, %v6732_v50  ;;  %v6212_v43 = vpop.f32.mrb[232].mxu1  ;;  %v6598_v0 = vpop.f32.mrb[40].mxu0 }
 0x54a   : > { %v10119_v20 = vadd.f32 %v6212_v43, %v15607_v29  ;;  %v10183_v24 = vadd.f32 %v6598_v0, %v15610_v36  ;;  %v6214_v35 = vpop.f32.mrb[233].mxu1  ;;  %v6600_v41 = vpop.f32.mrb[41].mxu0 }
 0x54b   : > { %v10120_v34 = vadd.f32 %v6214_v35, %v15613_v3  ;;  %v10184_v30 = vadd.f32 %v6600_v41, %v15616_v26  ;;  %v6216_v18 = vpop.f32.mrb[234].mxu1  ;;  %v6602_v31 = vpop.f32.mrb[42].mxu0  ;;  %7761 = vmatprep.mubr.bf16.mxu1 %v6822_v23  ;;  %8147 = vmatprep.mubr.bf16.mxu0 %v6822_v23 }
 0x54c   : > { %v10121_v61 = vadd.f32 %v6216_v18, %v15607_v29  ;;  %v10185_v56 = vadd.f32 %v6602_v31, %v15610_v36  ;;  %v6218_v57 = vpop.f32.mrb[235].mxu1  ;;  %v6604_v1 = vpop.f32.mrb[43].mxu0  ;;  %7762 = vmatmul.mubr.bf16.gmra.mrb[36].mxu1 %v6821_v12  ;;  %8148 = vmatmul.mubr.bf16.gmra.mrb[100].mxu0 %v6821_v12  ;;  %v6737_v25 = vmax.f32 %v10119_v20, 0.0  ;;  %v6739_v50 = vmax.f32 %v10183_v24, 0.0 }
 0x54d   : > { %v10122_v42 = vadd.f32 %v6218_v57, %v15613_v3  ;;  %v10186_v60 = vadd.f32 %v6604_v1, %v15616_v26  ;;  %v6738_v43 = vmax.f32 %v10120_v34, 0.0  ;;  %v6740_v0 = vmax.f32 %v10184_v30, 0.0 }
 0x54e   : > { %v6741_v33 = vmax.f32 %v10121_v61, 0.0  ;;  %v6743_v27 = vmax.f32 %v10185_v56, 0.0 }
 0x54f   : > { %v6742_v35 = vmax.f32 %v10122_v42, 0.0  ;;  %v6744_v23 = vmax.f32 %v10186_v60, 0.0 }
 0x550   : > { %v6825_v41 = vpack.c.bf16 %v6741_v33, %v6737_v25  ;;  %v15932_v18 = vpack.c.bf16 %v6743_v27, %v6739_v50 }
 0x551   : > { %v6826_v31 = vpack.c.bf16 %v6742_v35, %v6738_v43  ;;  %v15934_v48 = vpack.c.bf16 %v6744_v23, %v6740_v0  ;;  %v6222_v51 = vpop.f32.mrb[236].mxu1  ;;  %v6608_v12 = vpop.f32.mrb[44].mxu0 }
 0x552   : > { %v10123_v57 = vadd.f32 %v6222_v51, %v15607_v29  ;;  %v10187_v1 = vadd.f32 %v6608_v12, %v15610_v36  ;;  %v6224_v20 = vpop.f32.mrb[237].mxu1  ;;  %v6610_v24 = vpop.f32.mrb[45].mxu0 }
 0x553   : > { %v10124_v61 = vadd.f32 %v6224_v20, %v15613_v3  ;;  %v10188_v34 = vadd.f32 %v6610_v24, %v15616_v26  ;;  %v6226_v30 = vpop.f32.mrb[238].mxu1  ;;  %v6612_v56 = vpop.f32.mrb[46].mxu0  ;;  %7771 = vmatprep.mubr.bf16.mxu1 %v6826_v31  ;;  %8157 = vmatprep.mubr.bf16.mxu0 %v6826_v31 }
 0x554   : > { %v10125_v42 = vadd.f32 %v6226_v30, %v15607_v29  ;;  %v10189_v60 = vadd.f32 %v6612_v56, %v15610_v36  ;;  %v6228_v25 = vpop.f32.mrb[239].mxu1  ;;  %v6614_v50 = vpop.f32.mrb[47].mxu0  ;;  %7772 = vmatmul.mubr.bf16.gmra.mrb[40].mxu1 %v6825_v41  ;;  %8158 = vmatmul.mubr.bf16.gmra.mrb[104].mxu0 %v6825_v41  ;;  %v6745_v27 = vmax.f32 %v10123_v57, 0.0  ;;  %v6747_v43 = vmax.f32 %v10187_v1, 0.0 }
 0x555   : > { %v10126_v51 = vadd.f32 %v6228_v25, %v15613_v3  ;;  %v10190_v33 = vadd.f32 %v6614_v50, %v15616_v26  ;;  %v6746_v23 = vmax.f32 %v10124_v61, 0.0  ;;  %v6748_v12 = vmax.f32 %v10188_v34, 0.0 }
 0x556   : > { %v6749_v0 = vmax.f32 %v10125_v42, 0.0  ;;  %v6751_v35 = vmax.f32 %v10189_v60, 0.0 }
 0x557   : > { %v6750_v20 = vmax.f32 %v10126_v51, 0.0  ;;  %v6752_v31 = vmax.f32 %v10190_v33, 0.0 }
 0x558   : > { %v6829_v24 = vpack.c.bf16 %v6749_v0, %v6745_v27  ;;  %v15944_v30 = vpack.c.bf16 %v6751_v35, %v6747_v43 }
 0x559   : > { %v6830_v56 = vpack.c.bf16 %v6750_v20, %v6746_v23  ;;  %v15946_v38 = vpack.c.bf16 %v6752_v31, %v6748_v12  ;;  %v6232_v59 = vpop.f32.mrb[240].mxu1  ;;  %v6618_v41 = vpop.f32.mrb[48].mxu0 }
 0x55a   : > { %v10127_v25 = vadd.f32 %v6232_v59, %v15607_v29  ;;  %v10191_v50 = vadd.f32 %v6618_v41, %v15610_v36  ;;  %v6234_v57 = vpop.f32.mrb[241].mxu1  ;;  %v6620_v1 = vpop.f32.mrb[49].mxu0 }
 0x55b   : > { %v10128_v42 = vadd.f32 %v6234_v57, %v15613_v3  ;;  %v10192_v61 = vadd.f32 %v6620_v1, %v15616_v26  ;;  %v6236_v34 = vpop.f32.mrb[242].mxu1  ;;  %v6622_v60 = vpop.f32.mrb[50].mxu0  ;;  %7781 = vmatprep.mubr.bf16.mxu1 %v6830_v56  ;;  %8167 = vmatprep.mubr.bf16.mxu0 %v6830_v56 }
 0x55c   : > { %v10129_v51 = vadd.f32 %v6236_v34, %v15607_v29  ;;  %v10193_v33 = vadd.f32 %v6622_v60, %v15610_v36  ;;  %v6238_v27 = vpop.f32.mrb[243].mxu1  ;;  %v6624_v43 = vpop.f32.mrb[51].mxu0  ;;  %7782 = vmatmul.mubr.bf16.gmra.mrb[44].mxu1 %v6829_v24  ;;  %8168 = vmatmul.mubr.bf16.gmra.mrb[108].mxu0 %v6829_v24  ;;  %v6753_v35 = vmax.f32 %v10127_v25, 0.0  ;;  %v6755_v23 = vmax.f32 %v10191_v50, 0.0 }
 0x55d   : > { %v10130_v59 = vadd.f32 %v6238_v27, %v15613_v3  ;;  %v10194_v0 = vadd.f32 %v6624_v43, %v15616_v26  ;;  %v6754_v31 = vmax.f32 %v10128_v42, 0.0  ;;  %v6756_v41 = vmax.f32 %v10192_v61, 0.0 }
 0x55e   : > { %v6757_v12 = vmax.f32 %v10129_v51, 0.0  ;;  %v6759_v20 = vmax.f32 %v10193_v33, 0.0 }
 0x55f   : > { %v6758_v57 = vmax.f32 %v10130_v59, 0.0  ;;  %v6760_v56 = vmax.f32 %v10194_v0, 0.0 }
 0x560   : > { %v6833_v1 = vpack.c.bf16 %v6757_v12, %v6753_v35  ;;  %v15956_v34 = vpack.c.bf16 %v6759_v20, %v6755_v23 }
 0x561   : > { %v6834_v60 = vpack.c.bf16 %v6758_v57, %v6754_v31  ;;  %v15958_v13 = vpack.c.bf16 %v6760_v56, %v6756_v41  ;;  %v6242_v10 = vpop.f32.mrb[244].mxu1  ;;  %v6628_v24 = vpop.f32.mrb[52].mxu0 }
 0x562   : > { %v10131_v27 = vadd.f32 %v6242_v10, %v15607_v29  ;;  %v10195_v43 = vadd.f32 %v6628_v24, %v15610_v36  ;;  %v6244_v25 = vpop.f32.mrb[245].mxu1  ;;  %v6630_v50 = vpop.f32.mrb[53].mxu0 }
 0x563   : > { %v10132_v51 = vadd.f32 %v6244_v25, %v15613_v3  ;;  %v10196_v42 = vadd.f32 %v6630_v50, %v15616_v26  ;;  %v6246_v61 = vpop.f32.mrb[246].mxu1  ;;  %v6632_v33 = vpop.f32.mrb[54].mxu0  ;;  %7791 = vmatprep.mubr.bf16.mxu1 %v6834_v60  ;;  %8177 = vmatprep.mubr.bf16.mxu0 %v6834_v60 }
 0x564   : > { %v10133_v59 = vadd.f32 %v6246_v61, %v15607_v29  ;;  %v10197_v0 = vadd.f32 %v6632_v33, %v15610_v36  ;;  %v6248_v35 = vpop.f32.mrb[247].mxu1  ;;  %v6634_v23 = vpop.f32.mrb[55].mxu0  ;;  %7792 = vmatmul.mubr.bf16.gmra.mrb[48].mxu1 %v6833_v1  ;;  %8178 = vmatmul.mubr.bf16.gmra.mrb[112].mxu0 %v6833_v1  ;;  %v6761_v20 = vmax.f32 %v10131_v27, 0.0  ;;  %v6763_v31 = vmax.f32 %v10195_v43, 0.0 }
 0x565   : > { %v10134_v10 = vadd.f32 %v6248_v35, %v15613_v3  ;;  %v10198_v12 = vadd.f32 %v6634_v23, %v15616_v26  ;;  %v6762_v56 = vmax.f32 %v10132_v51, 0.0  ;;  %v6764_v24 = vmax.f32 %v10196_v42, 0.0 }
 0x566   : > { %v6765_v41 = vmax.f32 %v10133_v59, 0.0  ;;  %v6767_v57 = vmax.f32 %v10197_v0, 0.0 }
 0x567   : > { %v6766_v25 = vmax.f32 %v10134_v10, 0.0  ;;  %v6768_v60 = vmax.f32 %v10198_v12, 0.0 }
 0x568   : > { %v6837_v50 = vpack.c.bf16 %v6765_v41, %v6761_v20  ;;  %v15968_v61 = vpack.c.bf16 %v6767_v57, %v6763_v31 }
 0x569   : > { %v6838_v33 = vpack.c.bf16 %v6766_v25, %v6762_v56  ;;  %v15970_v52 = vpack.c.bf16 %v6768_v60, %v6764_v24  ;;  %v6252_v16 = vpop.f32.mrb[248].mxu1  ;;  %v6638_v1 = vpop.f32.mrb[56].mxu0 }
 0x56a   : > { %v10135_v35 = vadd.f32 %v6252_v16, %v15607_v29  ;;  %v10199_v23 = vadd.f32 %v6638_v1, %v15610_v36  ;;  %v6254_v27 = vpop.f32.mrb[249].mxu1  ;;  %v6640_v43 = vpop.f32.mrb[57].mxu0 }
 0x56b   : > { %v10136_v59 = vadd.f32 %v6254_v27, %v15613_v3  ;;  %v10200_v51 = vadd.f32 %v6640_v43, %v15616_v26  ;;  %v6256_v42 = vpop.f32.mrb[250].mxu1  ;;  %v6642_v0 = vpop.f32.mrb[58].mxu0  ;;  %7801 = vmatprep.mubr.bf16.mxu1 %v6838_v33  ;;  %8187 = vmatprep.mubr.bf16.mxu0 %v6838_v33 }
 0x56c   : > { %v10137_v10 = vadd.f32 %v6256_v42, %v15607_v29  ;;  %v10201_v12 = vadd.f32 %v6642_v0, %v15610_v36  ;;  %v6258_v20 = vpop.f32.mrb[251].mxu1  ;;  %v6644_v31 = vpop.f32.mrb[59].mxu0  ;;  %7802 = vmatmul.mubr.bf16.gmra.mrb[52].mxu1 %v6837_v50  ;;  %8188 = vmatmul.mubr.bf16.gmra.mrb[116].mxu0 %v6837_v50  ;;  %v6769_v57 = vmax.f32 %v10135_v35, 0.0  ;;  %v6771_v56 = vmax.f32 %v10199_v23, 0.0 }
 0x56d   : > { %v10138_v16 = vadd.f32 %v6258_v20, %v15613_v3  ;;  %v10202_v41 = vadd.f32 %v6644_v31, %v15616_v26  ;;  %v6770_v60 = vmax.f32 %v10136_v59, 0.0  ;;  %v6772_v1 = vmax.f32 %v10200_v51, 0.0 }
 0x56e   : > { %v6773_v24 = vmax.f32 %v10137_v10, 0.0  ;;  %v6775_v25 = vmax.f32 %v10201_v12, 0.0 }
 0x56f   : > { %v6774_v27 = vmax.f32 %v10138_v16, 0.0  ;;  %v6776_v33 = vmax.f32 %v10202_v41, 0.0 }
 0x570   : > { %v6841_v43 = vpack.c.bf16 %v6773_v24, %v6769_v57  ;;  %v15980_v42 = vpack.c.bf16 %v6775_v25, %v6771_v56  ;;  %v11328_v25 = vld [vmem:[%s16575_s11 + $0x40] sm:$0xff]  }
 0x571   : > { %v6842_v0 = vpack.c.bf16 %v6774_v27, %v6770_v60  ;;  %v15982_v21 = vpack.c.bf16 %v6776_v33, %v6772_v1  ;;  %v6262_v14 = vpop.f32.mrb[252].mxu1  ;;  %v6648_v50 = vpop.f32.mrb[60].mxu0  ;;  %9935 = vmatprep.subr.bf16.mxu1 %v11328_v25  ;;  %9823 = vmatprep.subr.bf16.mxu0 %v11328_v25  ;;  %v17219_v25 = vld [vmem:[#allocation10_spill] sm:$0xff] }
 0x572   : > { %v10139_v20 = vadd.f32 %v6262_v14, %v15607_v29  ;;  %v10203_v31 = vadd.f32 %v6648_v50, %v15610_v36  ;;  %v6264_v35 = vpop.f32.mrb[253].mxu1  ;;  %v6650_v23 = vpop.f32.mrb[61].mxu0 }
 0x573   : > { %v10140_v10 = vadd.f32 %v6264_v35, %v15613_v3  ;;  %v10204_v59 = vadd.f32 %v6650_v23, %v15616_v26  ;;  %v6266_v51 = vpop.f32.mrb[254].mxu1  ;;  %v6652_v12 = vpop.f32.mrb[62].mxu0  ;;  %7811 = vmatprep.mubr.bf16.mxu1 %v6842_v0  ;;  %8197 = vmatprep.mubr.bf16.mxu0 %v6842_v0 }
 0x574   : > { %v10141_v16 = vadd.f32 %v6266_v51, %v15607_v29  ;;  %v10205_v41 = vadd.f32 %v6652_v12, %v15610_v36  ;;  %v6268_v57 = vpop.f32.mrb[255].mxu1  ;;  %v6654_v56 = vpop.f32.mrb[63].mxu0  ;;  %7812 = vmatmul.mubr.bf16.gmra.mrb[56].mxu1 %v6841_v43  ;;  %8198 = vmatmul.mubr.bf16.gmra.mrb[120].mxu0 %v6841_v43  ;;  %v6777_v60 = vmax.f32 %v10139_v20, 0.0  ;;  %v6779_v1 = vmax.f32 %v10203_v31, 0.0  ;;  %v11330_v20 = vld [vmem:[%s16575_s11 + $0x48] sm:$0xff]   ;;  %v11332_v31 = vld [vmem:[%s16575_s11 + $0x50] sm:$0xff]  }
 0x575   : > { %v10142_v14 = vadd.f32 %v6268_v57, %v15613_v3  ;;  %v10206_v24 = vadd.f32 %v6654_v56, %v15616_v26  ;;  %v6778_v0 = vmax.f32 %v10140_v10, 0.0  ;;  %v6780_v29 = vmax.f32 %v10204_v59, 0.0  ;;  %v11329_v26 = vld [vmem:[%s16575_s11] sm:$0xff]   ;;  %v11335_v10 = vld [vmem:[%s16575_s11 + $0x18] sm:$0xff]   ;;  %v11339_v51 = vld [vmem:[%s16575_s11 + $0x28] sm:$0xff]  }
 0x576   : > { %v6781_v27 = vmax.f32 %v10141_v16, 0.0  ;;  %v6783_v33 = vmax.f32 %v10205_v41, 0.0  ;;  %v11336_v59 = vld [vmem:[%s16575_s11 + $0x60] sm:$0xff]   ;;  %v17216_v12 = vld [vmem:[#allocation11_spill] sm:$0xff]  ;;  %v17218_v57 = vmax.f32 %v14987_v5, 0.0 }
 0x577   : > { %v6782_v50 = vmax.f32 %v10142_v14, 0.0  ;;  %v6784_v36 = vmax.f32 %v10206_v24, 0.0  ;;  %v17217_v16 = vmax.f32 %v17216_v12, 0.0  ;;  %v17225_v5 = vld [vmem:[#allocation15_spill] sm:$0xff]  ;;  %v17232_v12 = vld [vmem:[#allocation16_spill] sm:$0xff] }
 0x578   : > { %v6845_v35 = vpack.c.bf16 %v6781_v27, %v6777_v60  ;;  %v15995_v43 = vpack.c.bf16 %v6783_v33, %v6779_v1  ;;  %v17220_v60 = vmax.f32 %v17219_v25, 0.0 }
 0x579   : > { %v6846_v3 = vpack.c.bf16 %v6782_v50, %v6778_v0  ;;  %v15997_v23 = vpack.c.bf16 %v6784_v36, %v6780_v29  ;;  %v17221_v0 = vld [vmem:[#allocation12_spill] sm:$0xff]  ;;  %v17223_v36 = vmax.f32 %v14971_v47, 0.0 }
 0x57a   : > { %v17222_v29 = vmax.f32 %v17221_v0, 0.0 }
 0x57b   : > { %7821 = vmatprep.mubr.bf16.mxu1 %v6846_v3  ;;  %8207 = vmatprep.mubr.bf16.mxu0 %v6846_v3 }
 0x57c   : > { %7822 = vmatmul.mubr.bf16.gmra.mrb[60].mxu1 %v6845_v35  ;;  %8208 = vmatmul.mubr.bf16.gmra.mrb[124].mxu0 %v6845_v35 }
 0x57d   : > { %7864 = vmatprep.mubr.bf16.mxu1 %v15628_v58  ;;  %8250 = vmatprep.mubr.bf16.mxu0 %v15628_v58  ;;  %v11331_v58 = vld [vmem:[%s16575_s11 + $0x8] sm:$0xff]  }
 0x584   : > { %7865 = vmatmul.mubr.bf16.vlgmr.msra.gmra.mrb[0].mxu1 %v15626_v9  ;;  %8251 = vmatmul.mubr.bf16.vlgmr.msra.gmra.mrb[64].mxu0 %v15626_v9  ;;  %v11333_v9 = vld [vmem:[%s16575_s11 + $0x10] sm:$0xff]  }
 0x585   : > { %7874 = vmatprep.mubr.bf16.mxu1 %v15664_v40  ;;  %8260 = vmatprep.mubr.bf16.mxu0 %v15664_v40  ;;  %v11334_v40 = vld [vmem:[%s16575_s11 + $0x58] sm:$0xff]  }
 0x586   : > { %9943 = vmatpush3.bf16.msra.mxu1 %v11329_v26  ;;  %9824 = vmatpush3.bf16.msra.mxu0 %v11329_v26 }
 0x587   : > { %9936 = vmatprep.subr.bf16.mxu1 %v11330_v20  ;;  %9825 = vmatprep.subr.bf16.mxu0 %v11330_v20  ;;  %v17226_v20 = vmax.f32 %v17225_v5, 0.0 }
 0x58a   : > { %9944 = vmatpush3.bf16.msra.mxu1 %v11331_v58  ;;  %9826 = vmatpush3.bf16.msra.mxu0 %v11331_v58 }
 0x58b   : > { %9937 = vmatprep.subr.bf16.mxu1 %v11332_v31  ;;  %9827 = vmatprep.subr.bf16.mxu0 %v11332_v31 }
 0x58c   : > { %7875 = vmatmul.mubr.bf16.gmra.mrb[4].mxu1 %v15662_v2  ;;  %8261 = vmatmul.mubr.bf16.gmra.mrb[68].mxu0 %v15662_v2  ;;  %v11337_v2 = vld [vmem:[%s16575_s11 + $0x20] sm:$0xff]  }
 0x58d   : > { %7884 = vmatprep.mubr.bf16.mxu1 %v15700_v6  ;;  %8270 = vmatprep.mubr.bf16.mxu0 %v15700_v6  ;;  %v11338_v6 = vld [vmem:[%s16575_s11 + $0x68] sm:$0xff]  }
 0x58e   : > { %9945 = vmatpush3.bf16.msra.mxu1 %v11333_v9  ;;  %9828 = vmatpush3.bf16.msra.mxu0 %v11333_v9 }
 0x58f   : > { %9938 = vmatprep.subr.bf16.mxu1 %v11334_v40  ;;  %9829 = vmatprep.subr.bf16.mxu0 %v11334_v40  ;;  %v17227_v40 = vmax.f32 %v14933_v8, 0.0 }
 0x592   : > { %9946 = vmatpush3.bf16.msra.mxu1 %v11335_v10  ;;  %9830 = vmatpush3.bf16.msra.mxu0 %v11335_v10 }
 0x593   : > { %9939 = vmatprep.subr.bf16.mxu1 %v11336_v59  ;;  %9831 = vmatprep.subr.bf16.mxu0 %v11336_v59 }
 0x594   : > { %7885 = vmatmul.mubr.bf16.gmra.mrb[8].mxu1 %v15698_v45  ;;  %8271 = vmatmul.mubr.bf16.gmra.mrb[72].mxu0 %v15698_v45 }
 0x595   : > { %7894 = vmatprep.mubr.bf16.mxu1 %v15736_v55  ;;  %8280 = vmatprep.mubr.bf16.mxu0 %v15736_v55 }
 0x596   : > { %9947 = vmatpush3.bf16.msra.mxu1 %v11337_v2  ;;  %9832 = vmatpush3.bf16.msra.mxu0 %v11337_v2 }
 0x597   : > { %9940 = vmatprep.subr.bf16.mxu1 %v11338_v6  ;;  %9833 = vmatprep.subr.bf16.mxu0 %v11338_v6 }
 0x59a   : > { %9948 = vmatpush3.bf16.msra.mxu1 %v11339_v51  ;;  %9834 = vmatpush3.bf16.msra.mxu0 %v11339_v51 }
 0x59c   : > { %7895 = vmatmul.mubr.bf16.gmra.mrb[12].mxu1 %v15734_v11  ;;  %8281 = vmatmul.mubr.bf16.gmra.mrb[76].mxu0 %v15734_v11 }
 0x59d   : > { %7904 = vmatprep.mubr.bf16.mxu1 %v15772_v39  ;;  %8290 = vmatprep.mubr.bf16.mxu0 %v15772_v39 }
 0x5a4   : > { %7905 = vmatmul.mubr.bf16.gmra.mrb[16].mxu1 %v15770_v32  ;;  %8291 = vmatmul.mubr.bf16.gmra.mrb[80].mxu0 %v15770_v32 }
 0x5a5   : > { %7914 = vmatprep.mubr.bf16.mxu1 %v15808_v17  ;;  %8300 = vmatprep.mubr.bf16.mxu0 %v15808_v17 }
 0x5ac   : > { %7915 = vmatmul.mubr.bf16.gmra.mrb[20].mxu1 %v15806_v53  ;;  %8301 = vmatmul.mubr.bf16.gmra.mrb[84].mxu0 %v15806_v53 }
 0x5ad   : > { %7924 = vmatprep.mubr.bf16.mxu1 %v15844_v54  ;;  %8310 = vmatprep.mubr.bf16.mxu0 %v15844_v54  ;;  %v11340_v54 = vld [vmem:[%s16575_s11 + $0x70] sm:$0xff]  }
 0x5ae   : > { %9941 = vmatprep.subr.bf16.mxu1 %v11340_v54  ;;  %9835 = vmatprep.subr.bf16.mxu0 %v11340_v54 }
 0x5b4   : > { %7925 = vmatmul.mubr.bf16.gmra.mrb[24].mxu1 %v15842_v44  ;;  %8311 = vmatmul.mubr.bf16.gmra.mrb[88].mxu0 %v15842_v44 }
 0x5b5   : > { %7934 = vmatprep.mubr.bf16.mxu1 %v15880_v19  ;;  %8320 = vmatprep.mubr.bf16.mxu0 %v15880_v19 }
 0x5bc   : > { %7935 = vmatmul.mubr.bf16.gmra.mrb[28].mxu1 %v15878_v15  ;;  %8321 = vmatmul.mubr.bf16.gmra.mrb[92].mxu0 %v15878_v15 }
 0x5bd   : > { %7944 = vmatprep.mubr.bf16.mxu1 %v15910_v63  ;;  %8330 = vmatprep.mubr.bf16.mxu0 %v15910_v63 }
 0x5c4   : > { %7945 = vmatmul.mubr.bf16.gmra.mrb[32].mxu1 %v15908_v49  ;;  %8331 = vmatmul.mubr.bf16.gmra.mrb[96].mxu0 %v15908_v49 }
 0x5c5   : > { %7954 = vmatprep.mubr.bf16.mxu1 %v15922_v37  ;;  %8340 = vmatprep.mubr.bf16.mxu0 %v15922_v37 }
 0x5cc   : > { %7955 = vmatmul.mubr.bf16.gmra.mrb[36].mxu1 %v15920_v7  ;;  %8341 = vmatmul.mubr.bf16.gmra.mrb[100].mxu0 %v15920_v7 }
 0x5cd   : > { %7964 = vmatprep.mubr.bf16.mxu1 %v15934_v48  ;;  %8350 = vmatprep.mubr.bf16.mxu0 %v15934_v48  ;;  %v11341_v48 = vld [vmem:[%s16575_s11 + $0x30] sm:$0xff]  }
 0x5ce   : > { %9949 = vmatpush3.bf16.msra.mxu1 %v11341_v48  ;;  %9836 = vmatpush3.bf16.msra.mxu0 %v11341_v48 }
 0x5d4   : > { %7965 = vmatmul.mubr.bf16.gmra.mrb[40].mxu1 %v15932_v18  ;;  %8351 = vmatmul.mubr.bf16.gmra.mrb[104].mxu0 %v15932_v18 }
 0x5d5   : > { %7974 = vmatprep.mubr.bf16.mxu1 %v15946_v38  ;;  %8360 = vmatprep.mubr.bf16.mxu0 %v15946_v38  ;;  %v11343_v38 = vld [vmem:[%s16575_s11 + $0x38] sm:$0xff]  }
 0x5dc   : > { %7975 = vmatmul.mubr.bf16.gmra.mrb[44].mxu1 %v15944_v30  ;;  %8361 = vmatmul.mubr.bf16.gmra.mrb[108].mxu0 %v15944_v30 }
 0x5dd   : > { %7984 = vmatprep.mubr.bf16.mxu1 %v15958_v13  ;;  %8370 = vmatprep.mubr.bf16.mxu0 %v15958_v13  ;;  %v11342_v13 = vld [vmem:[%s16575_s11 + $0x78] sm:$0xff]  }
 0x5de   : > { %9837 = vmatprep.subr.bf16.mxu0 %v11342_v13  ;;  %9942 = vmatprep.subr.bf16.mxu1 %v11342_v13 }
 0x5df   : > { %9838 = vmatpush3.bf16.msra.mxu0 %v11343_v38  ;;  %9950 = vmatpush3.bf16.msra.mxu1 %v11343_v38 }
 0x5e4   : > { %7985 = vmatmul.mubr.bf16.gmra.mrb[48].mxu1 %v15956_v34  ;;  %8371 = vmatmul.mubr.bf16.gmra.mrb[112].mxu0 %v15956_v34 }
 0x5e5   : > { %7994 = vmatprep.mubr.bf16.mxu1 %v15970_v52  ;;  %8380 = vmatprep.mubr.bf16.mxu0 %v15970_v52  ;;  %v6977_v52 = vld [vmem:[%s16574_s10] sm:$0xf] }
 0x5e6   : > { %v16112_v19 = vrot.slane %v6977_v52, %v17212_v4  ;;  %v16118_v39 = vrot.slane %v6977_v52, %v17214_v62  ;;  %v16121_v17 = vrot.slane %v6977_v52, %v17215_v28 }
 0x5ec   : > { %7995 = vmatmul.mubr.bf16.gmra.mrb[52].mxu1 %v15968_v61  ;;  %8381 = vmatmul.mubr.bf16.gmra.mrb[116].mxu0 %v15968_v61 }
 0x5ed   : > { %8004 = vmatprep.mubr.bf16.mxu1 %v15982_v21  ;;  %8390 = vmatprep.mubr.bf16.mxu0 %v15982_v21  ;;  %v16115_v21 = vrot.slane %v6977_v52, %v17213_v22 }
 0x5f4   : > { %8005 = vmatmul.mubr.bf16.gmra.mrb[56].mxu1 %v15980_v42  ;;  %8391 = vmatmul.mubr.bf16.gmra.mrb[120].mxu0 %v15980_v42 }
 0x5f5   : > { %8014 = vmatprep.mubr.bf16.mxu1 %v15997_v23  ;;  %8400 = vmatprep.mubr.bf16.mxu0 %v15997_v23  ;;  %v17224_v23 = vmax.f32 %v14950_v46, 0.0 }
 0x5fc   : > { %8015 = vmatmul.mubr.bf16.gmra.mrb[60].mxu1 %v15995_v43  ;;  %8401 = vmatmul.mubr.bf16.gmra.mrb[124].mxu0 %v15995_v43 }
 0x657   : > { %v7866_v55 = vpop.f32.mrb[0].mxu1  ;;  %v8252_v45 = vpop.f32.mrb[64].mxu0 }
 0x658   : > { %v10207_v11 = vadd.f32 %v7866_v55, %v16112_v19  ;;  %v10271_v32 = vadd.f32 %v8252_v45, %v16115_v21  ;;  %v7868_v53 = vpop.f32.mrb[1].mxu1  ;;  %v8254_v44 = vpop.f32.mrb[65].mxu0 }
 0x659   : > { %v10208_v4 = vadd.f32 %v7868_v53, %v16118_v39  ;;  %v10272_v15 = vadd.f32 %v8254_v44, %v16121_v17  ;;  %v7870_v22 = vpop.f32.mrb[2].mxu1  ;;  %v8256_v49 = vpop.f32.mrb[66].mxu0 }
 0x65a   : > { %v8411_v63 = vmax.f32 %v10207_v11, 0.0  ;;  %v8413_v62 = vmax.f32 %v10271_v32, 0.0  ;;  %v10209_v7 = vadd.f32 %v7870_v22, %v16112_v19  ;;  %v10273_v28 = vadd.f32 %v8256_v49, %v16115_v21  ;;  %v7872_v37 = vpop.f32.mrb[3].mxu1  ;;  %v8258_v18 = vpop.f32.mrb[67].mxu0  ;;  %v17228_v22 = vld [vmem:[#allocation19_spill] sm:$0xff] }
 0x65b   : > { %v8412_v30 = vmax.f32 %v10208_v4, 0.0  ;;  %v8414_v34 = vmax.f32 %v10272_v15, 0.0  ;;  %v10210_v61 = vadd.f32 %v7872_v37, %v16118_v39  ;;  %v10274_v42 = vadd.f32 %v8258_v18, %v16121_v17 }
 0x65c   : > { %v8539_v41 = vmul.f32 %v8411_v63, %v17217_v16  ;;  %v8541_v56 = vmul.f32 %v8413_v62, %v17218_v57  ;;  %v8415_v14 = vmax.f32 %v10209_v7, 0.0  ;;  %v8417_v24 = vmax.f32 %v10273_v28, 0.0  ;;  %v17230_v62 = vld [vmem:[#allocation90_spill] sm:$0xff] }
 0x65d   : > { %v8540_v1 = vmul.f32 %v8412_v30, %v17220_v60  ;;  %v8416_v27 = vmax.f32 %v10210_v61, 0.0  ;;  %v8418_v33 = vmax.f32 %v10274_v42, 0.0  ;;  %v8542_v26 = vmul.f32 %v8414_v34, %v17224_v23  ;;  %v17236_v60 = vld [vmem:[#allocation20_spill] sm:$0xff] }
 0x65e   : > { %v8543_v50 = vmul.f32 %v8415_v14, %v17222_v29  ;;  %v8545_v35 = vmul.f32 %v8417_v24, %v17223_v36  ;;  %v17229_v49 = vmax.f32 %v17228_v22, 0.0  ;;  %v17231_v7 = vmax.f32 %v17230_v62, 0.0  ;;  %v17234_v14 = vld [vmem:[#allocation87_spill] sm:$0xff]  ;;  %v17246_v62 = vld [vmem:[#allocation94_spill] sm:$0xff] }
 0x65f   : > { %v8667_v43 = vmax.f32 %v8539_v41, %v8540_v1  ;;  %v8731_v3 = vmax.f32 %v8540_v1, %v8541_v56  ;;  %v8544_v58 = vmul.f32 %v8416_v27, %v17226_v20  ;;  %v7876_v31 = vpop.f32.mrb[4].mxu1  ;;  %v8262_v9 = vpop.f32.mrb[68].mxu0  ;;  %v8546_v10 = vmul.f32 %v8418_v33, %v17227_v40  ;;  %v17238_v33 = vld [vmem:[#allocation88_spill] sm:$0xff] }
 0x660   : > { %v10211_v59 = vadd.f32 %v7876_v31, %v16112_v19  ;;  %v10275_v2 = vadd.f32 %v8262_v9, %v16115_v21  ;;  %v7878_v6 = vpop.f32.mrb[5].mxu1  ;;  %v8264_v47 = vpop.f32.mrb[69].mxu0  ;;  %v17233_v16 = vmax.f32 %v17232_v12, 0.0  ;;  %v17235_v24 = vmax.f32 %v17234_v14, 0.0 }
 0x661   : > { %v8699_v51 = vmax.f32 %v8667_v43, %v8541_v56  ;;  %v8763_v54 = vmax.f32 %v8731_v3, %v8542_v26  ;;  %v8668_v48 = vmax.f32 %v8543_v50, %v8544_v58  ;;  %v8732_v13 = vmax.f32 %v8544_v58, %v8545_v35  ;;  %v7880_v46 = vpop.f32.mrb[6].mxu1  ;;  %v8266_v38 = vpop.f32.mrb[70].mxu0  ;;  %v17240_v58 = vld [vmem:[#allocation24_spill] sm:$0xff] }
 0x662   : > { %v8419_v52 = vmax.f32 %v10211_v59, 0.0  ;;  %v8421_v55 = vmax.f32 %v10275_v2, 0.0  ;;  %v10212_v45 = vadd.f32 %v7878_v6, %v16118_v39  ;;  %v10276_v11 = vadd.f32 %v8264_v47, %v16121_v17  ;;  %v7882_v8 = vpop.f32.mrb[7].mxu1  ;;  %v8268_v32 = vpop.f32.mrb[71].mxu0 }
 0x663   : > { %v8700_v53 = vmax.f32 %v8668_v48, %v8545_v35  ;;  %v8764_v44 = vmax.f32 %v8732_v13, %v8546_v10  ;;  %v10213_v4 = vadd.f32 %v7880_v46, %v16112_v19  ;;  %v10277_v15 = vadd.f32 %v8266_v38, %v16115_v21 }
 0x664   : > { %v8547_v63 = vmul.f32 %v8419_v52, %v17229_v49  ;;  %v8549_v28 = vmul.f32 %v8421_v55, %v17231_v7  ;;  %v8420_v37 = vmax.f32 %v10212_v45, 0.0  ;;  %v8422_v18 = vmax.f32 %v10276_v11, 0.0 }
 0x665   : > { %v8795_v30 = vpack.c.bf16 %v8700_v53, %v8699_v51  ;;  %v8423_v34 = vmax.f32 %v10213_v4, 0.0  ;;  %v8425_v61 = vmax.f32 %v10277_v15, 0.0  ;;  %v10214_v42 = vadd.f32 %v7882_v8, %v16118_v39 }
 0x666   : > { %v8548_v41 = vmul.f32 %v8420_v37, %v17233_v16  ;;  %v10278_v57 = vadd.f32 %v8268_v32, %v16121_v17  ;;  %v8796_v56 = vpack.c.bf16 %v8764_v44, %v8763_v54  ;;  %v8550_v25 = vmul.f32 %v8422_v18, %v17235_v24  ;;  %v17242_v54 = vld [vmem:[#allocation86_spill] sm:$0xff]  ;;  %v17248_v37 = vld [vmem:[#allocation13_spill] sm:$0xff] }
 0x667   : > { %v17237_v1 = vmax.f32 %v17236_v60, 0.0  ;;  %v17239_v0 = vmax.f32 %v17238_v33, 0.0  ;;  %v8424_v50 = vmax.f32 %v10214_v42, 0.0  ;;  %v7886_v36 = vpop.f32.mrb[8].mxu1  ;;  %v8272_v35 = vpop.f32.mrb[72].mxu0  ;;  %v17241_v31 = vmax.f32 %v17240_v58, 0.0 }
 0x668   : > { %v8669_v43 = vmax.f32 %v8547_v63, %v8548_v41  ;;  %v8733_v3 = vmax.f32 %v8548_v41, %v8549_v28  ;;  %v8426_v23 = vmax.f32 %v10278_v57, 0.0  ;;  %v10215_v26 = vadd.f32 %v7886_v36, %v16112_v19  ;;  %8987 = vmatprep.mubr.bf16.mxu0 %v8796_v56  ;;  %v7888_v5 = vpop.f32.mrb[9].mxu1  ;;  %v8274_v20 = vpop.f32.mrb[73].mxu0  ;;  %v17244_v32 = vld [vmem:[#allocation14_spill] sm:$0xff] }
 0x669   : > { %v8551_v27 = vmul.f32 %v8423_v34, %v17237_v1  ;;  %v8553_v29 = vmul.f32 %v8425_v61, %v17239_v0  ;;  %v8552_v9 = vmul.f32 %v8424_v50, %v17241_v31  ;;  %v10279_v40 = vadd.f32 %v8272_v35, %v16115_v21  ;;  %8988 = vmatmul.mubr.bf16.vlgmr.msra.gmra.mrb[128].mxu0 %v8795_v30  ;;  %v7890_v2 = vpop.f32.mrb[10].mxu1  ;;  %v8276_v6 = vpop.f32.mrb[74].mxu0  ;;  %v17250_v34 = vld [vmem:[#allocation91_spill] sm:$0xff]  ;;  %v17252_v1 = vld [vmem:[#allocation5_spill] sm:$0xff]  ;;  %v17254_v0 = vld [vmem:[#allocation92_spill] sm:$0xff] }
 0x66a   : > { %v10216_v10 = vadd.f32 %v7888_v5, %v16118_v39  ;;  %v10280_v59 = vadd.f32 %v8274_v20, %v16121_v17  ;;  %v8701_v47 = vmax.f32 %v8669_v43, %v8549_v28  ;;  %v8765_v51 = vmax.f32 %v8733_v3, %v8550_v25  ;;  %v7892_v38 = vpop.f32.mrb[11].mxu1  ;;  %v8278_v52 = vpop.f32.mrb[75].mxu0 }
 0x66b   : > { %v17243_v48 = vmax.f32 %v17242_v54, 0.0  ;;  %v8427_v46 = vmax.f32 %v10215_v26, 0.0  ;;  %v8670_v55 = vmax.f32 %v8551_v27, %v8552_v9  ;;  %v8734_v45 = vmax.f32 %v8552_v9, %v8553_v29  ;;  %v17256_v9 = vld [vmem:[#allocation6_spill] sm:$0xff] }
 0x66c   : > { %v8429_v11 = vmax.f32 %v10279_v40, 0.0  ;;  %v8428_v8 = vmax.f32 %v10216_v10, 0.0  ;;  %v17245_v53 = vmax.f32 %v17244_v32, 0.0  ;;  %v8430_v4 = vmax.f32 %v10280_v59, 0.0 }
 0x66d   : > { %v8554_v13 = vmul.f32 %v8426_v23, %v17243_v48  ;;  %v10217_v15 = vadd.f32 %v7890_v2, %v16112_v19  ;;  %v10281_v22 = vadd.f32 %v8276_v6, %v16115_v21  ;;  %v8702_v49 = vmax.f32 %v8670_v55, %v8553_v29  ;;  %v17258_v48 = vld [vmem:[#allocation89_spill] sm:$0xff] }
 0x66e   : > { %v8555_v44 = vmul.f32 %v8427_v46, %v17245_v53  ;;  %v17247_v7 = vmax.f32 %v17246_v62, 0.0  ;;  %v17249_v18 = vmax.f32 %v17248_v37, 0.0  ;;  %v17251_v61 = vmax.f32 %v17250_v34, 0.0  ;;  %v17266_v34 = vld [vmem:[#allocation95_spill] sm:$0xff] }
 0x66f   : > { %v8766_v63 = vmax.f32 %v8734_v45, %v8554_v13  ;;  %v8431_v12 = vmax.f32 %v10217_v15, 0.0  ;;  %v8433_v16 = vmax.f32 %v10281_v22, 0.0  ;;  %v10218_v41 = vadd.f32 %v7892_v38, %v16118_v39  ;;  %v7896_v25 = vpop.f32.mrb[12].mxu1  ;;  %v8282_v60 = vpop.f32.mrb[76].mxu0 }
 0x670   : > { %v8557_v28 = vmul.f32 %v8429_v11, %v17247_v7  ;;  %v8556_v30 = vmul.f32 %v8428_v8, %v17249_v18  ;;  %v8558_v42 = vmul.f32 %v8430_v4, %v17251_v61  ;;  %v8797_v57 = vpack.c.bf16 %v8702_v49, %v8701_v47  ;;  %v7898_v43 = vpop.f32.mrb[13].mxu1  ;;  %v8284_v3 = vpop.f32.mrb[77].mxu0  ;;  %v17260_v8 = vld [vmem:[#allocation18_spill] sm:$0xff] }
 0x671   : > { %v10282_v24 = vadd.f32 %v8278_v52, %v16121_v17  ;;  %v17253_v27 = vmax.f32 %v17252_v1, 0.0  ;;  %v17255_v29 = vmax.f32 %v17254_v0, 0.0  ;;  %v8432_v36 = vmax.f32 %v10218_v41, 0.0  ;;  %v7900_v58 = vpop.f32.mrb[14].mxu1  ;;  %v8286_v31 = vpop.f32.mrb[78].mxu0 }
 0x672   : > { %v8671_v56 = vmax.f32 %v8555_v44, %v8556_v30  ;;  %v8735_v14 = vmax.f32 %v8556_v30, %v8557_v28  ;;  %v10219_v35 = vadd.f32 %v7896_v25, %v16112_v19  ;;  %v10283_v20 = vadd.f32 %v8282_v60, %v16115_v21  ;;  %v7902_v47 = vpop.f32.mrb[15].mxu1  ;;  %v8288_v54 = vpop.f32.mrb[79].mxu0 }
 0x673   : > { %v8559_v33 = vmul.f32 %v8431_v12, %v17253_v27  ;;  %v8561_v50 = vmul.f32 %v8433_v16, %v17255_v29  ;;  %v8434_v5 = vmax.f32 %v10282_v24, 0.0  ;;  %v17257_v40 = vmax.f32 %v17256_v9, 0.0  ;;  %v17268_v12 = vld [vmem:[#allocation2_spill] sm:$0xff]  ;;  %v17270_v29 = vld [vmem:[#allocation96_spill] sm:$0xff]  ;;  %v17272_v9 = vld [vmem:[#allocation23_spill] sm:$0xff] }
 0x674   : > { %v16192_v23 = vmax.f32 %v8671_v56, %v8557_v28  ;;  %v8767_v26 = vmax.f32 %v8735_v14, %v8558_v42  ;;  %v8435_v59 = vmax.f32 %v10219_v35, 0.0  ;;  %v8798_v2 = vpack.c.bf16 %v8766_v63, %v8765_v51  ;;  %v17262_v51 = vld [vmem:[#allocation98_spill] sm:$0xff]  ;;  %v17264_v28 = vld [vmem:[#allocation17_spill] sm:$0xff] }
 0x675   : > { %v8560_v10 = vmul.f32 %v8432_v36, %v17257_v40  ;;  %v10220_v6 = vadd.f32 %v7898_v43, %v16118_v39  ;;  %v17259_v13 = vmax.f32 %v17258_v48, 0.0  ;;  %v8437_v38 = vmax.f32 %v10283_v20, 0.0 }
 0x676   : > { %v10284_v52 = vadd.f32 %v8284_v3, %v16121_v17  ;;  %v10221_v55 = vadd.f32 %v7900_v58, %v16112_v19  ;;  %v17261_v32 = vmax.f32 %v17260_v8, 0.0  ;;  %8995 = vmatprep.mubr.bf16.mxu0 %v8798_v2  ;;  %v17263_v4 = vmax.f32 %v17262_v51, 0.0 }
 0x677   : > { %v8562_v46 = vmul.f32 %v8434_v5, %v17259_v13  ;;  %v8672_v45 = vmax.f32 %v8559_v33, %v8560_v10  ;;  %v8736_v11 = vmax.f32 %v8560_v10, %v8561_v50  ;;  %v8436_v44 = vmax.f32 %v10220_v6, 0.0  ;;  %8996 = vmatmul.mubr.bf16.gmra.mrb[132].mxu0 %v8797_v57  ;;  %v7906_v57 = vpop.f32.mrb[16].mxu1  ;;  %v8292_v24 = vpop.f32.mrb[80].mxu0  ;;  %v17274_v6 = vld [vmem:[#allocation93_spill] sm:$0xff] }
 0x678   : > { %v8563_v53 = vmul.f32 %v8435_v59, %v17261_v32  ;;  %v8565_v15 = vmul.f32 %v8437_v38, %v17263_v4  ;;  %v8438_v22 = vmax.f32 %v10284_v52, 0.0  ;;  %v8439_v49 = vmax.f32 %v10221_v55, 0.0  ;;  %v7908_v33 = vpop.f32.mrb[17].mxu1  ;;  %v8294_v0 = vpop.f32.mrb[81].mxu0 }
 0x679   : > { %v10285_v63 = vadd.f32 %v8286_v31, %v16115_v21  ;;  %v8704_v62 = vmax.f32 %v8672_v45, %v8561_v50  ;;  %v8768_v7 = vmax.f32 %v8736_v11, %v8562_v46  ;;  %v17265_v37 = vmax.f32 %v17264_v28, 0.0  ;;  %v7910_v5 = vpop.f32.mrb[18].mxu1  ;;  %v8296_v20 = vpop.f32.mrb[82].mxu0  ;;  %v17276_v11 = vld [vmem:[#allocation8_spill] sm:$0xff] }
 0x67a   : > { %v10222_v30 = vadd.f32 %v7902_v47, %v16118_v39  ;;  %v17267_v61 = vmax.f32 %v17266_v34, 0.0  ;;  %v17269_v16 = vmax.f32 %v17268_v12, 0.0  ;;  %v10286_v14 = vadd.f32 %v8288_v54, %v16121_v17  ;;  %v7912_v59 = vpop.f32.mrb[19].mxu1  ;;  %v8298_v2 = vpop.f32.mrb[83].mxu0  ;;  %v17282_v12 = vld [vmem:[#allocation99_spill] sm:$0xff] }
 0x67b   : > { %v8564_v18 = vmul.f32 %v8436_v44, %v17265_v37  ;;  %v8441_v56 = vmax.f32 %v10285_v63, 0.0  ;;  %v8799_v25 = vpack.c.bf16 %v8704_v62, %v16192_v23  ;;  %v17271_v50 = vmax.f32 %v17270_v29, 0.0  ;;  %v17280_v62 = vld [vmem:[#allocation7_spill] sm:$0xff] }
 0x67c   : > { %v8566_v42 = vmul.f32 %v8438_v22, %v17267_v61  ;;  %v8567_v41 = vmul.f32 %v8439_v49, %v17269_v16  ;;  %v8440_v27 = vmax.f32 %v10222_v30, 0.0  ;;  %v8442_v35 = vmax.f32 %v10286_v14, 0.0 }
 0x67d   : > { %v8673_v60 = vmax.f32 %v8563_v53, %v8564_v18  ;;  %v8737_v1 = vmax.f32 %v8564_v18, %v8565_v15  ;;  %v8569_v36 = vmul.f32 %v8441_v56, %v17271_v50  ;;  %v10223_v43 = vadd.f32 %v7906_v57, %v16112_v19  ;;  %v17284_v56 = vld [vmem:[#allocation21_spill] sm:$0xff] }
 0x67e   : > { %v10287_v3 = vadd.f32 %v8292_v24, %v16115_v21  ;;  %v17273_v40 = vmax.f32 %v17272_v9, 0.0  ;;  %v8800_v10 = vpack.c.bf16 %v8768_v7, %v8767_v26  ;;  %v17275_v47 = vmax.f32 %v17274_v6, 0.0  ;;  %v17278_v26 = vld [vmem:[#allocation102_spill] sm:$0xff] }
 0x67f   : > { %v8705_v58 = vmax.f32 %v8673_v60, %v8565_v15  ;;  %v8769_v31 = vmax.f32 %v8737_v1, %v8566_v42  ;;  %v8443_v48 = vmax.f32 %v10223_v43, 0.0  ;;  %v10224_v46 = vadd.f32 %v7908_v33, %v16118_v39  ;;  %v7916_v34 = vpop.f32.mrb[20].mxu1  ;;  %v8302_v61 = vpop.f32.mrb[84].mxu0  ;;  %v17286_v33 = vld [vmem:[#allocation100_spill] sm:$0xff] }
 0x680   : > { %v8568_v23 = vmul.f32 %v8440_v27, %v17273_v40  ;;  %v8570_v54 = vmul.f32 %v8442_v35, %v17275_v47  ;;  %v8445_v13 = vmax.f32 %v10287_v3, 0.0  ;;  %9003 = vmatprep.mubr.bf16.mxu1 %v8800_v10  ;;  %v10288_v55 = vadd.f32 %v8294_v0, %v16121_v17  ;;  %v8304_v60 = vpop.f32.mrb[85].mxu0  ;;  %v17288_v10 = vld [vmem:[#allocation25_spill] sm:$0xff] }
 0x681   : > { %v10225_v45 = vadd.f32 %v7910_v5, %v16112_v19  ;;  %v17277_v8 = vmax.f32 %v17276_v11, 0.0  ;;  %v17279_v53 = vmax.f32 %v17278_v26, 0.0  ;;  %v8444_v51 = vmax.f32 %v10224_v46, 0.0  ;;  %9004 = vmatmul.mubr.bf16.vlgmr.msra.gmra.mrb[64].mxu1 %v8799_v25  ;;  %v7918_v25 = vpop.f32.mrb[21].mxu1  ;;  %v8306_v35 = vpop.f32.mrb[86].mxu0  ;;  %v17290_v47 = vld [vmem:[#allocation97_spill] sm:$0xff] }
 0x682   : > { %v8674_v38 = vmax.f32 %v8567_v41, %v8568_v23  ;;  %v8738_v52 = vmax.f32 %v8568_v23, %v8569_v36  ;;  %v10289_v4 = vadd.f32 %v8296_v20, %v16115_v21  ;;  %v8446_v49 = vmax.f32 %v10288_v55, 0.0  ;;  %v8308_v9 = vpop.f32.mrb[87].mxu0 }
 0x683   : > { %v8571_v32 = vmul.f32 %v8443_v48, %v17277_v8  ;;  %v8573_v44 = vmul.f32 %v8445_v13, %v17279_v53  ;;  %v8447_v63 = vmax.f32 %v10225_v45, 0.0  ;;  %v17281_v7 = vmax.f32 %v17280_v62, 0.0  ;;  %v17292_v13 = vld [vmem:[#allocation27_spill] sm:$0xff] }
 0x684   : > { %v8706_v15 = vmax.f32 %v8674_v38, %v8569_v36  ;;  %v8770_v22 = vmax.f32 %v8738_v52, %v8570_v54  ;;  %v8449_v37 = vmax.f32 %v10289_v4, 0.0  ;;  %v10226_v18 = vadd.f32 %v7912_v59, %v16118_v39  ;;  %v7920_v36 = vpop.f32.mrb[22].mxu1 }
 0x685   : > { %v8572_v28 = vmul.f32 %v8444_v51, %v17281_v7  ;;  %v10290_v30 = vadd.f32 %v8298_v2, %v16121_v17  ;;  %v17283_v16 = vmax.f32 %v17282_v12, 0.0  ;;  %v17285_v14 = vmax.f32 %v17284_v56, 0.0 }
 0x686   : > { %v8801_v42 = vpack.c.bf16 %v8706_v15, %v8705_v58  ;;  %v10227_v24 = vadd.f32 %v7916_v34, %v16112_v19  ;;  %v17287_v0 = vmax.f32 %v17286_v33, 0.0  ;;  %v8448_v50 = vmax.f32 %v10226_v18, 0.0  ;;  %v7922_v58 = vpop.f32.mrb[23].mxu1  ;;  %v17298_v18 = vld [vmem:[#allocation103_spill] sm:$0xff]  ;;  %v17302_v33 = vld [vmem:[#allocation104_spill] sm:$0xff] }
 0x687   : > { %v8574_v41 = vmul.f32 %v8446_v49, %v17283_v16  ;;  %v8575_v57 = vmul.f32 %v8447_v63, %v17285_v14  ;;  %v8675_v1 = vmax.f32 %v8571_v32, %v8572_v28  ;;  %v8739_v27 = vmax.f32 %v8572_v28, %v8573_v44  ;;  %v17294_v32 = vld [vmem:[#allocation106_spill] sm:$0xff]  ;;  %v7926_v28 = vpop.f32.mrb[24].mxu1 }
 0x688   : > { %v8577_v29 = vmul.f32 %v8449_v37, %v17287_v0  ;;  %v8450_v43 = vmax.f32 %v10290_v30, 0.0  ;;  %v8451_v3 = vmax.f32 %v10227_v24, 0.0  ;;  %v10291_v5 = vadd.f32 %v8302_v61, %v16115_v21  ;;  %v17296_v49 = vld [vmem:[#allocation26_spill] sm:$0xff]  ;;  %v8312_v37 = vpop.f32.mrb[88].mxu0  ;;  %v7928_v16 = vpop.f32.mrb[25].mxu1  ;;  %v17300_v24 = vld [vmem:[#allocation28_spill] sm:$0xff] }
 0x689   : > { %v8802_v20 = vpack.c.bf16 %v8770_v22, %v8769_v31  ;;  %v8707_v40 = vmax.f32 %v8675_v1, %v8573_v44  ;;  %v8771_v23 = vmax.f32 %v8739_v27, %v8574_v41  ;;  %v17289_v59 = vmax.f32 %v17288_v10, 0.0  ;;  %v8314_v41 = vpop.f32.mrb[89].mxu0  ;;  %v7930_v1 = vpop.f32.mrb[26].mxu1 }
 0x68a   : > { %v10228_v6 = vadd.f32 %v7918_v25, %v16118_v39  ;;  %v17291_v54 = vmax.f32 %v17290_v47, 0.0  ;;  %v17293_v46 = vmax.f32 %v17292_v13, 0.0  ;;  %v8453_v52 = vmax.f32 %v10291_v5, 0.0  ;;  %v8316_v27 = vpop.f32.mrb[90].mxu0  ;;  %v7932_v5 = vpop.f32.mrb[27].mxu1 }
 0x68b   : > { %v8576_v2 = vmul.f32 %v8448_v50, %v17289_v59  ;;  %9011 = vmatprep.mubr.bf16.mxu1 %v8802_v20  ;;  %v10292_v55 = vadd.f32 %v8304_v60, %v16121_v17  ;;  %v10229_v8 = vadd.f32 %v7920_v36, %v16112_v19  ;;  %v17295_v26 = vmax.f32 %v17294_v32, 0.0  ;;  %v17304_v50 = vld [vmem:[#allocation29_spill] sm:$0xff]  ;;  %v8318_v20 = vpop.f32.mrb[91].mxu0  ;;  %v17310_v32 = vld [vmem:[#allocation110_spill] sm:$0xff] }
 0x68c   : > { %v8578_v48 = vmul.f32 %v8450_v43, %v17291_v54  ;;  %v8579_v38 = vmul.f32 %v8451_v3, %v17293_v46  ;;  %v8452_v11 = vmax.f32 %v10228_v6, 0.0  ;;  %9012 = vmatmul.mubr.bf16.gmra.mrb[68].mxu1 %v8801_v42  ;;  %v10293_v51 = vadd.f32 %v8306_v35, %v16115_v21  ;;  %v17306_v6 = vld [vmem:[#allocation101_spill] sm:$0xff] }
 0x68d   : > { %v8676_v31 = vmax.f32 %v8575_v57, %v8576_v2  ;;  %v8740_v45 = vmax.f32 %v8576_v2, %v8577_v29  ;;  %v8581_v53 = vmul.f32 %v8453_v52, %v17295_v26  ;;  %v8454_v44 = vmax.f32 %v10292_v55, 0.0 }
 0x68e   : > { %v10230_v4 = vadd.f32 %v7922_v58, %v16118_v39  ;;  %v17297_v63 = vmax.f32 %v17296_v49, 0.0  ;;  %v8455_v7 = vmax.f32 %v10229_v8, 0.0  ;;  %v17299_v30 = vmax.f32 %v17298_v18, 0.0  ;;  %v17312_v18 = vld [vmem:[#allocation30_spill] sm:$0xff] }
 0x68f   : > { %v8708_v15 = vmax.f32 %v8676_v31, %v8577_v29  ;;  %v8772_v22 = vmax.f32 %v8740_v45, %v8578_v48  ;;  %v8457_v61 = vmax.f32 %v10293_v51, 0.0  ;;  %v10294_v12 = vadd.f32 %v8308_v9, %v16121_v17  ;;  %v17308_v45 = vld [vmem:[#allocation31_spill] sm:$0xff] }
 0x690   : > { %v8580_v62 = vmul.f32 %v8452_v11, %v17297_v63  ;;  %v8582_v34 = vmul.f32 %v8454_v44, %v17299_v30  ;;  %v8456_v42 = vmax.f32 %v10230_v4, 0.0  ;;  %v17301_v25 = vmax.f32 %v17300_v24, 0.0 }
 0x691   : > { %v8803_v56 = vpack.c.bf16 %v8708_v15, %v8707_v40  ;;  %v17303_v0 = vmax.f32 %v17302_v33, 0.0  ;;  %v17305_v36 = vmax.f32 %v17304_v50, 0.0  ;;  %v8458_v43 = vmax.f32 %v10294_v12, 0.0  ;;  %v7936_v15 = vpop.f32.mrb[28].mxu1 }
 0x692   : > { %v8677_v14 = vmax.f32 %v8579_v38, %v8580_v62  ;;  %v8741_v57 = vmax.f32 %v8580_v62, %v8581_v53  ;;  %v8583_v60 = vmul.f32 %v8455_v7, %v17301_v25  ;;  %v10231_v3 = vadd.f32 %v7926_v28, %v16112_v19  ;;  %v7938_v28 = vpop.f32.mrb[29].mxu1  ;;  %v17318_v25 = vld [vmem:[#allocation108_spill] sm:$0xff] }
 0x693   : > { %v8585_v29 = vmul.f32 %v8457_v61, %v17303_v0  ;;  %v8584_v35 = vmul.f32 %v8456_v42, %v17305_v36  ;;  %v10295_v40 = vadd.f32 %v8312_v37, %v16115_v21  ;;  %v8804_v10 = vpack.c.bf16 %v8772_v22, %v8771_v23  ;;  %v8322_v22 = vpop.f32.mrb[92].mxu0  ;;  %v17314_v61 = vld [vmem:[#allocation107_spill] sm:$0xff] }
 0x694   : > { %v8709_v58 = vmax.f32 %v8677_v14, %v8581_v53  ;;  %v8773_v9 = vmax.f32 %v8741_v57, %v8582_v34  ;;  %v17307_v47 = vmax.f32 %v17306_v6, 0.0  ;;  %v8459_v48 = vmax.f32 %v10231_v3, 0.0  ;;  %v8324_v37 = vpop.f32.mrb[93].mxu0  ;;  %v7940_v57 = vpop.f32.mrb[30].mxu1 }
 0x695   : > { %v8678_v59 = vmax.f32 %v8583_v60, %v8584_v35  ;;  %v8742_v2 = vmax.f32 %v8584_v35, %v8585_v29  ;;  %v8461_v13 = vmax.f32 %v10295_v40, 0.0  ;;  %9019 = vmatprep.mubr.bf16.mxu1 %v8804_v10  ;;  %v10232_v46 = vadd.f32 %v7928_v16, %v16118_v39  ;;  %v17316_v16 = vld [vmem:[#allocation32_spill] sm:$0xff]  ;;  %v8326_v24 = vpop.f32.mrb[94].mxu0  ;;  %v17322_v40 = vld [vmem:[#allocation105_spill] sm:$0xff] }
 0x696   : > { %v8586_v54 = vmul.f32 %v8458_v43, %v17307_v47  ;;  %v10296_v38 = vadd.f32 %v8314_v41, %v16121_v17  ;;  %v10233_v52 = vadd.f32 %v7930_v1, %v16112_v19  ;;  %v17309_v11 = vmax.f32 %v17308_v45, 0.0  ;;  %9020 = vmatmul.mubr.bf16.gmra.mrb[72].mxu1 %v8803_v56  ;;  %v8328_v50 = vpop.f32.mrb[95].mxu0 }
 0x697   : > { %v8710_v55 = vmax.f32 %v8678_v59, %v8585_v29  ;;  %v10297_v23 = vadd.f32 %v8316_v27, %v16115_v21  ;;  %v17311_v26 = vmax.f32 %v17310_v32, 0.0  ;;  %v8460_v44 = vmax.f32 %v10232_v46, 0.0  ;;  %v7942_v29 = vpop.f32.mrb[31].mxu1 }
 0x698   : > { %v8774_v31 = vmax.f32 %v8742_v2, %v8586_v54  ;;  %v8587_v8 = vmul.f32 %v8459_v48, %v17309_v11  ;;  %v8462_v51 = vmax.f32 %v10296_v38, 0.0  ;;  %v8463_v4 = vmax.f32 %v10233_v52, 0.0  ;;  %v17324_v48 = vld [vmem:[#allocation35_spill] sm:$0xff] }
 0x699   : > { %v8589_v53 = vmul.f32 %v8461_v13, %v17311_v26  ;;  %v8805_v49 = vpack.c.bf16 %v8710_v55, %v8709_v58  ;;  %v8465_v63 = vmax.f32 %v10297_v23, 0.0  ;;  %v10234_v62 = vadd.f32 %v7932_v5, %v16118_v39  ;;  %v17320_v5 = vld [vmem:[#allocation33_spill] sm:$0xff] }
 0x69a   : > { %v10298_v7 = vadd.f32 %v8318_v20, %v16121_v17  ;;  %v17313_v30 = vmax.f32 %v17312_v18, 0.0  ;;  %v17315_v42 = vmax.f32 %v17314_v61, 0.0  ;;  %v17317_v41 = vmax.f32 %v17316_v16, 0.0 }
 0x69b   : > { %v10235_v14 = vadd.f32 %v7936_v15, %v16112_v19  ;;  %v17319_v60 = vmax.f32 %v17318_v25, 0.0  ;;  %v8464_v27 = vmax.f32 %v10234_v62, 0.0  ;;  %v10299_v0 = vadd.f32 %v8322_v22, %v16115_v21  ;;  %v17328_v15 = vld [vmem:[#allocation34_spill] sm:$0xff]  ;;  %v17332_v25 = vld [vmem:[#allocation36_spill] sm:$0xff] }
 0x69c   : > { %v8588_v34 = vmul.f32 %v8460_v44, %v17313_v30  ;;  %v8590_v12 = vmul.f32 %v8462_v51, %v17315_v42  ;;  %v8591_v56 = vmul.f32 %v8463_v4, %v17317_v41  ;;  %v8466_v33 = vmax.f32 %v10298_v7, 0.0  ;;  %v8332_v44 = vpop.f32.mrb[96].mxu0 }
 0x69d   : > { %v8593_v1 = vmul.f32 %v8465_v63, %v17319_v60  ;;  %v8467_v43 = vmax.f32 %v10235_v14, 0.0  ;;  %v8806_v3 = vpack.c.bf16 %v8774_v31, %v8773_v9  ;;  %v17321_v20 = vmax.f32 %v17320_v5, 0.0  ;;  %v17326_v9 = vld [vmem:[#allocation114_spill] sm:$0xff]  ;;  %v17338_v5 = vld [vmem:[#allocation109_spill] sm:$0xff] }
 0x69e   : > { %v8679_v36 = vmax.f32 %v8587_v8, %v8588_v34  ;;  %v8743_v35 = vmax.f32 %v8588_v34, %v8589_v53  ;;  %v17323_v10 = vmax.f32 %v17322_v40, 0.0  ;;  %v8469_v2 = vmax.f32 %v10299_v0, 0.0 }
 0x69f   : > { %v8592_v58 = vmul.f32 %v8464_v27, %v17321_v20  ;;  %v10236_v6 = vadd.f32 %v7938_v28, %v16118_v39  ;;  %v17325_v13 = vmax.f32 %v17324_v48, 0.0  ;;  %9027 = vmatprep.mubr.bf16.mxu1 %v8806_v3  ;;  %v10300_v38 = vadd.f32 %v8324_v37, %v16121_v17  ;;  %v8334_v28 = vpop.f32.mrb[97].mxu0  ;;  %v17330_v37 = vld [vmem:[#allocation111_spill] sm:$0xff]  ;;  %v17334_v27 = vld [vmem:[#allocation112_spill] sm:$0xff] }
 0x6a0   : > { %v8594_v59 = vmul.f32 %v8466_v33, %v17323_v10  ;;  %v8711_v47 = vmax.f32 %v8679_v36, %v8589_v53  ;;  %v8775_v54 = vmax.f32 %v8743_v35, %v8590_v12  ;;  %v17327_v31 = vmax.f32 %v17326_v9, 0.0  ;;  %9028 = vmatmul.mubr.bf16.gmra.mrb[76].mxu1 %v8805_v49  ;;  %v7946_v53 = vpop.f32.mrb[32].mxu1  ;;  %v8336_v12 = vpop.f32.mrb[98].mxu0 }
 0x6a1   : > { %v8595_v46 = vmul.f32 %v8467_v43, %v17325_v13  ;;  %v8680_v52 = vmax.f32 %v8591_v56, %v8592_v58  ;;  %v8744_v55 = vmax.f32 %v8592_v58, %v8593_v1  ;;  %v8468_v11 = vmax.f32 %v10236_v6, 0.0  ;;  %v7948_v7 = vpop.f32.mrb[33].mxu1 }
 0x6a2   : > { %v8597_v45 = vmul.f32 %v8469_v2, %v17327_v31  ;;  %v8470_v8 = vmax.f32 %v10300_v38, 0.0  ;;  %v10237_v23 = vadd.f32 %v7940_v57, %v16112_v19  ;;  %v10301_v32 = vadd.f32 %v8326_v24, %v16115_v21  ;;  %v7950_v42 = vpop.f32.mrb[34].mxu1  ;;  %v8338_v24 = vpop.f32.mrb[99].mxu0 }
 0x6a3   : > { %v10238_v26 = vadd.f32 %v7942_v29, %v16118_v39  ;;  %v8712_v51 = vmax.f32 %v8680_v52, %v8593_v1  ;;  %v8776_v4 = vmax.f32 %v8744_v55, %v8594_v59  ;;  %v17329_v22 = vmax.f32 %v17328_v15, 0.0  ;;  %v7952_v57 = vpop.f32.mrb[35].mxu1  ;;  %v17336_v29 = vld [vmem:[#allocation37_spill] sm:$0xff]  ;;  %v17340_v55 = vld [vmem:[#allocation39_spill] sm:$0xff] }
 0x6a4   : > { %v10302_v62 = vadd.f32 %v8328_v50, %v16121_v17  ;;  %v17331_v49 = vmax.f32 %v17330_v37, 0.0  ;;  %v8471_v30 = vmax.f32 %v10237_v23, 0.0  ;;  %v8473_v34 = vmax.f32 %v10301_v32, 0.0  ;;  %v17342_v23 = vld [vmem:[#allocation118_spill] sm:$0xff] }
 0x6a5   : > { %v8596_v63 = vmul.f32 %v8468_v11, %v17329_v22  ;;  %v8472_v61 = vmax.f32 %v10238_v26, 0.0  ;;  %v8807_v16 = vpack.c.bf16 %v8712_v51, %v8711_v47  ;;  %v17333_v60 = vmax.f32 %v17332_v25, 0.0  ;;  %v7956_v11 = vpop.f32.mrb[36].mxu1  ;;  %v17344_v37 = vld [vmem:[#allocation38_spill] sm:$0xff]  ;;  %v17350_v25 = vld [vmem:[#allocation116_spill] sm:$0xff] }
 0x6a6   : > { %v8598_v18 = vmul.f32 %v8470_v8, %v17331_v49  ;;  %v8474_v14 = vmax.f32 %v10302_v62, 0.0  ;;  %v17335_v33 = vmax.f32 %v17334_v27, 0.0  ;;  %v17337_v50 = vmax.f32 %v17336_v29, 0.0  ;;  %v8342_v8 = vpop.f32.mrb[100].mxu0  ;;  %v7958_v51 = vpop.f32.mrb[37].mxu1 }
 0x6a7   : > { %v8681_v41 = vmax.f32 %v8595_v46, %v8596_v63  ;;  %v8745_v56 = vmax.f32 %v8596_v63, %v8597_v45  ;;  %v8599_v1 = vmul.f32 %v8471_v30, %v17333_v60  ;;  %v10239_v35 = vadd.f32 %v7946_v53, %v16112_v19  ;;  %v17346_v30 = vld [vmem:[#allocation115_spill] sm:$0xff] }
 0x6a8   : > { %v8601_v0 = vmul.f32 %v8473_v34, %v17335_v33  ;;  %v8600_v36 = vmul.f32 %v8472_v61, %v17337_v50  ;;  %v17339_v20 = vmax.f32 %v17338_v5, 0.0  ;;  %v10303_v40 = vadd.f32 %v8332_v44, %v16115_v21  ;;  %v17354_v5 = vld [vmem:[#allocation113_spill] sm:$0xff] }
 0x6a9   : > { %v8713_v43 = vmax.f32 %v8681_v41, %v8597_v45  ;;  %v8777_v3 = vmax.f32 %v8745_v56, %v8598_v18  ;;  %v8475_v2 = vmax.f32 %v10239_v35, 0.0  ;;  %v8808_v6 = vpack.c.bf16 %v8776_v4, %v8775_v54  ;;  %v8344_v4 = vpop.f32.mrb[101].mxu0 }
 0x6aa   : > { %v8602_v58 = vmul.f32 %v8474_v14, %v17339_v20  ;;  %v8682_v10 = vmax.f32 %v8599_v1, %v8600_v36  ;;  %v8746_v59 = vmax.f32 %v8600_v36, %v8601_v0  ;;  %v8477_v47 = vmax.f32 %v10303_v40, 0.0  ;;  %v17352_v36 = vld [vmem:[#allocation41_spill] sm:$0xff] }
 0x6ab   : > { %v10240_v48 = vadd.f32 %v7948_v7, %v16118_v39  ;;  %v10304_v13 = vadd.f32 %v8334_v28, %v16121_v17  ;;  %v10241_v46 = vadd.f32 %v7950_v42, %v16112_v19  ;;  %v17341_v9 = vmax.f32 %v17340_v55, 0.0  ;;  %9035 = vmatprep.mubr.bf16.mxu1 %v8808_v6  ;;  %v7960_v7 = vpop.f32.mrb[38].mxu1  ;;  %v8346_v28 = vpop.f32.mrb[102].mxu0  ;;  %v17348_v42 = vld [vmem:[#allocation40_spill] sm:$0xff]  ;;  %v17356_v6 = vld [vmem:[#allocation43_spill] sm:$0xff] }
 0x6ac   : > { %v8714_v38 = vmax.f32 %v8682_v10, %v8601_v0  ;;  %v8778_v52 = vmax.f32 %v8746_v59, %v8602_v58  ;;  %v10305_v45 = vadd.f32 %v8336_v12, %v16115_v21  ;;  %v17343_v32 = vmax.f32 %v17342_v23, 0.0  ;;  %9036 = vmatmul.mubr.bf16.gmra.mrb[80].mxu1 %v8807_v16  ;;  %v7962_v56 = vpop.f32.mrb[39].mxu1  ;;  %v8348_v14 = vpop.f32.mrb[103].mxu0 }
 0x6ad   : > { %v8603_v31 = vmul.f32 %v8475_v2, %v17341_v9  ;;  %v8476_v26 = vmax.f32 %v10240_v48, 0.0  ;;  %v8478_v53 = vmax.f32 %v10304_v13, 0.0  ;;  %v8479_v44 = vmax.f32 %v10241_v46, 0.0 }
 0x6ae   : > { %v8605_v54 = vmul.f32 %v8477_v47, %v17343_v32  ;;  %v8809_v15 = vpack.c.bf16 %v8714_v38, %v8713_v43  ;;  %v8481_v22 = vmax.f32 %v10305_v45, 0.0  ;;  %v10242_v63 = vadd.f32 %v7952_v57, %v16118_v39  ;;  %v8352_v45 = vpop.f32.mrb[104].mxu0 }
 0x6af   : > { %v10306_v62 = vadd.f32 %v8338_v24, %v16121_v17  ;;  %v17345_v49 = vmax.f32 %v17344_v37, 0.0  ;;  %v17347_v34 = vmax.f32 %v17346_v30, 0.0  ;;  %v17349_v12 = vmax.f32 %v17348_v42, 0.0 }
 0x6b0   : > { %v10243_v41 = vadd.f32 %v7956_v11, %v16112_v19  ;;  %v17351_v60 = vmax.f32 %v17350_v25, 0.0  ;;  %v8480_v1 = vmax.f32 %v10242_v63, 0.0  ;;  %v10307_v27 = vadd.f32 %v8342_v8, %v16115_v21 }
 0x6b1   : > { %v8604_v18 = vmul.f32 %v8476_v26, %v17345_v49  ;;  %v8606_v61 = vmul.f32 %v8478_v53, %v17347_v34  ;;  %v8607_v16 = vmul.f32 %v8479_v44, %v17349_v12  ;;  %v8482_v24 = vmax.f32 %v10306_v62, 0.0  ;;  %v8354_v26 = vpop.f32.mrb[105].mxu0  ;;  %v17362_v49 = vld [vmem:[#allocation119_spill] sm:$0xff] }
 0x6b2   : > { %v8609_v57 = vmul.f32 %v8481_v22, %v17351_v60  ;;  %v8483_v29 = vmax.f32 %v10243_v41, 0.0  ;;  %v8810_v50 = vpack.c.bf16 %v8778_v52, %v8777_v3  ;;  %v17353_v35 = vmax.f32 %v17352_v36, 0.0  ;;  %v17358_v3 = vld [vmem:[#allocation122_spill] sm:$0xff]  ;;  %v8356_v37 = vpop.f32.mrb[106].mxu0  ;;  %v17370_v36 = vld [vmem:[#allocation117_spill] sm:$0xff] }
 0x6b3   : > { %v8683_v33 = vmax.f32 %v8603_v31, %v8604_v18  ;;  %v8747_v0 = vmax.f32 %v8604_v18, %v8605_v54  ;;  %v17355_v20 = vmax.f32 %v17354_v5, 0.0  ;;  %v8485_v40 = vmax.f32 %v10307_v27, 0.0  ;;  %v7966_v31 = vpop.f32.mrb[40].mxu1 }
 0x6b4   : > { %v8608_v43 = vmul.f32 %v8480_v1, %v17353_v35  ;;  %v10244_v10 = vadd.f32 %v7958_v51, %v16118_v39  ;;  %v17357_v47 = vmax.f32 %v17356_v6, 0.0  ;;  %9043 = vmatprep.mubr.bf16.mxu1 %v8810_v50  ;;  %v10308_v13 = vadd.f32 %v8344_v4, %v16121_v17  ;;  %v17360_v51 = vld [vmem:[#allocation42_spill] sm:$0xff] }
 0x6b5   : > { %v8610_v58 = vmul.f32 %v8482_v24, %v17355_v20  ;;  %v8715_v59 = vmax.f32 %v8683_v33, %v8605_v54  ;;  %v8779_v2 = vmax.f32 %v8747_v0, %v8606_v61  ;;  %v17359_v52 = vmax.f32 %v17358_v3, 0.0  ;;  %9044 = vmatmul.mubr.bf16.gmra.mrb[84].mxu1 %v8809_v15  ;;  %v7968_v54 = vpop.f32.mrb[41].mxu1  ;;  %v8358_v61 = vpop.f32.mrb[107].mxu0  ;;  %v17368_v24 = vld [vmem:[#allocation45_spill] sm:$0xff] }
 0x6b6   : > { %v8611_v48 = vmul.f32 %v8483_v29, %v17357_v47  ;;  %v8684_v46 = vmax.f32 %v8607_v16, %v8608_v43  ;;  %v8748_v38 = vmax.f32 %v8608_v43, %v8609_v57  ;;  %v8484_v9 = vmax.f32 %v10244_v10, 0.0  ;;  %v7970_v62 = vpop.f32.mrb[42].mxu1 }
 0x6b7   : > { %v8613_v55 = vmul.f32 %v8485_v40, %v17359_v52  ;;  %v8486_v11 = vmax.f32 %v10308_v13, 0.0  ;;  %v10245_v8 = vadd.f32 %v7960_v7, %v16112_v19  ;;  %v10309_v23 = vadd.f32 %v8346_v28, %v16115_v21  ;;  %v7972_v28 = vpop.f32.mrb[43].mxu1  ;;  %v17372_v52 = vld [vmem:[#allocation49_spill] sm:$0xff] }
 0x6b8   : > { %v10246_v32 = vadd.f32 %v7962_v56, %v16118_v39  ;;  %v8716_v53 = vmax.f32 %v8684_v46, %v8609_v57  ;;  %v8780_v44 = vmax.f32 %v8748_v38, %v8610_v58  ;;  %v17361_v4 = vmax.f32 %v17360_v51, 0.0  ;;  %v17364_v56 = vld [vmem:[#allocation44_spill] sm:$0xff]  ;;  %v7976_v13 = vpop.f32.mrb[44].mxu1  ;;  %v8362_v46 = vpop.f32.mrb[108].mxu0 }
 0x6b9   : > { %v10310_v63 = vadd.f32 %v8348_v14, %v16121_v17  ;;  %v17363_v18 = vmax.f32 %v17362_v49, 0.0  ;;  %v8487_v30 = vmax.f32 %v10245_v8, 0.0  ;;  %v8489_v7 = vmax.f32 %v10309_v23, 0.0  ;;  %v17366_v57 = vld [vmem:[#allocation120_spill] sm:$0xff]  ;;  %v17376_v49 = vld [vmem:[#allocation47_spill] sm:$0xff] }
 0x6ba   : > { %v8612_v22 = vmul.f32 %v8484_v9, %v17361_v4  ;;  %v8488_v34 = vmax.f32 %v10246_v32, 0.0  ;;  %v8811_v42 = vpack.c.bf16 %v8716_v53, %v8715_v59  ;;  %v17365_v25 = vmax.f32 %v17364_v56, 0.0  ;;  %v17382_v56 = vld [vmem:[#allocation48_spill] sm:$0xff] }
 0x6bb   : > { %v8614_v15 = vmul.f32 %v8486_v11, %v17363_v18  ;;  %v8490_v41 = vmax.f32 %v10310_v63, 0.0  ;;  %v17367_v1 = vmax.f32 %v17366_v57, 0.0  ;;  %v17369_v27 = vmax.f32 %v17368_v24, 0.0  ;;  %v8364_v11 = vpop.f32.mrb[109].mxu0 }
 0x6bc   : > { %v8685_v12 = vmax.f32 %v8611_v48, %v8612_v22  ;;  %v8749_v16 = vmax.f32 %v8612_v22, %v8613_v55  ;;  %v8615_v60 = vmul.f32 %v8487_v30, %v17365_v25  ;;  %v10247_v0 = vadd.f32 %v7966_v31, %v16112_v19  ;;  %v17378_v30 = vld [vmem:[#allocation123_spill] sm:$0xff] }
 0x6bd   : > { %v8617_v14 = vmul.f32 %v8489_v7, %v17367_v1  ;;  %v8616_v33 = vmul.f32 %v8488_v34, %v17369_v27  ;;  %v17371_v35 = vmax.f32 %v17370_v36, 0.0  ;;  %v10311_v5 = vadd.f32 %v8352_v45, %v16115_v21  ;;  %v7978_v45 = vpop.f32.mrb[45].mxu1  ;;  %v17386_v36 = vld [vmem:[#allocation121_spill] sm:$0xff] }
 0x6be   : > { %v16365_v29 = vmax.f32 %v8685_v12, %v8613_v55  ;;  %v8781_v50 = vmax.f32 %v8749_v16, %v8614_v15  ;;  %v8491_v40 = vmax.f32 %v10247_v0, 0.0  ;;  %v8812_v10 = vpack.c.bf16 %v8780_v44, %v8779_v2  ;;  %v17374_v2 = vld [vmem:[#allocation46_spill] sm:$0xff]  ;;  %v7980_v53 = vpop.f32.mrb[46].mxu1  ;;  %v8366_v44 = vpop.f32.mrb[110].mxu0 }
 0x6bf   : > { %v8618_v43 = vmul.f32 %v8490_v41, %v17371_v35  ;;  %v8686_v20 = vmax.f32 %v8615_v60, %v8616_v33  ;;  %v8750_v58 = vmax.f32 %v8616_v33, %v8617_v14  ;;  %v8493_v59 = vmax.f32 %v10311_v5, 0.0  ;;  %v17380_v12 = vld [vmem:[#allocation50_spill] sm:$0xff]  ;;  %v17384_v33 = vld [vmem:[#allocation51_spill] sm:$0xff] }
 0x6c0   : > { %v10248_v6 = vadd.f32 %v7968_v54, %v16118_v39  ;;  %v10312_v47 = vadd.f32 %v8354_v26, %v16121_v17  ;;  %v10249_v48 = vadd.f32 %v7970_v62, %v16112_v19  ;;  %v17373_v55 = vmax.f32 %v17372_v52, 0.0  ;;  %9051 = vmatprep.mubr.bf16.mxu1 %v8812_v10  ;;  %v7982_v62 = vpop.f32.mrb[47].mxu1  ;;  %v17388_v10 = vld [vmem:[#allocation56_spill] sm:$0xff] }
 0x6c1   : > { %v8718_v38 = vmax.f32 %v8686_v20, %v8617_v14  ;;  %v8782_v3 = vmax.f32 %v8750_v58, %v8618_v43  ;;  %v10313_v31 = vadd.f32 %v8356_v37, %v16115_v21  ;;  %v17375_v8 = vmax.f32 %v17374_v2, 0.0  ;;  %9052 = vmatmul.mubr.bf16.gmra.mrb[88].mxu1 %v8811_v42  ;;  %v8368_v37 = vpop.f32.mrb[111].mxu0 }
 0x6c2   : > { %v8619_v9 = vmul.f32 %v8491_v40, %v17373_v55  ;;  %v8492_v32 = vmax.f32 %v10248_v6, 0.0  ;;  %v8494_v54 = vmax.f32 %v10312_v47, 0.0  ;;  %v8495_v26 = vmax.f32 %v10249_v48, 0.0  ;;  %v7986_v48 = vpop.f32.mrb[48].mxu1 }
 0x6c3   : > { %v8621_v23 = vmul.f32 %v8493_v59, %v17375_v8  ;;  %v8813_v51 = vpack.c.bf16 %v8718_v38, %v16365_v29  ;;  %v8497_v4 = vmax.f32 %v10313_v31, 0.0  ;;  %v10250_v22 = vadd.f32 %v7972_v28, %v16118_v39  ;;  %v17390_v38 = vld [vmem:[#allocation52_spill] sm:$0xff] }
 0x6c4   : > { %v10314_v63 = vadd.f32 %v8358_v61, %v16121_v17  ;;  %v17377_v18 = vmax.f32 %v17376_v49, 0.0  ;;  %v17379_v7 = vmax.f32 %v17378_v30, 0.0  ;;  %v17381_v42 = vmax.f32 %v17380_v12, 0.0  ;;  %v17394_v30 = vld [vmem:[#allocation53_spill] sm:$0xff] }
 0x6c5   : > { %v10251_v41 = vadd.f32 %v7976_v13, %v16112_v19  ;;  %v17383_v25 = vmax.f32 %v17382_v56, 0.0  ;;  %v8496_v57 = vmax.f32 %v10250_v22, 0.0  ;;  %v10315_v61 = vadd.f32 %v8362_v46, %v16115_v21 }
 0x6c6   : > { %v8620_v15 = vmul.f32 %v8492_v32, %v17377_v18  ;;  %v8622_v34 = vmul.f32 %v8494_v54, %v17379_v7  ;;  %v8623_v16 = vmul.f32 %v8495_v26, %v17381_v42  ;;  %v8498_v28 = vmax.f32 %v10314_v63, 0.0 }
 0x6c7   : > { %v8625_v60 = vmul.f32 %v8497_v4, %v17383_v25  ;;  %v8499_v24 = vmax.f32 %v10251_v41, 0.0  ;;  %v8814_v27 = vpack.c.bf16 %v8782_v3, %v8781_v50  ;;  %v17385_v0 = vmax.f32 %v17384_v33, 0.0  ;;  %v8372_v50 = vpop.f32.mrb[112].mxu0  ;;  %v17392_v4 = vld [vmem:[#allocation54_spill] sm:$0xff]  ;;  %v17396_v41 = vld [vmem:[#allocation57_spill] sm:$0xff] }
 0x6c8   : > { %v8687_v1 = vmax.f32 %v8619_v9, %v8620_v15  ;;  %v8751_v14 = vmax.f32 %v8620_v15, %v8621_v23  ;;  %v17387_v35 = vmax.f32 %v17386_v36, 0.0  ;;  %v8501_v5 = vmax.f32 %v10315_v61, 0.0  ;;  %v7988_v9 = vpop.f32.mrb[49].mxu1  ;;  %v8374_v31 = vpop.f32.mrb[113].mxu0  ;;  %v17402_v33 = vld [vmem:[#allocation58_spill] sm:$0xff] }
 0x6c9   : > { %v8624_v29 = vmul.f32 %v8496_v57, %v17385_v0  ;;  %v10252_v20 = vadd.f32 %v7978_v45, %v16118_v39  ;;  %v17389_v59 = vmax.f32 %v17388_v10, 0.0  ;;  %9059 = vmatprep.mubr.bf16.mxu1 %v8814_v27  ;;  %v10316_v47 = vadd.f32 %v8364_v11, %v16121_v17  ;;  %v7990_v32 = vpop.f32.mrb[50].mxu1  ;;  %v8376_v11 = vpop.f32.mrb[114].mxu0 }
 0x6ca   : > { %v8626_v43 = vmul.f32 %v8498_v28, %v17387_v35  ;;  %v16396_v58 = vmax.f32 %v8687_v1, %v8621_v23  ;;  %v8783_v40 = vmax.f32 %v8751_v14, %v8622_v34  ;;  %v17391_v3 = vmax.f32 %v17390_v38, 0.0  ;;  %9060 = vmatmul.mubr.bf16.gmra.mrb[92].mxu1 %v8813_v51  ;;  %v7992_v18 = vpop.f32.mrb[51].mxu1  ;;  %v8378_v15 = vpop.f32.mrb[115].mxu0 }
 0x6cb   : > { %v8627_v6 = vmul.f32 %v8499_v24, %v17389_v59  ;;  %v8688_v13 = vmax.f32 %v8623_v16, %v8624_v29  ;;  %v8752_v46 = vmax.f32 %v8624_v29, %v8625_v60  ;;  %v8500_v55 = vmax.f32 %v10252_v20, 0.0  ;;  %v8382_v10 = vpop.f32.mrb[116].mxu0 }
 0x6cc   : > { %v8629_v52 = vmul.f32 %v8501_v5, %v17391_v3  ;;  %v8502_v45 = vmax.f32 %v10316_v47, 0.0  ;;  %v10253_v2 = vadd.f32 %v7980_v53, %v16112_v19  ;;  %v10317_v8 = vadd.f32 %v8366_v44, %v16115_v21 }
 0x6cd   : > { %v10254_v23 = vadd.f32 %v7982_v62, %v16118_v39  ;;  %v8720_v54 = vmax.f32 %v8688_v13, %v8625_v60  ;;  %v8784_v26 = vmax.f32 %v8752_v46, %v8626_v43  ;;  %v17393_v22 = vmax.f32 %v17392_v4, 0.0  ;;  %v17398_v60 = vld [vmem:[#allocation55_spill] sm:$0xff]  ;;  %v8384_v46 = vpop.f32.mrb[117].mxu0 }
 0x6ce   : > { %v10318_v49 = vadd.f32 %v8368_v37, %v16121_v17  ;;  %v17395_v7 = vmax.f32 %v17394_v30, 0.0  ;;  %v8503_v34 = vmax.f32 %v10253_v2, 0.0  ;;  %v8505_v53 = vmax.f32 %v10317_v8, 0.0  ;;  %v17400_v37 = vld [vmem:[#allocation59_spill] sm:$0xff]  ;;  %v8386_v2 = vpop.f32.mrb[118].mxu0  ;;  %v17406_v8 = vld [vmem:[#allocation60_spill] sm:$0xff] }
 0x6cf   : > { %v8628_v63 = vmul.f32 %v8500_v55, %v17393_v22  ;;  %v8504_v12 = vmax.f32 %v10254_v23, 0.0  ;;  %v8815_v44 = vpack.c.bf16 %v8720_v54, %v16396_v58  ;;  %v17397_v56 = vmax.f32 %v17396_v41, 0.0  ;;  %v7996_v58 = vpop.f32.mrb[52].mxu1  ;;  %v8388_v4 = vpop.f32.mrb[119].mxu0  ;;  %v17414_v41 = vld [vmem:[#allocation63_spill] sm:$0xff] }
 0x6d0   : > { %v8630_v51 = vmul.f32 %v8502_v45, %v17395_v7  ;;  %v8506_v16 = vmax.f32 %v10318_v49, 0.0  ;;  %v17399_v57 = vmax.f32 %v17398_v60, 0.0  ;;  %v17401_v61 = vmax.f32 %v17400_v37, 0.0  ;;  %v7998_v13 = vpop.f32.mrb[53].mxu1  ;;  %v17408_v7 = vld [vmem:[#allocation62_spill] sm:$0xff] }
 0x6d1   : > { %v8689_v62 = vmax.f32 %v8627_v6, %v8628_v63  ;;  %v8753_v42 = vmax.f32 %v8628_v63, %v8629_v52  ;;  %v8631_v25 = vmul.f32 %v8503_v34, %v17397_v56  ;;  %v10255_v14 = vadd.f32 %v7986_v48, %v16112_v19  ;;  %v17410_v34 = vld [vmem:[#allocation61_spill] sm:$0xff] }
 0x6d2   : > { %v8633_v28 = vmul.f32 %v8505_v53, %v17399_v57  ;;  %v8632_v1 = vmul.f32 %v8504_v12, %v17401_v61  ;;  %v17403_v0 = vmax.f32 %v17402_v33, 0.0  ;;  %v10319_v36 = vadd.f32 %v8372_v50, %v16115_v21  ;;  %v17418_v33 = vld [vmem:[#allocation66_spill] sm:$0xff] }
 0x6d3   : > { %v16419_v24 = vmax.f32 %v8689_v62, %v8629_v52  ;;  %v8785_v27 = vmax.f32 %v8753_v42, %v8630_v51  ;;  %v8507_v5 = vmax.f32 %v10255_v14, 0.0  ;;  %v8816_v20 = vpack.c.bf16 %v8784_v26, %v8783_v40  ;;  %v17404_v52 = vld [vmem:[#allocation64_spill] sm:$0xff]  ;;  %v8000_v40 = vpop.f32.mrb[54].mxu1  ;;  %v17412_v62 = vld [vmem:[#allocation65_spill] sm:$0xff] }
 0x6d4   : > { %v8634_v29 = vmul.f32 %v8506_v16, %v17403_v0  ;;  %v8690_v35 = vmax.f32 %v8631_v25, %v8632_v1  ;;  %v8754_v43 = vmax.f32 %v8632_v1, %v8633_v28  ;;  %v8509_v59 = vmax.f32 %v10319_v36, 0.0  ;;  %v17416_v1 = vld [vmem:[#allocation67_spill] sm:$0xff] }
 0x6d5   : > { %v10256_v6 = vadd.f32 %v7988_v9, %v16118_v39  ;;  %v10320_v47 = vadd.f32 %v8374_v31, %v16121_v17  ;;  %v10257_v48 = vadd.f32 %v7990_v32, %v16112_v19  ;;  %v17405_v55 = vmax.f32 %v17404_v52, 0.0  ;;  %9067 = vmatprep.mubr.bf16.mxu1 %v8816_v20  ;;  %v8002_v32 = vpop.f32.mrb[55].mxu1  ;;  %v17422_v52 = vld [vmem:[#allocation68_spill] sm:$0xff] }
 0x6d6   : > { %v8722_v38 = vmax.f32 %v8690_v35, %v8633_v28  ;;  %v8786_v3 = vmax.f32 %v8754_v43, %v8634_v29  ;;  %v10321_v45 = vadd.f32 %v8376_v11, %v16115_v21  ;;  %v17407_v23 = vmax.f32 %v17406_v8, 0.0  ;;  %9068 = vmatmul.mubr.bf16.gmra.mrb[96].mxu1 %v8815_v44  ;;  %v8006_v43 = vpop.f32.mrb[56].mxu1 }
 0x6d7   : > { %v8635_v50 = vmul.f32 %v8507_v5, %v17405_v55  ;;  %v8508_v9 = vmax.f32 %v10256_v6, 0.0  ;;  %v8510_v26 = vmax.f32 %v10320_v47, 0.0  ;;  %v8511_v31 = vmax.f32 %v10257_v48, 0.0  ;;  %v8392_v5 = vpop.f32.mrb[120].mxu0  ;;  %v8008_v47 = vpop.f32.mrb[57].mxu1 }
 0x6d8   : > { %v8637_v54 = vmul.f32 %v8509_v59, %v17407_v23  ;;  %v8817_v22 = vpack.c.bf16 %v8722_v38, %v16419_v24  ;;  %v8513_v63 = vmax.f32 %v10321_v45, 0.0  ;;  %v10258_v49 = vadd.f32 %v7992_v18, %v16118_v39  ;;  %v17420_v59 = vld [vmem:[#allocation72_spill] sm:$0xff]  ;;  %v8394_v48 = vpop.f32.mrb[121].mxu0 }
 0x6d9   : > { %v10322_v30 = vadd.f32 %v8378_v15, %v16121_v17  ;;  %v17409_v11 = vmax.f32 %v17408_v7, 0.0  ;;  %v17411_v53 = vmax.f32 %v17410_v34, 0.0  ;;  %v17413_v42 = vmax.f32 %v17412_v62, 0.0  ;;  %v8396_v8 = vpop.f32.mrb[122].mxu0  ;;  %v17426_v34 = vld [vmem:[#allocation69_spill] sm:$0xff] }
 0x6da   : > { %v10259_v44 = vadd.f32 %v7996_v58, %v16112_v19  ;;  %v17415_v56 = vmax.f32 %v17414_v41, 0.0  ;;  %v8512_v60 = vmax.f32 %v10258_v49, 0.0  ;;  %v10323_v18 = vadd.f32 %v8382_v10, %v16115_v21 }
 0x6db   : > { %v8636_v51 = vmul.f32 %v8508_v9, %v17409_v11  ;;  %v8638_v12 = vmul.f32 %v8510_v26, %v17411_v53  ;;  %v8639_v16 = vmul.f32 %v8511_v31, %v17413_v42  ;;  %v8514_v57 = vmax.f32 %v10322_v30, 0.0  ;;  %v17424_v30 = vld [vmem:[#allocation70_spill] sm:$0xff] }
 0x6dc   : > { %v8641_v25 = vmul.f32 %v8513_v63, %v17415_v56  ;;  %v8515_v37 = vmax.f32 %v10259_v44, 0.0  ;;  %v8818_v61 = vpack.c.bf16 %v8786_v3, %v8785_v27  ;;  %v17417_v14 = vmax.f32 %v17416_v1, 0.0  ;;  %v17428_v44 = vld [vmem:[#allocation73_spill] sm:$0xff]  ;;  %v17434_v1 = vld [vmem:[#allocation74_spill] sm:$0xff] }
 0x6dd   : > { %v8691_v28 = vmax.f32 %v8635_v50, %v8636_v51  ;;  %v8755_v15 = vmax.f32 %v8636_v51, %v8637_v54  ;;  %v17419_v0 = vmax.f32 %v17418_v33, 0.0  ;;  %v8517_v36 = vmax.f32 %v10323_v18, 0.0  ;;  %v17432_v18 = vld [vmem:[#allocation75_spill] sm:$0xff] }
 0x6de   : > { %v8640_v24 = vmul.f32 %v8512_v60, %v17417_v14  ;;  %v10260_v35 = vadd.f32 %v7998_v13, %v16118_v39  ;;  %v17421_v10 = vmax.f32 %v17420_v59, 0.0  ;;  %9075 = vmatprep.mubr.bf16.mxu1 %v8818_v61  ;;  %v10324_v27 = vadd.f32 %v8384_v46, %v16121_v17  ;;  %v8010_v13 = vpop.f32.mrb[58].mxu1  ;;  %v8398_v46 = vpop.f32.mrb[123].mxu0 }
 0x6df   : > { %v8642_v29 = vmul.f32 %v8514_v57, %v17419_v0  ;;  %v16450_v20 = vmax.f32 %v8691_v28, %v8637_v54  ;;  %v8787_v58 = vmax.f32 %v8755_v15, %v8638_v12  ;;  %v17423_v55 = vmax.f32 %v17422_v52, 0.0  ;;  %9076 = vmatmul.mubr.bf16.gmra.mrb[100].mxu1 %v8817_v22  ;;  %v8012_v31 = vpop.f32.mrb[59].mxu1 }
 0x6e0   : > { %v8643_v6 = vmul.f32 %v8515_v37, %v17421_v10  ;;  %v8692_v38 = vmax.f32 %v8639_v16, %v8640_v24  ;;  %v8756_v3 = vmax.f32 %v8640_v24, %v8641_v25  ;;  %v8516_v45 = vmax.f32 %v10260_v35, 0.0  ;;  %v8016_v0 = vpop.f32.mrb[60].mxu1 }
 0x6e1   : > { %v8645_v50 = vmul.f32 %v8517_v36, %v17423_v55  ;;  %v8518_v23 = vmax.f32 %v10324_v27, 0.0  ;;  %v10261_v54 = vadd.f32 %v8000_v40, %v16112_v19  ;;  %v10325_v9 = vadd.f32 %v8386_v2, %v16115_v21  ;;  %v8018_v10 = vpop.f32.mrb[61].mxu1 }
 0x6e2   : > { %v10262_v26 = vadd.f32 %v8002_v32, %v16118_v39  ;;  %v8724_v63 = vmax.f32 %v8692_v38, %v8641_v25  ;;  %v8788_v49 = vmax.f32 %v8756_v3, %v8642_v29  ;;  %v17425_v7 = vmax.f32 %v17424_v30, 0.0  ;;  %v17430_v25 = vld [vmem:[#allocation71_spill] sm:$0xff]  ;;  %v8402_v29 = vpop.f32.mrb[124].mxu0  ;;  %v8020_v52 = vpop.f32.mrb[62].mxu1 }
 0x6e3   : > { %v10326_v51 = vadd.f32 %v8388_v4, %v16121_v17  ;;  %v17427_v53 = vmax.f32 %v17426_v34, 0.0  ;;  %v8519_v62 = vmax.f32 %v10261_v54, 0.0  ;;  %v8521_v22 = vmax.f32 %v10325_v9, 0.0 }
 0x6e4   : > { %v8644_v11 = vmul.f32 %v8516_v45, %v17425_v7  ;;  %v8520_v42 = vmax.f32 %v10262_v26, 0.0  ;;  %v8819_v40 = vpack.c.bf16 %v8724_v63, %v16450_v20  ;;  %v17429_v41 = vmax.f32 %v17428_v44, 0.0  ;;  %v17438_v63 = vld [vmem:[#allocation76_spill] sm:$0xff] }
 0x6e5   : > { %v8646_v12 = vmul.f32 %v8518_v23, %v17427_v53  ;;  %v8522_v32 = vmax.f32 %v10326_v51, 0.0  ;;  %v17431_v60 = vmax.f32 %v17430_v25, 0.0  ;;  %v17433_v28 = vmax.f32 %v17432_v18, 0.0  ;;  %v17440_v53 = vld [vmem:[#allocation77_spill] sm:$0xff] }
 0x6e6   : > { %v8693_v2 = vmax.f32 %v8643_v6, %v8644_v11  ;;  %v8757_v16 = vmax.f32 %v8644_v11, %v8645_v50  ;;  %v8647_v56 = vmul.f32 %v8519_v62, %v17429_v41  ;;  %v10263_v15 = vadd.f32 %v8006_v43, %v16112_v19  ;;  %v8404_v6 = vpop.f32.mrb[125].mxu0  ;;  %v17446_v41 = vld [vmem:[#allocation78_spill] sm:$0xff] }
 0x6e7   : > { %v8649_v57 = vmul.f32 %v8521_v22, %v17431_v60  ;;  %v8648_v4 = vmul.f32 %v8520_v42, %v17433_v28  ;;  %v17435_v14 = vmax.f32 %v17434_v1, 0.0  ;;  %v10327_v33 = vadd.f32 %v8392_v5, %v16115_v21  ;;  %v8406_v55 = vpop.f32.mrb[126].mxu0  ;;  %v17436_v5 = vld [vmem:[#allocation79_spill] sm:$0xff]  ;;  %v17442_v22 = vld [vmem:[#allocation125_spill] sm:$0xff]  ;;  %v17450_v1 = vld [vmem:[#allocation124_spill] sm:$0xff] }
 0x6e8   : > { %v8725_v37 = vmax.f32 %v8693_v2, %v8645_v50  ;;  %v8789_v61 = vmax.f32 %v8757_v16, %v8646_v12  ;;  %v8523_v20 = vmax.f32 %v10263_v15, 0.0  ;;  %v8820_v59 = vpack.c.bf16 %v8788_v49, %v8787_v58  ;;  %v8022_v58 = vpop.f32.mrb[63].mxu1  ;;  %v8408_v26 = vpop.f32.mrb[127].mxu0  ;;  %v17444_v2 = vld [vmem:[#allocation80_spill] sm:$0xff] }
 0x6e9   : > { %v8650_v24 = vmul.f32 %v8522_v32, %v17435_v14  ;;  %v8694_v36 = vmax.f32 %v8647_v56, %v8648_v4  ;;  %v8758_v35 = vmax.f32 %v8648_v4, %v8649_v57  ;;  %v8525_v27 = vmax.f32 %v10327_v33, 0.0  ;;  %v17448_v4 = vld [vmem:[#allocation81_spill] sm:$0xff] }
 0x6ea   : > { %v10264_v38 = vadd.f32 %v8008_v47, %v16118_v39  ;;  %v10328_v43 = vadd.f32 %v8394_v48, %v16121_v17  ;;  %v10265_v3 = vadd.f32 %v8010_v13, %v16112_v19  ;;  %v17437_v23 = vmax.f32 %v17436_v5, 0.0  ;;  %9083 = vmatprep.mubr.bf16.mxu1 %v8820_v59 }
 0x6eb   : > { %v8726_v50 = vmax.f32 %v8694_v36, %v8649_v57  ;;  %v8790_v45 = vmax.f32 %v8758_v35, %v8650_v24  ;;  %v10329_v9 = vadd.f32 %v8396_v8, %v16115_v21  ;;  %v17439_v49 = vmax.f32 %v17438_v63, 0.0  ;;  %9084 = vmatmul.mubr.bf16.gmra.mrb[104].mxu1 %v8819_v40 }
 0x6ec   : > { %v8651_v54 = vmul.f32 %v8523_v20, %v17437_v23  ;;  %v8524_v47 = vmax.f32 %v10264_v38, 0.0  ;;  %v8526_v7 = vmax.f32 %v10328_v43, 0.0  ;;  %v8527_v48 = vmax.f32 %v10265_v3, 0.0  ;;  %v17452_v20 = vld [vmem:[#allocation83_spill] sm:$0xff] }
 0x6ed   : > { %v8653_v30 = vmul.f32 %v8525_v27, %v17439_v49  ;;  %v8821_v13 = vpack.c.bf16 %v8726_v50, %v8725_v37  ;;  %v8529_v11 = vmax.f32 %v10329_v9, 0.0  ;;  %v10266_v51 = vadd.f32 %v8012_v31, %v16118_v39  ;;  %v17456_v49 = vld [vmem:[#allocation82_spill] sm:$0xff] }
 0x6ee   : > { %v10330_v34 = vadd.f32 %v8398_v46, %v16121_v17  ;;  %v17441_v12 = vmax.f32 %v17440_v53, 0.0  ;;  %v17443_v8 = vmax.f32 %v17442_v22, 0.0  ;;  %v17445_v16 = vmax.f32 %v17444_v2, 0.0 }
 0x6ef   : > { %v10267_v44 = vadd.f32 %v8016_v0, %v16112_v19  ;;  %v17447_v40 = vmax.f32 %v17446_v41, 0.0  ;;  %v8528_v25 = vmax.f32 %v10266_v51, 0.0  ;;  %v10331_v31 = vadd.f32 %v8402_v29, %v16115_v21  ;;  %v17466_v41 = vld [vmem:[#allocation126_spill] sm:$0xff] }
 0x6f0   : > { %v8652_v62 = vmul.f32 %v8524_v47, %v17441_v12  ;;  %v8654_v42 = vmul.f32 %v8526_v7, %v17443_v8  ;;  %v8655_v32 = vmul.f32 %v8527_v48, %v17445_v16  ;;  %v8530_v60 = vmax.f32 %v10330_v34, 0.0  ;;  %v17458_v7 = vld [vmem:[#allocation127_spill] sm:$0xff]  ;;  %v17464_v8 = vld [vmem:[#allocation85_spill] sm:$0xff] }
 0x6f1   : > { %v8657_v56 = vmul.f32 %v8529_v11, %v17447_v40  ;;  %v8531_v18 = vmax.f32 %v10267_v44, 0.0  ;;  %v8822_v28 = vpack.c.bf16 %v8790_v45, %v8789_v61  ;;  %v17449_v15 = vmax.f32 %v17448_v4, 0.0  ;;  %v17454_v61 = vld [vmem:[#allocation129_spill] sm:$0xff] }
 0x6f2   : > { %v8695_v57 = vmax.f32 %v8651_v54, %v8652_v62  ;;  %v8759_v46 = vmax.f32 %v8652_v62, %v8653_v30  ;;  %v17451_v14 = vmax.f32 %v17450_v1, 0.0  ;;  %v8533_v33 = vmax.f32 %v10331_v31, 0.0 }
 0x6f3   : > { %v8656_v37 = vmul.f32 %v8528_v25, %v17449_v15  ;;  %v10268_v0 = vadd.f32 %v8018_v10, %v16118_v39  ;;  %v17453_v59 = vmax.f32 %v17452_v20, 0.0  ;;  %9091 = vmatprep.mubr.bf16.mxu1 %v8822_v28  ;;  %v10332_v29 = vadd.f32 %v8404_v6, %v16121_v17 }
 0x6f4   : > { %v8658_v24 = vmul.f32 %v8530_v60, %v17451_v14  ;;  %v8727_v36 = vmax.f32 %v8695_v57, %v8653_v30  ;;  %v8791_v35 = vmax.f32 %v8759_v46, %v8654_v42  ;;  %v17455_v3 = vmax.f32 %v17454_v61, 0.0  ;;  %9092 = vmatmul.mubr.bf16.gmra.mrb[108].mxu1 %v8821_v13 }
 0x6f5   : > { %v8659_v27 = vmul.f32 %v8531_v18, %v17453_v59  ;;  %v8696_v38 = vmax.f32 %v8655_v32, %v8656_v37  ;;  %v8760_v43 = vmax.f32 %v8656_v37, %v8657_v56  ;;  %v8532_v45 = vmax.f32 %v10268_v0, 0.0 }
 0x6f6   : > { %v8661_v50 = vmul.f32 %v8533_v33, %v17455_v3  ;;  %v8534_v5 = vmax.f32 %v10332_v29, 0.0  ;;  %v10269_v23 = vadd.f32 %v8020_v52, %v16112_v19  ;;  %v10333_v10 = vadd.f32 %v8406_v55, %v16115_v21  ;;  %v17460_v21 = vld [vmem:[#allocation84_spill] sm:$0xff] }
 0x6f7   : > { %v10270_v54 = vadd.f32 %v8022_v58, %v16118_v39  ;;  %v8728_v9 = vmax.f32 %v8696_v38, %v8657_v56  ;;  %v8792_v63 = vmax.f32 %v8760_v43, %v8658_v24  ;;  %v17457_v30 = vmax.f32 %v17456_v49, 0.0  ;;  %v17462_v58 = vld [vmem:[#allocation128_spill] sm:$0xff] }
 0x6f8   : > { %v10334_v6 = vadd.f32 %v8408_v26, %v16121_v17  ;;  %v17459_v48 = vmax.f32 %v17458_v7, 0.0  ;;  %v8535_v51 = vmax.f32 %v10269_v23, 0.0  ;;  %v8537_v34 = vmax.f32 %v10333_v10, 0.0 }
 0x6f9   : > { %v8660_v47 = vmul.f32 %v8532_v45, %v17457_v30  ;;  %v8536_v53 = vmax.f32 %v10270_v54, 0.0  ;;  %v8823_v13 = vpack.c.bf16 %v8728_v9, %v8727_v36  ;;  %v17461_v55 = vmax.f32 %v17460_v21, 0.0 }
 0x6fa   : > { %v8662_v11 = vmul.f32 %v8534_v5, %v17459_v48  ;;  %v8538_v52 = vmax.f32 %v10334_v6, 0.0  ;;  %v17463_v62 = vmax.f32 %v17462_v58, 0.0  ;;  %v17465_v42 = vmax.f32 %v17464_v8, 0.0 }
 0x6fb   : > { %v8697_v12 = vmax.f32 %v8659_v27, %v8660_v47  ;;  %v8761_v19 = vmax.f32 %v8660_v47, %v8661_v50  ;;  %v8663_v39 = vmul.f32 %v8535_v51, %v17461_v55  ;;  %v8824_v17 = vpack.c.bf16 %v8792_v63, %v8791_v35 }
 0x6fc   : > { %v8665_v22 = vmul.f32 %v8537_v34, %v17463_v62  ;;  %v8664_v2 = vmul.f32 %v8536_v53, %v17465_v42  ;;  %v17467_v40 = vmax.f32 %v17466_v41, 0.0 }
 0x6fd   : > { %v8729_v26 = vmax.f32 %v8697_v12, %v8661_v50  ;;  %v8793_v16 = vmax.f32 %v8761_v19, %v8662_v11  ;;  %9099 = vmatprep.mubr.bf16.mxu1 %v8824_v17 }
 0x6fe   : > { %v8698_v32 = vmax.f32 %v8663_v39, %v8664_v2  ;;  %v8762_v44 = vmax.f32 %v8664_v2, %v8665_v22  ;;  %v8666_v56 = vmul.f32 %v8538_v52, %v17467_v40  ;;  %9100 = vmatmul.mubr.bf16.gmra.mrb[112].mxu1 %v8823_v13 }
 0x700   : > { %v8730_v25 = vmax.f32 %v8698_v32, %v8665_v22  ;;  %v8794_v60 = vmax.f32 %v8762_v44, %v8666_v56 }
 0x702   : > { %v8825_v31 = vpack.c.bf16 %v8730_v25, %v8729_v26  ;;  %v8826_v57 = vpack.c.bf16 %v8794_v60, %v8793_v16 }
 0x704   : > { %9107 = vmatprep.mubr.bf16.mxu1 %v8826_v57 }
 0x706   : > { %9108 = vmatmul.mubr.bf16.gmra.mrb[116].mxu1 %v8825_v31 }
 0x73c   : > { %v9839_v46 = vpop.f32.mrb[128].mxu0 }
 0x73d   : > { %v9840_v18 = vpop.f32.mrb[129].mxu0 }
 0x73e   : > { %v9841_v28 = vadd.f32 %v9840_v18, %v9839_v46  ;;  %v9842_v4 = vpop.f32.mrb[130].mxu0 }
 0x73f   : > { %v9843_v15 = vpop.f32.mrb[131].mxu0 }
 0x740   : > { %v8990_v37 = vadd.f32 -0.007941881, %v9841_v28  ;;  %v9844_v1 = vadd.f32 %v9843_v15, %v9842_v4 }
 0x742   : > { %9116 = vst [vmem:[%s16527_s30] sm:$0xff] %v8990_v37  ;;  %v8993_v14 = vadd.f32 -0.007941881, %v9844_v1 }
 0x744   : > { %9117 = vst [vmem:[%s16527_s30 + $0x8] sm:$0xff] %v8993_v14 }
 0x74a   : > { %v9845_v24 = vpop.f32.mrb[132].mxu0 }
 0x74b   : > { %v9846_v33 = vpop.f32.mrb[133].mxu0 }
 0x74c   : > { %v9847_v0 = vadd.f32 %v9846_v33, %v9845_v24  ;;  %v9848_v36 = vpop.f32.mrb[134].mxu0 }
 0x74d   : > { %v9849_v35 = vpop.f32.mrb[135].mxu0 }
 0x74e   : > { %v8998_v20 = vadd.f32 -0.007941881, %v9847_v0  ;;  %v9850_v59 = vadd.f32 %v9849_v35, %v9848_v36 }
 0x750   : > { %9118 = vst [vmem:[%s16527_s30 + $0x10] sm:$0xff] %v8998_v20  ;;  %v9001_v27 = vadd.f32 -0.007941881, %v9850_v59 }
 0x752   : > { %9119 = vst [vmem:[%s16527_s30 + $0x18] sm:$0xff] %v9001_v27 }
 0x754   : > { %v9851_v29 = vpop.f32.mrb[64].mxu1 }
 0x755   : > { %v9852_v38 = vpop.f32.mrb[65].mxu1 }
 0x756   : > { %v9853_v43 = vadd.f32 %v9852_v38, %v9851_v29  ;;  %v9854_v61 = vpop.f32.mrb[66].mxu1 }
 0x757   : > { %v9855_v3 = vpop.f32.mrb[67].mxu1 }
 0x758   : > { %v9006_v50 = vadd.f32 -0.007941881, %v9853_v43  ;;  %v9856_v45 = vadd.f32 %v9855_v3, %v9854_v61 }
 0x75a   : > { %9120 = vst [vmem:[%s16527_s30 + $0x20] sm:$0xff] %v9006_v50  ;;  %v9009_v5 = vadd.f32 -0.007941881, %v9856_v45 }
 0x75c   : > { %9121 = vst [vmem:[%s16527_s30 + $0x28] sm:$0xff] %v9009_v5 }
 0x75f   : > { %v9857_v23 = vpop.f32.mrb[68].mxu1 }
 0x760   : > { %v9858_v10 = vpop.f32.mrb[69].mxu1 }
 0x761   : > { %v9859_v54 = vadd.f32 %v9858_v10, %v9857_v23  ;;  %v9860_v9 = vpop.f32.mrb[70].mxu1 }
 0x762   : > { %v9861_v63 = vpop.f32.mrb[71].mxu1 }
 0x763   : > { %v9014_v49 = vadd.f32 -0.007941881, %v9859_v54  ;;  %v9862_v30 = vadd.f32 %v9861_v63, %v9860_v9 }
 0x765   : > { %9122 = vst [vmem:[%s16527_s30 + $0x30] sm:$0xff] %v9014_v49  ;;  %v9017_v47 = vadd.f32 -0.007941881, %v9862_v30 }
 0x767   : > { %9123 = vst [vmem:[%s16527_s30 + $0x38] sm:$0xff] %v9017_v47 }
 0x769   : > { %v9863_v6 = vpop.f32.mrb[72].mxu1 }
 0x76a   : > { %v9864_v7 = vpop.f32.mrb[73].mxu1 }
 0x76b   : > { %v9865_v48 = vadd.f32 %v9864_v7, %v9863_v6  ;;  %v9866_v11 = vpop.f32.mrb[74].mxu1 }
 0x76c   : > { %v9867_v51 = vpop.f32.mrb[75].mxu1 }
 0x76d   : > { %v9022_v34 = vadd.f32 -0.007941881, %v9865_v48  ;;  %v9868_v53 = vadd.f32 %v9867_v51, %v9866_v11 }
 0x76f   : > { %9124 = vst [vmem:[%s16527_s30 + $0x40] sm:$0xff] %v9022_v34  ;;  %v9025_v13 = vadd.f32 -0.007941881, %v9868_v53 }
 0x771   : > { %9125 = vst [vmem:[%s16527_s30 + $0x48] sm:$0xff] %v9025_v13 }
 0x773   : > { %v9869_v12 = vpop.f32.mrb[76].mxu1 }
 0x774   : > { %v9870_v19 = vpop.f32.mrb[77].mxu1 }
 0x775   : > { %v9871_v52 = vadd.f32 %v9870_v19, %v9869_v12  ;;  %v9872_v21 = vpop.f32.mrb[78].mxu1 }
 0x776   : > { %v9873_v55 = vpop.f32.mrb[79].mxu1 }
 0x777   : > { %v9030_v39 = vadd.f32 -0.007941881, %v9871_v52  ;;  %v9874_v58 = vadd.f32 %v9873_v55, %v9872_v21 }
 0x779   : > { %9126 = vst [vmem:[%s16527_s30 + $0x50] sm:$0xff] %v9030_v39  ;;  %v9033_v62 = vadd.f32 -0.007941881, %v9874_v58 }
 0x77b   : > { %9127 = vst [vmem:[%s16527_s30 + $0x58] sm:$0xff] %v9033_v62 }
 0x77f   : > { %v9875_v22 = vpop.f32.mrb[80].mxu1 }
 0x780   : > { %v9876_v8 = vpop.f32.mrb[81].mxu1 }
 0x781   : > { %v9877_v42 = vadd.f32 %v9876_v8, %v9875_v22  ;;  %v9878_v2 = vpop.f32.mrb[82].mxu1 }
 0x782   : > { %v9879_v17 = vpop.f32.mrb[83].mxu1 }
 0x783   : > { %v9038_v26 = vadd.f32 -0.007941881, %v9877_v42  ;;  %v9880_v16 = vadd.f32 %v9879_v17, %v9878_v2 }
 0x785   : > { %9128 = vst [vmem:[%s16527_s30 + $0x60] sm:$0xff] %v9038_v26  ;;  %v9041_v32 = vadd.f32 -0.007941881, %v9880_v16 }
 0x787   : > { %9129 = vst [vmem:[%s16527_s30 + $0x68] sm:$0xff] %v9041_v32 }
 0x788   : > { %v9881_v44 = vpop.f32.mrb[84].mxu1 }
 0x789   : > { %v9882_v41 = vpop.f32.mrb[85].mxu1 }
 0x78a   : > { %v9883_v40 = vadd.f32 %v9882_v41, %v9881_v44  ;;  %v9884_v56 = vpop.f32.mrb[86].mxu1 }
 0x78b   : > { %v9885_v25 = vpop.f32.mrb[87].mxu1 }
 0x78c   : > { %v9046_v60 = vadd.f32 -0.007941881, %v9883_v40  ;;  %v9886_v31 = vadd.f32 %v9885_v25, %v9884_v56 }
 0x78e   : > { %9130 = vst [vmem:[%s16527_s30 + $0x70] sm:$0xff] %v9046_v60  ;;  %v9049_v57 = vadd.f32 -0.007941881, %v9886_v31 }
 0x790   : > { %9131 = vst [vmem:[%s16527_s30 + $0x78] sm:$0xff] %v9049_v57 }
 0x794   : > { %v9887_v46 = vpop.f32.mrb[88].mxu1 }
 0x795   : > { %v9888_v18 = vpop.f32.mrb[89].mxu1 }
 0x796   : > { %v9889_v28 = vadd.f32 %v9888_v18, %v9887_v46  ;;  %v9890_v4 = vpop.f32.mrb[90].mxu1 }
 0x797   : > { %v9891_v15 = vpop.f32.mrb[91].mxu1 }
 0x798   : > { %v9054_v37 = vadd.f32 -0.007941881, %v9889_v28  ;;  %v9892_v1 = vadd.f32 %v9891_v15, %v9890_v4 }
 0x79a   : > { %9132 = vst [vmem:[%s16527_s30 + $0x80] sm:$0xff] %v9054_v37  ;;  %v9057_v14 = vadd.f32 -0.007941881, %v9892_v1 }
 0x79c   : > { %9133 = vst [vmem:[%s16527_s30 + $0x88] sm:$0xff] %v9057_v14 }
 0x79d   : > { %v9893_v24 = vpop.f32.mrb[92].mxu1 }
 0x79e   : > { %v9894_v33 = vpop.f32.mrb[93].mxu1 }
 0x79f   : > { %v9895_v0 = vadd.f32 %v9894_v33, %v9893_v24  ;;  %v9896_v36 = vpop.f32.mrb[94].mxu1 }
 0x7a0   : > { %v9897_v35 = vpop.f32.mrb[95].mxu1 }
 0x7a1   : > { %v9062_v20 = vadd.f32 -0.007941881, %v9895_v0  ;;  %v9898_v59 = vadd.f32 %v9897_v35, %v9896_v36 }
 0x7a3   : > { %9134 = vst [vmem:[%s16527_s30 + $0x90] sm:$0xff] %v9062_v20  ;;  %v9065_v27 = vadd.f32 -0.007941881, %v9898_v59 }
 0x7a5   : > { %9135 = vst [vmem:[%s16527_s30 + $0x98] sm:$0xff] %v9065_v27 }
 0x7a9   : > { %v9899_v29 = vpop.f32.mrb[96].mxu1 }
 0x7aa   : > { %v9900_v38 = vpop.f32.mrb[97].mxu1 }
 0x7ab   : > { %v9901_v43 = vadd.f32 %v9900_v38, %v9899_v29  ;;  %v9902_v61 = vpop.f32.mrb[98].mxu1 }
 0x7ac   : > { %v9903_v3 = vpop.f32.mrb[99].mxu1 }
 0x7ad   : > { %v9070_v50 = vadd.f32 -0.007941881, %v9901_v43  ;;  %v9904_v45 = vadd.f32 %v9903_v3, %v9902_v61 }
 0x7af   : > { %9136 = vst [vmem:[%s16527_s30 + $0xa0] sm:$0xff] %v9070_v50  ;;  %v9073_v5 = vadd.f32 -0.007941881, %v9904_v45 }
 0x7b1   : > { %9137 = vst [vmem:[%s16527_s30 + $0xa8] sm:$0xff] %v9073_v5 }
 0x7b2   : > { %v9905_v23 = vpop.f32.mrb[100].mxu1 }
 0x7b3   : > { %v9906_v10 = vpop.f32.mrb[101].mxu1 }
 0x7b4   : > { %v9907_v54 = vadd.f32 %v9906_v10, %v9905_v23  ;;  %v9908_v9 = vpop.f32.mrb[102].mxu1 }
 0x7b5   : > { %v9909_v63 = vpop.f32.mrb[103].mxu1 }
 0x7b6   : > { %v9078_v49 = vadd.f32 -0.007941881, %v9907_v54  ;;  %v9910_v30 = vadd.f32 %v9909_v63, %v9908_v9 }
 0x7b8   : > { %9138 = vst [vmem:[%s16527_s30 + $0xb0] sm:$0xff] %v9078_v49  ;;  %v9081_v47 = vadd.f32 -0.007941881, %v9910_v30 }
 0x7ba   : > { %9139 = vst [vmem:[%s16527_s30 + $0xb8] sm:$0xff] %v9081_v47 }
 0x7be   : > { %v9911_v6 = vpop.f32.mrb[104].mxu1 }
 0x7bf   : > { %v9912_v7 = vpop.f32.mrb[105].mxu1 }
 0x7c0   : > { %v9913_v48 = vadd.f32 %v9912_v7, %v9911_v6  ;;  %v9914_v11 = vpop.f32.mrb[106].mxu1 }
 0x7c1   : > { %v9915_v51 = vpop.f32.mrb[107].mxu1 }
 0x7c2   : > { %v9086_v34 = vadd.f32 -0.007941881, %v9913_v48  ;;  %v9916_v53 = vadd.f32 %v9915_v51, %v9914_v11 }
 0x7c4   : > { %9140 = vst [vmem:[%s16527_s30 + $0xc0] sm:$0xff] %v9086_v34  ;;  %v9089_v13 = vadd.f32 -0.007941881, %v9916_v53 }
 0x7c6   : > { %9141 = vst [vmem:[%s16527_s30 + $0xc8] sm:$0xff] %v9089_v13 }
 0x7c7   : > { %v9917_v12 = vpop.f32.mrb[108].mxu1 }
 0x7c8   : > { %v9918_v19 = vpop.f32.mrb[109].mxu1 }
 0x7c9   : > { %v9919_v52 = vadd.f32 %v9918_v19, %v9917_v12  ;;  %v9920_v21 = vpop.f32.mrb[110].mxu1 }
 0x7ca   : > { %v9921_v55 = vpop.f32.mrb[111].mxu1 }
 0x7cb   : > { %v9094_v39 = vadd.f32 -0.007941881, %v9919_v52  ;;  %v9922_v58 = vadd.f32 %v9921_v55, %v9920_v21 }
 0x7cd   : > { %9142 = vst [vmem:[%s16527_s30 + $0xd0] sm:$0xff] %v9094_v39  ;;  %v9097_v62 = vadd.f32 -0.007941881, %v9922_v58 }
 0x7cf   : > { %9143 = vst [vmem:[%s16527_s30 + $0xd8] sm:$0xff] %v9097_v62 }
 0x7d1   : > { %v9923_v22 = vpop.f32.mrb[112].mxu1 }
 0x7d2   : > { %v9924_v8 = vpop.f32.mrb[113].mxu1 }
 0x7d3   : > { %v9925_v42 = vadd.f32 %v9924_v8, %v9923_v22  ;;  %v9926_v2 = vpop.f32.mrb[114].mxu1 }
 0x7d4   : > { %v9927_v17 = vpop.f32.mrb[115].mxu1 }
 0x7d5   : > { %v9102_v26 = vadd.f32 -0.007941881, %v9925_v42  ;;  %v9928_v16 = vadd.f32 %v9927_v17, %v9926_v2 }
 0x7d7   : > { %9144 = vst [vmem:[%s16527_s30 + $0xe0] sm:$0xff] %v9102_v26  ;;  %v9105_v32 = vadd.f32 -0.007941881, %v9928_v16 }
 0x7d9   : > { %9145 = vst [vmem:[%s16527_s30 + $0xe8] sm:$0xff] %v9105_v32  ;;  %v9929_v44 = vpop.f32.mrb[116].mxu1 }
 0x7da   : > { %v9930_v41 = vpop.f32.mrb[117].mxu1 }
 0x7db   : > { %v9931_v40 = vadd.f32 %v9930_v41, %v9929_v44  ;;  %v9932_v56 = vpop.f32.mrb[118].mxu1 }
 0x7dc   : > { %v9933_v25 = vpop.f32.mrb[119].mxu1 }
 0x7dd   : > { %v9110_v60 = vadd.f32 -0.007941881, %v9931_v40  ;;  %v9934_v31 = vadd.f32 %v9933_v25, %v9932_v56 }
 0x7df   : > { %9146 = vst [vmem:[%s16527_s30 + $0xf0] sm:$0xff] %v9110_v60  ;;  %v9113_v57 = vadd.f32 -0.007941881, %v9934_v31 }
 0x7e1   : > { %9147 = vst [vmem:[%s16527_s30 + $0xf8] sm:$0xff] %v9113_v57 }
 0x7e2 PF: > { %s22_s21 = sadd.s32 1, %s11481_s21  }
 0x7e3   : > { %p19_p4 = scmp.ge.s32.totalorder %s22_s21, 4  }
 0x7e5   :  { %21 = sbr.rel (!%p19_p4) target bundleno = 1 (0x1), region = 98 }

</bundles_post_ra>
